<compile_context>
chip_gen: v7x
topology: tpu7x:2x2x1
jax: 0.10.0
libtpu: 0.0.40
codegen_flags: <defaults>
</compile_context>

<pallas_src>
import math

import jax
import jax.numpy as jnp
from jax.experimental import pallas as pl
from jax.experimental.pallas import tpu as pltpu

VOCAB = 64          # vocab_size (small synthetic)
VOCAB_PAD = 128     # lane-dense padded output width for the final projection
EMBED = 128         # embed_size (module default)
NHEAD = 8           # nhead (module default)
HEAD_DIM = EMBED // NHEAD
NUM_LAYERS = 3      # num_layers (module default)
FFN = 512           # dim_feedforward (module default)
LN_EPS = 1e-5


# ----------------------------- Pallas kernel -------------------------------

def _layernorm(x, gamma, beta):
    # gamma/beta arrive as (1, D) slabs; biased variance like PyTorch LayerNorm.
    mu = jnp.mean(x, axis=-1, keepdims=True)
    var = jnp.mean((x - mu) ** 2, axis=-1, keepdims=True)
    return (x - mu) * jax.lax.rsqrt(var + LN_EPS) * gamma + beta


def make_fused_kernel(batch, seq):
    """Build the fused forward kernel for static (batch, seq)."""
    tokens = batch * seq
    scale = 1.0 / math.sqrt(HEAD_DIM)

    def kernel(ids_ref, embed_ref,
               wqkv_ref, bqkv_ref, wo_ref, bo_ref,
               ln1g_ref, ln1b_ref, w1_ref, b1_ref, w2_ref, b2_ref,
               ln2g_ref, ln2b_ref, fcw_ref, fcb_ref, out_ref):
        # --- embedding lookup as a one-hot MXU matmul: (T, V) @ (V, D), exact ---
        ids = ids_ref[...]                                            # (T, 1) int32
        onehot = (ids == jax.lax.broadcasted_iota(jnp.int32, (tokens, VOCAB), 1)
                  ).astype(jnp.float32)                               # (T, V)
        x = jnp.dot(onehot, embed_ref[...],
                    preferred_element_type=jnp.float32)               # (T, D) f32

        for l in range(NUM_LAYERS):                                   # static unroll
            wqkv = wqkv_ref[l]                                        # (D, 3D) bf16
            wo = wo_ref[l]                                            # (D, D)  bf16
            w1 = w1_ref[l]                                            # (D, F)  bf16
            w2 = w2_ref[l]                                            # (F, D)  bf16

            # --- QKV projection over ALL tokens at once (weights pushed once) ---
            qkv = jnp.dot(x.astype(jnp.bfloat16), wqkv,
                          preferred_element_type=jnp.float32) + bqkv_ref[l]  # (T, 3D)

            # --- multi-head self-attention, per batch element (no cross-batch mix) ---
            attn_rows = []
            for b in range(batch):                                    # static unroll
                r0 = b * seq
                acc = jnp.zeros((seq, EMBED), jnp.float32)
                for h in range(NHEAD):                                # static unroll
                    lo = h * HEAD_DIM
                    qh = qkv[r0:r0 + seq, lo:lo + HEAD_DIM]
                    kh = qkv[r0:r0 + seq, EMBED + lo:EMBED + lo + HEAD_DIM]
                    vh = qkv[r0:r0 + seq, 2 * EMBED + lo:2 * EMBED + lo + HEAD_DIM]
                    s = jnp.dot(qh, kh.T, preferred_element_type=jnp.float32) * scale
                    s = s - jnp.max(s, axis=-1, keepdims=True)
                    p = jnp.exp(s)
                    p = p * pl.reciprocal(jnp.sum(p, axis=-1, keepdims=True),
                                          approx=True)
                    oh = jnp.dot(p, vh, preferred_element_type=jnp.float32)   # (S, hd)
                    # distribute output projection per head -> no lane concatenate
                    acc = acc + jnp.dot(oh.astype(jnp.bfloat16),
                                        wo[lo:lo + HEAD_DIM, :],
                                        preferred_element_type=jnp.float32)   # (S, D)
                attn_rows.append(acc)
            attn = (jnp.concatenate(attn_rows, axis=0)
                    if batch > 1 else attn_rows[0]) + bo_ref[l]       # (T, D)

            # --- residual + LayerNorm1 (post-norm) ---
            x1 = _layernorm(x + attn, ln1g_ref[l], ln1b_ref[l])

            # --- feed-forward over ALL tokens: Linear -> ReLU -> Linear ---
            h1 = jnp.dot(x1.astype(jnp.bfloat16), w1,
                         preferred_element_type=jnp.float32) + b1_ref[l]
            h1 = jnp.maximum(h1, 0.0)
            ff = jnp.dot(h1.astype(jnp.bfloat16), w2,
                         preferred_element_type=jnp.float32) + b2_ref[l]

            # --- residual + LayerNorm2 ---
            x = _layernorm(x1 + ff, ln2g_ref[l], ln2b_ref[l])

        # --- final projection into a lane-dense (128-wide) padded slab ---
        out_ref[...] = jnp.dot(x.astype(jnp.bfloat16), fcw_ref[...],
                               preferred_element_type=jnp.float32) + fcb_ref[...]

    return kernel


# ----------------------------- wrapper --------------------------------------

_WEIGHT_NAMES = ("embed", "wqkv", "bqkv", "wo", "bo", "ln1_g", "ln1_b",
                 "w1", "b1", "w2", "b2", "ln2_g", "ln2_b", "fc_w", "fc_b")


def _const_map(ndim):
    return lambda i: (0,) * ndim


def chord_predictor_forward(src, kp):
    """src: (B, S) int token ids; kp: packed kernel params. Returns (B, S, VOCAB)."""
    B, S = src.shape
    T = B * S
    ids = src.astype(jnp.int32).reshape(T, 1)
    weights = [kp[n] for n in _WEIGHT_NAMES]

    in_specs = [pl.BlockSpec((T, 1), lambda i: (0, 0))]
    in_specs += [pl.BlockSpec(w.shape, _const_map(w.ndim)) for w in weights]

    out = pl.pallas_call(
        make_fused_kernel(B, S),
        out_shape=jax.ShapeDtypeStruct((T, VOCAB_PAD), jnp.float32),
        grid=(1,),
        in_specs=in_specs,
        out_specs=pl.BlockSpec((T, VOCAB_PAD), lambda i: (0, 0)),
        compiler_params=pltpu.CompilerParams(
            dimension_semantics=("arbitrary",)),
    )(ids, *weights)
    return out.reshape(B, S, VOCAB_PAD)[:, :, :VOCAB]


# ------------------------- deterministic parameters -------------------------

def init_params(key):
    """f32 master parameters (also used by the pure-JAX reference)."""
    def nrm(k, shape, scale=0.02):
        return (scale * jax.random.normal(k, shape)).astype(jnp.float32)

    keys = jax.random.split(key, 2 + NUM_LAYERS)
    params = {"embed": nrm(keys[0], (VOCAB, EMBED), 1.0)}
    layers = []
    for l in range(NUM_LAYERS):
        ks = jax.random.split(keys[2 + l], 8)
        layers.append(dict(
            wqkv=nrm(ks[0], (EMBED, 3 * EMBED)), bqkv=nrm(ks[1], (3 * EMBED,)),
            wo=nrm(ks[2], (EMBED, EMBED)), bo=nrm(ks[3], (EMBED,)),
            ln1_g=jnp.ones((EMBED,), jnp.float32),
            ln1_b=jnp.zeros((EMBED,), jnp.float32),
            w1=nrm(ks[4], (EMBED, FFN)), b1=nrm(ks[5], (FFN,)),
            w2=nrm(ks[6], (FFN, EMBED)), b2=nrm(ks[7], (EMBED,)),
            ln2_g=jnp.ones((EMBED,), jnp.float32),
            ln2_b=jnp.zeros((EMBED,), jnp.float32),
        ))
    fk = jax.random.split(keys[1], 2)
    params["fc_w"] = nrm(fk[0], (EMBED, VOCAB))
    params["fc_b"] = nrm(fk[1], (VOCAB,))
    params["layers"] = layers
    return params


def pack_params(params):
    """Stack per-layer params, cast matmul weights to bf16, pad fc to 128 lanes."""
    def stack(name):
        return jnp.stack([params["layers"][l][name] for l in range(NUM_LAYERS)])

    def stack_bias(name):
        return stack(name)[:, None, :]                      # (L, 1, N) f32

    kp = {
        "embed": params["embed"],                            # (V, D) f32 (exact lookup)
        "wqkv": stack("wqkv").astype(jnp.bfloat16),          # (L, D, 3D)
        "bqkv": stack_bias("bqkv"),
        "wo": stack("wo").astype(jnp.bfloat16),              # (L, D, D)
        "bo": stack_bias("bo"),
        "ln1_g": stack_bias("ln1_g"), "ln1_b": stack_bias("ln1_b"),
        "w1": stack("w1").astype(jnp.bfloat16),              # (L, D, F)
        "b1": stack_bias("b1"),
        "w2": stack("w2").astype(jnp.bfloat16),              # (L, F, D)
        "b2": stack_bias("b2"),
        "ln2_g": stack_bias("ln2_g"), "ln2_b": stack_bias("ln2_b"),
        "fc_w": jnp.pad(params["fc_w"],
                        ((0, 0), (0, VOCAB_PAD - VOCAB))).astype(jnp.bfloat16),
        "fc_b": jnp.pad(params["fc_b"], (0, VOCAB_PAD - VOCAB))[None, :],   # (1,128) f32
    }
    return kp


# ------------------------- pure-JAX reference -------------------------------

def reference_forward(src, params):
    hp = jax.lax.Precision.HIGHEST
    x = params["embed"][src]
    B, S, D = x.shape
    for p in params["layers"]:
        qkv = jnp.dot(x, p["wqkv"], precision=hp) + p["bqkv"]
        q, k, v = jnp.split(qkv, 3, axis=-1)
        qh = q.reshape(B, S, NHEAD, HEAD_DIM).transpose(0, 2, 1, 3)
        kh = k.reshape(B, S, NHEAD, HEAD_DIM).transpose(0, 2, 1, 3)
        vh = v.reshape(B, S, NHEAD, HEAD_DIM).transpose(0, 2, 1, 3)
        s = jnp.einsum("bhqd,bhkd->bhqk", qh, kh, precision=hp) / math.sqrt(HEAD_DIM)
        a = jax.nn.softmax(s, axis=-1)
        o = jnp.einsum("bhqk,bhkd->bhqd", a, vh, precision=hp)
        o = o.transpose(0, 2, 1, 3).reshape(B, S, D)
        attn = jnp.dot(o, p["wo"], precision=hp) + p["bo"]
        x1 = x + attn
        x1 = (x1 - x1.mean(-1, keepdims=True)) * jax.lax.rsqrt(
            x1.var(-1, keepdims=True) + LN_EPS) * p["ln1_g"] + p["ln1_b"]
        ff = jnp.maximum(jnp.dot(x1, p["w1"], precision=hp) + p["b1"], 0.0)
        ff = jnp.dot(ff, p["w2"], precision=hp) + p["b2"]
        x2 = x1 + ff
        x = (x2 - x2.mean(-1, keepdims=True)) * jax.lax.rsqrt(
            x2.var(-1, keepdims=True) + LN_EPS) * p["ln2_g"] + p["ln2_b"]
    return jnp.dot(x, params["fc_w"], precision=hp) + params["fc_b"]


# --------------------------------- main --------------------------------------

if __name__ == "__main__":
    key = jax.random.PRNGKey(0)
    pkey, dkey = jax.random.split(key)
    params = init_params(pkey)
    kparams = pack_params(params)

    B, S = 2, 8
    src = jax.random.randint(dkey, (B, S), 0, VOCAB, dtype=jnp.int32)

    out = chord_predictor_forward(src, kparams)
    out = jax.block_until_ready(out)

    assert out.shape == (B, S, VOCAB), out.shape
    assert bool(jnp.all(jnp.isfinite(out)))

    ref = reference_forward(src, params)
    max_err = float(jnp.max(jnp.abs(out - ref)))
    # bf16 matmul operands with f32 accumulation + approx softmax reciprocal:
    # observed error is a few 1e-3; 2e-2 leaves margin while still meaningful.
    assert max_err < 2e-2, f"mismatch vs reference: {max_err}"

    print("KERNEL_OK")
</pallas_src>

<mosaic_0001>
module attributes {stable_mosaic.version = 11 : i64} {
  func.func @kernel(%arg0: i32, %arg1: memref<16x1xi32, #tpu.memory_space<vmem>>, %arg2: memref<64x128xf32, #tpu.memory_space<vmem>>, %arg3: memref<3x128x384xbf16, #tpu.memory_space<vmem>>, %arg4: memref<3x1x384xf32, #tpu.memory_space<vmem>>, %arg5: memref<3x128x128xbf16, #tpu.memory_space<vmem>>, %arg6: memref<3x1x128xf32, #tpu.memory_space<vmem>>, %arg7: memref<3x1x128xf32, #tpu.memory_space<vmem>>, %arg8: memref<3x1x128xf32, #tpu.memory_space<vmem>>, %arg9: memref<3x128x512xbf16, #tpu.memory_space<vmem>>, %arg10: memref<3x1x512xf32, #tpu.memory_space<vmem>>, %arg11: memref<3x512x128xbf16, #tpu.memory_space<vmem>>, %arg12: memref<3x1x128xf32, #tpu.memory_space<vmem>>, %arg13: memref<3x1x128xf32, #tpu.memory_space<vmem>>, %arg14: memref<3x1x128xf32, #tpu.memory_space<vmem>>, %arg15: memref<128x128xbf16, #tpu.memory_space<vmem>>, %arg16: memref<1x128xf32, #tpu.memory_space<vmem>>, %arg17: memref<16x128xf32, #tpu.memory_space<vmem>>) attributes {dimension_semantics = [#tpu.dimension_semantics<arbitrary>], iteration_bounds = array<i64: 1>, scalar_prefetch = 0 : i64, scratch_operands = 0 : i64, tpu.core_type = #tpu.core_type<tc>, window_params = [{pipeline_mode = #tpu.pipeline_mode<synchronous>, transform_indices = @transform_0, window_bounds = array<i64: 16, 1>}, {pipeline_mode = #tpu.pipeline_mode<synchronous>, transform_indices = @transform_1, window_bounds = array<i64: 64, 128>}, {pipeline_mode = #tpu.pipeline_mode<synchronous>, transform_indices = @transform_2, window_bounds = array<i64: 3, 128, 384>}, {pipeline_mode = #tpu.pipeline_mode<synchronous>, transform_indices = @transform_3, window_bounds = array<i64: 3, 1, 384>}, {pipeline_mode = #tpu.pipeline_mode<synchronous>, transform_indices = @transform_4, window_bounds = array<i64: 3, 128, 128>}, {pipeline_mode = #tpu.pipeline_mode<synchronous>, transform_indices = @transform_5, window_bounds = array<i64: 3, 1, 128>}, {pipeline_mode = #tpu.pipeline_mode<synchronous>, transform_indices = @transform_6, window_bounds = array<i64: 3, 1, 128>}, {pipeline_mode = #tpu.pipeline_mode<synchronous>, transform_indices = @transform_7, window_bounds = array<i64: 3, 1, 128>}, {pipeline_mode = #tpu.pipeline_mode<synchronous>, transform_indices = @transform_8, window_bounds = array<i64: 3, 128, 512>}, {pipeline_mode = #tpu.pipeline_mode<synchronous>, transform_indices = @transform_9, window_bounds = array<i64: 3, 1, 512>}, {pipeline_mode = #tpu.pipeline_mode<synchronous>, transform_indices = @transform_10, window_bounds = array<i64: 3, 512, 128>}, {pipeline_mode = #tpu.pipeline_mode<synchronous>, transform_indices = @transform_11, window_bounds = array<i64: 3, 1, 128>}, {pipeline_mode = #tpu.pipeline_mode<synchronous>, transform_indices = @transform_12, window_bounds = array<i64: 3, 1, 128>}, {pipeline_mode = #tpu.pipeline_mode<synchronous>, transform_indices = @transform_13, window_bounds = array<i64: 3, 1, 128>}, {pipeline_mode = #tpu.pipeline_mode<synchronous>, transform_indices = @transform_14, window_bounds = array<i64: 128, 128>}, {pipeline_mode = #tpu.pipeline_mode<synchronous>, transform_indices = @transform_15, window_bounds = array<i64: 1, 128>}, {pipeline_mode = #tpu.pipeline_mode<synchronous>, transform_indices = @transform_16, window_bounds = array<i64: 16, 128>}]} {
    %c0 = arith.constant 0 : index
    %c0_0 = arith.constant 0 : index
    %0 = vector.load %arg1[%c0, %c0_0] : memref<16x1xi32, #tpu.memory_space<vmem>>, vector<16x1xi32>
    %1 = tpu.iota {dimensions = array<i32: 1>} : vector<16x64xi32>
    %2 = vector.broadcast %0 : vector<16x1xi32> to vector<16x64xi32>
    %3 = arith.cmpi eq, %2, %1 : vector<16x64xi32>
    %4 = arith.extui %3 : vector<16x64xi1> to vector<16x64xi32>
    %5 = arith.sitofp %4 : vector<16x64xi32> to vector<16x64xf32>
    %c0_1 = arith.constant 0 : index
    %c0_2 = arith.constant 0 : index
    %6 = vector.load %arg2[%c0_1, %c0_2] : memref<64x128xf32, #tpu.memory_space<vmem>>, vector<64x128xf32>
    %cst = arith.constant dense<0.000000e+00> : vector<16x128xf32>
    %7 = tpu.matmul %5, %6, %cst {dimension_numbers = #tpu.dot_dimension_numbers<[1], [0], [0], [1], [0, 0, 1, 1], [], []>} : vector<16x64xf32>, vector<64x128xf32>, vector<16x128xf32> -> vector<16x128xf32>
    %c0_3 = arith.constant 0 : index
    %c0_4 = arith.constant 0 : index
    %c0_5 = arith.constant 0 : index
    %8 = vector.load %arg3[%c0_3, %c0_4, %c0_5] : memref<3x128x384xbf16, #tpu.memory_space<vmem>>, vector<1x128x384xbf16>
    %9 = vector.shape_cast %8 : vector<1x128x384xbf16> to vector<128x384xbf16>
    %c0_6 = arith.constant 0 : index
    %c0_7 = arith.constant 0 : index
    %c0_8 = arith.constant 0 : index
    %10 = vector.load %arg5[%c0_6, %c0_7, %c0_8] : memref<3x128x128xbf16, #tpu.memory_space<vmem>>, vector<1x128x128xbf16>
    %11 = vector.shape_cast %10 : vector<1x128x128xbf16> to vector<128x128xbf16>
    %c0_9 = arith.constant 0 : index
    %c0_10 = arith.constant 0 : index
    %c0_11 = arith.constant 0 : index
    %12 = vector.load %arg9[%c0_9, %c0_10, %c0_11] : memref<3x128x512xbf16, #tpu.memory_space<vmem>>, vector<1x128x512xbf16>
    %13 = vector.shape_cast %12 : vector<1x128x512xbf16> to vector<128x512xbf16>
    %c0_12 = arith.constant 0 : index
    %c0_13 = arith.constant 0 : index
    %c0_14 = arith.constant 0 : index
    %14 = vector.load %arg11[%c0_12, %c0_13, %c0_14] : memref<3x512x128xbf16, #tpu.memory_space<vmem>>, vector<1x512x128xbf16>
    %15 = vector.shape_cast %14 : vector<1x512x128xbf16> to vector<512x128xbf16>
    %16 = arith.truncf %7 : vector<16x128xf32> to vector<16x128xbf16>
    %cst_15 = arith.constant dense<0.000000e+00> : vector<16x384xf32>
    %17 = tpu.matmul %16, %9, %cst_15 {dimension_numbers = #tpu.dot_dimension_numbers<[1], [0], [0], [1], [0, 0, 1, 1], [], []>} : vector<16x128xbf16>, vector<128x384xbf16>, vector<16x384xf32> -> vector<16x384xf32>
    %c0_16 = arith.constant 0 : index
    %c0_17 = arith.constant 0 : index
    %c0_18 = arith.constant 0 : index
    %18 = vector.load %arg4[%c0_16, %c0_17, %c0_18] : memref<3x1x384xf32, #tpu.memory_space<vmem>>, vector<1x1x384xf32>
    %19 = vector.shape_cast %18 : vector<1x1x384xf32> to vector<1x384xf32>
    %20 = vector.broadcast %19 : vector<1x384xf32> to vector<16x384xf32>
    %21 = arith.addf %17, %20 : vector<16x384xf32>
    %cst_19 = arith.constant 0.000000e+00 : f32
    %22 = vector.broadcast %cst_19 : f32 to vector<8x128xf32>
    %23 = vector.extract_strided_slice %21 {offsets = [0, 0], sizes = [8, 16], strides = [1, 1]} : vector<16x384xf32> to vector<8x16xf32>
    %24 = vector.extract_strided_slice %21 {offsets = [0, 128], sizes = [8, 16], strides = [1, 1]} : vector<16x384xf32> to vector<8x16xf32>
    %25 = vector.extract_strided_slice %21 {offsets = [0, 256], sizes = [8, 16], strides = [1, 1]} : vector<16x384xf32> to vector<8x16xf32>
    %26 = tpu.transpose %24, [1, 0] : vector<8x16xf32> -> vector<16x8xf32>
    %cst_20 = arith.constant dense<0.000000e+00> : vector<8x8xf32>
    %27 = tpu.matmul %23, %26, %cst_20 {dimension_numbers = #tpu.dot_dimension_numbers<[1], [0], [0], [1], [0, 0, 1, 1], [], []>} : vector<8x16xf32>, vector<16x8xf32>, vector<8x8xf32> -> vector<8x8xf32>
    %cst_21 = arith.constant 2.500000e-01 : f32
    %28 = vector.broadcast %cst_21 : f32 to vector<8x8xf32>
    %29 = arith.mulf %27, %28 : vector<8x8xf32>
    %cst_22 = arith.constant dense<0xFF800000> : vector<8xf32>
    %30 = vector.multi_reduction <maximumf>, %29, %cst_22 [1] : vector<8x8xf32> to vector<8xf32>
    %31 = vector.shape_cast %30 : vector<8xf32> to vector<8x1xf32>
    %32 = vector.broadcast %31 : vector<8x1xf32> to vector<8x8xf32>
    %33 = arith.subf %29, %32 : vector<8x8xf32>
    %34 = math.exp %33 : vector<8x8xf32>
    %cst_23 = arith.constant dense<0.000000e+00> : vector<8xf32>
    %35 = vector.multi_reduction <add>, %34, %cst_23 [1] : vector<8x8xf32> to vector<8xf32>
    %36 = vector.shape_cast %35 : vector<8xf32> to vector<8x1xf32>
    %37 = tpu.reciprocal %36 {approx = true} : vector<8x1xf32> -> vector<8x1xf32>
    %38 = vector.broadcast %37 : vector<8x1xf32> to vector<8x8xf32>
    %39 = arith.mulf %34, %38 : vector<8x8xf32>
    %cst_24 = arith.constant dense<0.000000e+00> : vector<8x16xf32>
    %40 = tpu.matmul %39, %25, %cst_24 {dimension_numbers = #tpu.dot_dimension_numbers<[1], [0], [0], [1], [0, 0, 1, 1], [], []>} : vector<8x8xf32>, vector<8x16xf32>, vector<8x16xf32> -> vector<8x16xf32>
    %41 = arith.truncf %40 : vector<8x16xf32> to vector<8x16xbf16>
    %42 = vector.extract_strided_slice %11 {offsets = [0, 0], sizes = [16, 128], strides = [1, 1]} : vector<128x128xbf16> to vector<16x128xbf16>
    %cst_25 = arith.constant dense<0.000000e+00> : vector<8x128xf32>
    %43 = tpu.matmul %41, %42, %cst_25 {dimension_numbers = #tpu.dot_dimension_numbers<[1], [0], [0], [1], [0, 0, 1, 1], [], []>} : vector<8x16xbf16>, vector<16x128xbf16>, vector<8x128xf32> -> vector<8x128xf32>
    %44 = arith.addf %22, %43 : vector<8x128xf32>
    %45 = vector.extract_strided_slice %21 {offsets = [0, 16], sizes = [8, 16], strides = [1, 1]} : vector<16x384xf32> to vector<8x16xf32>
    %46 = vector.extract_strided_slice %21 {offsets = [0, 144], sizes = [8, 16], strides = [1, 1]} : vector<16x384xf32> to vector<8x16xf32>
    %47 = vector.extract_strided_slice %21 {offsets = [0, 272], sizes = [8, 16], strides = [1, 1]} : vector<16x384xf32> to vector<8x16xf32>
    %48 = tpu.transpose %46, [1, 0] : vector<8x16xf32> -> vector<16x8xf32>
    %cst_26 = arith.constant dense<0.000000e+00> : vector<8x8xf32>
    %49 = tpu.matmul %45, %48, %cst_26 {dimension_numbers = #tpu.dot_dimension_numbers<[1], [0], [0], [1], [0, 0, 1, 1], [], []>} : vector<8x16xf32>, vector<16x8xf32>, vector<8x8xf32> -> vector<8x8xf32>
    %cst_27 = arith.constant 2.500000e-01 : f32
    %50 = vector.broadcast %cst_27 : f32 to vector<8x8xf32>
    %51 = arith.mulf %49, %50 : vector<8x8xf32>
    %cst_28 = arith.constant dense<0xFF800000> : vector<8xf32>
    %52 = vector.multi_reduction <maximumf>, %51, %cst_28 [1] : vector<8x8xf32> to vector<8xf32>
    %53 = vector.shape_cast %52 : vector<8xf32> to vector<8x1xf32>
    %54 = vector.broadcast %53 : vector<8x1xf32> to vector<8x8xf32>
    %55 = arith.subf %51, %54 : vector<8x8xf32>
    %56 = math.exp %55 : vector<8x8xf32>
    %cst_29 = arith.constant dense<0.000000e+00> : vector<8xf32>
    %57 = vector.multi_reduction <add>, %56, %cst_29 [1] : vector<8x8xf32> to vector<8xf32>
    %58 = vector.shape_cast %57 : vector<8xf32> to vector<8x1xf32>
    %59 = tpu.reciprocal %58 {approx = true} : vector<8x1xf32> -> vector<8x1xf32>
    %60 = vector.broadcast %59 : vector<8x1xf32> to vector<8x8xf32>
    %61 = arith.mulf %56, %60 : vector<8x8xf32>
    %cst_30 = arith.constant dense<0.000000e+00> : vector<8x16xf32>
    %62 = tpu.matmul %61, %47, %cst_30 {dimension_numbers = #tpu.dot_dimension_numbers<[1], [0], [0], [1], [0, 0, 1, 1], [], []>} : vector<8x8xf32>, vector<8x16xf32>, vector<8x16xf32> -> vector<8x16xf32>
    %63 = arith.truncf %62 : vector<8x16xf32> to vector<8x16xbf16>
    %64 = vector.extract_strided_slice %11 {offsets = [16, 0], sizes = [16, 128], strides = [1, 1]} : vector<128x128xbf16> to vector<16x128xbf16>
    %cst_31 = arith.constant dense<0.000000e+00> : vector<8x128xf32>
    %65 = tpu.matmul %63, %64, %cst_31 {dimension_numbers = #tpu.dot_dimension_numbers<[1], [0], [0], [1], [0, 0, 1, 1], [], []>} : vector<8x16xbf16>, vector<16x128xbf16>, vector<8x128xf32> -> vector<8x128xf32>
    %66 = arith.addf %44, %65 : vector<8x128xf32>
    %67 = vector.extract_strided_slice %21 {offsets = [0, 32], sizes = [8, 16], strides = [1, 1]} : vector<16x384xf32> to vector<8x16xf32>
    %68 = vector.extract_strided_slice %21 {offsets = [0, 160], sizes = [8, 16], strides = [1, 1]} : vector<16x384xf32> to vector<8x16xf32>
    %69 = vector.extract_strided_slice %21 {offsets = [0, 288], sizes = [8, 16], strides = [1, 1]} : vector<16x384xf32> to vector<8x16xf32>
    %70 = tpu.transpose %68, [1, 0] : vector<8x16xf32> -> vector<16x8xf32>
    %cst_32 = arith.constant dense<0.000000e+00> : vector<8x8xf32>
    %71 = tpu.matmul %67, %70, %cst_32 {dimension_numbers = #tpu.dot_dimension_numbers<[1], [0], [0], [1], [0, 0, 1, 1], [], []>} : vector<8x16xf32>, vector<16x8xf32>, vector<8x8xf32> -> vector<8x8xf32>
    %cst_33 = arith.constant 2.500000e-01 : f32
    %72 = vector.broadcast %cst_33 : f32 to vector<8x8xf32>
    %73 = arith.mulf %71, %72 : vector<8x8xf32>
    %cst_34 = arith.constant dense<0xFF800000> : vector<8xf32>
    %74 = vector.multi_reduction <maximumf>, %73, %cst_34 [1] : vector<8x8xf32> to vector<8xf32>
    %75 = vector.shape_cast %74 : vector<8xf32> to vector<8x1xf32>
    %76 = vector.broadcast %75 : vector<8x1xf32> to vector<8x8xf32>
    %77 = arith.subf %73, %76 : vector<8x8xf32>
    %78 = math.exp %77 : vector<8x8xf32>
    %cst_35 = arith.constant dense<0.000000e+00> : vector<8xf32>
    %79 = vector.multi_reduction <add>, %78, %cst_35 [1] : vector<8x8xf32> to vector<8xf32>
    %80 = vector.shape_cast %79 : vector<8xf32> to vector<8x1xf32>
    %81 = tpu.reciprocal %80 {approx = true} : vector<8x1xf32> -> vector<8x1xf32>
    %82 = vector.broadcast %81 : vector<8x1xf32> to vector<8x8xf32>
    %83 = arith.mulf %78, %82 : vector<8x8xf32>
    %cst_36 = arith.constant dense<0.000000e+00> : vector<8x16xf32>
    %84 = tpu.matmul %83, %69, %cst_36 {dimension_numbers = #tpu.dot_dimension_numbers<[1], [0], [0], [1], [0, 0, 1, 1], [], []>} : vector<8x8xf32>, vector<8x16xf32>, vector<8x16xf32> -> vector<8x16xf32>
    %85 = arith.truncf %84 : vector<8x16xf32> to vector<8x16xbf16>
    %86 = vector.extract_strided_slice %11 {offsets = [32, 0], sizes = [16, 128], strides = [1, 1]} : vector<128x128xbf16> to vector<16x128xbf16>
    %cst_37 = arith.constant dense<0.000000e+00> : vector<8x128xf32>
    %87 = tpu.matmul %85, %86, %cst_37 {dimension_numbers = #tpu.dot_dimension_numbers<[1], [0], [0], [1], [0, 0, 1, 1], [], []>} : vector<8x16xbf16>, vector<16x128xbf16>, vector<8x128xf32> -> vector<8x128xf32>
    %88 = arith.addf %66, %87 : vector<8x128xf32>
    %89 = vector.extract_strided_slice %21 {offsets = [0, 48], sizes = [8, 16], strides = [1, 1]} : vector<16x384xf32> to vector<8x16xf32>
    %90 = vector.extract_strided_slice %21 {offsets = [0, 176], sizes = [8, 16], strides = [1, 1]} : vector<16x384xf32> to vector<8x16xf32>
    %91 = vector.extract_strided_slice %21 {offsets = [0, 304], sizes = [8, 16], strides = [1, 1]} : vector<16x384xf32> to vector<8x16xf32>
    %92 = tpu.transpose %90, [1, 0] : vector<8x16xf32> -> vector<16x8xf32>
    %cst_38 = arith.constant dense<0.000000e+00> : vector<8x8xf32>
    %93 = tpu.matmul %89, %92, %cst_38 {dimension_numbers = #tpu.dot_dimension_numbers<[1], [0], [0], [1], [0, 0, 1, 1], [], []>} : vector<8x16xf32>, vector<16x8xf32>, vector<8x8xf32> -> vector<8x8xf32>
    %cst_39 = arith.constant 2.500000e-01 : f32
    %94 = vector.broadcast %cst_39 : f32 to vector<8x8xf32>
    %95 = arith.mulf %93, %94 : vector<8x8xf32>
    %cst_40 = arith.constant dense<0xFF800000> : vector<8xf32>
    %96 = vector.multi_reduction <maximumf>, %95, %cst_40 [1] : vector<8x8xf32> to vector<8xf32>
    %97 = vector.shape_cast %96 : vector<8xf32> to vector<8x1xf32>
    %98 = vector.broadcast %97 : vector<8x1xf32> to vector<8x8xf32>
    %99 = arith.subf %95, %98 : vector<8x8xf32>
    %100 = math.exp %99 : vector<8x8xf32>
    %cst_41 = arith.constant dense<0.000000e+00> : vector<8xf32>
    %101 = vector.multi_reduction <add>, %100, %cst_41 [1] : vector<8x8xf32> to vector<8xf32>
    %102 = vector.shape_cast %101 : vector<8xf32> to vector<8x1xf32>
    %103 = tpu.reciprocal %102 {approx = true} : vector<8x1xf32> -> vector<8x1xf32>
    %104 = vector.broadcast %103 : vector<8x1xf32> to vector<8x8xf32>
    %105 = arith.mulf %100, %104 : vector<8x8xf32>
    %cst_42 = arith.constant dense<0.000000e+00> : vector<8x16xf32>
    %106 = tpu.matmul %105, %91, %cst_42 {dimension_numbers = #tpu.dot_dimension_numbers<[1], [0], [0], [1], [0, 0, 1, 1], [], []>} : vector<8x8xf32>, vector<8x16xf32>, vector<8x16xf32> -> vector<8x16xf32>
    %107 = arith.truncf %106 : vector<8x16xf32> to vector<8x16xbf16>
    %108 = vector.extract_strided_slice %11 {offsets = [48, 0], sizes = [16, 128], strides = [1, 1]} : vector<128x128xbf16> to vector<16x128xbf16>
    %cst_43 = arith.constant dense<0.000000e+00> : vector<8x128xf32>
    %109 = tpu.matmul %107, %108, %cst_43 {dimension_numbers = #tpu.dot_dimension_numbers<[1], [0], [0], [1], [0, 0, 1, 1], [], []>} : vector<8x16xbf16>, vector<16x128xbf16>, vector<8x128xf32> -> vector<8x128xf32>
    %110 = arith.addf %88, %109 : vector<8x128xf32>
    %111 = vector.extract_strided_slice %21 {offsets = [0, 64], sizes = [8, 16], strides = [1, 1]} : vector<16x384xf32> to vector<8x16xf32>
    %112 = vector.extract_strided_slice %21 {offsets = [0, 192], sizes = [8, 16], strides = [1, 1]} : vector<16x384xf32> to vector<8x16xf32>
    %113 = vector.extract_strided_slice %21 {offsets = [0, 320], sizes = [8, 16], strides = [1, 1]} : vector<16x384xf32> to vector<8x16xf32>
    %114 = tpu.transpose %112, [1, 0] : vector<8x16xf32> -> vector<16x8xf32>
    %cst_44 = arith.constant dense<0.000000e+00> : vector<8x8xf32>
    %115 = tpu.matmul %111, %114, %cst_44 {dimension_numbers = #tpu.dot_dimension_numbers<[1], [0], [0], [1], [0, 0, 1, 1], [], []>} : vector<8x16xf32>, vector<16x8xf32>, vector<8x8xf32> -> vector<8x8xf32>
    %cst_45 = arith.constant 2.500000e-01 : f32
    %116 = vector.broadcast %cst_45 : f32 to vector<8x8xf32>
    %117 = arith.mulf %115, %116 : vector<8x8xf32>
    %cst_46 = arith.constant dense<0xFF800000> : vector<8xf32>
    %118 = vector.multi_reduction <maximumf>, %117, %cst_46 [1] : vector<8x8xf32> to vector<8xf32>
    %119 = vector.shape_cast %118 : vector<8xf32> to vector<8x1xf32>
    %120 = vector.broadcast %119 : vector<8x1xf32> to vector<8x8xf32>
    %121 = arith.subf %117, %120 : vector<8x8xf32>
    %122 = math.exp %121 : vector<8x8xf32>
    %cst_47 = arith.constant dense<0.000000e+00> : vector<8xf32>
    %123 = vector.multi_reduction <add>, %122, %cst_47 [1] : vector<8x8xf32> to vector<8xf32>
    %124 = vector.shape_cast %123 : vector<8xf32> to vector<8x1xf32>
    %125 = tpu.reciprocal %124 {approx = true} : vector<8x1xf32> -> vector<8x1xf32>
    %126 = vector.broadcast %125 : vector<8x1xf32> to vector<8x8xf32>
    %127 = arith.mulf %122, %126 : vector<8x8xf32>
    %cst_48 = arith.constant dense<0.000000e+00> : vector<8x16xf32>
    %128 = tpu.matmul %127, %113, %cst_48 {dimension_numbers = #tpu.dot_dimension_numbers<[1], [0], [0], [1], [0, 0, 1, 1], [], []>} : vector<8x8xf32>, vector<8x16xf32>, vector<8x16xf32> -> vector<8x16xf32>
    %129 = arith.truncf %128 : vector<8x16xf32> to vector<8x16xbf16>
    %130 = vector.extract_strided_slice %11 {offsets = [64, 0], sizes = [16, 128], strides = [1, 1]} : vector<128x128xbf16> to vector<16x128xbf16>
    %cst_49 = arith.constant dense<0.000000e+00> : vector<8x128xf32>
    %131 = tpu.matmul %129, %130, %cst_49 {dimension_numbers = #tpu.dot_dimension_numbers<[1], [0], [0], [1], [0, 0, 1, 1], [], []>} : vector<8x16xbf16>, vector<16x128xbf16>, vector<8x128xf32> -> vector<8x128xf32>
    %132 = arith.addf %110, %131 : vector<8x128xf32>
    %133 = vector.extract_strided_slice %21 {offsets = [0, 80], sizes = [8, 16], strides = [1, 1]} : vector<16x384xf32> to vector<8x16xf32>
    %134 = vector.extract_strided_slice %21 {offsets = [0, 208], sizes = [8, 16], strides = [1, 1]} : vector<16x384xf32> to vector<8x16xf32>
    %135 = vector.extract_strided_slice %21 {offsets = [0, 336], sizes = [8, 16], strides = [1, 1]} : vector<16x384xf32> to vector<8x16xf32>
    %136 = tpu.transpose %134, [1, 0] : vector<8x16xf32> -> vector<16x8xf32>
    %cst_50 = arith.constant dense<0.000000e+00> : vector<8x8xf32>
    %137 = tpu.matmul %133, %136, %cst_50 {dimension_numbers = #tpu.dot_dimension_numbers<[1], [0], [0], [1], [0, 0, 1, 1], [], []>} : vector<8x16xf32>, vector<16x8xf32>, vector<8x8xf32> -> vector<8x8xf32>
    %cst_51 = arith.constant 2.500000e-01 : f32
    %138 = vector.broadcast %cst_51 : f32 to vector<8x8xf32>
    %139 = arith.mulf %137, %138 : vector<8x8xf32>
    %cst_52 = arith.constant dense<0xFF800000> : vector<8xf32>
    %140 = vector.multi_reduction <maximumf>, %139, %cst_52 [1] : vector<8x8xf32> to vector<8xf32>
    %141 = vector.shape_cast %140 : vector<8xf32> to vector<8x1xf32>
    %142 = vector.broadcast %141 : vector<8x1xf32> to vector<8x8xf32>
    %143 = arith.subf %139, %142 : vector<8x8xf32>
    %144 = math.exp %143 : vector<8x8xf32>
    %cst_53 = arith.constant dense<0.000000e+00> : vector<8xf32>
    %145 = vector.multi_reduction <add>, %144, %cst_53 [1] : vector<8x8xf32> to vector<8xf32>
    %146 = vector.shape_cast %145 : vector<8xf32> to vector<8x1xf32>
    %147 = tpu.reciprocal %146 {approx = true} : vector<8x1xf32> -> vector<8x1xf32>
    %148 = vector.broadcast %147 : vector<8x1xf32> to vector<8x8xf32>
    %149 = arith.mulf %144, %148 : vector<8x8xf32>
    %cst_54 = arith.constant dense<0.000000e+00> : vector<8x16xf32>
    %150 = tpu.matmul %149, %135, %cst_54 {dimension_numbers = #tpu.dot_dimension_numbers<[1], [0], [0], [1], [0, 0, 1, 1], [], []>} : vector<8x8xf32>, vector<8x16xf32>, vector<8x16xf32> -> vector<8x16xf32>
    %151 = arith.truncf %150 : vector<8x16xf32> to vector<8x16xbf16>
    %152 = vector.extract_strided_slice %11 {offsets = [80, 0], sizes = [16, 128], strides = [1, 1]} : vector<128x128xbf16> to vector<16x128xbf16>
    %cst_55 = arith.constant dense<0.000000e+00> : vector<8x128xf32>
    %153 = tpu.matmul %151, %152, %cst_55 {dimension_numbers = #tpu.dot_dimension_numbers<[1], [0], [0], [1], [0, 0, 1, 1], [], []>} : vector<8x16xbf16>, vector<16x128xbf16>, vector<8x128xf32> -> vector<8x128xf32>
    %154 = arith.addf %132, %153 : vector<8x128xf32>
    %155 = vector.extract_strided_slice %21 {offsets = [0, 96], sizes = [8, 16], strides = [1, 1]} : vector<16x384xf32> to vector<8x16xf32>
    %156 = vector.extract_strided_slice %21 {offsets = [0, 224], sizes = [8, 16], strides = [1, 1]} : vector<16x384xf32> to vector<8x16xf32>
    %157 = vector.extract_strided_slice %21 {offsets = [0, 352], sizes = [8, 16], strides = [1, 1]} : vector<16x384xf32> to vector<8x16xf32>
    %158 = tpu.transpose %156, [1, 0] : vector<8x16xf32> -> vector<16x8xf32>
    %cst_56 = arith.constant dense<0.000000e+00> : vector<8x8xf32>
    %159 = tpu.matmul %155, %158, %cst_56 {dimension_numbers = #tpu.dot_dimension_numbers<[1], [0], [0], [1], [0, 0, 1, 1], [], []>} : vector<8x16xf32>, vector<16x8xf32>, vector<8x8xf32> -> vector<8x8xf32>
    %cst_57 = arith.constant 2.500000e-01 : f32
    %160 = vector.broadcast %cst_57 : f32 to vector<8x8xf32>
    %161 = arith.mulf %159, %160 : vector<8x8xf32>
    %cst_58 = arith.constant dense<0xFF800000> : vector<8xf32>
    %162 = vector.multi_reduction <maximumf>, %161, %cst_58 [1] : vector<8x8xf32> to vector<8xf32>
    %163 = vector.shape_cast %162 : vector<8xf32> to vector<8x1xf32>
    %164 = vector.broadcast %163 : vector<8x1xf32> to vector<8x8xf32>
    %165 = arith.subf %161, %164 : vector<8x8xf32>
    %166 = math.exp %165 : vector<8x8xf32>
    %cst_59 = arith.constant dense<0.000000e+00> : vector<8xf32>
    %167 = vector.multi_reduction <add>, %166, %cst_59 [1] : vector<8x8xf32> to vector<8xf32>
    %168 = vector.shape_cast %167 : vector<8xf32> to vector<8x1xf32>
    %169 = tpu.reciprocal %168 {approx = true} : vector<8x1xf32> -> vector<8x1xf32>
    %170 = vector.broadcast %169 : vector<8x1xf32> to vector<8x8xf32>
    %171 = arith.mulf %166, %170 : vector<8x8xf32>
    %cst_60 = arith.constant dense<0.000000e+00> : vector<8x16xf32>
    %172 = tpu.matmul %171, %157, %cst_60 {dimension_numbers = #tpu.dot_dimension_numbers<[1], [0], [0], [1], [0, 0, 1, 1], [], []>} : vector<8x8xf32>, vector<8x16xf32>, vector<8x16xf32> -> vector<8x16xf32>
    %173 = arith.truncf %172 : vector<8x16xf32> to vector<8x16xbf16>
    %174 = vector.extract_strided_slice %11 {offsets = [96, 0], sizes = [16, 128], strides = [1, 1]} : vector<128x128xbf16> to vector<16x128xbf16>
    %cst_61 = arith.constant dense<0.000000e+00> : vector<8x128xf32>
    %175 = tpu.matmul %173, %174, %cst_61 {dimension_numbers = #tpu.dot_dimension_numbers<[1], [0], [0], [1], [0, 0, 1, 1], [], []>} : vector<8x16xbf16>, vector<16x128xbf16>, vector<8x128xf32> -> vector<8x128xf32>
    %176 = arith.addf %154, %175 : vector<8x128xf32>
    %177 = vector.extract_strided_slice %21 {offsets = [0, 112], sizes = [8, 16], strides = [1, 1]} : vector<16x384xf32> to vector<8x16xf32>
    %178 = vector.extract_strided_slice %21 {offsets = [0, 240], sizes = [8, 16], strides = [1, 1]} : vector<16x384xf32> to vector<8x16xf32>
    %179 = vector.extract_strided_slice %21 {offsets = [0, 368], sizes = [8, 16], strides = [1, 1]} : vector<16x384xf32> to vector<8x16xf32>
    %180 = tpu.transpose %178, [1, 0] : vector<8x16xf32> -> vector<16x8xf32>
    %cst_62 = arith.constant dense<0.000000e+00> : vector<8x8xf32>
    %181 = tpu.matmul %177, %180, %cst_62 {dimension_numbers = #tpu.dot_dimension_numbers<[1], [0], [0], [1], [0, 0, 1, 1], [], []>} : vector<8x16xf32>, vector<16x8xf32>, vector<8x8xf32> -> vector<8x8xf32>
    %cst_63 = arith.constant 2.500000e-01 : f32
    %182 = vector.broadcast %cst_63 : f32 to vector<8x8xf32>
    %183 = arith.mulf %181, %182 : vector<8x8xf32>
    %cst_64 = arith.constant dense<0xFF800000> : vector<8xf32>
    %184 = vector.multi_reduction <maximumf>, %183, %cst_64 [1] : vector<8x8xf32> to vector<8xf32>
    %185 = vector.shape_cast %184 : vector<8xf32> to vector<8x1xf32>
    %186 = vector.broadcast %185 : vector<8x1xf32> to vector<8x8xf32>
    %187 = arith.subf %183, %186 : vector<8x8xf32>
    %188 = math.exp %187 : vector<8x8xf32>
    %cst_65 = arith.constant dense<0.000000e+00> : vector<8xf32>
    %189 = vector.multi_reduction <add>, %188, %cst_65 [1] : vector<8x8xf32> to vector<8xf32>
    %190 = vector.shape_cast %189 : vector<8xf32> to vector<8x1xf32>
    %191 = tpu.reciprocal %190 {approx = true} : vector<8x1xf32> -> vector<8x1xf32>
    %192 = vector.broadcast %191 : vector<8x1xf32> to vector<8x8xf32>
    %193 = arith.mulf %188, %192 : vector<8x8xf32>
    %cst_66 = arith.constant dense<0.000000e+00> : vector<8x16xf32>
    %194 = tpu.matmul %193, %179, %cst_66 {dimension_numbers = #tpu.dot_dimension_numbers<[1], [0], [0], [1], [0, 0, 1, 1], [], []>} : vector<8x8xf32>, vector<8x16xf32>, vector<8x16xf32> -> vector<8x16xf32>
    %195 = arith.truncf %194 : vector<8x16xf32> to vector<8x16xbf16>
    %196 = vector.extract_strided_slice %11 {offsets = [112, 0], sizes = [16, 128], strides = [1, 1]} : vector<128x128xbf16> to vector<16x128xbf16>
    %cst_67 = arith.constant dense<0.000000e+00> : vector<8x128xf32>
    %197 = tpu.matmul %195, %196, %cst_67 {dimension_numbers = #tpu.dot_dimension_numbers<[1], [0], [0], [1], [0, 0, 1, 1], [], []>} : vector<8x16xbf16>, vector<16x128xbf16>, vector<8x128xf32> -> vector<8x128xf32>
    %198 = arith.addf %176, %197 : vector<8x128xf32>
    %cst_68 = arith.constant 0.000000e+00 : f32
    %199 = vector.broadcast %cst_68 : f32 to vector<8x128xf32>
    %200 = vector.extract_strided_slice %21 {offsets = [8, 0], sizes = [8, 16], strides = [1, 1]} : vector<16x384xf32> to vector<8x16xf32>
    %201 = vector.extract_strided_slice %21 {offsets = [8, 128], sizes = [8, 16], strides = [1, 1]} : vector<16x384xf32> to vector<8x16xf32>
    %202 = vector.extract_strided_slice %21 {offsets = [8, 256], sizes = [8, 16], strides = [1, 1]} : vector<16x384xf32> to vector<8x16xf32>
    %203 = tpu.transpose %201, [1, 0] : vector<8x16xf32> -> vector<16x8xf32>
    %cst_69 = arith.constant dense<0.000000e+00> : vector<8x8xf32>
    %204 = tpu.matmul %200, %203, %cst_69 {dimension_numbers = #tpu.dot_dimension_numbers<[1], [0], [0], [1], [0, 0, 1, 1], [], []>} : vector<8x16xf32>, vector<16x8xf32>, vector<8x8xf32> -> vector<8x8xf32>
    %cst_70 = arith.constant 2.500000e-01 : f32
    %205 = vector.broadcast %cst_70 : f32 to vector<8x8xf32>
    %206 = arith.mulf %204, %205 : vector<8x8xf32>
    %cst_71 = arith.constant dense<0xFF800000> : vector<8xf32>
    %207 = vector.multi_reduction <maximumf>, %206, %cst_71 [1] : vector<8x8xf32> to vector<8xf32>
    %208 = vector.shape_cast %207 : vector<8xf32> to vector<8x1xf32>
    %209 = vector.broadcast %208 : vector<8x1xf32> to vector<8x8xf32>
    %210 = arith.subf %206, %209 : vector<8x8xf32>
    %211 = math.exp %210 : vector<8x8xf32>
    %cst_72 = arith.constant dense<0.000000e+00> : vector<8xf32>
    %212 = vector.multi_reduction <add>, %211, %cst_72 [1] : vector<8x8xf32> to vector<8xf32>
    %213 = vector.shape_cast %212 : vector<8xf32> to vector<8x1xf32>
    %214 = tpu.reciprocal %213 {approx = true} : vector<8x1xf32> -> vector<8x1xf32>
    %215 = vector.broadcast %214 : vector<8x1xf32> to vector<8x8xf32>
    %216 = arith.mulf %211, %215 : vector<8x8xf32>
    %cst_73 = arith.constant dense<0.000000e+00> : vector<8x16xf32>
    %217 = tpu.matmul %216, %202, %cst_73 {dimension_numbers = #tpu.dot_dimension_numbers<[1], [0], [0], [1], [0, 0, 1, 1], [], []>} : vector<8x8xf32>, vector<8x16xf32>, vector<8x16xf32> -> vector<8x16xf32>
    %218 = arith.truncf %217 : vector<8x16xf32> to vector<8x16xbf16>
    %219 = vector.extract_strided_slice %11 {offsets = [0, 0], sizes = [16, 128], strides = [1, 1]} : vector<128x128xbf16> to vector<16x128xbf16>
    %cst_74 = arith.constant dense<0.000000e+00> : vector<8x128xf32>
    %220 = tpu.matmul %218, %219, %cst_74 {dimension_numbers = #tpu.dot_dimension_numbers<[1], [0], [0], [1], [0, 0, 1, 1], [], []>} : vector<8x16xbf16>, vector<16x128xbf16>, vector<8x128xf32> -> vector<8x128xf32>
    %221 = arith.addf %199, %220 : vector<8x128xf32>
    %222 = vector.extract_strided_slice %21 {offsets = [8, 16], sizes = [8, 16], strides = [1, 1]} : vector<16x384xf32> to vector<8x16xf32>
    %223 = vector.extract_strided_slice %21 {offsets = [8, 144], sizes = [8, 16], strides = [1, 1]} : vector<16x384xf32> to vector<8x16xf32>
    %224 = vector.extract_strided_slice %21 {offsets = [8, 272], sizes = [8, 16], strides = [1, 1]} : vector<16x384xf32> to vector<8x16xf32>
    %225 = tpu.transpose %223, [1, 0] : vector<8x16xf32> -> vector<16x8xf32>
    %cst_75 = arith.constant dense<0.000000e+00> : vector<8x8xf32>
    %226 = tpu.matmul %222, %225, %cst_75 {dimension_numbers = #tpu.dot_dimension_numbers<[1], [0], [0], [1], [0, 0, 1, 1], [], []>} : vector<8x16xf32>, vector<16x8xf32>, vector<8x8xf32> -> vector<8x8xf32>
    %cst_76 = arith.constant 2.500000e-01 : f32
    %227 = vector.broadcast %cst_76 : f32 to vector<8x8xf32>
    %228 = arith.mulf %226, %227 : vector<8x8xf32>
    %cst_77 = arith.constant dense<0xFF800000> : vector<8xf32>
    %229 = vector.multi_reduction <maximumf>, %228, %cst_77 [1] : vector<8x8xf32> to vector<8xf32>
    %230 = vector.shape_cast %229 : vector<8xf32> to vector<8x1xf32>
    %231 = vector.broadcast %230 : vector<8x1xf32> to vector<8x8xf32>
    %232 = arith.subf %228, %231 : vector<8x8xf32>
    %233 = math.exp %232 : vector<8x8xf32>
    %cst_78 = arith.constant dense<0.000000e+00> : vector<8xf32>
    %234 = vector.multi_reduction <add>, %233, %cst_78 [1] : vector<8x8xf32> to vector<8xf32>
    %235 = vector.shape_cast %234 : vector<8xf32> to vector<8x1xf32>
    %236 = tpu.reciprocal %235 {approx = true} : vector<8x1xf32> -> vector<8x1xf32>
    %237 = vector.broadcast %236 : vector<8x1xf32> to vector<8x8xf32>
    %238 = arith.mulf %233, %237 : vector<8x8xf32>
    %cst_79 = arith.constant dense<0.000000e+00> : vector<8x16xf32>
    %239 = tpu.matmul %238, %224, %cst_79 {dimension_numbers = #tpu.dot_dimension_numbers<[1], [0], [0], [1], [0, 0, 1, 1], [], []>} : vector<8x8xf32>, vector<8x16xf32>, vector<8x16xf32> -> vector<8x16xf32>
    %240 = arith.truncf %239 : vector<8x16xf32> to vector<8x16xbf16>
    %241 = vector.extract_strided_slice %11 {offsets = [16, 0], sizes = [16, 128], strides = [1, 1]} : vector<128x128xbf16> to vector<16x128xbf16>
    %cst_80 = arith.constant dense<0.000000e+00> : vector<8x128xf32>
    %242 = tpu.matmul %240, %241, %cst_80 {dimension_numbers = #tpu.dot_dimension_numbers<[1], [0], [0], [1], [0, 0, 1, 1], [], []>} : vector<8x16xbf16>, vector<16x128xbf16>, vector<8x128xf32> -> vector<8x128xf32>
    %243 = arith.addf %221, %242 : vector<8x128xf32>
    %244 = vector.extract_strided_slice %21 {offsets = [8, 32], sizes = [8, 16], strides = [1, 1]} : vector<16x384xf32> to vector<8x16xf32>
    %245 = vector.extract_strided_slice %21 {offsets = [8, 160], sizes = [8, 16], strides = [1, 1]} : vector<16x384xf32> to vector<8x16xf32>
    %246 = vector.extract_strided_slice %21 {offsets = [8, 288], sizes = [8, 16], strides = [1, 1]} : vector<16x384xf32> to vector<8x16xf32>
    %247 = tpu.transpose %245, [1, 0] : vector<8x16xf32> -> vector<16x8xf32>
    %cst_81 = arith.constant dense<0.000000e+00> : vector<8x8xf32>
    %248 = tpu.matmul %244, %247, %cst_81 {dimension_numbers = #tpu.dot_dimension_numbers<[1], [0], [0], [1], [0, 0, 1, 1], [], []>} : vector<8x16xf32>, vector<16x8xf32>, vector<8x8xf32> -> vector<8x8xf32>
    %cst_82 = arith.constant 2.500000e-01 : f32
    %249 = vector.broadcast %cst_82 : f32 to vector<8x8xf32>
    %250 = arith.mulf %248, %249 : vector<8x8xf32>
    %cst_83 = arith.constant dense<0xFF800000> : vector<8xf32>
    %251 = vector.multi_reduction <maximumf>, %250, %cst_83 [1] : vector<8x8xf32> to vector<8xf32>
    %252 = vector.shape_cast %251 : vector<8xf32> to vector<8x1xf32>
    %253 = vector.broadcast %252 : vector<8x1xf32> to vector<8x8xf32>
    %254 = arith.subf %250, %253 : vector<8x8xf32>
    %255 = math.exp %254 : vector<8x8xf32>
    %cst_84 = arith.constant dense<0.000000e+00> : vector<8xf32>
    %256 = vector.multi_reduction <add>, %255, %cst_84 [1] : vector<8x8xf32> to vector<8xf32>
    %257 = vector.shape_cast %256 : vector<8xf32> to vector<8x1xf32>
    %258 = tpu.reciprocal %257 {approx = true} : vector<8x1xf32> -> vector<8x1xf32>
    %259 = vector.broadcast %258 : vector<8x1xf32> to vector<8x8xf32>
    %260 = arith.mulf %255, %259 : vector<8x8xf32>
    %cst_85 = arith.constant dense<0.000000e+00> : vector<8x16xf32>
    %261 = tpu.matmul %260, %246, %cst_85 {dimension_numbers = #tpu.dot_dimension_numbers<[1], [0], [0], [1], [0, 0, 1, 1], [], []>} : vector<8x8xf32>, vector<8x16xf32>, vector<8x16xf32> -> vector<8x16xf32>
    %262 = arith.truncf %261 : vector<8x16xf32> to vector<8x16xbf16>
    %263 = vector.extract_strided_slice %11 {offsets = [32, 0], sizes = [16, 128], strides = [1, 1]} : vector<128x128xbf16> to vector<16x128xbf16>
    %cst_86 = arith.constant dense<0.000000e+00> : vector<8x128xf32>
    %264 = tpu.matmul %262, %263, %cst_86 {dimension_numbers = #tpu.dot_dimension_numbers<[1], [0], [0], [1], [0, 0, 1, 1], [], []>} : vector<8x16xbf16>, vector<16x128xbf16>, vector<8x128xf32> -> vector<8x128xf32>
    %265 = arith.addf %243, %264 : vector<8x128xf32>
    %266 = vector.extract_strided_slice %21 {offsets = [8, 48], sizes = [8, 16], strides = [1, 1]} : vector<16x384xf32> to vector<8x16xf32>
    %267 = vector.extract_strided_slice %21 {offsets = [8, 176], sizes = [8, 16], strides = [1, 1]} : vector<16x384xf32> to vector<8x16xf32>
    %268 = vector.extract_strided_slice %21 {offsets = [8, 304], sizes = [8, 16], strides = [1, 1]} : vector<16x384xf32> to vector<8x16xf32>
    %269 = tpu.transpose %267, [1, 0] : vector<8x16xf32> -> vector<16x8xf32>
    %cst_87 = arith.constant dense<0.000000e+00> : vector<8x8xf32>
    %270 = tpu.matmul %266, %269, %cst_87 {dimension_numbers = #tpu.dot_dimension_numbers<[1], [0], [0], [1], [0, 0, 1, 1], [], []>} : vector<8x16xf32>, vector<16x8xf32>, vector<8x8xf32> -> vector<8x8xf32>
    %cst_88 = arith.constant 2.500000e-01 : f32
    %271 = vector.broadcast %cst_88 : f32 to vector<8x8xf32>
    %272 = arith.mulf %270, %271 : vector<8x8xf32>
    %cst_89 = arith.constant dense<0xFF800000> : vector<8xf32>
    %273 = vector.multi_reduction <maximumf>, %272, %cst_89 [1] : vector<8x8xf32> to vector<8xf32>
    %274 = vector.shape_cast %273 : vector<8xf32> to vector<8x1xf32>
    %275 = vector.broadcast %274 : vector<8x1xf32> to vector<8x8xf32>
    %276 = arith.subf %272, %275 : vector<8x8xf32>
    %277 = math.exp %276 : vector<8x8xf32>
    %cst_90 = arith.constant dense<0.000000e+00> : vector<8xf32>
    %278 = vector.multi_reduction <add>, %277, %cst_90 [1] : vector<8x8xf32> to vector<8xf32>
    %279 = vector.shape_cast %278 : vector<8xf32> to vector<8x1xf32>
    %280 = tpu.reciprocal %279 {approx = true} : vector<8x1xf32> -> vector<8x1xf32>
    %281 = vector.broadcast %280 : vector<8x1xf32> to vector<8x8xf32>
    %282 = arith.mulf %277, %281 : vector<8x8xf32>
    %cst_91 = arith.constant dense<0.000000e+00> : vector<8x16xf32>
    %283 = tpu.matmul %282, %268, %cst_91 {dimension_numbers = #tpu.dot_dimension_numbers<[1], [0], [0], [1], [0, 0, 1, 1], [], []>} : vector<8x8xf32>, vector<8x16xf32>, vector<8x16xf32> -> vector<8x16xf32>
    %284 = arith.truncf %283 : vector<8x16xf32> to vector<8x16xbf16>
    %285 = vector.extract_strided_slice %11 {offsets = [48, 0], sizes = [16, 128], strides = [1, 1]} : vector<128x128xbf16> to vector<16x128xbf16>
    %cst_92 = arith.constant dense<0.000000e+00> : vector<8x128xf32>
    %286 = tpu.matmul %284, %285, %cst_92 {dimension_numbers = #tpu.dot_dimension_numbers<[1], [0], [0], [1], [0, 0, 1, 1], [], []>} : vector<8x16xbf16>, vector<16x128xbf16>, vector<8x128xf32> -> vector<8x128xf32>
    %287 = arith.addf %265, %286 : vector<8x128xf32>
    %288 = vector.extract_strided_slice %21 {offsets = [8, 64], sizes = [8, 16], strides = [1, 1]} : vector<16x384xf32> to vector<8x16xf32>
    %289 = vector.extract_strided_slice %21 {offsets = [8, 192], sizes = [8, 16], strides = [1, 1]} : vector<16x384xf32> to vector<8x16xf32>
    %290 = vector.extract_strided_slice %21 {offsets = [8, 320], sizes = [8, 16], strides = [1, 1]} : vector<16x384xf32> to vector<8x16xf32>
    %291 = tpu.transpose %289, [1, 0] : vector<8x16xf32> -> vector<16x8xf32>
    %cst_93 = arith.constant dense<0.000000e+00> : vector<8x8xf32>
    %292 = tpu.matmul %288, %291, %cst_93 {dimension_numbers = #tpu.dot_dimension_numbers<[1], [0], [0], [1], [0, 0, 1, 1], [], []>} : vector<8x16xf32>, vector<16x8xf32>, vector<8x8xf32> -> vector<8x8xf32>
    %cst_94 = arith.constant 2.500000e-01 : f32
    %293 = vector.broadcast %cst_94 : f32 to vector<8x8xf32>
    %294 = arith.mulf %292, %293 : vector<8x8xf32>
    %cst_95 = arith.constant dense<0xFF800000> : vector<8xf32>
    %295 = vector.multi_reduction <maximumf>, %294, %cst_95 [1] : vector<8x8xf32> to vector<8xf32>
    %296 = vector.shape_cast %295 : vector<8xf32> to vector<8x1xf32>
    %297 = vector.broadcast %296 : vector<8x1xf32> to vector<8x8xf32>
    %298 = arith.subf %294, %297 : vector<8x8xf32>
    %299 = math.exp %298 : vector<8x8xf32>
    %cst_96 = arith.constant dense<0.000000e+00> : vector<8xf32>
    %300 = vector.multi_reduction <add>, %299, %cst_96 [1] : vector<8x8xf32> to vector<8xf32>
    %301 = vector.shape_cast %300 : vector<8xf32> to vector<8x1xf32>
    %302 = tpu.reciprocal %301 {approx = true} : vector<8x1xf32> -> vector<8x1xf32>
    %303 = vector.broadcast %302 : vector<8x1xf32> to vector<8x8xf32>
    %304 = arith.mulf %299, %303 : vector<8x8xf32>
    %cst_97 = arith.constant dense<0.000000e+00> : vector<8x16xf32>
    %305 = tpu.matmul %304, %290, %cst_97 {dimension_numbers = #tpu.dot_dimension_numbers<[1], [0], [0], [1], [0, 0, 1, 1], [], []>} : vector<8x8xf32>, vector<8x16xf32>, vector<8x16xf32> -> vector<8x16xf32>
    %306 = arith.truncf %305 : vector<8x16xf32> to vector<8x16xbf16>
    %307 = vector.extract_strided_slice %11 {offsets = [64, 0], sizes = [16, 128], strides = [1, 1]} : vector<128x128xbf16> to vector<16x128xbf16>
    %cst_98 = arith.constant dense<0.000000e+00> : vector<8x128xf32>
    %308 = tpu.matmul %306, %307, %cst_98 {dimension_numbers = #tpu.dot_dimension_numbers<[1], [0], [0], [1], [0, 0, 1, 1], [], []>} : vector<8x16xbf16>, vector<16x128xbf16>, vector<8x128xf32> -> vector<8x128xf32>
    %309 = arith.addf %287, %308 : vector<8x128xf32>
    %310 = vector.extract_strided_slice %21 {offsets = [8, 80], sizes = [8, 16], strides = [1, 1]} : vector<16x384xf32> to vector<8x16xf32>
    %311 = vector.extract_strided_slice %21 {offsets = [8, 208], sizes = [8, 16], strides = [1, 1]} : vector<16x384xf32> to vector<8x16xf32>
    %312 = vector.extract_strided_slice %21 {offsets = [8, 336], sizes = [8, 16], strides = [1, 1]} : vector<16x384xf32> to vector<8x16xf32>
    %313 = tpu.transpose %311, [1, 0] : vector<8x16xf32> -> vector<16x8xf32>
    %cst_99 = arith.constant dense<0.000000e+00> : vector<8x8xf32>
    %314 = tpu.matmul %310, %313, %cst_99 {dimension_numbers = #tpu.dot_dimension_numbers<[1], [0], [0], [1], [0, 0, 1, 1], [], []>} : vector<8x16xf32>, vector<16x8xf32>, vector<8x8xf32> -> vector<8x8xf32>
    %cst_100 = arith.constant 2.500000e-01 : f32
    %315 = vector.broadcast %cst_100 : f32 to vector<8x8xf32>
    %316 = arith.mulf %314, %315 : vector<8x8xf32>
    %cst_101 = arith.constant dense<0xFF800000> : vector<8xf32>
    %317 = vector.multi_reduction <maximumf>, %316, %cst_101 [1] : vector<8x8xf32> to vector<8xf32>
    %318 = vector.shape_cast %317 : vector<8xf32> to vector<8x1xf32>
    %319 = vector.broadcast %318 : vector<8x1xf32> to vector<8x8xf32>
    %320 = arith.subf %316, %319 : vector<8x8xf32>
    %321 = math.exp %320 : vector<8x8xf32>
    %cst_102 = arith.constant dense<0.000000e+00> : vector<8xf32>
    %322 = vector.multi_reduction <add>, %321, %cst_102 [1] : vector<8x8xf32> to vector<8xf32>
    %323 = vector.shape_cast %322 : vector<8xf32> to vector<8x1xf32>
    %324 = tpu.reciprocal %323 {approx = true} : vector<8x1xf32> -> vector<8x1xf32>
    %325 = vector.broadcast %324 : vector<8x1xf32> to vector<8x8xf32>
    %326 = arith.mulf %321, %325 : vector<8x8xf32>
    %cst_103 = arith.constant dense<0.000000e+00> : vector<8x16xf32>
    %327 = tpu.matmul %326, %312, %cst_103 {dimension_numbers = #tpu.dot_dimension_numbers<[1], [0], [0], [1], [0, 0, 1, 1], [], []>} : vector<8x8xf32>, vector<8x16xf32>, vector<8x16xf32> -> vector<8x16xf32>
    %328 = arith.truncf %327 : vector<8x16xf32> to vector<8x16xbf16>
    %329 = vector.extract_strided_slice %11 {offsets = [80, 0], sizes = [16, 128], strides = [1, 1]} : vector<128x128xbf16> to vector<16x128xbf16>
    %cst_104 = arith.constant dense<0.000000e+00> : vector<8x128xf32>
    %330 = tpu.matmul %328, %329, %cst_104 {dimension_numbers = #tpu.dot_dimension_numbers<[1], [0], [0], [1], [0, 0, 1, 1], [], []>} : vector<8x16xbf16>, vector<16x128xbf16>, vector<8x128xf32> -> vector<8x128xf32>
    %331 = arith.addf %309, %330 : vector<8x128xf32>
    %332 = vector.extract_strided_slice %21 {offsets = [8, 96], sizes = [8, 16], strides = [1, 1]} : vector<16x384xf32> to vector<8x16xf32>
    %333 = vector.extract_strided_slice %21 {offsets = [8, 224], sizes = [8, 16], strides = [1, 1]} : vector<16x384xf32> to vector<8x16xf32>
    %334 = vector.extract_strided_slice %21 {offsets = [8, 352], sizes = [8, 16], strides = [1, 1]} : vector<16x384xf32> to vector<8x16xf32>
    %335 = tpu.transpose %333, [1, 0] : vector<8x16xf32> -> vector<16x8xf32>
    %cst_105 = arith.constant dense<0.000000e+00> : vector<8x8xf32>
    %336 = tpu.matmul %332, %335, %cst_105 {dimension_numbers = #tpu.dot_dimension_numbers<[1], [0], [0], [1], [0, 0, 1, 1], [], []>} : vector<8x16xf32>, vector<16x8xf32>, vector<8x8xf32> -> vector<8x8xf32>
    %cst_106 = arith.constant 2.500000e-01 : f32
    %337 = vector.broadcast %cst_106 : f32 to vector<8x8xf32>
    %338 = arith.mulf %336, %337 : vector<8x8xf32>
    %cst_107 = arith.constant dense<0xFF800000> : vector<8xf32>
    %339 = vector.multi_reduction <maximumf>, %338, %cst_107 [1] : vector<8x8xf32> to vector<8xf32>
    %340 = vector.shape_cast %339 : vector<8xf32> to vector<8x1xf32>
    %341 = vector.broadcast %340 : vector<8x1xf32> to vector<8x8xf32>
    %342 = arith.subf %338, %341 : vector<8x8xf32>
    %343 = math.exp %342 : vector<8x8xf32>
    %cst_108 = arith.constant dense<0.000000e+00> : vector<8xf32>
    %344 = vector.multi_reduction <add>, %343, %cst_108 [1] : vector<8x8xf32> to vector<8xf32>
    %345 = vector.shape_cast %344 : vector<8xf32> to vector<8x1xf32>
    %346 = tpu.reciprocal %345 {approx = true} : vector<8x1xf32> -> vector<8x1xf32>
    %347 = vector.broadcast %346 : vector<8x1xf32> to vector<8x8xf32>
    %348 = arith.mulf %343, %347 : vector<8x8xf32>
    %cst_109 = arith.constant dense<0.000000e+00> : vector<8x16xf32>
    %349 = tpu.matmul %348, %334, %cst_109 {dimension_numbers = #tpu.dot_dimension_numbers<[1], [0], [0], [1], [0, 0, 1, 1], [], []>} : vector<8x8xf32>, vector<8x16xf32>, vector<8x16xf32> -> vector<8x16xf32>
    %350 = arith.truncf %349 : vector<8x16xf32> to vector<8x16xbf16>
    %351 = vector.extract_strided_slice %11 {offsets = [96, 0], sizes = [16, 128], strides = [1, 1]} : vector<128x128xbf16> to vector<16x128xbf16>
    %cst_110 = arith.constant dense<0.000000e+00> : vector<8x128xf32>
    %352 = tpu.matmul %350, %351, %cst_110 {dimension_numbers = #tpu.dot_dimension_numbers<[1], [0], [0], [1], [0, 0, 1, 1], [], []>} : vector<8x16xbf16>, vector<16x128xbf16>, vector<8x128xf32> -> vector<8x128xf32>
    %353 = arith.addf %331, %352 : vector<8x128xf32>
    %354 = vector.extract_strided_slice %21 {offsets = [8, 112], sizes = [8, 16], strides = [1, 1]} : vector<16x384xf32> to vector<8x16xf32>
    %355 = vector.extract_strided_slice %21 {offsets = [8, 240], sizes = [8, 16], strides = [1, 1]} : vector<16x384xf32> to vector<8x16xf32>
    %356 = vector.extract_strided_slice %21 {offsets = [8, 368], sizes = [8, 16], strides = [1, 1]} : vector<16x384xf32> to vector<8x16xf32>
    %357 = tpu.transpose %355, [1, 0] : vector<8x16xf32> -> vector<16x8xf32>
    %cst_111 = arith.constant dense<0.000000e+00> : vector<8x8xf32>
    %358 = tpu.matmul %354, %357, %cst_111 {dimension_numbers = #tpu.dot_dimension_numbers<[1], [0], [0], [1], [0, 0, 1, 1], [], []>} : vector<8x16xf32>, vector<16x8xf32>, vector<8x8xf32> -> vector<8x8xf32>
    %cst_112 = arith.constant 2.500000e-01 : f32
    %359 = vector.broadcast %cst_112 : f32 to vector<8x8xf32>
    %360 = arith.mulf %358, %359 : vector<8x8xf32>
    %cst_113 = arith.constant dense<0xFF800000> : vector<8xf32>
    %361 = vector.multi_reduction <maximumf>, %360, %cst_113 [1] : vector<8x8xf32> to vector<8xf32>
    %362 = vector.shape_cast %361 : vector<8xf32> to vector<8x1xf32>
    %363 = vector.broadcast %362 : vector<8x1xf32> to vector<8x8xf32>
    %364 = arith.subf %360, %363 : vector<8x8xf32>
    %365 = math.exp %364 : vector<8x8xf32>
    %cst_114 = arith.constant dense<0.000000e+00> : vector<8xf32>
    %366 = vector.multi_reduction <add>, %365, %cst_114 [1] : vector<8x8xf32> to vector<8xf32>
    %367 = vector.shape_cast %366 : vector<8xf32> to vector<8x1xf32>
    %368 = tpu.reciprocal %367 {approx = true} : vector<8x1xf32> -> vector<8x1xf32>
    %369 = vector.broadcast %368 : vector<8x1xf32> to vector<8x8xf32>
    %370 = arith.mulf %365, %369 : vector<8x8xf32>
    %cst_115 = arith.constant dense<0.000000e+00> : vector<8x16xf32>
    %371 = tpu.matmul %370, %356, %cst_115 {dimension_numbers = #tpu.dot_dimension_numbers<[1], [0], [0], [1], [0, 0, 1, 1], [], []>} : vector<8x8xf32>, vector<8x16xf32>, vector<8x16xf32> -> vector<8x16xf32>
    %372 = arith.truncf %371 : vector<8x16xf32> to vector<8x16xbf16>
    %373 = vector.extract_strided_slice %11 {offsets = [112, 0], sizes = [16, 128], strides = [1, 1]} : vector<128x128xbf16> to vector<16x128xbf16>
    %cst_116 = arith.constant dense<0.000000e+00> : vector<8x128xf32>
    %374 = tpu.matmul %372, %373, %cst_116 {dimension_numbers = #tpu.dot_dimension_numbers<[1], [0], [0], [1], [0, 0, 1, 1], [], []>} : vector<8x16xbf16>, vector<16x128xbf16>, vector<8x128xf32> -> vector<8x128xf32>
    %375 = arith.addf %353, %374 : vector<8x128xf32>
    %376 = tpu.concatenate %198, %375 in 0 : vector<8x128xf32>, vector<8x128xf32> -> vector<16x128xf32>
    %c0_117 = arith.constant 0 : index
    %c0_118 = arith.constant 0 : index
    %c0_119 = arith.constant 0 : index
    %377 = vector.load %arg6[%c0_117, %c0_118, %c0_119] : memref<3x1x128xf32, #tpu.memory_space<vmem>>, vector<1x1x128xf32>
    %378 = vector.shape_cast %377 : vector<1x1x128xf32> to vector<1x128xf32>
    %379 = vector.broadcast %378 : vector<1x128xf32> to vector<16x128xf32>
    %380 = arith.addf %376, %379 : vector<16x128xf32>
    %381 = arith.addf %7, %380 : vector<16x128xf32>
    %c0_120 = arith.constant 0 : index
    %c0_121 = arith.constant 0 : index
    %c0_122 = arith.constant 0 : index
    %382 = vector.load %arg7[%c0_120, %c0_121, %c0_122] : memref<3x1x128xf32, #tpu.memory_space<vmem>>, vector<1x1x128xf32>
    %383 = vector.shape_cast %382 : vector<1x1x128xf32> to vector<1x128xf32>
    %c0_123 = arith.constant 0 : index
    %c0_124 = arith.constant 0 : index
    %c0_125 = arith.constant 0 : index
    %384 = vector.load %arg8[%c0_123, %c0_124, %c0_125] : memref<3x1x128xf32, #tpu.memory_space<vmem>>, vector<1x1x128xf32>
    %385 = vector.shape_cast %384 : vector<1x1x128xf32> to vector<1x128xf32>
    %cst_126 = arith.constant dense<0.000000e+00> : vector<16xf32>
    %386 = vector.multi_reduction <add>, %381, %cst_126 [1] : vector<16x128xf32> to vector<16xf32>
    %387 = vector.shape_cast %386 : vector<16xf32> to vector<16x1xf32>
    %cst_127 = arith.constant 1.280000e+02 : f32
    %388 = vector.broadcast %cst_127 : f32 to vector<16x1xf32>
    %389 = arith.divf %387, %388 : vector<16x1xf32>
    %390 = vector.broadcast %389 : vector<16x1xf32> to vector<16x128xf32>
    %391 = arith.subf %381, %390 : vector<16x128xf32>
    %392 = arith.mulf %391, %391 : vector<16x128xf32>
    %cst_128 = arith.constant dense<0.000000e+00> : vector<16xf32>
    %393 = vector.multi_reduction <add>, %392, %cst_128 [1] : vector<16x128xf32> to vector<16xf32>
    %394 = vector.shape_cast %393 : vector<16xf32> to vector<16x1xf32>
    %cst_129 = arith.constant 1.280000e+02 : f32
    %395 = vector.broadcast %cst_129 : f32 to vector<16x1xf32>
    %396 = arith.divf %394, %395 : vector<16x1xf32>
    %397 = vector.broadcast %389 : vector<16x1xf32> to vector<16x128xf32>
    %398 = arith.subf %381, %397 : vector<16x128xf32>
    %cst_130 = arith.constant 9.99999974E-6 : f32
    %399 = vector.broadcast %cst_130 : f32 to vector<16x1xf32>
    %400 = arith.addf %396, %399 : vector<16x1xf32>
    %401 = math.rsqrt %400 : vector<16x1xf32>
    %402 = vector.broadcast %401 : vector<16x1xf32> to vector<16x128xf32>
    %403 = arith.mulf %398, %402 : vector<16x128xf32>
    %404 = vector.broadcast %383 : vector<1x128xf32> to vector<16x128xf32>
    %405 = arith.mulf %403, %404 : vector<16x128xf32>
    %406 = vector.broadcast %385 : vector<1x128xf32> to vector<16x128xf32>
    %407 = arith.addf %405, %406 : vector<16x128xf32>
    %408 = arith.truncf %407 : vector<16x128xf32> to vector<16x128xbf16>
    %cst_131 = arith.constant dense<0.000000e+00> : vector<16x512xf32>
    %409 = tpu.matmul %408, %13, %cst_131 {dimension_numbers = #tpu.dot_dimension_numbers<[1], [0], [0], [1], [0, 0, 1, 1], [], []>} : vector<16x128xbf16>, vector<128x512xbf16>, vector<16x512xf32> -> vector<16x512xf32>
    %c0_132 = arith.constant 0 : index
    %c0_133 = arith.constant 0 : index
    %c0_134 = arith.constant 0 : index
    %410 = vector.load %arg10[%c0_132, %c0_133, %c0_134] : memref<3x1x512xf32, #tpu.memory_space<vmem>>, vector<1x1x512xf32>
    %411 = vector.shape_cast %410 : vector<1x1x512xf32> to vector<1x512xf32>
    %412 = vector.broadcast %411 : vector<1x512xf32> to vector<16x512xf32>
    %413 = arith.addf %409, %412 : vector<16x512xf32>
    %cst_135 = arith.constant 0.000000e+00 : f32
    %414 = vector.broadcast %cst_135 : f32 to vector<16x512xf32>
    %415 = arith.maximumf %413, %414 : vector<16x512xf32>
    %416 = arith.truncf %415 : vector<16x512xf32> to vector<16x512xbf16>
    %cst_136 = arith.constant dense<0.000000e+00> : vector<16x128xf32>
    %417 = tpu.matmul %416, %15, %cst_136 {dimension_numbers = #tpu.dot_dimension_numbers<[1], [0], [0], [1], [0, 0, 1, 1], [], []>} : vector<16x512xbf16>, vector<512x128xbf16>, vector<16x128xf32> -> vector<16x128xf32>
    %c0_137 = arith.constant 0 : index
    %c0_138 = arith.constant 0 : index
    %c0_139 = arith.constant 0 : index
    %418 = vector.load %arg12[%c0_137, %c0_138, %c0_139] : memref<3x1x128xf32, #tpu.memory_space<vmem>>, vector<1x1x128xf32>
    %419 = vector.shape_cast %418 : vector<1x1x128xf32> to vector<1x128xf32>
    %420 = vector.broadcast %419 : vector<1x128xf32> to vector<16x128xf32>
    %421 = arith.addf %417, %420 : vector<16x128xf32>
    %422 = arith.addf %407, %421 : vector<16x128xf32>
    %c0_140 = arith.constant 0 : index
    %c0_141 = arith.constant 0 : index
    %c0_142 = arith.constant 0 : index
    %423 = vector.load %arg13[%c0_140, %c0_141, %c0_142] : memref<3x1x128xf32, #tpu.memory_space<vmem>>, vector<1x1x128xf32>
    %424 = vector.shape_cast %423 : vector<1x1x128xf32> to vector<1x128xf32>
    %c0_143 = arith.constant 0 : index
    %c0_144 = arith.constant 0 : index
    %c0_145 = arith.constant 0 : index
    %425 = vector.load %arg14[%c0_143, %c0_144, %c0_145] : memref<3x1x128xf32, #tpu.memory_space<vmem>>, vector<1x1x128xf32>
    %426 = vector.shape_cast %425 : vector<1x1x128xf32> to vector<1x128xf32>
    %cst_146 = arith.constant dense<0.000000e+00> : vector<16xf32>
    %427 = vector.multi_reduction <add>, %422, %cst_146 [1] : vector<16x128xf32> to vector<16xf32>
    %428 = vector.shape_cast %427 : vector<16xf32> to vector<16x1xf32>
    %cst_147 = arith.constant 1.280000e+02 : f32
    %429 = vector.broadcast %cst_147 : f32 to vector<16x1xf32>
    %430 = arith.divf %428, %429 : vector<16x1xf32>
    %431 = vector.broadcast %430 : vector<16x1xf32> to vector<16x128xf32>
    %432 = arith.subf %422, %431 : vector<16x128xf32>
    %433 = arith.mulf %432, %432 : vector<16x128xf32>
    %cst_148 = arith.constant dense<0.000000e+00> : vector<16xf32>
    %434 = vector.multi_reduction <add>, %433, %cst_148 [1] : vector<16x128xf32> to vector<16xf32>
    %435 = vector.shape_cast %434 : vector<16xf32> to vector<16x1xf32>
    %cst_149 = arith.constant 1.280000e+02 : f32
    %436 = vector.broadcast %cst_149 : f32 to vector<16x1xf32>
    %437 = arith.divf %435, %436 : vector<16x1xf32>
    %438 = vector.broadcast %430 : vector<16x1xf32> to vector<16x128xf32>
    %439 = arith.subf %422, %438 : vector<16x128xf32>
    %cst_150 = arith.constant 9.99999974E-6 : f32
    %440 = vector.broadcast %cst_150 : f32 to vector<16x1xf32>
    %441 = arith.addf %437, %440 : vector<16x1xf32>
    %442 = math.rsqrt %441 : vector<16x1xf32>
    %443 = vector.broadcast %442 : vector<16x1xf32> to vector<16x128xf32>
    %444 = arith.mulf %439, %443 : vector<16x128xf32>
    %445 = vector.broadcast %424 : vector<1x128xf32> to vector<16x128xf32>
    %446 = arith.mulf %444, %445 : vector<16x128xf32>
    %447 = vector.broadcast %426 : vector<1x128xf32> to vector<16x128xf32>
    %448 = arith.addf %446, %447 : vector<16x128xf32>
    %c1 = arith.constant 1 : index
    %c0_151 = arith.constant 0 : index
    %c0_152 = arith.constant 0 : index
    %449 = vector.load %arg3[%c1, %c0_151, %c0_152] : memref<3x128x384xbf16, #tpu.memory_space<vmem>>, vector<1x128x384xbf16>
    %450 = vector.shape_cast %449 : vector<1x128x384xbf16> to vector<128x384xbf16>
    %c1_153 = arith.constant 1 : index
    %c0_154 = arith.constant 0 : index
    %c0_155 = arith.constant 0 : index
    %451 = vector.load %arg5[%c1_153, %c0_154, %c0_155] : memref<3x128x128xbf16, #tpu.memory_space<vmem>>, vector<1x128x128xbf16>
    %452 = vector.shape_cast %451 : vector<1x128x128xbf16> to vector<128x128xbf16>
    %c1_156 = arith.constant 1 : index
    %c0_157 = arith.constant 0 : index
    %c0_158 = arith.constant 0 : index
    %453 = vector.load %arg9[%c1_156, %c0_157, %c0_158] : memref<3x128x512xbf16, #tpu.memory_space<vmem>>, vector<1x128x512xbf16>
    %454 = vector.shape_cast %453 : vector<1x128x512xbf16> to vector<128x512xbf16>
    %c1_159 = arith.constant 1 : index
    %c0_160 = arith.constant 0 : index
    %c0_161 = arith.constant 0 : index
    %455 = vector.load %arg11[%c1_159, %c0_160, %c0_161] : memref<3x512x128xbf16, #tpu.memory_space<vmem>>, vector<1x512x128xbf16>
    %456 = vector.shape_cast %455 : vector<1x512x128xbf16> to vector<512x128xbf16>
    %457 = arith.truncf %448 : vector<16x128xf32> to vector<16x128xbf16>
    %cst_162 = arith.constant dense<0.000000e+00> : vector<16x384xf32>
    %458 = tpu.matmul %457, %450, %cst_162 {dimension_numbers = #tpu.dot_dimension_numbers<[1], [0], [0], [1], [0, 0, 1, 1], [], []>} : vector<16x128xbf16>, vector<128x384xbf16>, vector<16x384xf32> -> vector<16x384xf32>
    %c1_163 = arith.constant 1 : index
    %c0_164 = arith.constant 0 : index
    %c0_165 = arith.constant 0 : index
    %459 = vector.load %arg4[%c1_163, %c0_164, %c0_165] : memref<3x1x384xf32, #tpu.memory_space<vmem>>, vector<1x1x384xf32>
    %460 = vector.shape_cast %459 : vector<1x1x384xf32> to vector<1x384xf32>
    %461 = vector.broadcast %460 : vector<1x384xf32> to vector<16x384xf32>
    %462 = arith.addf %458, %461 : vector<16x384xf32>
    %cst_166 = arith.constant 0.000000e+00 : f32
    %463 = vector.broadcast %cst_166 : f32 to vector<8x128xf32>
    %464 = vector.extract_strided_slice %462 {offsets = [0, 0], sizes = [8, 16], strides = [1, 1]} : vector<16x384xf32> to vector<8x16xf32>
    %465 = vector.extract_strided_slice %462 {offsets = [0, 128], sizes = [8, 16], strides = [1, 1]} : vector<16x384xf32> to vector<8x16xf32>
    %466 = vector.extract_strided_slice %462 {offsets = [0, 256], sizes = [8, 16], strides = [1, 1]} : vector<16x384xf32> to vector<8x16xf32>
    %467 = tpu.transpose %465, [1, 0] : vector<8x16xf32> -> vector<16x8xf32>
    %cst_167 = arith.constant dense<0.000000e+00> : vector<8x8xf32>
    %468 = tpu.matmul %464, %467, %cst_167 {dimension_numbers = #tpu.dot_dimension_numbers<[1], [0], [0], [1], [0, 0, 1, 1], [], []>} : vector<8x16xf32>, vector<16x8xf32>, vector<8x8xf32> -> vector<8x8xf32>
    %cst_168 = arith.constant 2.500000e-01 : f32
    %469 = vector.broadcast %cst_168 : f32 to vector<8x8xf32>
    %470 = arith.mulf %468, %469 : vector<8x8xf32>
    %cst_169 = arith.constant dense<0xFF800000> : vector<8xf32>
    %471 = vector.multi_reduction <maximumf>, %470, %cst_169 [1] : vector<8x8xf32> to vector<8xf32>
    %472 = vector.shape_cast %471 : vector<8xf32> to vector<8x1xf32>
    %473 = vector.broadcast %472 : vector<8x1xf32> to vector<8x8xf32>
    %474 = arith.subf %470, %473 : vector<8x8xf32>
    %475 = math.exp %474 : vector<8x8xf32>
    %cst_170 = arith.constant dense<0.000000e+00> : vector<8xf32>
    %476 = vector.multi_reduction <add>, %475, %cst_170 [1] : vector<8x8xf32> to vector<8xf32>
    %477 = vector.shape_cast %476 : vector<8xf32> to vector<8x1xf32>
    %478 = tpu.reciprocal %477 {approx = true} : vector<8x1xf32> -> vector<8x1xf32>
    %479 = vector.broadcast %478 : vector<8x1xf32> to vector<8x8xf32>
    %480 = arith.mulf %475, %479 : vector<8x8xf32>
    %cst_171 = arith.constant dense<0.000000e+00> : vector<8x16xf32>
    %481 = tpu.matmul %480, %466, %cst_171 {dimension_numbers = #tpu.dot_dimension_numbers<[1], [0], [0], [1], [0, 0, 1, 1], [], []>} : vector<8x8xf32>, vector<8x16xf32>, vector<8x16xf32> -> vector<8x16xf32>
    %482 = arith.truncf %481 : vector<8x16xf32> to vector<8x16xbf16>
    %483 = vector.extract_strided_slice %452 {offsets = [0, 0], sizes = [16, 128], strides = [1, 1]} : vector<128x128xbf16> to vector<16x128xbf16>
    %cst_172 = arith.constant dense<0.000000e+00> : vector<8x128xf32>
    %484 = tpu.matmul %482, %483, %cst_172 {dimension_numbers = #tpu.dot_dimension_numbers<[1], [0], [0], [1], [0, 0, 1, 1], [], []>} : vector<8x16xbf16>, vector<16x128xbf16>, vector<8x128xf32> -> vector<8x128xf32>
    %485 = arith.addf %463, %484 : vector<8x128xf32>
    %486 = vector.extract_strided_slice %462 {offsets = [0, 16], sizes = [8, 16], strides = [1, 1]} : vector<16x384xf32> to vector<8x16xf32>
    %487 = vector.extract_strided_slice %462 {offsets = [0, 144], sizes = [8, 16], strides = [1, 1]} : vector<16x384xf32> to vector<8x16xf32>
    %488 = vector.extract_strided_slice %462 {offsets = [0, 272], sizes = [8, 16], strides = [1, 1]} : vector<16x384xf32> to vector<8x16xf32>
    %489 = tpu.transpose %487, [1, 0] : vector<8x16xf32> -> vector<16x8xf32>
    %cst_173 = arith.constant dense<0.000000e+00> : vector<8x8xf32>
    %490 = tpu.matmul %486, %489, %cst_173 {dimension_numbers = #tpu.dot_dimension_numbers<[1], [0], [0], [1], [0, 0, 1, 1], [], []>} : vector<8x16xf32>, vector<16x8xf32>, vector<8x8xf32> -> vector<8x8xf32>
    %cst_174 = arith.constant 2.500000e-01 : f32
    %491 = vector.broadcast %cst_174 : f32 to vector<8x8xf32>
    %492 = arith.mulf %490, %491 : vector<8x8xf32>
    %cst_175 = arith.constant dense<0xFF800000> : vector<8xf32>
    %493 = vector.multi_reduction <maximumf>, %492, %cst_175 [1] : vector<8x8xf32> to vector<8xf32>
    %494 = vector.shape_cast %493 : vector<8xf32> to vector<8x1xf32>
    %495 = vector.broadcast %494 : vector<8x1xf32> to vector<8x8xf32>
    %496 = arith.subf %492, %495 : vector<8x8xf32>
    %497 = math.exp %496 : vector<8x8xf32>
    %cst_176 = arith.constant dense<0.000000e+00> : vector<8xf32>
    %498 = vector.multi_reduction <add>, %497, %cst_176 [1] : vector<8x8xf32> to vector<8xf32>
    %499 = vector.shape_cast %498 : vector<8xf32> to vector<8x1xf32>
    %500 = tpu.reciprocal %499 {approx = true} : vector<8x1xf32> -> vector<8x1xf32>
    %501 = vector.broadcast %500 : vector<8x1xf32> to vector<8x8xf32>
    %502 = arith.mulf %497, %501 : vector<8x8xf32>
    %cst_177 = arith.constant dense<0.000000e+00> : vector<8x16xf32>
    %503 = tpu.matmul %502, %488, %cst_177 {dimension_numbers = #tpu.dot_dimension_numbers<[1], [0], [0], [1], [0, 0, 1, 1], [], []>} : vector<8x8xf32>, vector<8x16xf32>, vector<8x16xf32> -> vector<8x16xf32>
    %504 = arith.truncf %503 : vector<8x16xf32> to vector<8x16xbf16>
    %505 = vector.extract_strided_slice %452 {offsets = [16, 0], sizes = [16, 128], strides = [1, 1]} : vector<128x128xbf16> to vector<16x128xbf16>
    %cst_178 = arith.constant dense<0.000000e+00> : vector<8x128xf32>
    %506 = tpu.matmul %504, %505, %cst_178 {dimension_numbers = #tpu.dot_dimension_numbers<[1], [0], [0], [1], [0, 0, 1, 1], [], []>} : vector<8x16xbf16>, vector<16x128xbf16>, vector<8x128xf32> -> vector<8x128xf32>
    %507 = arith.addf %485, %506 : vector<8x128xf32>
    %508 = vector.extract_strided_slice %462 {offsets = [0, 32], sizes = [8, 16], strides = [1, 1]} : vector<16x384xf32> to vector<8x16xf32>
    %509 = vector.extract_strided_slice %462 {offsets = [0, 160], sizes = [8, 16], strides = [1, 1]} : vector<16x384xf32> to vector<8x16xf32>
    %510 = vector.extract_strided_slice %462 {offsets = [0, 288], sizes = [8, 16], strides = [1, 1]} : vector<16x384xf32> to vector<8x16xf32>
    %511 = tpu.transpose %509, [1, 0] : vector<8x16xf32> -> vector<16x8xf32>
    %cst_179 = arith.constant dense<0.000000e+00> : vector<8x8xf32>
    %512 = tpu.matmul %508, %511, %cst_179 {dimension_numbers = #tpu.dot_dimension_numbers<[1], [0], [0], [1], [0, 0, 1, 1], [], []>} : vector<8x16xf32>, vector<16x8xf32>, vector<8x8xf32> -> vector<8x8xf32>
    %cst_180 = arith.constant 2.500000e-01 : f32
    %513 = vector.broadcast %cst_180 : f32 to vector<8x8xf32>
    %514 = arith.mulf %512, %513 : vector<8x8xf32>
    %cst_181 = arith.constant dense<0xFF800000> : vector<8xf32>
    %515 = vector.multi_reduction <maximumf>, %514, %cst_181 [1] : vector<8x8xf32> to vector<8xf32>
    %516 = vector.shape_cast %515 : vector<8xf32> to vector<8x1xf32>
    %517 = vector.broadcast %516 : vector<8x1xf32> to vector<8x8xf32>
    %518 = arith.subf %514, %517 : vector<8x8xf32>
    %519 = math.exp %518 : vector<8x8xf32>
    %cst_182 = arith.constant dense<0.000000e+00> : vector<8xf32>
    %520 = vector.multi_reduction <add>, %519, %cst_182 [1] : vector<8x8xf32> to vector<8xf32>
    %521 = vector.shape_cast %520 : vector<8xf32> to vector<8x1xf32>
    %522 = tpu.reciprocal %521 {approx = true} : vector<8x1xf32> -> vector<8x1xf32>
    %523 = vector.broadcast %522 : vector<8x1xf32> to vector<8x8xf32>
    %524 = arith.mulf %519, %523 : vector<8x8xf32>
    %cst_183 = arith.constant dense<0.000000e+00> : vector<8x16xf32>
    %525 = tpu.matmul %524, %510, %cst_183 {dimension_numbers = #tpu.dot_dimension_numbers<[1], [0], [0], [1], [0, 0, 1, 1], [], []>} : vector<8x8xf32>, vector<8x16xf32>, vector<8x16xf32> -> vector<8x16xf32>
    %526 = arith.truncf %525 : vector<8x16xf32> to vector<8x16xbf16>
    %527 = vector.extract_strided_slice %452 {offsets = [32, 0], sizes = [16, 128], strides = [1, 1]} : vector<128x128xbf16> to vector<16x128xbf16>
    %cst_184 = arith.constant dense<0.000000e+00> : vector<8x128xf32>
    %528 = tpu.matmul %526, %527, %cst_184 {dimension_numbers = #tpu.dot_dimension_numbers<[1], [0], [0], [1], [0, 0, 1, 1], [], []>} : vector<8x16xbf16>, vector<16x128xbf16>, vector<8x128xf32> -> vector<8x128xf32>
    %529 = arith.addf %507, %528 : vector<8x128xf32>
    %530 = vector.extract_strided_slice %462 {offsets = [0, 48], sizes = [8, 16], strides = [1, 1]} : vector<16x384xf32> to vector<8x16xf32>
    %531 = vector.extract_strided_slice %462 {offsets = [0, 176], sizes = [8, 16], strides = [1, 1]} : vector<16x384xf32> to vector<8x16xf32>
    %532 = vector.extract_strided_slice %462 {offsets = [0, 304], sizes = [8, 16], strides = [1, 1]} : vector<16x384xf32> to vector<8x16xf32>
    %533 = tpu.transpose %531, [1, 0] : vector<8x16xf32> -> vector<16x8xf32>
    %cst_185 = arith.constant dense<0.000000e+00> : vector<8x8xf32>
    %534 = tpu.matmul %530, %533, %cst_185 {dimension_numbers = #tpu.dot_dimension_numbers<[1], [0], [0], [1], [0, 0, 1, 1], [], []>} : vector<8x16xf32>, vector<16x8xf32>, vector<8x8xf32> -> vector<8x8xf32>
    %cst_186 = arith.constant 2.500000e-01 : f32
    %535 = vector.broadcast %cst_186 : f32 to vector<8x8xf32>
    %536 = arith.mulf %534, %535 : vector<8x8xf32>
    %cst_187 = arith.constant dense<0xFF800000> : vector<8xf32>
    %537 = vector.multi_reduction <maximumf>, %536, %cst_187 [1] : vector<8x8xf32> to vector<8xf32>
    %538 = vector.shape_cast %537 : vector<8xf32> to vector<8x1xf32>
    %539 = vector.broadcast %538 : vector<8x1xf32> to vector<8x8xf32>
    %540 = arith.subf %536, %539 : vector<8x8xf32>
    %541 = math.exp %540 : vector<8x8xf32>
    %cst_188 = arith.constant dense<0.000000e+00> : vector<8xf32>
    %542 = vector.multi_reduction <add>, %541, %cst_188 [1] : vector<8x8xf32> to vector<8xf32>
    %543 = vector.shape_cast %542 : vector<8xf32> to vector<8x1xf32>
    %544 = tpu.reciprocal %543 {approx = true} : vector<8x1xf32> -> vector<8x1xf32>
    %545 = vector.broadcast %544 : vector<8x1xf32> to vector<8x8xf32>
    %546 = arith.mulf %541, %545 : vector<8x8xf32>
    %cst_189 = arith.constant dense<0.000000e+00> : vector<8x16xf32>
    %547 = tpu.matmul %546, %532, %cst_189 {dimension_numbers = #tpu.dot_dimension_numbers<[1], [0], [0], [1], [0, 0, 1, 1], [], []>} : vector<8x8xf32>, vector<8x16xf32>, vector<8x16xf32> -> vector<8x16xf32>
    %548 = arith.truncf %547 : vector<8x16xf32> to vector<8x16xbf16>
    %549 = vector.extract_strided_slice %452 {offsets = [48, 0], sizes = [16, 128], strides = [1, 1]} : vector<128x128xbf16> to vector<16x128xbf16>
    %cst_190 = arith.constant dense<0.000000e+00> : vector<8x128xf32>
    %550 = tpu.matmul %548, %549, %cst_190 {dimension_numbers = #tpu.dot_dimension_numbers<[1], [0], [0], [1], [0, 0, 1, 1], [], []>} : vector<8x16xbf16>, vector<16x128xbf16>, vector<8x128xf32> -> vector<8x128xf32>
    %551 = arith.addf %529, %550 : vector<8x128xf32>
    %552 = vector.extract_strided_slice %462 {offsets = [0, 64], sizes = [8, 16], strides = [1, 1]} : vector<16x384xf32> to vector<8x16xf32>
    %553 = vector.extract_strided_slice %462 {offsets = [0, 192], sizes = [8, 16], strides = [1, 1]} : vector<16x384xf32> to vector<8x16xf32>
    %554 = vector.extract_strided_slice %462 {offsets = [0, 320], sizes = [8, 16], strides = [1, 1]} : vector<16x384xf32> to vector<8x16xf32>
    %555 = tpu.transpose %553, [1, 0] : vector<8x16xf32> -> vector<16x8xf32>
    %cst_191 = arith.constant dense<0.000000e+00> : vector<8x8xf32>
    %556 = tpu.matmul %552, %555, %cst_191 {dimension_numbers = #tpu.dot_dimension_numbers<[1], [0], [0], [1], [0, 0, 1, 1], [], []>} : vector<8x16xf32>, vector<16x8xf32>, vector<8x8xf32> -> vector<8x8xf32>
    %cst_192 = arith.constant 2.500000e-01 : f32
    %557 = vector.broadcast %cst_192 : f32 to vector<8x8xf32>
    %558 = arith.mulf %556, %557 : vector<8x8xf32>
    %cst_193 = arith.constant dense<0xFF800000> : vector<8xf32>
    %559 = vector.multi_reduction <maximumf>, %558, %cst_193 [1] : vector<8x8xf32> to vector<8xf32>
    %560 = vector.shape_cast %559 : vector<8xf32> to vector<8x1xf32>
    %561 = vector.broadcast %560 : vector<8x1xf32> to vector<8x8xf32>
    %562 = arith.subf %558, %561 : vector<8x8xf32>
    %563 = math.exp %562 : vector<8x8xf32>
    %cst_194 = arith.constant dense<0.000000e+00> : vector<8xf32>
    %564 = vector.multi_reduction <add>, %563, %cst_194 [1] : vector<8x8xf32> to vector<8xf32>
    %565 = vector.shape_cast %564 : vector<8xf32> to vector<8x1xf32>
    %566 = tpu.reciprocal %565 {approx = true} : vector<8x1xf32> -> vector<8x1xf32>
    %567 = vector.broadcast %566 : vector<8x1xf32> to vector<8x8xf32>
    %568 = arith.mulf %563, %567 : vector<8x8xf32>
    %cst_195 = arith.constant dense<0.000000e+00> : vector<8x16xf32>
    %569 = tpu.matmul %568, %554, %cst_195 {dimension_numbers = #tpu.dot_dimension_numbers<[1], [0], [0], [1], [0, 0, 1, 1], [], []>} : vector<8x8xf32>, vector<8x16xf32>, vector<8x16xf32> -> vector<8x16xf32>
    %570 = arith.truncf %569 : vector<8x16xf32> to vector<8x16xbf16>
    %571 = vector.extract_strided_slice %452 {offsets = [64, 0], sizes = [16, 128], strides = [1, 1]} : vector<128x128xbf16> to vector<16x128xbf16>
    %cst_196 = arith.constant dense<0.000000e+00> : vector<8x128xf32>
    %572 = tpu.matmul %570, %571, %cst_196 {dimension_numbers = #tpu.dot_dimension_numbers<[1], [0], [0], [1], [0, 0, 1, 1], [], []>} : vector<8x16xbf16>, vector<16x128xbf16>, vector<8x128xf32> -> vector<8x128xf32>
    %573 = arith.addf %551, %572 : vector<8x128xf32>
    %574 = vector.extract_strided_slice %462 {offsets = [0, 80], sizes = [8, 16], strides = [1, 1]} : vector<16x384xf32> to vector<8x16xf32>
    %575 = vector.extract_strided_slice %462 {offsets = [0, 208], sizes = [8, 16], strides = [1, 1]} : vector<16x384xf32> to vector<8x16xf32>
    %576 = vector.extract_strided_slice %462 {offsets = [0, 336], sizes = [8, 16], strides = [1, 1]} : vector<16x384xf32> to vector<8x16xf32>
    %577 = tpu.transpose %575, [1, 0] : vector<8x16xf32> -> vector<16x8xf32>
    %cst_197 = arith.constant dense<0.000000e+00> : vector<8x8xf32>
    %578 = tpu.matmul %574, %577, %cst_197 {dimension_numbers = #tpu.dot_dimension_numbers<[1], [0], [0], [1], [0, 0, 1, 1], [], []>} : vector<8x16xf32>, vector<16x8xf32>, vector<8x8xf32> -> vector<8x8xf32>
    %cst_198 = arith.constant 2.500000e-01 : f32
    %579 = vector.broadcast %cst_198 : f32 to vector<8x8xf32>
    %580 = arith.mulf %578, %579 : vector<8x8xf32>
    %cst_199 = arith.constant dense<0xFF800000> : vector<8xf32>
    %581 = vector.multi_reduction <maximumf>, %580, %cst_199 [1] : vector<8x8xf32> to vector<8xf32>
    %582 = vector.shape_cast %581 : vector<8xf32> to vector<8x1xf32>
    %583 = vector.broadcast %582 : vector<8x1xf32> to vector<8x8xf32>
    %584 = arith.subf %580, %583 : vector<8x8xf32>
    %585 = math.exp %584 : vector<8x8xf32>
    %cst_200 = arith.constant dense<0.000000e+00> : vector<8xf32>
    %586 = vector.multi_reduction <add>, %585, %cst_200 [1] : vector<8x8xf32> to vector<8xf32>
    %587 = vector.shape_cast %586 : vector<8xf32> to vector<8x1xf32>
    %588 = tpu.reciprocal %587 {approx = true} : vector<8x1xf32> -> vector<8x1xf32>
    %589 = vector.broadcast %588 : vector<8x1xf32> to vector<8x8xf32>
    %590 = arith.mulf %585, %589 : vector<8x8xf32>
    %cst_201 = arith.constant dense<0.000000e+00> : vector<8x16xf32>
    %591 = tpu.matmul %590, %576, %cst_201 {dimension_numbers = #tpu.dot_dimension_numbers<[1], [0], [0], [1], [0, 0, 1, 1], [], []>} : vector<8x8xf32>, vector<8x16xf32>, vector<8x16xf32> -> vector<8x16xf32>
    %592 = arith.truncf %591 : vector<8x16xf32> to vector<8x16xbf16>
    %593 = vector.extract_strided_slice %452 {offsets = [80, 0], sizes = [16, 128], strides = [1, 1]} : vector<128x128xbf16> to vector<16x128xbf16>
    %cst_202 = arith.constant dense<0.000000e+00> : vector<8x128xf32>
    %594 = tpu.matmul %592, %593, %cst_202 {dimension_numbers = #tpu.dot_dimension_numbers<[1], [0], [0], [1], [0, 0, 1, 1], [], []>} : vector<8x16xbf16>, vector<16x128xbf16>, vector<8x128xf32> -> vector<8x128xf32>
    %595 = arith.addf %573, %594 : vector<8x128xf32>
    %596 = vector.extract_strided_slice %462 {offsets = [0, 96], sizes = [8, 16], strides = [1, 1]} : vector<16x384xf32> to vector<8x16xf32>
    %597 = vector.extract_strided_slice %462 {offsets = [0, 224], sizes = [8, 16], strides = [1, 1]} : vector<16x384xf32> to vector<8x16xf32>
    %598 = vector.extract_strided_slice %462 {offsets = [0, 352], sizes = [8, 16], strides = [1, 1]} : vector<16x384xf32> to vector<8x16xf32>
    %599 = tpu.transpose %597, [1, 0] : vector<8x16xf32> -> vector<16x8xf32>
    %cst_203 = arith.constant dense<0.000000e+00> : vector<8x8xf32>
    %600 = tpu.matmul %596, %599, %cst_203 {dimension_numbers = #tpu.dot_dimension_numbers<[1], [0], [0], [1], [0, 0, 1, 1], [], []>} : vector<8x16xf32>, vector<16x8xf32>, vector<8x8xf32> -> vector<8x8xf32>
    %cst_204 = arith.constant 2.500000e-01 : f32
    %601 = vector.broadcast %cst_204 : f32 to vector<8x8xf32>
    %602 = arith.mulf %600, %601 : vector<8x8xf32>
    %cst_205 = arith.constant dense<0xFF800000> : vector<8xf32>
    %603 = vector.multi_reduction <maximumf>, %602, %cst_205 [1] : vector<8x8xf32> to vector<8xf32>
    %604 = vector.shape_cast %603 : vector<8xf32> to vector<8x1xf32>
    %605 = vector.broadcast %604 : vector<8x1xf32> to vector<8x8xf32>
    %606 = arith.subf %602, %605 : vector<8x8xf32>
    %607 = math.exp %606 : vector<8x8xf32>
    %cst_206 = arith.constant dense<0.000000e+00> : vector<8xf32>
    %608 = vector.multi_reduction <add>, %607, %cst_206 [1] : vector<8x8xf32> to vector<8xf32>
    %609 = vector.shape_cast %608 : vector<8xf32> to vector<8x1xf32>
    %610 = tpu.reciprocal %609 {approx = true} : vector<8x1xf32> -> vector<8x1xf32>
    %611 = vector.broadcast %610 : vector<8x1xf32> to vector<8x8xf32>
    %612 = arith.mulf %607, %611 : vector<8x8xf32>
    %cst_207 = arith.constant dense<0.000000e+00> : vector<8x16xf32>
    %613 = tpu.matmul %612, %598, %cst_207 {dimension_numbers = #tpu.dot_dimension_numbers<[1], [0], [0], [1], [0, 0, 1, 1], [], []>} : vector<8x8xf32>, vector<8x16xf32>, vector<8x16xf32> -> vector<8x16xf32>
    %614 = arith.truncf %613 : vector<8x16xf32> to vector<8x16xbf16>
    %615 = vector.extract_strided_slice %452 {offsets = [96, 0], sizes = [16, 128], strides = [1, 1]} : vector<128x128xbf16> to vector<16x128xbf16>
    %cst_208 = arith.constant dense<0.000000e+00> : vector<8x128xf32>
    %616 = tpu.matmul %614, %615, %cst_208 {dimension_numbers = #tpu.dot_dimension_numbers<[1], [0], [0], [1], [0, 0, 1, 1], [], []>} : vector<8x16xbf16>, vector<16x128xbf16>, vector<8x128xf32> -> vector<8x128xf32>
    %617 = arith.addf %595, %616 : vector<8x128xf32>
    %618 = vector.extract_strided_slice %462 {offsets = [0, 112], sizes = [8, 16], strides = [1, 1]} : vector<16x384xf32> to vector<8x16xf32>
    %619 = vector.extract_strided_slice %462 {offsets = [0, 240], sizes = [8, 16], strides = [1, 1]} : vector<16x384xf32> to vector<8x16xf32>
    %620 = vector.extract_strided_slice %462 {offsets = [0, 368], sizes = [8, 16], strides = [1, 1]} : vector<16x384xf32> to vector<8x16xf32>
    %621 = tpu.transpose %619, [1, 0] : vector<8x16xf32> -> vector<16x8xf32>
    %cst_209 = arith.constant dense<0.000000e+00> : vector<8x8xf32>
    %622 = tpu.matmul %618, %621, %cst_209 {dimension_numbers = #tpu.dot_dimension_numbers<[1], [0], [0], [1], [0, 0, 1, 1], [], []>} : vector<8x16xf32>, vector<16x8xf32>, vector<8x8xf32> -> vector<8x8xf32>
    %cst_210 = arith.constant 2.500000e-01 : f32
    %623 = vector.broadcast %cst_210 : f32 to vector<8x8xf32>
    %624 = arith.mulf %622, %623 : vector<8x8xf32>
    %cst_211 = arith.constant dense<0xFF800000> : vector<8xf32>
    %625 = vector.multi_reduction <maximumf>, %624, %cst_211 [1] : vector<8x8xf32> to vector<8xf32>
    %626 = vector.shape_cast %625 : vector<8xf32> to vector<8x1xf32>
    %627 = vector.broadcast %626 : vector<8x1xf32> to vector<8x8xf32>
    %628 = arith.subf %624, %627 : vector<8x8xf32>
    %629 = math.exp %628 : vector<8x8xf32>
    %cst_212 = arith.constant dense<0.000000e+00> : vector<8xf32>
    %630 = vector.multi_reduction <add>, %629, %cst_212 [1] : vector<8x8xf32> to vector<8xf32>
    %631 = vector.shape_cast %630 : vector<8xf32> to vector<8x1xf32>
    %632 = tpu.reciprocal %631 {approx = true} : vector<8x1xf32> -> vector<8x1xf32>
    %633 = vector.broadcast %632 : vector<8x1xf32> to vector<8x8xf32>
    %634 = arith.mulf %629, %633 : vector<8x8xf32>
    %cst_213 = arith.constant dense<0.000000e+00> : vector<8x16xf32>
    %635 = tpu.matmul %634, %620, %cst_213 {dimension_numbers = #tpu.dot_dimension_numbers<[1], [0], [0], [1], [0, 0, 1, 1], [], []>} : vector<8x8xf32>, vector<8x16xf32>, vector<8x16xf32> -> vector<8x16xf32>
    %636 = arith.truncf %635 : vector<8x16xf32> to vector<8x16xbf16>
    %637 = vector.extract_strided_slice %452 {offsets = [112, 0], sizes = [16, 128], strides = [1, 1]} : vector<128x128xbf16> to vector<16x128xbf16>
    %cst_214 = arith.constant dense<0.000000e+00> : vector<8x128xf32>
    %638 = tpu.matmul %636, %637, %cst_214 {dimension_numbers = #tpu.dot_dimension_numbers<[1], [0], [0], [1], [0, 0, 1, 1], [], []>} : vector<8x16xbf16>, vector<16x128xbf16>, vector<8x128xf32> -> vector<8x128xf32>
    %639 = arith.addf %617, %638 : vector<8x128xf32>
    %cst_215 = arith.constant 0.000000e+00 : f32
    %640 = vector.broadcast %cst_215 : f32 to vector<8x128xf32>
    %641 = vector.extract_strided_slice %462 {offsets = [8, 0], sizes = [8, 16], strides = [1, 1]} : vector<16x384xf32> to vector<8x16xf32>
    %642 = vector.extract_strided_slice %462 {offsets = [8, 128], sizes = [8, 16], strides = [1, 1]} : vector<16x384xf32> to vector<8x16xf32>
    %643 = vector.extract_strided_slice %462 {offsets = [8, 256], sizes = [8, 16], strides = [1, 1]} : vector<16x384xf32> to vector<8x16xf32>
    %644 = tpu.transpose %642, [1, 0] : vector<8x16xf32> -> vector<16x8xf32>
    %cst_216 = arith.constant dense<0.000000e+00> : vector<8x8xf32>
    %645 = tpu.matmul %641, %644, %cst_216 {dimension_numbers = #tpu.dot_dimension_numbers<[1], [0], [0], [1], [0, 0, 1, 1], [], []>} : vector<8x16xf32>, vector<16x8xf32>, vector<8x8xf32> -> vector<8x8xf32>
    %cst_217 = arith.constant 2.500000e-01 : f32
    %646 = vector.broadcast %cst_217 : f32 to vector<8x8xf32>
    %647 = arith.mulf %645, %646 : vector<8x8xf32>
    %cst_218 = arith.constant dense<0xFF800000> : vector<8xf32>
    %648 = vector.multi_reduction <maximumf>, %647, %cst_218 [1] : vector<8x8xf32> to vector<8xf32>
    %649 = vector.shape_cast %648 : vector<8xf32> to vector<8x1xf32>
    %650 = vector.broadcast %649 : vector<8x1xf32> to vector<8x8xf32>
    %651 = arith.subf %647, %650 : vector<8x8xf32>
    %652 = math.exp %651 : vector<8x8xf32>
    %cst_219 = arith.constant dense<0.000000e+00> : vector<8xf32>
    %653 = vector.multi_reduction <add>, %652, %cst_219 [1] : vector<8x8xf32> to vector<8xf32>
    %654 = vector.shape_cast %653 : vector<8xf32> to vector<8x1xf32>
    %655 = tpu.reciprocal %654 {approx = true} : vector<8x1xf32> -> vector<8x1xf32>
    %656 = vector.broadcast %655 : vector<8x1xf32> to vector<8x8xf32>
    %657 = arith.mulf %652, %656 : vector<8x8xf32>
    %cst_220 = arith.constant dense<0.000000e+00> : vector<8x16xf32>
    %658 = tpu.matmul %657, %643, %cst_220 {dimension_numbers = #tpu.dot_dimension_numbers<[1], [0], [0], [1], [0, 0, 1, 1], [], []>} : vector<8x8xf32>, vector<8x16xf32>, vector<8x16xf32> -> vector<8x16xf32>
    %659 = arith.truncf %658 : vector<8x16xf32> to vector<8x16xbf16>
    %660 = vector.extract_strided_slice %452 {offsets = [0, 0], sizes = [16, 128], strides = [1, 1]} : vector<128x128xbf16> to vector<16x128xbf16>
    %cst_221 = arith.constant dense<0.000000e+00> : vector<8x128xf32>
    %661 = tpu.matmul %659, %660, %cst_221 {dimension_numbers = #tpu.dot_dimension_numbers<[1], [0], [0], [1], [0, 0, 1, 1], [], []>} : vector<8x16xbf16>, vector<16x128xbf16>, vector<8x128xf32> -> vector<8x128xf32>
    %662 = arith.addf %640, %661 : vector<8x128xf32>
    %663 = vector.extract_strided_slice %462 {offsets = [8, 16], sizes = [8, 16], strides = [1, 1]} : vector<16x384xf32> to vector<8x16xf32>
    %664 = vector.extract_strided_slice %462 {offsets = [8, 144], sizes = [8, 16], strides = [1, 1]} : vector<16x384xf32> to vector<8x16xf32>
    %665 = vector.extract_strided_slice %462 {offsets = [8, 272], sizes = [8, 16], strides = [1, 1]} : vector<16x384xf32> to vector<8x16xf32>
    %666 = tpu.transpose %664, [1, 0] : vector<8x16xf32> -> vector<16x8xf32>
    %cst_222 = arith.constant dense<0.000000e+00> : vector<8x8xf32>
    %667 = tpu.matmul %663, %666, %cst_222 {dimension_numbers = #tpu.dot_dimension_numbers<[1], [0], [0], [1], [0, 0, 1, 1], [], []>} : vector<8x16xf32>, vector<16x8xf32>, vector<8x8xf32> -> vector<8x8xf32>
    %cst_223 = arith.constant 2.500000e-01 : f32
    %668 = vector.broadcast %cst_223 : f32 to vector<8x8xf32>
    %669 = arith.mulf %667, %668 : vector<8x8xf32>
    %cst_224 = arith.constant dense<0xFF800000> : vector<8xf32>
    %670 = vector.multi_reduction <maximumf>, %669, %cst_224 [1] : vector<8x8xf32> to vector<8xf32>
    %671 = vector.shape_cast %670 : vector<8xf32> to vector<8x1xf32>
    %672 = vector.broadcast %671 : vector<8x1xf32> to vector<8x8xf32>
    %673 = arith.subf %669, %672 : vector<8x8xf32>
    %674 = math.exp %673 : vector<8x8xf32>
    %cst_225 = arith.constant dense<0.000000e+00> : vector<8xf32>
    %675 = vector.multi_reduction <add>, %674, %cst_225 [1] : vector<8x8xf32> to vector<8xf32>
    %676 = vector.shape_cast %675 : vector<8xf32> to vector<8x1xf32>
    %677 = tpu.reciprocal %676 {approx = true} : vector<8x1xf32> -> vector<8x1xf32>
    %678 = vector.broadcast %677 : vector<8x1xf32> to vector<8x8xf32>
    %679 = arith.mulf %674, %678 : vector<8x8xf32>
    %cst_226 = arith.constant dense<0.000000e+00> : vector<8x16xf32>
    %680 = tpu.matmul %679, %665, %cst_226 {dimension_numbers = #tpu.dot_dimension_numbers<[1], [0], [0], [1], [0, 0, 1, 1], [], []>} : vector<8x8xf32>, vector<8x16xf32>, vector<8x16xf32> -> vector<8x16xf32>
    %681 = arith.truncf %680 : vector<8x16xf32> to vector<8x16xbf16>
    %682 = vector.extract_strided_slice %452 {offsets = [16, 0], sizes = [16, 128], strides = [1, 1]} : vector<128x128xbf16> to vector<16x128xbf16>
    %cst_227 = arith.constant dense<0.000000e+00> : vector<8x128xf32>
    %683 = tpu.matmul %681, %682, %cst_227 {dimension_numbers = #tpu.dot_dimension_numbers<[1], [0], [0], [1], [0, 0, 1, 1], [], []>} : vector<8x16xbf16>, vector<16x128xbf16>, vector<8x128xf32> -> vector<8x128xf32>
    %684 = arith.addf %662, %683 : vector<8x128xf32>
    %685 = vector.extract_strided_slice %462 {offsets = [8, 32], sizes = [8, 16], strides = [1, 1]} : vector<16x384xf32> to vector<8x16xf32>
    %686 = vector.extract_strided_slice %462 {offsets = [8, 160], sizes = [8, 16], strides = [1, 1]} : vector<16x384xf32> to vector<8x16xf32>
    %687 = vector.extract_strided_slice %462 {offsets = [8, 288], sizes = [8, 16], strides = [1, 1]} : vector<16x384xf32> to vector<8x16xf32>
    %688 = tpu.transpose %686, [1, 0] : vector<8x16xf32> -> vector<16x8xf32>
    %cst_228 = arith.constant dense<0.000000e+00> : vector<8x8xf32>
    %689 = tpu.matmul %685, %688, %cst_228 {dimension_numbers = #tpu.dot_dimension_numbers<[1], [0], [0], [1], [0, 0, 1, 1], [], []>} : vector<8x16xf32>, vector<16x8xf32>, vector<8x8xf32> -> vector<8x8xf32>
    %cst_229 = arith.constant 2.500000e-01 : f32
    %690 = vector.broadcast %cst_229 : f32 to vector<8x8xf32>
    %691 = arith.mulf %689, %690 : vector<8x8xf32>
    %cst_230 = arith.constant dense<0xFF800000> : vector<8xf32>
    %692 = vector.multi_reduction <maximumf>, %691, %cst_230 [1] : vector<8x8xf32> to vector<8xf32>
    %693 = vector.shape_cast %692 : vector<8xf32> to vector<8x1xf32>
    %694 = vector.broadcast %693 : vector<8x1xf32> to vector<8x8xf32>
    %695 = arith.subf %691, %694 : vector<8x8xf32>
    %696 = math.exp %695 : vector<8x8xf32>
    %cst_231 = arith.constant dense<0.000000e+00> : vector<8xf32>
    %697 = vector.multi_reduction <add>, %696, %cst_231 [1] : vector<8x8xf32> to vector<8xf32>
    %698 = vector.shape_cast %697 : vector<8xf32> to vector<8x1xf32>
    %699 = tpu.reciprocal %698 {approx = true} : vector<8x1xf32> -> vector<8x1xf32>
    %700 = vector.broadcast %699 : vector<8x1xf32> to vector<8x8xf32>
    %701 = arith.mulf %696, %700 : vector<8x8xf32>
    %cst_232 = arith.constant dense<0.000000e+00> : vector<8x16xf32>
    %702 = tpu.matmul %701, %687, %cst_232 {dimension_numbers = #tpu.dot_dimension_numbers<[1], [0], [0], [1], [0, 0, 1, 1], [], []>} : vector<8x8xf32>, vector<8x16xf32>, vector<8x16xf32> -> vector<8x16xf32>
    %703 = arith.truncf %702 : vector<8x16xf32> to vector<8x16xbf16>
    %704 = vector.extract_strided_slice %452 {offsets = [32, 0], sizes = [16, 128], strides = [1, 1]} : vector<128x128xbf16> to vector<16x128xbf16>
    %cst_233 = arith.constant dense<0.000000e+00> : vector<8x128xf32>
    %705 = tpu.matmul %703, %704, %cst_233 {dimension_numbers = #tpu.dot_dimension_numbers<[1], [0], [0], [1], [0, 0, 1, 1], [], []>} : vector<8x16xbf16>, vector<16x128xbf16>, vector<8x128xf32> -> vector<8x128xf32>
    %706 = arith.addf %684, %705 : vector<8x128xf32>
    %707 = vector.extract_strided_slice %462 {offsets = [8, 48], sizes = [8, 16], strides = [1, 1]} : vector<16x384xf32> to vector<8x16xf32>
    %708 = vector.extract_strided_slice %462 {offsets = [8, 176], sizes = [8, 16], strides = [1, 1]} : vector<16x384xf32> to vector<8x16xf32>
    %709 = vector.extract_strided_slice %462 {offsets = [8, 304], sizes = [8, 16], strides = [1, 1]} : vector<16x384xf32> to vector<8x16xf32>
    %710 = tpu.transpose %708, [1, 0] : vector<8x16xf32> -> vector<16x8xf32>
    %cst_234 = arith.constant dense<0.000000e+00> : vector<8x8xf32>
    %711 = tpu.matmul %707, %710, %cst_234 {dimension_numbers = #tpu.dot_dimension_numbers<[1], [0], [0], [1], [0, 0, 1, 1], [], []>} : vector<8x16xf32>, vector<16x8xf32>, vector<8x8xf32> -> vector<8x8xf32>
    %cst_235 = arith.constant 2.500000e-01 : f32
    %712 = vector.broadcast %cst_235 : f32 to vector<8x8xf32>
    %713 = arith.mulf %711, %712 : vector<8x8xf32>
    %cst_236 = arith.constant dense<0xFF800000> : vector<8xf32>
    %714 = vector.multi_reduction <maximumf>, %713, %cst_236 [1] : vector<8x8xf32> to vector<8xf32>
    %715 = vector.shape_cast %714 : vector<8xf32> to vector<8x1xf32>
    %716 = vector.broadcast %715 : vector<8x1xf32> to vector<8x8xf32>
    %717 = arith.subf %713, %716 : vector<8x8xf32>
    %718 = math.exp %717 : vector<8x8xf32>
    %cst_237 = arith.constant dense<0.000000e+00> : vector<8xf32>
    %719 = vector.multi_reduction <add>, %718, %cst_237 [1] : vector<8x8xf32> to vector<8xf32>
    %720 = vector.shape_cast %719 : vector<8xf32> to vector<8x1xf32>
    %721 = tpu.reciprocal %720 {approx = true} : vector<8x1xf32> -> vector<8x1xf32>
    %722 = vector.broadcast %721 : vector<8x1xf32> to vector<8x8xf32>
    %723 = arith.mulf %718, %722 : vector<8x8xf32>
    %cst_238 = arith.constant dense<0.000000e+00> : vector<8x16xf32>
    %724 = tpu.matmul %723, %709, %cst_238 {dimension_numbers = #tpu.dot_dimension_numbers<[1], [0], [0], [1], [0, 0, 1, 1], [], []>} : vector<8x8xf32>, vector<8x16xf32>, vector<8x16xf32> -> vector<8x16xf32>
    %725 = arith.truncf %724 : vector<8x16xf32> to vector<8x16xbf16>
    %726 = vector.extract_strided_slice %452 {offsets = [48, 0], sizes = [16, 128], strides = [1, 1]} : vector<128x128xbf16> to vector<16x128xbf16>
    %cst_239 = arith.constant dense<0.000000e+00> : vector<8x128xf32>
    %727 = tpu.matmul %725, %726, %cst_239 {dimension_numbers = #tpu.dot_dimension_numbers<[1], [0], [0], [1], [0, 0, 1, 1], [], []>} : vector<8x16xbf16>, vector<16x128xbf16>, vector<8x128xf32> -> vector<8x128xf32>
    %728 = arith.addf %706, %727 : vector<8x128xf32>
    %729 = vector.extract_strided_slice %462 {offsets = [8, 64], sizes = [8, 16], strides = [1, 1]} : vector<16x384xf32> to vector<8x16xf32>
    %730 = vector.extract_strided_slice %462 {offsets = [8, 192], sizes = [8, 16], strides = [1, 1]} : vector<16x384xf32> to vector<8x16xf32>
    %731 = vector.extract_strided_slice %462 {offsets = [8, 320], sizes = [8, 16], strides = [1, 1]} : vector<16x384xf32> to vector<8x16xf32>
    %732 = tpu.transpose %730, [1, 0] : vector<8x16xf32> -> vector<16x8xf32>
    %cst_240 = arith.constant dense<0.000000e+00> : vector<8x8xf32>
    %733 = tpu.matmul %729, %732, %cst_240 {dimension_numbers = #tpu.dot_dimension_numbers<[1], [0], [0], [1], [0, 0, 1, 1], [], []>} : vector<8x16xf32>, vector<16x8xf32>, vector<8x8xf32> -> vector<8x8xf32>
    %cst_241 = arith.constant 2.500000e-01 : f32
    %734 = vector.broadcast %cst_241 : f32 to vector<8x8xf32>
    %735 = arith.mulf %733, %734 : vector<8x8xf32>
    %cst_242 = arith.constant dense<0xFF800000> : vector<8xf32>
    %736 = vector.multi_reduction <maximumf>, %735, %cst_242 [1] : vector<8x8xf32> to vector<8xf32>
    %737 = vector.shape_cast %736 : vector<8xf32> to vector<8x1xf32>
    %738 = vector.broadcast %737 : vector<8x1xf32> to vector<8x8xf32>
    %739 = arith.subf %735, %738 : vector<8x8xf32>
    %740 = math.exp %739 : vector<8x8xf32>
    %cst_243 = arith.constant dense<0.000000e+00> : vector<8xf32>
    %741 = vector.multi_reduction <add>, %740, %cst_243 [1] : vector<8x8xf32> to vector<8xf32>
    %742 = vector.shape_cast %741 : vector<8xf32> to vector<8x1xf32>
    %743 = tpu.reciprocal %742 {approx = true} : vector<8x1xf32> -> vector<8x1xf32>
    %744 = vector.broadcast %743 : vector<8x1xf32> to vector<8x8xf32>
    %745 = arith.mulf %740, %744 : vector<8x8xf32>
    %cst_244 = arith.constant dense<0.000000e+00> : vector<8x16xf32>
    %746 = tpu.matmul %745, %731, %cst_244 {dimension_numbers = #tpu.dot_dimension_numbers<[1], [0], [0], [1], [0, 0, 1, 1], [], []>} : vector<8x8xf32>, vector<8x16xf32>, vector<8x16xf32> -> vector<8x16xf32>
    %747 = arith.truncf %746 : vector<8x16xf32> to vector<8x16xbf16>
    %748 = vector.extract_strided_slice %452 {offsets = [64, 0], sizes = [16, 128], strides = [1, 1]} : vector<128x128xbf16> to vector<16x128xbf16>
    %cst_245 = arith.constant dense<0.000000e+00> : vector<8x128xf32>
    %749 = tpu.matmul %747, %748, %cst_245 {dimension_numbers = #tpu.dot_dimension_numbers<[1], [0], [0], [1], [0, 0, 1, 1], [], []>} : vector<8x16xbf16>, vector<16x128xbf16>, vector<8x128xf32> -> vector<8x128xf32>
    %750 = arith.addf %728, %749 : vector<8x128xf32>
    %751 = vector.extract_strided_slice %462 {offsets = [8, 80], sizes = [8, 16], strides = [1, 1]} : vector<16x384xf32> to vector<8x16xf32>
    %752 = vector.extract_strided_slice %462 {offsets = [8, 208], sizes = [8, 16], strides = [1, 1]} : vector<16x384xf32> to vector<8x16xf32>
    %753 = vector.extract_strided_slice %462 {offsets = [8, 336], sizes = [8, 16], strides = [1, 1]} : vector<16x384xf32> to vector<8x16xf32>
    %754 = tpu.transpose %752, [1, 0] : vector<8x16xf32> -> vector<16x8xf32>
    %cst_246 = arith.constant dense<0.000000e+00> : vector<8x8xf32>
    %755 = tpu.matmul %751, %754, %cst_246 {dimension_numbers = #tpu.dot_dimension_numbers<[1], [0], [0], [1], [0, 0, 1, 1], [], []>} : vector<8x16xf32>, vector<16x8xf32>, vector<8x8xf32> -> vector<8x8xf32>
    %cst_247 = arith.constant 2.500000e-01 : f32
    %756 = vector.broadcast %cst_247 : f32 to vector<8x8xf32>
    %757 = arith.mulf %755, %756 : vector<8x8xf32>
    %cst_248 = arith.constant dense<0xFF800000> : vector<8xf32>
    %758 = vector.multi_reduction <maximumf>, %757, %cst_248 [1] : vector<8x8xf32> to vector<8xf32>
    %759 = vector.shape_cast %758 : vector<8xf32> to vector<8x1xf32>
    %760 = vector.broadcast %759 : vector<8x1xf32> to vector<8x8xf32>
    %761 = arith.subf %757, %760 : vector<8x8xf32>
    %762 = math.exp %761 : vector<8x8xf32>
    %cst_249 = arith.constant dense<0.000000e+00> : vector<8xf32>
    %763 = vector.multi_reduction <add>, %762, %cst_249 [1] : vector<8x8xf32> to vector<8xf32>
    %764 = vector.shape_cast %763 : vector<8xf32> to vector<8x1xf32>
    %765 = tpu.reciprocal %764 {approx = true} : vector<8x1xf32> -> vector<8x1xf32>
    %766 = vector.broadcast %765 : vector<8x1xf32> to vector<8x8xf32>
    %767 = arith.mulf %762, %766 : vector<8x8xf32>
    %cst_250 = arith.constant dense<0.000000e+00> : vector<8x16xf32>
    %768 = tpu.matmul %767, %753, %cst_250 {dimension_numbers = #tpu.dot_dimension_numbers<[1], [0], [0], [1], [0, 0, 1, 1], [], []>} : vector<8x8xf32>, vector<8x16xf32>, vector<8x16xf32> -> vector<8x16xf32>
    %769 = arith.truncf %768 : vector<8x16xf32> to vector<8x16xbf16>
    %770 = vector.extract_strided_slice %452 {offsets = [80, 0], sizes = [16, 128], strides = [1, 1]} : vector<128x128xbf16> to vector<16x128xbf16>
    %cst_251 = arith.constant dense<0.000000e+00> : vector<8x128xf32>
    %771 = tpu.matmul %769, %770, %cst_251 {dimension_numbers = #tpu.dot_dimension_numbers<[1], [0], [0], [1], [0, 0, 1, 1], [], []>} : vector<8x16xbf16>, vector<16x128xbf16>, vector<8x128xf32> -> vector<8x128xf32>
    %772 = arith.addf %750, %771 : vector<8x128xf32>
    %773 = vector.extract_strided_slice %462 {offsets = [8, 96], sizes = [8, 16], strides = [1, 1]} : vector<16x384xf32> to vector<8x16xf32>
    %774 = vector.extract_strided_slice %462 {offsets = [8, 224], sizes = [8, 16], strides = [1, 1]} : vector<16x384xf32> to vector<8x16xf32>
    %775 = vector.extract_strided_slice %462 {offsets = [8, 352], sizes = [8, 16], strides = [1, 1]} : vector<16x384xf32> to vector<8x16xf32>
    %776 = tpu.transpose %774, [1, 0] : vector<8x16xf32> -> vector<16x8xf32>
    %cst_252 = arith.constant dense<0.000000e+00> : vector<8x8xf32>
    %777 = tpu.matmul %773, %776, %cst_252 {dimension_numbers = #tpu.dot_dimension_numbers<[1], [0], [0], [1], [0, 0, 1, 1], [], []>} : vector<8x16xf32>, vector<16x8xf32>, vector<8x8xf32> -> vector<8x8xf32>
    %cst_253 = arith.constant 2.500000e-01 : f32
    %778 = vector.broadcast %cst_253 : f32 to vector<8x8xf32>
    %779 = arith.mulf %777, %778 : vector<8x8xf32>
    %cst_254 = arith.constant dense<0xFF800000> : vector<8xf32>
    %780 = vector.multi_reduction <maximumf>, %779, %cst_254 [1] : vector<8x8xf32> to vector<8xf32>
    %781 = vector.shape_cast %780 : vector<8xf32> to vector<8x1xf32>
    %782 = vector.broadcast %781 : vector<8x1xf32> to vector<8x8xf32>
    %783 = arith.subf %779, %782 : vector<8x8xf32>
    %784 = math.exp %783 : vector<8x8xf32>
    %cst_255 = arith.constant dense<0.000000e+00> : vector<8xf32>
    %785 = vector.multi_reduction <add>, %784, %cst_255 [1] : vector<8x8xf32> to vector<8xf32>
    %786 = vector.shape_cast %785 : vector<8xf32> to vector<8x1xf32>
    %787 = tpu.reciprocal %786 {approx = true} : vector<8x1xf32> -> vector<8x1xf32>
    %788 = vector.broadcast %787 : vector<8x1xf32> to vector<8x8xf32>
    %789 = arith.mulf %784, %788 : vector<8x8xf32>
    %cst_256 = arith.constant dense<0.000000e+00> : vector<8x16xf32>
    %790 = tpu.matmul %789, %775, %cst_256 {dimension_numbers = #tpu.dot_dimension_numbers<[1], [0], [0], [1], [0, 0, 1, 1], [], []>} : vector<8x8xf32>, vector<8x16xf32>, vector<8x16xf32> -> vector<8x16xf32>
    %791 = arith.truncf %790 : vector<8x16xf32> to vector<8x16xbf16>
    %792 = vector.extract_strided_slice %452 {offsets = [96, 0], sizes = [16, 128], strides = [1, 1]} : vector<128x128xbf16> to vector<16x128xbf16>
    %cst_257 = arith.constant dense<0.000000e+00> : vector<8x128xf32>
    %793 = tpu.matmul %791, %792, %cst_257 {dimension_numbers = #tpu.dot_dimension_numbers<[1], [0], [0], [1], [0, 0, 1, 1], [], []>} : vector<8x16xbf16>, vector<16x128xbf16>, vector<8x128xf32> -> vector<8x128xf32>
    %794 = arith.addf %772, %793 : vector<8x128xf32>
    %795 = vector.extract_strided_slice %462 {offsets = [8, 112], sizes = [8, 16], strides = [1, 1]} : vector<16x384xf32> to vector<8x16xf32>
    %796 = vector.extract_strided_slice %462 {offsets = [8, 240], sizes = [8, 16], strides = [1, 1]} : vector<16x384xf32> to vector<8x16xf32>
    %797 = vector.extract_strided_slice %462 {offsets = [8, 368], sizes = [8, 16], strides = [1, 1]} : vector<16x384xf32> to vector<8x16xf32>
    %798 = tpu.transpose %796, [1, 0] : vector<8x16xf32> -> vector<16x8xf32>
    %cst_258 = arith.constant dense<0.000000e+00> : vector<8x8xf32>
    %799 = tpu.matmul %795, %798, %cst_258 {dimension_numbers = #tpu.dot_dimension_numbers<[1], [0], [0], [1], [0, 0, 1, 1], [], []>} : vector<8x16xf32>, vector<16x8xf32>, vector<8x8xf32> -> vector<8x8xf32>
    %cst_259 = arith.constant 2.500000e-01 : f32
    %800 = vector.broadcast %cst_259 : f32 to vector<8x8xf32>
    %801 = arith.mulf %799, %800 : vector<8x8xf32>
    %cst_260 = arith.constant dense<0xFF800000> : vector<8xf32>
    %802 = vector.multi_reduction <maximumf>, %801, %cst_260 [1] : vector<8x8xf32> to vector<8xf32>
    %803 = vector.shape_cast %802 : vector<8xf32> to vector<8x1xf32>
    %804 = vector.broadcast %803 : vector<8x1xf32> to vector<8x8xf32>
    %805 = arith.subf %801, %804 : vector<8x8xf32>
    %806 = math.exp %805 : vector<8x8xf32>
    %cst_261 = arith.constant dense<0.000000e+00> : vector<8xf32>
    %807 = vector.multi_reduction <add>, %806, %cst_261 [1] : vector<8x8xf32> to vector<8xf32>
    %808 = vector.shape_cast %807 : vector<8xf32> to vector<8x1xf32>
    %809 = tpu.reciprocal %808 {approx = true} : vector<8x1xf32> -> vector<8x1xf32>
    %810 = vector.broadcast %809 : vector<8x1xf32> to vector<8x8xf32>
    %811 = arith.mulf %806, %810 : vector<8x8xf32>
    %cst_262 = arith.constant dense<0.000000e+00> : vector<8x16xf32>
    %812 = tpu.matmul %811, %797, %cst_262 {dimension_numbers = #tpu.dot_dimension_numbers<[1], [0], [0], [1], [0, 0, 1, 1], [], []>} : vector<8x8xf32>, vector<8x16xf32>, vector<8x16xf32> -> vector<8x16xf32>
    %813 = arith.truncf %812 : vector<8x16xf32> to vector<8x16xbf16>
    %814 = vector.extract_strided_slice %452 {offsets = [112, 0], sizes = [16, 128], strides = [1, 1]} : vector<128x128xbf16> to vector<16x128xbf16>
    %cst_263 = arith.constant dense<0.000000e+00> : vector<8x128xf32>
    %815 = tpu.matmul %813, %814, %cst_263 {dimension_numbers = #tpu.dot_dimension_numbers<[1], [0], [0], [1], [0, 0, 1, 1], [], []>} : vector<8x16xbf16>, vector<16x128xbf16>, vector<8x128xf32> -> vector<8x128xf32>
    %816 = arith.addf %794, %815 : vector<8x128xf32>
    %817 = tpu.concatenate %639, %816 in 0 : vector<8x128xf32>, vector<8x128xf32> -> vector<16x128xf32>
    %c1_264 = arith.constant 1 : index
    %c0_265 = arith.constant 0 : index
    %c0_266 = arith.constant 0 : index
    %818 = vector.load %arg6[%c1_264, %c0_265, %c0_266] : memref<3x1x128xf32, #tpu.memory_space<vmem>>, vector<1x1x128xf32>
    %819 = vector.shape_cast %818 : vector<1x1x128xf32> to vector<1x128xf32>
    %820 = vector.broadcast %819 : vector<1x128xf32> to vector<16x128xf32>
    %821 = arith.addf %817, %820 : vector<16x128xf32>
    %822 = arith.addf %448, %821 : vector<16x128xf32>
    %c1_267 = arith.constant 1 : index
    %c0_268 = arith.constant 0 : index
    %c0_269 = arith.constant 0 : index
    %823 = vector.load %arg7[%c1_267, %c0_268, %c0_269] : memref<3x1x128xf32, #tpu.memory_space<vmem>>, vector<1x1x128xf32>
    %824 = vector.shape_cast %823 : vector<1x1x128xf32> to vector<1x128xf32>
    %c1_270 = arith.constant 1 : index
    %c0_271 = arith.constant 0 : index
    %c0_272 = arith.constant 0 : index
    %825 = vector.load %arg8[%c1_270, %c0_271, %c0_272] : memref<3x1x128xf32, #tpu.memory_space<vmem>>, vector<1x1x128xf32>
    %826 = vector.shape_cast %825 : vector<1x1x128xf32> to vector<1x128xf32>
    %cst_273 = arith.constant dense<0.000000e+00> : vector<16xf32>
    %827 = vector.multi_reduction <add>, %822, %cst_273 [1] : vector<16x128xf32> to vector<16xf32>
    %828 = vector.shape_cast %827 : vector<16xf32> to vector<16x1xf32>
    %cst_274 = arith.constant 1.280000e+02 : f32
    %829 = vector.broadcast %cst_274 : f32 to vector<16x1xf32>
    %830 = arith.divf %828, %829 : vector<16x1xf32>
    %831 = vector.broadcast %830 : vector<16x1xf32> to vector<16x128xf32>
    %832 = arith.subf %822, %831 : vector<16x128xf32>
    %833 = arith.mulf %832, %832 : vector<16x128xf32>
    %cst_275 = arith.constant dense<0.000000e+00> : vector<16xf32>
    %834 = vector.multi_reduction <add>, %833, %cst_275 [1] : vector<16x128xf32> to vector<16xf32>
    %835 = vector.shape_cast %834 : vector<16xf32> to vector<16x1xf32>
    %cst_276 = arith.constant 1.280000e+02 : f32
    %836 = vector.broadcast %cst_276 : f32 to vector<16x1xf32>
    %837 = arith.divf %835, %836 : vector<16x1xf32>
    %838 = vector.broadcast %830 : vector<16x1xf32> to vector<16x128xf32>
    %839 = arith.subf %822, %838 : vector<16x128xf32>
    %cst_277 = arith.constant 9.99999974E-6 : f32
    %840 = vector.broadcast %cst_277 : f32 to vector<16x1xf32>
    %841 = arith.addf %837, %840 : vector<16x1xf32>
    %842 = math.rsqrt %841 : vector<16x1xf32>
    %843 = vector.broadcast %842 : vector<16x1xf32> to vector<16x128xf32>
    %844 = arith.mulf %839, %843 : vector<16x128xf32>
    %845 = vector.broadcast %824 : vector<1x128xf32> to vector<16x128xf32>
    %846 = arith.mulf %844, %845 : vector<16x128xf32>
    %847 = vector.broadcast %826 : vector<1x128xf32> to vector<16x128xf32>
    %848 = arith.addf %846, %847 : vector<16x128xf32>
    %849 = arith.truncf %848 : vector<16x128xf32> to vector<16x128xbf16>
    %cst_278 = arith.constant dense<0.000000e+00> : vector<16x512xf32>
    %850 = tpu.matmul %849, %454, %cst_278 {dimension_numbers = #tpu.dot_dimension_numbers<[1], [0], [0], [1], [0, 0, 1, 1], [], []>} : vector<16x128xbf16>, vector<128x512xbf16>, vector<16x512xf32> -> vector<16x512xf32>
    %c1_279 = arith.constant 1 : index
    %c0_280 = arith.constant 0 : index
    %c0_281 = arith.constant 0 : index
    %851 = vector.load %arg10[%c1_279, %c0_280, %c0_281] : memref<3x1x512xf32, #tpu.memory_space<vmem>>, vector<1x1x512xf32>
    %852 = vector.shape_cast %851 : vector<1x1x512xf32> to vector<1x512xf32>
    %853 = vector.broadcast %852 : vector<1x512xf32> to vector<16x512xf32>
    %854 = arith.addf %850, %853 : vector<16x512xf32>
    %cst_282 = arith.constant 0.000000e+00 : f32
    %855 = vector.broadcast %cst_282 : f32 to vector<16x512xf32>
    %856 = arith.maximumf %854, %855 : vector<16x512xf32>
    %857 = arith.truncf %856 : vector<16x512xf32> to vector<16x512xbf16>
    %cst_283 = arith.constant dense<0.000000e+00> : vector<16x128xf32>
    %858 = tpu.matmul %857, %456, %cst_283 {dimension_numbers = #tpu.dot_dimension_numbers<[1], [0], [0], [1], [0, 0, 1, 1], [], []>} : vector<16x512xbf16>, vector<512x128xbf16>, vector<16x128xf32> -> vector<16x128xf32>
    %c1_284 = arith.constant 1 : index
    %c0_285 = arith.constant 0 : index
    %c0_286 = arith.constant 0 : index
    %859 = vector.load %arg12[%c1_284, %c0_285, %c0_286] : memref<3x1x128xf32, #tpu.memory_space<vmem>>, vector<1x1x128xf32>
    %860 = vector.shape_cast %859 : vector<1x1x128xf32> to vector<1x128xf32>
    %861 = vector.broadcast %860 : vector<1x128xf32> to vector<16x128xf32>
    %862 = arith.addf %858, %861 : vector<16x128xf32>
    %863 = arith.addf %848, %862 : vector<16x128xf32>
    %c1_287 = arith.constant 1 : index
    %c0_288 = arith.constant 0 : index
    %c0_289 = arith.constant 0 : index
    %864 = vector.load %arg13[%c1_287, %c0_288, %c0_289] : memref<3x1x128xf32, #tpu.memory_space<vmem>>, vector<1x1x128xf32>
    %865 = vector.shape_cast %864 : vector<1x1x128xf32> to vector<1x128xf32>
    %c1_290 = arith.constant 1 : index
    %c0_291 = arith.constant 0 : index
    %c0_292 = arith.constant 0 : index
    %866 = vector.load %arg14[%c1_290, %c0_291, %c0_292] : memref<3x1x128xf32, #tpu.memory_space<vmem>>, vector<1x1x128xf32>
    %867 = vector.shape_cast %866 : vector<1x1x128xf32> to vector<1x128xf32>
    %cst_293 = arith.constant dense<0.000000e+00> : vector<16xf32>
    %868 = vector.multi_reduction <add>, %863, %cst_293 [1] : vector<16x128xf32> to vector<16xf32>
    %869 = vector.shape_cast %868 : vector<16xf32> to vector<16x1xf32>
    %cst_294 = arith.constant 1.280000e+02 : f32
    %870 = vector.broadcast %cst_294 : f32 to vector<16x1xf32>
    %871 = arith.divf %869, %870 : vector<16x1xf32>
    %872 = vector.broadcast %871 : vector<16x1xf32> to vector<16x128xf32>
    %873 = arith.subf %863, %872 : vector<16x128xf32>
    %874 = arith.mulf %873, %873 : vector<16x128xf32>
    %cst_295 = arith.constant dense<0.000000e+00> : vector<16xf32>
    %875 = vector.multi_reduction <add>, %874, %cst_295 [1] : vector<16x128xf32> to vector<16xf32>
    %876 = vector.shape_cast %875 : vector<16xf32> to vector<16x1xf32>
    %cst_296 = arith.constant 1.280000e+02 : f32
    %877 = vector.broadcast %cst_296 : f32 to vector<16x1xf32>
    %878 = arith.divf %876, %877 : vector<16x1xf32>
    %879 = vector.broadcast %871 : vector<16x1xf32> to vector<16x128xf32>
    %880 = arith.subf %863, %879 : vector<16x128xf32>
    %cst_297 = arith.constant 9.99999974E-6 : f32
    %881 = vector.broadcast %cst_297 : f32 to vector<16x1xf32>
    %882 = arith.addf %878, %881 : vector<16x1xf32>
    %883 = math.rsqrt %882 : vector<16x1xf32>
    %884 = vector.broadcast %883 : vector<16x1xf32> to vector<16x128xf32>
    %885 = arith.mulf %880, %884 : vector<16x128xf32>
    %886 = vector.broadcast %865 : vector<1x128xf32> to vector<16x128xf32>
    %887 = arith.mulf %885, %886 : vector<16x128xf32>
    %888 = vector.broadcast %867 : vector<1x128xf32> to vector<16x128xf32>
    %889 = arith.addf %887, %888 : vector<16x128xf32>
    %c2 = arith.constant 2 : index
    %c0_298 = arith.constant 0 : index
    %c0_299 = arith.constant 0 : index
    %890 = vector.load %arg3[%c2, %c0_298, %c0_299] : memref<3x128x384xbf16, #tpu.memory_space<vmem>>, vector<1x128x384xbf16>
    %891 = vector.shape_cast %890 : vector<1x128x384xbf16> to vector<128x384xbf16>
    %c2_300 = arith.constant 2 : index
    %c0_301 = arith.constant 0 : index
    %c0_302 = arith.constant 0 : index
    %892 = vector.load %arg5[%c2_300, %c0_301, %c0_302] : memref<3x128x128xbf16, #tpu.memory_space<vmem>>, vector<1x128x128xbf16>
    %893 = vector.shape_cast %892 : vector<1x128x128xbf16> to vector<128x128xbf16>
    %c2_303 = arith.constant 2 : index
    %c0_304 = arith.constant 0 : index
    %c0_305 = arith.constant 0 : index
    %894 = vector.load %arg9[%c2_303, %c0_304, %c0_305] : memref<3x128x512xbf16, #tpu.memory_space<vmem>>, vector<1x128x512xbf16>
    %895 = vector.shape_cast %894 : vector<1x128x512xbf16> to vector<128x512xbf16>
    %c2_306 = arith.constant 2 : index
    %c0_307 = arith.constant 0 : index
    %c0_308 = arith.constant 0 : index
    %896 = vector.load %arg11[%c2_306, %c0_307, %c0_308] : memref<3x512x128xbf16, #tpu.memory_space<vmem>>, vector<1x512x128xbf16>
    %897 = vector.shape_cast %896 : vector<1x512x128xbf16> to vector<512x128xbf16>
    %898 = arith.truncf %889 : vector<16x128xf32> to vector<16x128xbf16>
    %cst_309 = arith.constant dense<0.000000e+00> : vector<16x384xf32>
    %899 = tpu.matmul %898, %891, %cst_309 {dimension_numbers = #tpu.dot_dimension_numbers<[1], [0], [0], [1], [0, 0, 1, 1], [], []>} : vector<16x128xbf16>, vector<128x384xbf16>, vector<16x384xf32> -> vector<16x384xf32>
    %c2_310 = arith.constant 2 : index
    %c0_311 = arith.constant 0 : index
    %c0_312 = arith.constant 0 : index
    %900 = vector.load %arg4[%c2_310, %c0_311, %c0_312] : memref<3x1x384xf32, #tpu.memory_space<vmem>>, vector<1x1x384xf32>
    %901 = vector.shape_cast %900 : vector<1x1x384xf32> to vector<1x384xf32>
    %902 = vector.broadcast %901 : vector<1x384xf32> to vector<16x384xf32>
    %903 = arith.addf %899, %902 : vector<16x384xf32>
    %cst_313 = arith.constant 0.000000e+00 : f32
    %904 = vector.broadcast %cst_313 : f32 to vector<8x128xf32>
    %905 = vector.extract_strided_slice %903 {offsets = [0, 0], sizes = [8, 16], strides = [1, 1]} : vector<16x384xf32> to vector<8x16xf32>
    %906 = vector.extract_strided_slice %903 {offsets = [0, 128], sizes = [8, 16], strides = [1, 1]} : vector<16x384xf32> to vector<8x16xf32>
    %907 = vector.extract_strided_slice %903 {offsets = [0, 256], sizes = [8, 16], strides = [1, 1]} : vector<16x384xf32> to vector<8x16xf32>
    %908 = tpu.transpose %906, [1, 0] : vector<8x16xf32> -> vector<16x8xf32>
    %cst_314 = arith.constant dense<0.000000e+00> : vector<8x8xf32>
    %909 = tpu.matmul %905, %908, %cst_314 {dimension_numbers = #tpu.dot_dimension_numbers<[1], [0], [0], [1], [0, 0, 1, 1], [], []>} : vector<8x16xf32>, vector<16x8xf32>, vector<8x8xf32> -> vector<8x8xf32>
    %cst_315 = arith.constant 2.500000e-01 : f32
    %910 = vector.broadcast %cst_315 : f32 to vector<8x8xf32>
    %911 = arith.mulf %909, %910 : vector<8x8xf32>
    %cst_316 = arith.constant dense<0xFF800000> : vector<8xf32>
    %912 = vector.multi_reduction <maximumf>, %911, %cst_316 [1] : vector<8x8xf32> to vector<8xf32>
    %913 = vector.shape_cast %912 : vector<8xf32> to vector<8x1xf32>
    %914 = vector.broadcast %913 : vector<8x1xf32> to vector<8x8xf32>
    %915 = arith.subf %911, %914 : vector<8x8xf32>
    %916 = math.exp %915 : vector<8x8xf32>
    %cst_317 = arith.constant dense<0.000000e+00> : vector<8xf32>
    %917 = vector.multi_reduction <add>, %916, %cst_317 [1] : vector<8x8xf32> to vector<8xf32>
    %918 = vector.shape_cast %917 : vector<8xf32> to vector<8x1xf32>
    %919 = tpu.reciprocal %918 {approx = true} : vector<8x1xf32> -> vector<8x1xf32>
    %920 = vector.broadcast %919 : vector<8x1xf32> to vector<8x8xf32>
    %921 = arith.mulf %916, %920 : vector<8x8xf32>
    %cst_318 = arith.constant dense<0.000000e+00> : vector<8x16xf32>
    %922 = tpu.matmul %921, %907, %cst_318 {dimension_numbers = #tpu.dot_dimension_numbers<[1], [0], [0], [1], [0, 0, 1, 1], [], []>} : vector<8x8xf32>, vector<8x16xf32>, vector<8x16xf32> -> vector<8x16xf32>
    %923 = arith.truncf %922 : vector<8x16xf32> to vector<8x16xbf16>
    %924 = vector.extract_strided_slice %893 {offsets = [0, 0], sizes = [16, 128], strides = [1, 1]} : vector<128x128xbf16> to vector<16x128xbf16>
    %cst_319 = arith.constant dense<0.000000e+00> : vector<8x128xf32>
    %925 = tpu.matmul %923, %924, %cst_319 {dimension_numbers = #tpu.dot_dimension_numbers<[1], [0], [0], [1], [0, 0, 1, 1], [], []>} : vector<8x16xbf16>, vector<16x128xbf16>, vector<8x128xf32> -> vector<8x128xf32>
    %926 = arith.addf %904, %925 : vector<8x128xf32>
    %927 = vector.extract_strided_slice %903 {offsets = [0, 16], sizes = [8, 16], strides = [1, 1]} : vector<16x384xf32> to vector<8x16xf32>
    %928 = vector.extract_strided_slice %903 {offsets = [0, 144], sizes = [8, 16], strides = [1, 1]} : vector<16x384xf32> to vector<8x16xf32>
    %929 = vector.extract_strided_slice %903 {offsets = [0, 272], sizes = [8, 16], strides = [1, 1]} : vector<16x384xf32> to vector<8x16xf32>
    %930 = tpu.transpose %928, [1, 0] : vector<8x16xf32> -> vector<16x8xf32>
    %cst_320 = arith.constant dense<0.000000e+00> : vector<8x8xf32>
    %931 = tpu.matmul %927, %930, %cst_320 {dimension_numbers = #tpu.dot_dimension_numbers<[1], [0], [0], [1], [0, 0, 1, 1], [], []>} : vector<8x16xf32>, vector<16x8xf32>, vector<8x8xf32> -> vector<8x8xf32>
    %cst_321 = arith.constant 2.500000e-01 : f32
    %932 = vector.broadcast %cst_321 : f32 to vector<8x8xf32>
    %933 = arith.mulf %931, %932 : vector<8x8xf32>
    %cst_322 = arith.constant dense<0xFF800000> : vector<8xf32>
    %934 = vector.multi_reduction <maximumf>, %933, %cst_322 [1] : vector<8x8xf32> to vector<8xf32>
    %935 = vector.shape_cast %934 : vector<8xf32> to vector<8x1xf32>
    %936 = vector.broadcast %935 : vector<8x1xf32> to vector<8x8xf32>
    %937 = arith.subf %933, %936 : vector<8x8xf32>
    %938 = math.exp %937 : vector<8x8xf32>
    %cst_323 = arith.constant dense<0.000000e+00> : vector<8xf32>
    %939 = vector.multi_reduction <add>, %938, %cst_323 [1] : vector<8x8xf32> to vector<8xf32>
    %940 = vector.shape_cast %939 : vector<8xf32> to vector<8x1xf32>
    %941 = tpu.reciprocal %940 {approx = true} : vector<8x1xf32> -> vector<8x1xf32>
    %942 = vector.broadcast %941 : vector<8x1xf32> to vector<8x8xf32>
    %943 = arith.mulf %938, %942 : vector<8x8xf32>
    %cst_324 = arith.constant dense<0.000000e+00> : vector<8x16xf32>
    %944 = tpu.matmul %943, %929, %cst_324 {dimension_numbers = #tpu.dot_dimension_numbers<[1], [0], [0], [1], [0, 0, 1, 1], [], []>} : vector<8x8xf32>, vector<8x16xf32>, vector<8x16xf32> -> vector<8x16xf32>
    %945 = arith.truncf %944 : vector<8x16xf32> to vector<8x16xbf16>
    %946 = vector.extract_strided_slice %893 {offsets = [16, 0], sizes = [16, 128], strides = [1, 1]} : vector<128x128xbf16> to vector<16x128xbf16>
    %cst_325 = arith.constant dense<0.000000e+00> : vector<8x128xf32>
    %947 = tpu.matmul %945, %946, %cst_325 {dimension_numbers = #tpu.dot_dimension_numbers<[1], [0], [0], [1], [0, 0, 1, 1], [], []>} : vector<8x16xbf16>, vector<16x128xbf16>, vector<8x128xf32> -> vector<8x128xf32>
    %948 = arith.addf %926, %947 : vector<8x128xf32>
    %949 = vector.extract_strided_slice %903 {offsets = [0, 32], sizes = [8, 16], strides = [1, 1]} : vector<16x384xf32> to vector<8x16xf32>
    %950 = vector.extract_strided_slice %903 {offsets = [0, 160], sizes = [8, 16], strides = [1, 1]} : vector<16x384xf32> to vector<8x16xf32>
    %951 = vector.extract_strided_slice %903 {offsets = [0, 288], sizes = [8, 16], strides = [1, 1]} : vector<16x384xf32> to vector<8x16xf32>
    %952 = tpu.transpose %950, [1, 0] : vector<8x16xf32> -> vector<16x8xf32>
    %cst_326 = arith.constant dense<0.000000e+00> : vector<8x8xf32>
    %953 = tpu.matmul %949, %952, %cst_326 {dimension_numbers = #tpu.dot_dimension_numbers<[1], [0], [0], [1], [0, 0, 1, 1], [], []>} : vector<8x16xf32>, vector<16x8xf32>, vector<8x8xf32> -> vector<8x8xf32>
    %cst_327 = arith.constant 2.500000e-01 : f32
    %954 = vector.broadcast %cst_327 : f32 to vector<8x8xf32>
    %955 = arith.mulf %953, %954 : vector<8x8xf32>
    %cst_328 = arith.constant dense<0xFF800000> : vector<8xf32>
    %956 = vector.multi_reduction <maximumf>, %955, %cst_328 [1] : vector<8x8xf32> to vector<8xf32>
    %957 = vector.shape_cast %956 : vector<8xf32> to vector<8x1xf32>
    %958 = vector.broadcast %957 : vector<8x1xf32> to vector<8x8xf32>
    %959 = arith.subf %955, %958 : vector<8x8xf32>
    %960 = math.exp %959 : vector<8x8xf32>
    %cst_329 = arith.constant dense<0.000000e+00> : vector<8xf32>
    %961 = vector.multi_reduction <add>, %960, %cst_329 [1] : vector<8x8xf32> to vector<8xf32>
    %962 = vector.shape_cast %961 : vector<8xf32> to vector<8x1xf32>
    %963 = tpu.reciprocal %962 {approx = true} : vector<8x1xf32> -> vector<8x1xf32>
    %964 = vector.broadcast %963 : vector<8x1xf32> to vector<8x8xf32>
    %965 = arith.mulf %960, %964 : vector<8x8xf32>
    %cst_330 = arith.constant dense<0.000000e+00> : vector<8x16xf32>
    %966 = tpu.matmul %965, %951, %cst_330 {dimension_numbers = #tpu.dot_dimension_numbers<[1], [0], [0], [1], [0, 0, 1, 1], [], []>} : vector<8x8xf32>, vector<8x16xf32>, vector<8x16xf32> -> vector<8x16xf32>
    %967 = arith.truncf %966 : vector<8x16xf32> to vector<8x16xbf16>
    %968 = vector.extract_strided_slice %893 {offsets = [32, 0], sizes = [16, 128], strides = [1, 1]} : vector<128x128xbf16> to vector<16x128xbf16>
    %cst_331 = arith.constant dense<0.000000e+00> : vector<8x128xf32>
    %969 = tpu.matmul %967, %968, %cst_331 {dimension_numbers = #tpu.dot_dimension_numbers<[1], [0], [0], [1], [0, 0, 1, 1], [], []>} : vector<8x16xbf16>, vector<16x128xbf16>, vector<8x128xf32> -> vector<8x128xf32>
    %970 = arith.addf %948, %969 : vector<8x128xf32>
    %971 = vector.extract_strided_slice %903 {offsets = [0, 48], sizes = [8, 16], strides = [1, 1]} : vector<16x384xf32> to vector<8x16xf32>
    %972 = vector.extract_strided_slice %903 {offsets = [0, 176], sizes = [8, 16], strides = [1, 1]} : vector<16x384xf32> to vector<8x16xf32>
    %973 = vector.extract_strided_slice %903 {offsets = [0, 304], sizes = [8, 16], strides = [1, 1]} : vector<16x384xf32> to vector<8x16xf32>
    %974 = tpu.transpose %972, [1, 0] : vector<8x16xf32> -> vector<16x8xf32>
    %cst_332 = arith.constant dense<0.000000e+00> : vector<8x8xf32>
    %975 = tpu.matmul %971, %974, %cst_332 {dimension_numbers = #tpu.dot_dimension_numbers<[1], [0], [0], [1], [0, 0, 1, 1], [], []>} : vector<8x16xf32>, vector<16x8xf32>, vector<8x8xf32> -> vector<8x8xf32>
    %cst_333 = arith.constant 2.500000e-01 : f32
    %976 = vector.broadcast %cst_333 : f32 to vector<8x8xf32>
    %977 = arith.mulf %975, %976 : vector<8x8xf32>
    %cst_334 = arith.constant dense<0xFF800000> : vector<8xf32>
    %978 = vector.multi_reduction <maximumf>, %977, %cst_334 [1] : vector<8x8xf32> to vector<8xf32>
    %979 = vector.shape_cast %978 : vector<8xf32> to vector<8x1xf32>
    %980 = vector.broadcast %979 : vector<8x1xf32> to vector<8x8xf32>
    %981 = arith.subf %977, %980 : vector<8x8xf32>
    %982 = math.exp %981 : vector<8x8xf32>
    %cst_335 = arith.constant dense<0.000000e+00> : vector<8xf32>
    %983 = vector.multi_reduction <add>, %982, %cst_335 [1] : vector<8x8xf32> to vector<8xf32>
    %984 = vector.shape_cast %983 : vector<8xf32> to vector<8x1xf32>
    %985 = tpu.reciprocal %984 {approx = true} : vector<8x1xf32> -> vector<8x1xf32>
    %986 = vector.broadcast %985 : vector<8x1xf32> to vector<8x8xf32>
    %987 = arith.mulf %982, %986 : vector<8x8xf32>
    %cst_336 = arith.constant dense<0.000000e+00> : vector<8x16xf32>
    %988 = tpu.matmul %987, %973, %cst_336 {dimension_numbers = #tpu.dot_dimension_numbers<[1], [0], [0], [1], [0, 0, 1, 1], [], []>} : vector<8x8xf32>, vector<8x16xf32>, vector<8x16xf32> -> vector<8x16xf32>
    %989 = arith.truncf %988 : vector<8x16xf32> to vector<8x16xbf16>
    %990 = vector.extract_strided_slice %893 {offsets = [48, 0], sizes = [16, 128], strides = [1, 1]} : vector<128x128xbf16> to vector<16x128xbf16>
    %cst_337 = arith.constant dense<0.000000e+00> : vector<8x128xf32>
    %991 = tpu.matmul %989, %990, %cst_337 {dimension_numbers = #tpu.dot_dimension_numbers<[1], [0], [0], [1], [0, 0, 1, 1], [], []>} : vector<8x16xbf16>, vector<16x128xbf16>, vector<8x128xf32> -> vector<8x128xf32>
    %992 = arith.addf %970, %991 : vector<8x128xf32>
    %993 = vector.extract_strided_slice %903 {offsets = [0, 64], sizes = [8, 16], strides = [1, 1]} : vector<16x384xf32> to vector<8x16xf32>
    %994 = vector.extract_strided_slice %903 {offsets = [0, 192], sizes = [8, 16], strides = [1, 1]} : vector<16x384xf32> to vector<8x16xf32>
    %995 = vector.extract_strided_slice %903 {offsets = [0, 320], sizes = [8, 16], strides = [1, 1]} : vector<16x384xf32> to vector<8x16xf32>
    %996 = tpu.transpose %994, [1, 0] : vector<8x16xf32> -> vector<16x8xf32>
    %cst_338 = arith.constant dense<0.000000e+00> : vector<8x8xf32>
    %997 = tpu.matmul %993, %996, %cst_338 {dimension_numbers = #tpu.dot_dimension_numbers<[1], [0], [0], [1], [0, 0, 1, 1], [], []>} : vector<8x16xf32>, vector<16x8xf32>, vector<8x8xf32> -> vector<8x8xf32>
    %cst_339 = arith.constant 2.500000e-01 : f32
    %998 = vector.broadcast %cst_339 : f32 to vector<8x8xf32>
    %999 = arith.mulf %997, %998 : vector<8x8xf32>
    %cst_340 = arith.constant dense<0xFF800000> : vector<8xf32>
    %1000 = vector.multi_reduction <maximumf>, %999, %cst_340 [1] : vector<8x8xf32> to vector<8xf32>
    %1001 = vector.shape_cast %1000 : vector<8xf32> to vector<8x1xf32>
    %1002 = vector.broadcast %1001 : vector<8x1xf32> to vector<8x8xf32>
    %1003 = arith.subf %999, %1002 : vector<8x8xf32>
    %1004 = math.exp %1003 : vector<8x8xf32>
    %cst_341 = arith.constant dense<0.000000e+00> : vector<8xf32>
    %1005 = vector.multi_reduction <add>, %1004, %cst_341 [1] : vector<8x8xf32> to vector<8xf32>
    %1006 = vector.shape_cast %1005 : vector<8xf32> to vector<8x1xf32>
    %1007 = tpu.reciprocal %1006 {approx = true} : vector<8x1xf32> -> vector<8x1xf32>
    %1008 = vector.broadcast %1007 : vector<8x1xf32> to vector<8x8xf32>
    %1009 = arith.mulf %1004, %1008 : vector<8x8xf32>
    %cst_342 = arith.constant dense<0.000000e+00> : vector<8x16xf32>
    %1010 = tpu.matmul %1009, %995, %cst_342 {dimension_numbers = #tpu.dot_dimension_numbers<[1], [0], [0], [1], [0, 0, 1, 1], [], []>} : vector<8x8xf32>, vector<8x16xf32>, vector<8x16xf32> -> vector<8x16xf32>
    %1011 = arith.truncf %1010 : vector<8x16xf32> to vector<8x16xbf16>
    %1012 = vector.extract_strided_slice %893 {offsets = [64, 0], sizes = [16, 128], strides = [1, 1]} : vector<128x128xbf16> to vector<16x128xbf16>
    %cst_343 = arith.constant dense<0.000000e+00> : vector<8x128xf32>
    %1013 = tpu.matmul %1011, %1012, %cst_343 {dimension_numbers = #tpu.dot_dimension_numbers<[1], [0], [0], [1], [0, 0, 1, 1], [], []>} : vector<8x16xbf16>, vector<16x128xbf16>, vector<8x128xf32> -> vector<8x128xf32>
    %1014 = arith.addf %992, %1013 : vector<8x128xf32>
    %1015 = vector.extract_strided_slice %903 {offsets = [0, 80], sizes = [8, 16], strides = [1, 1]} : vector<16x384xf32> to vector<8x16xf32>
    %1016 = vector.extract_strided_slice %903 {offsets = [0, 208], sizes = [8, 16], strides = [1, 1]} : vector<16x384xf32> to vector<8x16xf32>
    %1017 = vector.extract_strided_slice %903 {offsets = [0, 336], sizes = [8, 16], strides = [1, 1]} : vector<16x384xf32> to vector<8x16xf32>
    %1018 = tpu.transpose %1016, [1, 0] : vector<8x16xf32> -> vector<16x8xf32>
    %cst_344 = arith.constant dense<0.000000e+00> : vector<8x8xf32>
    %1019 = tpu.matmul %1015, %1018, %cst_344 {dimension_numbers = #tpu.dot_dimension_numbers<[1], [0], [0], [1], [0, 0, 1, 1], [], []>} : vector<8x16xf32>, vector<16x8xf32>, vector<8x8xf32> -> vector<8x8xf32>
    %cst_345 = arith.constant 2.500000e-01 : f32
    %1020 = vector.broadcast %cst_345 : f32 to vector<8x8xf32>
    %1021 = arith.mulf %1019, %1020 : vector<8x8xf32>
    %cst_346 = arith.constant dense<0xFF800000> : vector<8xf32>
    %1022 = vector.multi_reduction <maximumf>, %1021, %cst_346 [1] : vector<8x8xf32> to vector<8xf32>
    %1023 = vector.shape_cast %1022 : vector<8xf32> to vector<8x1xf32>
    %1024 = vector.broadcast %1023 : vector<8x1xf32> to vector<8x8xf32>
    %1025 = arith.subf %1021, %1024 : vector<8x8xf32>
    %1026 = math.exp %1025 : vector<8x8xf32>
    %cst_347 = arith.constant dense<0.000000e+00> : vector<8xf32>
    %1027 = vector.multi_reduction <add>, %1026, %cst_347 [1] : vector<8x8xf32> to vector<8xf32>
    %1028 = vector.shape_cast %1027 : vector<8xf32> to vector<8x1xf32>
    %1029 = tpu.reciprocal %1028 {approx = true} : vector<8x1xf32> -> vector<8x1xf32>
    %1030 = vector.broadcast %1029 : vector<8x1xf32> to vector<8x8xf32>
    %1031 = arith.mulf %1026, %1030 : vector<8x8xf32>
    %cst_348 = arith.constant dense<0.000000e+00> : vector<8x16xf32>
    %1032 = tpu.matmul %1031, %1017, %cst_348 {dimension_numbers = #tpu.dot_dimension_numbers<[1], [0], [0], [1], [0, 0, 1, 1], [], []>} : vector<8x8xf32>, vector<8x16xf32>, vector<8x16xf32> -> vector<8x16xf32>
    %1033 = arith.truncf %1032 : vector<8x16xf32> to vector<8x16xbf16>
    %1034 = vector.extract_strided_slice %893 {offsets = [80, 0], sizes = [16, 128], strides = [1, 1]} : vector<128x128xbf16> to vector<16x128xbf16>
    %cst_349 = arith.constant dense<0.000000e+00> : vector<8x128xf32>
    %1035 = tpu.matmul %1033, %1034, %cst_349 {dimension_numbers = #tpu.dot_dimension_numbers<[1], [0], [0], [1], [0, 0, 1, 1], [], []>} : vector<8x16xbf16>, vector<16x128xbf16>, vector<8x128xf32> -> vector<8x128xf32>
    %1036 = arith.addf %1014, %1035 : vector<8x128xf32>
    %1037 = vector.extract_strided_slice %903 {offsets = [0, 96], sizes = [8, 16], strides = [1, 1]} : vector<16x384xf32> to vector<8x16xf32>
    %1038 = vector.extract_strided_slice %903 {offsets = [0, 224], sizes = [8, 16], strides = [1, 1]} : vector<16x384xf32> to vector<8x16xf32>
    %1039 = vector.extract_strided_slice %903 {offsets = [0, 352], sizes = [8, 16], strides = [1, 1]} : vector<16x384xf32> to vector<8x16xf32>
    %1040 = tpu.transpose %1038, [1, 0] : vector<8x16xf32> -> vector<16x8xf32>
    %cst_350 = arith.constant dense<0.000000e+00> : vector<8x8xf32>
    %1041 = tpu.matmul %1037, %1040, %cst_350 {dimension_numbers = #tpu.dot_dimension_numbers<[1], [0], [0], [1], [0, 0, 1, 1], [], []>} : vector<8x16xf32>, vector<16x8xf32>, vector<8x8xf32> -> vector<8x8xf32>
    %cst_351 = arith.constant 2.500000e-01 : f32
    %1042 = vector.broadcast %cst_351 : f32 to vector<8x8xf32>
    %1043 = arith.mulf %1041, %1042 : vector<8x8xf32>
    %cst_352 = arith.constant dense<0xFF800000> : vector<8xf32>
    %1044 = vector.multi_reduction <maximumf>, %1043, %cst_352 [1] : vector<8x8xf32> to vector<8xf32>
    %1045 = vector.shape_cast %1044 : vector<8xf32> to vector<8x1xf32>
    %1046 = vector.broadcast %1045 : vector<8x1xf32> to vector<8x8xf32>
    %1047 = arith.subf %1043, %1046 : vector<8x8xf32>
    %1048 = math.exp %1047 : vector<8x8xf32>
    %cst_353 = arith.constant dense<0.000000e+00> : vector<8xf32>
    %1049 = vector.multi_reduction <add>, %1048, %cst_353 [1] : vector<8x8xf32> to vector<8xf32>
    %1050 = vector.shape_cast %1049 : vector<8xf32> to vector<8x1xf32>
    %1051 = tpu.reciprocal %1050 {approx = true} : vector<8x1xf32> -> vector<8x1xf32>
    %1052 = vector.broadcast %1051 : vector<8x1xf32> to vector<8x8xf32>
    %1053 = arith.mulf %1048, %1052 : vector<8x8xf32>
    %cst_354 = arith.constant dense<0.000000e+00> : vector<8x16xf32>
    %1054 = tpu.matmul %1053, %1039, %cst_354 {dimension_numbers = #tpu.dot_dimension_numbers<[1], [0], [0], [1], [0, 0, 1, 1], [], []>} : vector<8x8xf32>, vector<8x16xf32>, vector<8x16xf32> -> vector<8x16xf32>
    %1055 = arith.truncf %1054 : vector<8x16xf32> to vector<8x16xbf16>
    %1056 = vector.extract_strided_slice %893 {offsets = [96, 0], sizes = [16, 128], strides = [1, 1]} : vector<128x128xbf16> to vector<16x128xbf16>
    %cst_355 = arith.constant dense<0.000000e+00> : vector<8x128xf32>
    %1057 = tpu.matmul %1055, %1056, %cst_355 {dimension_numbers = #tpu.dot_dimension_numbers<[1], [0], [0], [1], [0, 0, 1, 1], [], []>} : vector<8x16xbf16>, vector<16x128xbf16>, vector<8x128xf32> -> vector<8x128xf32>
    %1058 = arith.addf %1036, %1057 : vector<8x128xf32>
    %1059 = vector.extract_strided_slice %903 {offsets = [0, 112], sizes = [8, 16], strides = [1, 1]} : vector<16x384xf32> to vector<8x16xf32>
    %1060 = vector.extract_strided_slice %903 {offsets = [0, 240], sizes = [8, 16], strides = [1, 1]} : vector<16x384xf32> to vector<8x16xf32>
    %1061 = vector.extract_strided_slice %903 {offsets = [0, 368], sizes = [8, 16], strides = [1, 1]} : vector<16x384xf32> to vector<8x16xf32>
    %1062 = tpu.transpose %1060, [1, 0] : vector<8x16xf32> -> vector<16x8xf32>
    %cst_356 = arith.constant dense<0.000000e+00> : vector<8x8xf32>
    %1063 = tpu.matmul %1059, %1062, %cst_356 {dimension_numbers = #tpu.dot_dimension_numbers<[1], [0], [0], [1], [0, 0, 1, 1], [], []>} : vector<8x16xf32>, vector<16x8xf32>, vector<8x8xf32> -> vector<8x8xf32>
    %cst_357 = arith.constant 2.500000e-01 : f32
    %1064 = vector.broadcast %cst_357 : f32 to vector<8x8xf32>
    %1065 = arith.mulf %1063, %1064 : vector<8x8xf32>
    %cst_358 = arith.constant dense<0xFF800000> : vector<8xf32>
    %1066 = vector.multi_reduction <maximumf>, %1065, %cst_358 [1] : vector<8x8xf32> to vector<8xf32>
    %1067 = vector.shape_cast %1066 : vector<8xf32> to vector<8x1xf32>
    %1068 = vector.broadcast %1067 : vector<8x1xf32> to vector<8x8xf32>
    %1069 = arith.subf %1065, %1068 : vector<8x8xf32>
    %1070 = math.exp %1069 : vector<8x8xf32>
    %cst_359 = arith.constant dense<0.000000e+00> : vector<8xf32>
    %1071 = vector.multi_reduction <add>, %1070, %cst_359 [1] : vector<8x8xf32> to vector<8xf32>
    %1072 = vector.shape_cast %1071 : vector<8xf32> to vector<8x1xf32>
    %1073 = tpu.reciprocal %1072 {approx = true} : vector<8x1xf32> -> vector<8x1xf32>
    %1074 = vector.broadcast %1073 : vector<8x1xf32> to vector<8x8xf32>
    %1075 = arith.mulf %1070, %1074 : vector<8x8xf32>
    %cst_360 = arith.constant dense<0.000000e+00> : vector<8x16xf32>
    %1076 = tpu.matmul %1075, %1061, %cst_360 {dimension_numbers = #tpu.dot_dimension_numbers<[1], [0], [0], [1], [0, 0, 1, 1], [], []>} : vector<8x8xf32>, vector<8x16xf32>, vector<8x16xf32> -> vector<8x16xf32>
    %1077 = arith.truncf %1076 : vector<8x16xf32> to vector<8x16xbf16>
    %1078 = vector.extract_strided_slice %893 {offsets = [112, 0], sizes = [16, 128], strides = [1, 1]} : vector<128x128xbf16> to vector<16x128xbf16>
    %cst_361 = arith.constant dense<0.000000e+00> : vector<8x128xf32>
    %1079 = tpu.matmul %1077, %1078, %cst_361 {dimension_numbers = #tpu.dot_dimension_numbers<[1], [0], [0], [1], [0, 0, 1, 1], [], []>} : vector<8x16xbf16>, vector<16x128xbf16>, vector<8x128xf32> -> vector<8x128xf32>
    %1080 = arith.addf %1058, %1079 : vector<8x128xf32>
    %cst_362 = arith.constant 0.000000e+00 : f32
    %1081 = vector.broadcast %cst_362 : f32 to vector<8x128xf32>
    %1082 = vector.extract_strided_slice %903 {offsets = [8, 0], sizes = [8, 16], strides = [1, 1]} : vector<16x384xf32> to vector<8x16xf32>
    %1083 = vector.extract_strided_slice %903 {offsets = [8, 128], sizes = [8, 16], strides = [1, 1]} : vector<16x384xf32> to vector<8x16xf32>
    %1084 = vector.extract_strided_slice %903 {offsets = [8, 256], sizes = [8, 16], strides = [1, 1]} : vector<16x384xf32> to vector<8x16xf32>
    %1085 = tpu.transpose %1083, [1, 0] : vector<8x16xf32> -> vector<16x8xf32>
    %cst_363 = arith.constant dense<0.000000e+00> : vector<8x8xf32>
    %1086 = tpu.matmul %1082, %1085, %cst_363 {dimension_numbers = #tpu.dot_dimension_numbers<[1], [0], [0], [1], [0, 0, 1, 1], [], []>} : vector<8x16xf32>, vector<16x8xf32>, vector<8x8xf32> -> vector<8x8xf32>
    %cst_364 = arith.constant 2.500000e-01 : f32
    %1087 = vector.broadcast %cst_364 : f32 to vector<8x8xf32>
    %1088 = arith.mulf %1086, %1087 : vector<8x8xf32>
    %cst_365 = arith.constant dense<0xFF800000> : vector<8xf32>
    %1089 = vector.multi_reduction <maximumf>, %1088, %cst_365 [1] : vector<8x8xf32> to vector<8xf32>
    %1090 = vector.shape_cast %1089 : vector<8xf32> to vector<8x1xf32>
    %1091 = vector.broadcast %1090 : vector<8x1xf32> to vector<8x8xf32>
    %1092 = arith.subf %1088, %1091 : vector<8x8xf32>
    %1093 = math.exp %1092 : vector<8x8xf32>
    %cst_366 = arith.constant dense<0.000000e+00> : vector<8xf32>
    %1094 = vector.multi_reduction <add>, %1093, %cst_366 [1] : vector<8x8xf32> to vector<8xf32>
    %1095 = vector.shape_cast %1094 : vector<8xf32> to vector<8x1xf32>
    %1096 = tpu.reciprocal %1095 {approx = true} : vector<8x1xf32> -> vector<8x1xf32>
    %1097 = vector.broadcast %1096 : vector<8x1xf32> to vector<8x8xf32>
    %1098 = arith.mulf %1093, %1097 : vector<8x8xf32>
    %cst_367 = arith.constant dense<0.000000e+00> : vector<8x16xf32>
    %1099 = tpu.matmul %1098, %1084, %cst_367 {dimension_numbers = #tpu.dot_dimension_numbers<[1], [0], [0], [1], [0, 0, 1, 1], [], []>} : vector<8x8xf32>, vector<8x16xf32>, vector<8x16xf32> -> vector<8x16xf32>
    %1100 = arith.truncf %1099 : vector<8x16xf32> to vector<8x16xbf16>
    %1101 = vector.extract_strided_slice %893 {offsets = [0, 0], sizes = [16, 128], strides = [1, 1]} : vector<128x128xbf16> to vector<16x128xbf16>
    %cst_368 = arith.constant dense<0.000000e+00> : vector<8x128xf32>
    %1102 = tpu.matmul %1100, %1101, %cst_368 {dimension_numbers = #tpu.dot_dimension_numbers<[1], [0], [0], [1], [0, 0, 1, 1], [], []>} : vector<8x16xbf16>, vector<16x128xbf16>, vector<8x128xf32> -> vector<8x128xf32>
    %1103 = arith.addf %1081, %1102 : vector<8x128xf32>
    %1104 = vector.extract_strided_slice %903 {offsets = [8, 16], sizes = [8, 16], strides = [1, 1]} : vector<16x384xf32> to vector<8x16xf32>
    %1105 = vector.extract_strided_slice %903 {offsets = [8, 144], sizes = [8, 16], strides = [1, 1]} : vector<16x384xf32> to vector<8x16xf32>
    %1106 = vector.extract_strided_slice %903 {offsets = [8, 272], sizes = [8, 16], strides = [1, 1]} : vector<16x384xf32> to vector<8x16xf32>
    %1107 = tpu.transpose %1105, [1, 0] : vector<8x16xf32> -> vector<16x8xf32>
    %cst_369 = arith.constant dense<0.000000e+00> : vector<8x8xf32>
    %1108 = tpu.matmul %1104, %1107, %cst_369 {dimension_numbers = #tpu.dot_dimension_numbers<[1], [0], [0], [1], [0, 0, 1, 1], [], []>} : vector<8x16xf32>, vector<16x8xf32>, vector<8x8xf32> -> vector<8x8xf32>
    %cst_370 = arith.constant 2.500000e-01 : f32
    %1109 = vector.broadcast %cst_370 : f32 to vector<8x8xf32>
    %1110 = arith.mulf %1108, %1109 : vector<8x8xf32>
    %cst_371 = arith.constant dense<0xFF800000> : vector<8xf32>
    %1111 = vector.multi_reduction <maximumf>, %1110, %cst_371 [1] : vector<8x8xf32> to vector<8xf32>
    %1112 = vector.shape_cast %1111 : vector<8xf32> to vector<8x1xf32>
    %1113 = vector.broadcast %1112 : vector<8x1xf32> to vector<8x8xf32>
    %1114 = arith.subf %1110, %1113 : vector<8x8xf32>
    %1115 = math.exp %1114 : vector<8x8xf32>
    %cst_372 = arith.constant dense<0.000000e+00> : vector<8xf32>
    %1116 = vector.multi_reduction <add>, %1115, %cst_372 [1] : vector<8x8xf32> to vector<8xf32>
    %1117 = vector.shape_cast %1116 : vector<8xf32> to vector<8x1xf32>
    %1118 = tpu.reciprocal %1117 {approx = true} : vector<8x1xf32> -> vector<8x1xf32>
    %1119 = vector.broadcast %1118 : vector<8x1xf32> to vector<8x8xf32>
    %1120 = arith.mulf %1115, %1119 : vector<8x8xf32>
    %cst_373 = arith.constant dense<0.000000e+00> : vector<8x16xf32>
    %1121 = tpu.matmul %1120, %1106, %cst_373 {dimension_numbers = #tpu.dot_dimension_numbers<[1], [0], [0], [1], [0, 0, 1, 1], [], []>} : vector<8x8xf32>, vector<8x16xf32>, vector<8x16xf32> -> vector<8x16xf32>
    %1122 = arith.truncf %1121 : vector<8x16xf32> to vector<8x16xbf16>
    %1123 = vector.extract_strided_slice %893 {offsets = [16, 0], sizes = [16, 128], strides = [1, 1]} : vector<128x128xbf16> to vector<16x128xbf16>
    %cst_374 = arith.constant dense<0.000000e+00> : vector<8x128xf32>
    %1124 = tpu.matmul %1122, %1123, %cst_374 {dimension_numbers = #tpu.dot_dimension_numbers<[1], [0], [0], [1], [0, 0, 1, 1], [], []>} : vector<8x16xbf16>, vector<16x128xbf16>, vector<8x128xf32> -> vector<8x128xf32>
    %1125 = arith.addf %1103, %1124 : vector<8x128xf32>
    %1126 = vector.extract_strided_slice %903 {offsets = [8, 32], sizes = [8, 16], strides = [1, 1]} : vector<16x384xf32> to vector<8x16xf32>
    %1127 = vector.extract_strided_slice %903 {offsets = [8, 160], sizes = [8, 16], strides = [1, 1]} : vector<16x384xf32> to vector<8x16xf32>
    %1128 = vector.extract_strided_slice %903 {offsets = [8, 288], sizes = [8, 16], strides = [1, 1]} : vector<16x384xf32> to vector<8x16xf32>
    %1129 = tpu.transpose %1127, [1, 0] : vector<8x16xf32> -> vector<16x8xf32>
    %cst_375 = arith.constant dense<0.000000e+00> : vector<8x8xf32>
    %1130 = tpu.matmul %1126, %1129, %cst_375 {dimension_numbers = #tpu.dot_dimension_numbers<[1], [0], [0], [1], [0, 0, 1, 1], [], []>} : vector<8x16xf32>, vector<16x8xf32>, vector<8x8xf32> -> vector<8x8xf32>
    %cst_376 = arith.constant 2.500000e-01 : f32
    %1131 = vector.broadcast %cst_376 : f32 to vector<8x8xf32>
    %1132 = arith.mulf %1130, %1131 : vector<8x8xf32>
    %cst_377 = arith.constant dense<0xFF800000> : vector<8xf32>
    %1133 = vector.multi_reduction <maximumf>, %1132, %cst_377 [1] : vector<8x8xf32> to vector<8xf32>
    %1134 = vector.shape_cast %1133 : vector<8xf32> to vector<8x1xf32>
    %1135 = vector.broadcast %1134 : vector<8x1xf32> to vector<8x8xf32>
    %1136 = arith.subf %1132, %1135 : vector<8x8xf32>
    %1137 = math.exp %1136 : vector<8x8xf32>
    %cst_378 = arith.constant dense<0.000000e+00> : vector<8xf32>
    %1138 = vector.multi_reduction <add>, %1137, %cst_378 [1] : vector<8x8xf32> to vector<8xf32>
    %1139 = vector.shape_cast %1138 : vector<8xf32> to vector<8x1xf32>
    %1140 = tpu.reciprocal %1139 {approx = true} : vector<8x1xf32> -> vector<8x1xf32>
    %1141 = vector.broadcast %1140 : vector<8x1xf32> to vector<8x8xf32>
    %1142 = arith.mulf %1137, %1141 : vector<8x8xf32>
    %cst_379 = arith.constant dense<0.000000e+00> : vector<8x16xf32>
    %1143 = tpu.matmul %1142, %1128, %cst_379 {dimension_numbers = #tpu.dot_dimension_numbers<[1], [0], [0], [1], [0, 0, 1, 1], [], []>} : vector<8x8xf32>, vector<8x16xf32>, vector<8x16xf32> -> vector<8x16xf32>
    %1144 = arith.truncf %1143 : vector<8x16xf32> to vector<8x16xbf16>
    %1145 = vector.extract_strided_slice %893 {offsets = [32, 0], sizes = [16, 128], strides = [1, 1]} : vector<128x128xbf16> to vector<16x128xbf16>
    %cst_380 = arith.constant dense<0.000000e+00> : vector<8x128xf32>
    %1146 = tpu.matmul %1144, %1145, %cst_380 {dimension_numbers = #tpu.dot_dimension_numbers<[1], [0], [0], [1], [0, 0, 1, 1], [], []>} : vector<8x16xbf16>, vector<16x128xbf16>, vector<8x128xf32> -> vector<8x128xf32>
    %1147 = arith.addf %1125, %1146 : vector<8x128xf32>
    %1148 = vector.extract_strided_slice %903 {offsets = [8, 48], sizes = [8, 16], strides = [1, 1]} : vector<16x384xf32> to vector<8x16xf32>
    %1149 = vector.extract_strided_slice %903 {offsets = [8, 176], sizes = [8, 16], strides = [1, 1]} : vector<16x384xf32> to vector<8x16xf32>
    %1150 = vector.extract_strided_slice %903 {offsets = [8, 304], sizes = [8, 16], strides = [1, 1]} : vector<16x384xf32> to vector<8x16xf32>
    %1151 = tpu.transpose %1149, [1, 0] : vector<8x16xf32> -> vector<16x8xf32>
    %cst_381 = arith.constant dense<0.000000e+00> : vector<8x8xf32>
    %1152 = tpu.matmul %1148, %1151, %cst_381 {dimension_numbers = #tpu.dot_dimension_numbers<[1], [0], [0], [1], [0, 0, 1, 1], [], []>} : vector<8x16xf32>, vector<16x8xf32>, vector<8x8xf32> -> vector<8x8xf32>
    %cst_382 = arith.constant 2.500000e-01 : f32
    %1153 = vector.broadcast %cst_382 : f32 to vector<8x8xf32>
    %1154 = arith.mulf %1152, %1153 : vector<8x8xf32>
    %cst_383 = arith.constant dense<0xFF800000> : vector<8xf32>
    %1155 = vector.multi_reduction <maximumf>, %1154, %cst_383 [1] : vector<8x8xf32> to vector<8xf32>
    %1156 = vector.shape_cast %1155 : vector<8xf32> to vector<8x1xf32>
    %1157 = vector.broadcast %1156 : vector<8x1xf32> to vector<8x8xf32>
    %1158 = arith.subf %1154, %1157 : vector<8x8xf32>
    %1159 = math.exp %1158 : vector<8x8xf32>
    %cst_384 = arith.constant dense<0.000000e+00> : vector<8xf32>
    %1160 = vector.multi_reduction <add>, %1159, %cst_384 [1] : vector<8x8xf32> to vector<8xf32>
    %1161 = vector.shape_cast %1160 : vector<8xf32> to vector<8x1xf32>
    %1162 = tpu.reciprocal %1161 {approx = true} : vector<8x1xf32> -> vector<8x1xf32>
    %1163 = vector.broadcast %1162 : vector<8x1xf32> to vector<8x8xf32>
    %1164 = arith.mulf %1159, %1163 : vector<8x8xf32>
    %cst_385 = arith.constant dense<0.000000e+00> : vector<8x16xf32>
    %1165 = tpu.matmul %1164, %1150, %cst_385 {dimension_numbers = #tpu.dot_dimension_numbers<[1], [0], [0], [1], [0, 0, 1, 1], [], []>} : vector<8x8xf32>, vector<8x16xf32>, vector<8x16xf32> -> vector<8x16xf32>
    %1166 = arith.truncf %1165 : vector<8x16xf32> to vector<8x16xbf16>
    %1167 = vector.extract_strided_slice %893 {offsets = [48, 0], sizes = [16, 128], strides = [1, 1]} : vector<128x128xbf16> to vector<16x128xbf16>
    %cst_386 = arith.constant dense<0.000000e+00> : vector<8x128xf32>
    %1168 = tpu.matmul %1166, %1167, %cst_386 {dimension_numbers = #tpu.dot_dimension_numbers<[1], [0], [0], [1], [0, 0, 1, 1], [], []>} : vector<8x16xbf16>, vector<16x128xbf16>, vector<8x128xf32> -> vector<8x128xf32>
    %1169 = arith.addf %1147, %1168 : vector<8x128xf32>
    %1170 = vector.extract_strided_slice %903 {offsets = [8, 64], sizes = [8, 16], strides = [1, 1]} : vector<16x384xf32> to vector<8x16xf32>
    %1171 = vector.extract_strided_slice %903 {offsets = [8, 192], sizes = [8, 16], strides = [1, 1]} : vector<16x384xf32> to vector<8x16xf32>
    %1172 = vector.extract_strided_slice %903 {offsets = [8, 320], sizes = [8, 16], strides = [1, 1]} : vector<16x384xf32> to vector<8x16xf32>
    %1173 = tpu.transpose %1171, [1, 0] : vector<8x16xf32> -> vector<16x8xf32>
    %cst_387 = arith.constant dense<0.000000e+00> : vector<8x8xf32>
    %1174 = tpu.matmul %1170, %1173, %cst_387 {dimension_numbers = #tpu.dot_dimension_numbers<[1], [0], [0], [1], [0, 0, 1, 1], [], []>} : vector<8x16xf32>, vector<16x8xf32>, vector<8x8xf32> -> vector<8x8xf32>
    %cst_388 = arith.constant 2.500000e-01 : f32
    %1175 = vector.broadcast %cst_388 : f32 to vector<8x8xf32>
    %1176 = arith.mulf %1174, %1175 : vector<8x8xf32>
    %cst_389 = arith.constant dense<0xFF800000> : vector<8xf32>
    %1177 = vector.multi_reduction <maximumf>, %1176, %cst_389 [1] : vector<8x8xf32> to vector<8xf32>
    %1178 = vector.shape_cast %1177 : vector<8xf32> to vector<8x1xf32>
    %1179 = vector.broadcast %1178 : vector<8x1xf32> to vector<8x8xf32>
    %1180 = arith.subf %1176, %1179 : vector<8x8xf32>
    %1181 = math.exp %1180 : vector<8x8xf32>
    %cst_390 = arith.constant dense<0.000000e+00> : vector<8xf32>
    %1182 = vector.multi_reduction <add>, %1181, %cst_390 [1] : vector<8x8xf32> to vector<8xf32>
    %1183 = vector.shape_cast %1182 : vector<8xf32> to vector<8x1xf32>
    %1184 = tpu.reciprocal %1183 {approx = true} : vector<8x1xf32> -> vector<8x1xf32>
    %1185 = vector.broadcast %1184 : vector<8x1xf32> to vector<8x8xf32>
    %1186 = arith.mulf %1181, %1185 : vector<8x8xf32>
    %cst_391 = arith.constant dense<0.000000e+00> : vector<8x16xf32>
    %1187 = tpu.matmul %1186, %1172, %cst_391 {dimension_numbers = #tpu.dot_dimension_numbers<[1], [0], [0], [1], [0, 0, 1, 1], [], []>} : vector<8x8xf32>, vector<8x16xf32>, vector<8x16xf32> -> vector<8x16xf32>
    %1188 = arith.truncf %1187 : vector<8x16xf32> to vector<8x16xbf16>
    %1189 = vector.extract_strided_slice %893 {offsets = [64, 0], sizes = [16, 128], strides = [1, 1]} : vector<128x128xbf16> to vector<16x128xbf16>
    %cst_392 = arith.constant dense<0.000000e+00> : vector<8x128xf32>
    %1190 = tpu.matmul %1188, %1189, %cst_392 {dimension_numbers = #tpu.dot_dimension_numbers<[1], [0], [0], [1], [0, 0, 1, 1], [], []>} : vector<8x16xbf16>, vector<16x128xbf16>, vector<8x128xf32> -> vector<8x128xf32>
    %1191 = arith.addf %1169, %1190 : vector<8x128xf32>
    %1192 = vector.extract_strided_slice %903 {offsets = [8, 80], sizes = [8, 16], strides = [1, 1]} : vector<16x384xf32> to vector<8x16xf32>
    %1193 = vector.extract_strided_slice %903 {offsets = [8, 208], sizes = [8, 16], strides = [1, 1]} : vector<16x384xf32> to vector<8x16xf32>
    %1194 = vector.extract_strided_slice %903 {offsets = [8, 336], sizes = [8, 16], strides = [1, 1]} : vector<16x384xf32> to vector<8x16xf32>
    %1195 = tpu.transpose %1193, [1, 0] : vector<8x16xf32> -> vector<16x8xf32>
    %cst_393 = arith.constant dense<0.000000e+00> : vector<8x8xf32>
    %1196 = tpu.matmul %1192, %1195, %cst_393 {dimension_numbers = #tpu.dot_dimension_numbers<[1], [0], [0], [1], [0, 0, 1, 1], [], []>} : vector<8x16xf32>, vector<16x8xf32>, vector<8x8xf32> -> vector<8x8xf32>
    %cst_394 = arith.constant 2.500000e-01 : f32
    %1197 = vector.broadcast %cst_394 : f32 to vector<8x8xf32>
    %1198 = arith.mulf %1196, %1197 : vector<8x8xf32>
    %cst_395 = arith.constant dense<0xFF800000> : vector<8xf32>
    %1199 = vector.multi_reduction <maximumf>, %1198, %cst_395 [1] : vector<8x8xf32> to vector<8xf32>
    %1200 = vector.shape_cast %1199 : vector<8xf32> to vector<8x1xf32>
    %1201 = vector.broadcast %1200 : vector<8x1xf32> to vector<8x8xf32>
    %1202 = arith.subf %1198, %1201 : vector<8x8xf32>
    %1203 = math.exp %1202 : vector<8x8xf32>
    %cst_396 = arith.constant dense<0.000000e+00> : vector<8xf32>
    %1204 = vector.multi_reduction <add>, %1203, %cst_396 [1] : vector<8x8xf32> to vector<8xf32>
    %1205 = vector.shape_cast %1204 : vector<8xf32> to vector<8x1xf32>
    %1206 = tpu.reciprocal %1205 {approx = true} : vector<8x1xf32> -> vector<8x1xf32>
    %1207 = vector.broadcast %1206 : vector<8x1xf32> to vector<8x8xf32>
    %1208 = arith.mulf %1203, %1207 : vector<8x8xf32>
    %cst_397 = arith.constant dense<0.000000e+00> : vector<8x16xf32>
    %1209 = tpu.matmul %1208, %1194, %cst_397 {dimension_numbers = #tpu.dot_dimension_numbers<[1], [0], [0], [1], [0, 0, 1, 1], [], []>} : vector<8x8xf32>, vector<8x16xf32>, vector<8x16xf32> -> vector<8x16xf32>
    %1210 = arith.truncf %1209 : vector<8x16xf32> to vector<8x16xbf16>
    %1211 = vector.extract_strided_slice %893 {offsets = [80, 0], sizes = [16, 128], strides = [1, 1]} : vector<128x128xbf16> to vector<16x128xbf16>
    %cst_398 = arith.constant dense<0.000000e+00> : vector<8x128xf32>
    %1212 = tpu.matmul %1210, %1211, %cst_398 {dimension_numbers = #tpu.dot_dimension_numbers<[1], [0], [0], [1], [0, 0, 1, 1], [], []>} : vector<8x16xbf16>, vector<16x128xbf16>, vector<8x128xf32> -> vector<8x128xf32>
    %1213 = arith.addf %1191, %1212 : vector<8x128xf32>
    %1214 = vector.extract_strided_slice %903 {offsets = [8, 96], sizes = [8, 16], strides = [1, 1]} : vector<16x384xf32> to vector<8x16xf32>
    %1215 = vector.extract_strided_slice %903 {offsets = [8, 224], sizes = [8, 16], strides = [1, 1]} : vector<16x384xf32> to vector<8x16xf32>
    %1216 = vector.extract_strided_slice %903 {offsets = [8, 352], sizes = [8, 16], strides = [1, 1]} : vector<16x384xf32> to vector<8x16xf32>
    %1217 = tpu.transpose %1215, [1, 0] : vector<8x16xf32> -> vector<16x8xf32>
    %cst_399 = arith.constant dense<0.000000e+00> : vector<8x8xf32>
    %1218 = tpu.matmul %1214, %1217, %cst_399 {dimension_numbers = #tpu.dot_dimension_numbers<[1], [0], [0], [1], [0, 0, 1, 1], [], []>} : vector<8x16xf32>, vector<16x8xf32>, vector<8x8xf32> -> vector<8x8xf32>
    %cst_400 = arith.constant 2.500000e-01 : f32
    %1219 = vector.broadcast %cst_400 : f32 to vector<8x8xf32>
    %1220 = arith.mulf %1218, %1219 : vector<8x8xf32>
    %cst_401 = arith.constant dense<0xFF800000> : vector<8xf32>
    %1221 = vector.multi_reduction <maximumf>, %1220, %cst_401 [1] : vector<8x8xf32> to vector<8xf32>
    %1222 = vector.shape_cast %1221 : vector<8xf32> to vector<8x1xf32>
    %1223 = vector.broadcast %1222 : vector<8x1xf32> to vector<8x8xf32>
    %1224 = arith.subf %1220, %1223 : vector<8x8xf32>
    %1225 = math.exp %1224 : vector<8x8xf32>
    %cst_402 = arith.constant dense<0.000000e+00> : vector<8xf32>
    %1226 = vector.multi_reduction <add>, %1225, %cst_402 [1] : vector<8x8xf32> to vector<8xf32>
    %1227 = vector.shape_cast %1226 : vector<8xf32> to vector<8x1xf32>
    %1228 = tpu.reciprocal %1227 {approx = true} : vector<8x1xf32> -> vector<8x1xf32>
    %1229 = vector.broadcast %1228 : vector<8x1xf32> to vector<8x8xf32>
    %1230 = arith.mulf %1225, %1229 : vector<8x8xf32>
    %cst_403 = arith.constant dense<0.000000e+00> : vector<8x16xf32>
    %1231 = tpu.matmul %1230, %1216, %cst_403 {dimension_numbers = #tpu.dot_dimension_numbers<[1], [0], [0], [1], [0, 0, 1, 1], [], []>} : vector<8x8xf32>, vector<8x16xf32>, vector<8x16xf32> -> vector<8x16xf32>
    %1232 = arith.truncf %1231 : vector<8x16xf32> to vector<8x16xbf16>
    %1233 = vector.extract_strided_slice %893 {offsets = [96, 0], sizes = [16, 128], strides = [1, 1]} : vector<128x128xbf16> to vector<16x128xbf16>
    %cst_404 = arith.constant dense<0.000000e+00> : vector<8x128xf32>
    %1234 = tpu.matmul %1232, %1233, %cst_404 {dimension_numbers = #tpu.dot_dimension_numbers<[1], [0], [0], [1], [0, 0, 1, 1], [], []>} : vector<8x16xbf16>, vector<16x128xbf16>, vector<8x128xf32> -> vector<8x128xf32>
    %1235 = arith.addf %1213, %1234 : vector<8x128xf32>
    %1236 = vector.extract_strided_slice %903 {offsets = [8, 112], sizes = [8, 16], strides = [1, 1]} : vector<16x384xf32> to vector<8x16xf32>
    %1237 = vector.extract_strided_slice %903 {offsets = [8, 240], sizes = [8, 16], strides = [1, 1]} : vector<16x384xf32> to vector<8x16xf32>
    %1238 = vector.extract_strided_slice %903 {offsets = [8, 368], sizes = [8, 16], strides = [1, 1]} : vector<16x384xf32> to vector<8x16xf32>
    %1239 = tpu.transpose %1237, [1, 0] : vector<8x16xf32> -> vector<16x8xf32>
    %cst_405 = arith.constant dense<0.000000e+00> : vector<8x8xf32>
    %1240 = tpu.matmul %1236, %1239, %cst_405 {dimension_numbers = #tpu.dot_dimension_numbers<[1], [0], [0], [1], [0, 0, 1, 1], [], []>} : vector<8x16xf32>, vector<16x8xf32>, vector<8x8xf32> -> vector<8x8xf32>
    %cst_406 = arith.constant 2.500000e-01 : f32
    %1241 = vector.broadcast %cst_406 : f32 to vector<8x8xf32>
    %1242 = arith.mulf %1240, %1241 : vector<8x8xf32>
    %cst_407 = arith.constant dense<0xFF800000> : vector<8xf32>
    %1243 = vector.multi_reduction <maximumf>, %1242, %cst_407 [1] : vector<8x8xf32> to vector<8xf32>
    %1244 = vector.shape_cast %1243 : vector<8xf32> to vector<8x1xf32>
    %1245 = vector.broadcast %1244 : vector<8x1xf32> to vector<8x8xf32>
    %1246 = arith.subf %1242, %1245 : vector<8x8xf32>
    %1247 = math.exp %1246 : vector<8x8xf32>
    %cst_408 = arith.constant dense<0.000000e+00> : vector<8xf32>
    %1248 = vector.multi_reduction <add>, %1247, %cst_408 [1] : vector<8x8xf32> to vector<8xf32>
    %1249 = vector.shape_cast %1248 : vector<8xf32> to vector<8x1xf32>
    %1250 = tpu.reciprocal %1249 {approx = true} : vector<8x1xf32> -> vector<8x1xf32>
    %1251 = vector.broadcast %1250 : vector<8x1xf32> to vector<8x8xf32>
    %1252 = arith.mulf %1247, %1251 : vector<8x8xf32>
    %cst_409 = arith.constant dense<0.000000e+00> : vector<8x16xf32>
    %1253 = tpu.matmul %1252, %1238, %cst_409 {dimension_numbers = #tpu.dot_dimension_numbers<[1], [0], [0], [1], [0, 0, 1, 1], [], []>} : vector<8x8xf32>, vector<8x16xf32>, vector<8x16xf32> -> vector<8x16xf32>
    %1254 = arith.truncf %1253 : vector<8x16xf32> to vector<8x16xbf16>
    %1255 = vector.extract_strided_slice %893 {offsets = [112, 0], sizes = [16, 128], strides = [1, 1]} : vector<128x128xbf16> to vector<16x128xbf16>
    %cst_410 = arith.constant dense<0.000000e+00> : vector<8x128xf32>
    %1256 = tpu.matmul %1254, %1255, %cst_410 {dimension_numbers = #tpu.dot_dimension_numbers<[1], [0], [0], [1], [0, 0, 1, 1], [], []>} : vector<8x16xbf16>, vector<16x128xbf16>, vector<8x128xf32> -> vector<8x128xf32>
    %1257 = arith.addf %1235, %1256 : vector<8x128xf32>
    %1258 = tpu.concatenate %1080, %1257 in 0 : vector<8x128xf32>, vector<8x128xf32> -> vector<16x128xf32>
    %c2_411 = arith.constant 2 : index
    %c0_412 = arith.constant 0 : index
    %c0_413 = arith.constant 0 : index
    %1259 = vector.load %arg6[%c2_411, %c0_412, %c0_413] : memref<3x1x128xf32, #tpu.memory_space<vmem>>, vector<1x1x128xf32>
    %1260 = vector.shape_cast %1259 : vector<1x1x128xf32> to vector<1x128xf32>
    %1261 = vector.broadcast %1260 : vector<1x128xf32> to vector<16x128xf32>
    %1262 = arith.addf %1258, %1261 : vector<16x128xf32>
    %1263 = arith.addf %889, %1262 : vector<16x128xf32>
    %c2_414 = arith.constant 2 : index
    %c0_415 = arith.constant 0 : index
    %c0_416 = arith.constant 0 : index
    %1264 = vector.load %arg7[%c2_414, %c0_415, %c0_416] : memref<3x1x128xf32, #tpu.memory_space<vmem>>, vector<1x1x128xf32>
    %1265 = vector.shape_cast %1264 : vector<1x1x128xf32> to vector<1x128xf32>
    %c2_417 = arith.constant 2 : index
    %c0_418 = arith.constant 0 : index
    %c0_419 = arith.constant 0 : index
    %1266 = vector.load %arg8[%c2_417, %c0_418, %c0_419] : memref<3x1x128xf32, #tpu.memory_space<vmem>>, vector<1x1x128xf32>
    %1267 = vector.shape_cast %1266 : vector<1x1x128xf32> to vector<1x128xf32>
    %cst_420 = arith.constant dense<0.000000e+00> : vector<16xf32>
    %1268 = vector.multi_reduction <add>, %1263, %cst_420 [1] : vector<16x128xf32> to vector<16xf32>
    %1269 = vector.shape_cast %1268 : vector<16xf32> to vector<16x1xf32>
    %cst_421 = arith.constant 1.280000e+02 : f32
    %1270 = vector.broadcast %cst_421 : f32 to vector<16x1xf32>
    %1271 = arith.divf %1269, %1270 : vector<16x1xf32>
    %1272 = vector.broadcast %1271 : vector<16x1xf32> to vector<16x128xf32>
    %1273 = arith.subf %1263, %1272 : vector<16x128xf32>
    %1274 = arith.mulf %1273, %1273 : vector<16x128xf32>
    %cst_422 = arith.constant dense<0.000000e+00> : vector<16xf32>
    %1275 = vector.multi_reduction <add>, %1274, %cst_422 [1] : vector<16x128xf32> to vector<16xf32>
    %1276 = vector.shape_cast %1275 : vector<16xf32> to vector<16x1xf32>
    %cst_423 = arith.constant 1.280000e+02 : f32
    %1277 = vector.broadcast %cst_423 : f32 to vector<16x1xf32>
    %1278 = arith.divf %1276, %1277 : vector<16x1xf32>
    %1279 = vector.broadcast %1271 : vector<16x1xf32> to vector<16x128xf32>
    %1280 = arith.subf %1263, %1279 : vector<16x128xf32>
    %cst_424 = arith.constant 9.99999974E-6 : f32
    %1281 = vector.broadcast %cst_424 : f32 to vector<16x1xf32>
    %1282 = arith.addf %1278, %1281 : vector<16x1xf32>
    %1283 = math.rsqrt %1282 : vector<16x1xf32>
    %1284 = vector.broadcast %1283 : vector<16x1xf32> to vector<16x128xf32>
    %1285 = arith.mulf %1280, %1284 : vector<16x128xf32>
    %1286 = vector.broadcast %1265 : vector<1x128xf32> to vector<16x128xf32>
    %1287 = arith.mulf %1285, %1286 : vector<16x128xf32>
    %1288 = vector.broadcast %1267 : vector<1x128xf32> to vector<16x128xf32>
    %1289 = arith.addf %1287, %1288 : vector<16x128xf32>
    %1290 = arith.truncf %1289 : vector<16x128xf32> to vector<16x128xbf16>
    %cst_425 = arith.constant dense<0.000000e+00> : vector<16x512xf32>
    %1291 = tpu.matmul %1290, %895, %cst_425 {dimension_numbers = #tpu.dot_dimension_numbers<[1], [0], [0], [1], [0, 0, 1, 1], [], []>} : vector<16x128xbf16>, vector<128x512xbf16>, vector<16x512xf32> -> vector<16x512xf32>
    %c2_426 = arith.constant 2 : index
    %c0_427 = arith.constant 0 : index
    %c0_428 = arith.constant 0 : index
    %1292 = vector.load %arg10[%c2_426, %c0_427, %c0_428] : memref<3x1x512xf32, #tpu.memory_space<vmem>>, vector<1x1x512xf32>
    %1293 = vector.shape_cast %1292 : vector<1x1x512xf32> to vector<1x512xf32>
    %1294 = vector.broadcast %1293 : vector<1x512xf32> to vector<16x512xf32>
    %1295 = arith.addf %1291, %1294 : vector<16x512xf32>
    %cst_429 = arith.constant 0.000000e+00 : f32
    %1296 = vector.broadcast %cst_429 : f32 to vector<16x512xf32>
    %1297 = arith.maximumf %1295, %1296 : vector<16x512xf32>
    %1298 = arith.truncf %1297 : vector<16x512xf32> to vector<16x512xbf16>
    %cst_430 = arith.constant dense<0.000000e+00> : vector<16x128xf32>
    %1299 = tpu.matmul %1298, %897, %cst_430 {dimension_numbers = #tpu.dot_dimension_numbers<[1], [0], [0], [1], [0, 0, 1, 1], [], []>} : vector<16x512xbf16>, vector<512x128xbf16>, vector<16x128xf32> -> vector<16x128xf32>
    %c2_431 = arith.constant 2 : index
    %c0_432 = arith.constant 0 : index
    %c0_433 = arith.constant 0 : index
    %1300 = vector.load %arg12[%c2_431, %c0_432, %c0_433] : memref<3x1x128xf32, #tpu.memory_space<vmem>>, vector<1x1x128xf32>
    %1301 = vector.shape_cast %1300 : vector<1x1x128xf32> to vector<1x128xf32>
    %1302 = vector.broadcast %1301 : vector<1x128xf32> to vector<16x128xf32>
    %1303 = arith.addf %1299, %1302 : vector<16x128xf32>
    %1304 = arith.addf %1289, %1303 : vector<16x128xf32>
    %c2_434 = arith.constant 2 : index
    %c0_435 = arith.constant 0 : index
    %c0_436 = arith.constant 0 : index
    %1305 = vector.load %arg13[%c2_434, %c0_435, %c0_436] : memref<3x1x128xf32, #tpu.memory_space<vmem>>, vector<1x1x128xf32>
    %1306 = vector.shape_cast %1305 : vector<1x1x128xf32> to vector<1x128xf32>
    %c2_437 = arith.constant 2 : index
    %c0_438 = arith.constant 0 : index
    %c0_439 = arith.constant 0 : index
    %1307 = vector.load %arg14[%c2_437, %c0_438, %c0_439] : memref<3x1x128xf32, #tpu.memory_space<vmem>>, vector<1x1x128xf32>
    %1308 = vector.shape_cast %1307 : vector<1x1x128xf32> to vector<1x128xf32>
    %cst_440 = arith.constant dense<0.000000e+00> : vector<16xf32>
    %1309 = vector.multi_reduction <add>, %1304, %cst_440 [1] : vector<16x128xf32> to vector<16xf32>
    %1310 = vector.shape_cast %1309 : vector<16xf32> to vector<16x1xf32>
    %cst_441 = arith.constant 1.280000e+02 : f32
    %1311 = vector.broadcast %cst_441 : f32 to vector<16x1xf32>
    %1312 = arith.divf %1310, %1311 : vector<16x1xf32>
    %1313 = vector.broadcast %1312 : vector<16x1xf32> to vector<16x128xf32>
    %1314 = arith.subf %1304, %1313 : vector<16x128xf32>
    %1315 = arith.mulf %1314, %1314 : vector<16x128xf32>
    %cst_442 = arith.constant dense<0.000000e+00> : vector<16xf32>
    %1316 = vector.multi_reduction <add>, %1315, %cst_442 [1] : vector<16x128xf32> to vector<16xf32>
    %1317 = vector.shape_cast %1316 : vector<16xf32> to vector<16x1xf32>
    %cst_443 = arith.constant 1.280000e+02 : f32
    %1318 = vector.broadcast %cst_443 : f32 to vector<16x1xf32>
    %1319 = arith.divf %1317, %1318 : vector<16x1xf32>
    %1320 = vector.broadcast %1312 : vector<16x1xf32> to vector<16x128xf32>
    %1321 = arith.subf %1304, %1320 : vector<16x128xf32>
    %cst_444 = arith.constant 9.99999974E-6 : f32
    %1322 = vector.broadcast %cst_444 : f32 to vector<16x1xf32>
    %1323 = arith.addf %1319, %1322 : vector<16x1xf32>
    %1324 = math.rsqrt %1323 : vector<16x1xf32>
    %1325 = vector.broadcast %1324 : vector<16x1xf32> to vector<16x128xf32>
    %1326 = arith.mulf %1321, %1325 : vector<16x128xf32>
    %1327 = vector.broadcast %1306 : vector<1x128xf32> to vector<16x128xf32>
    %1328 = arith.mulf %1326, %1327 : vector<16x128xf32>
    %1329 = vector.broadcast %1308 : vector<1x128xf32> to vector<16x128xf32>
    %1330 = arith.addf %1328, %1329 : vector<16x128xf32>
    %1331 = arith.truncf %1330 : vector<16x128xf32> to vector<16x128xbf16>
    %c0_445 = arith.constant 0 : index
    %c0_446 = arith.constant 0 : index
    %1332 = vector.load %arg15[%c0_445, %c0_446] : memref<128x128xbf16, #tpu.memory_space<vmem>>, vector<128x128xbf16>
    %cst_447 = arith.constant dense<0.000000e+00> : vector<16x128xf32>
    %1333 = tpu.matmul %1331, %1332, %cst_447 {dimension_numbers = #tpu.dot_dimension_numbers<[1], [0], [0], [1], [0, 0, 1, 1], [], []>} : vector<16x128xbf16>, vector<128x128xbf16>, vector<16x128xf32> -> vector<16x128xf32>
    %c0_448 = arith.constant 0 : index
    %c0_449 = arith.constant 0 : index
    %1334 = vector.load %arg16[%c0_448, %c0_449] : memref<1x128xf32, #tpu.memory_space<vmem>>, vector<1x128xf32>
    %1335 = vector.broadcast %1334 : vector<1x128xf32> to vector<16x128xf32>
    %1336 = arith.addf %1333, %1335 : vector<16x128xf32>
    %c0_450 = arith.constant 0 : index
    %c0_451 = arith.constant 0 : index
    %1337 = vector.load %arg17[%c0_450, %c0_451] : memref<16x128xf32, #tpu.memory_space<vmem>>, vector<16x128xf32>
    tpu.vector_store %arg17[%c0_450, %c0_451], %1336 {strides = array<i32>} : memref<16x128xf32, #tpu.memory_space<vmem>>, vector<16x128xf32>,
    return
  }
  func.func @transform_0(%arg0: i32) -> (i32, i32) {
    %c0_i32 = arith.constant 0 : i32
    %c0_i32_0 = arith.constant 0 : i32
    %c0_i32_1 = arith.constant 0 : i32
    return %c0_i32, %c0_i32_0 : i32, i32
  }
  func.func @transform_1(%arg0: i32) -> (i32, i32) {
    %c0_i32 = arith.constant 0 : i32
    %c0_i32_0 = arith.constant 0 : i32
    %c0_i32_1 = arith.constant 0 : i32
    return %c0_i32, %c0_i32_0 : i32, i32
  }
  func.func @transform_2(%arg0: i32) -> (i32, i32, i32) {
    %c0_i32 = arith.constant 0 : i32
    %c0_i32_0 = arith.constant 0 : i32
    %c0_i32_1 = arith.constant 0 : i32
    %c0_i32_2 = arith.constant 0 : i32
    return %c0_i32, %c0_i32_0, %c0_i32_1 : i32, i32, i32
  }
  func.func @transform_3(%arg0: i32) -> (i32, i32, i32) {
    %c0_i32 = arith.constant 0 : i32
    %c0_i32_0 = arith.constant 0 : i32
    %c0_i32_1 = arith.constant 0 : i32
    %c0_i32_2 = arith.constant 0 : i32
    return %c0_i32, %c0_i32_0, %c0_i32_1 : i32, i32, i32
  }
  func.func @transform_4(%arg0: i32) -> (i32, i32, i32) {
    %c0_i32 = arith.constant 0 : i32
    %c0_i32_0 = arith.constant 0 : i32
    %c0_i32_1 = arith.constant 0 : i32
    %c0_i32_2 = arith.constant 0 : i32
    return %c0_i32, %c0_i32_0, %c0_i32_1 : i32, i32, i32
  }
  func.func @transform_5(%arg0: i32) -> (i32, i32, i32) {
    %c0_i32 = arith.constant 0 : i32
    %c0_i32_0 = arith.constant 0 : i32
    %c0_i32_1 = arith.constant 0 : i32
    %c0_i32_2 = arith.constant 0 : i32
    return %c0_i32, %c0_i32_0, %c0_i32_1 : i32, i32, i32
  }
  func.func @transform_6(%arg0: i32) -> (i32, i32, i32) {
    %c0_i32 = arith.constant 0 : i32
    %c0_i32_0 = arith.constant 0 : i32
    %c0_i32_1 = arith.constant 0 : i32
    %c0_i32_2 = arith.constant 0 : i32
    return %c0_i32, %c0_i32_0, %c0_i32_1 : i32, i32, i32
  }
  func.func @transform_7(%arg0: i32) -> (i32, i32, i32) {
    %c0_i32 = arith.constant 0 : i32
    %c0_i32_0 = arith.constant 0 : i32
    %c0_i32_1 = arith.constant 0 : i32
    %c0_i32_2 = arith.constant 0 : i32
    return %c0_i32, %c0_i32_0, %c0_i32_1 : i32, i32, i32
  }
  func.func @transform_8(%arg0: i32) -> (i32, i32, i32) {
    %c0_i32 = arith.constant 0 : i32
    %c0_i32_0 = arith.constant 0 : i32
    %c0_i32_1 = arith.constant 0 : i32
    %c0_i32_2 = arith.constant 0 : i32
    return %c0_i32, %c0_i32_0, %c0_i32_1 : i32, i32, i32
  }
  func.func @transform_9(%arg0: i32) -> (i32, i32, i32) {
    %c0_i32 = arith.constant 0 : i32
    %c0_i32_0 = arith.constant 0 : i32
    %c0_i32_1 = arith.constant 0 : i32
    %c0_i32_2 = arith.constant 0 : i32
    return %c0_i32, %c0_i32_0, %c0_i32_1 : i32, i32, i32
  }
  func.func @transform_10(%arg0: i32) -> (i32, i32, i32) {
    %c0_i32 = arith.constant 0 : i32
    %c0_i32_0 = arith.constant 0 : i32
    %c0_i32_1 = arith.constant 0 : i32
    %c0_i32_2 = arith.constant 0 : i32
    return %c0_i32, %c0_i32_0, %c0_i32_1 : i32, i32, i32
  }
  func.func @transform_11(%arg0: i32) -> (i32, i32, i32) {
    %c0_i32 = arith.constant 0 : i32
    %c0_i32_0 = arith.constant 0 : i32
    %c0_i32_1 = arith.constant 0 : i32
    %c0_i32_2 = arith.constant 0 : i32
    return %c0_i32, %c0_i32_0, %c0_i32_1 : i32, i32, i32
  }
  func.func @transform_12(%arg0: i32) -> (i32, i32, i32) {
    %c0_i32 = arith.constant 0 : i32
    %c0_i32_0 = arith.constant 0 : i32
    %c0_i32_1 = arith.constant 0 : i32
    %c0_i32_2 = arith.constant 0 : i32
    return %c0_i32, %c0_i32_0, %c0_i32_1 : i32, i32, i32
  }
  func.func @transform_13(%arg0: i32) -> (i32, i32, i32) {
    %c0_i32 = arith.constant 0 : i32
    %c0_i32_0 = arith.constant 0 : i32
    %c0_i32_1 = arith.constant 0 : i32
    %c0_i32_2 = arith.constant 0 : i32
    return %c0_i32, %c0_i32_0, %c0_i32_1 : i32, i32, i32
  }
  func.func @transform_14(%arg0: i32) -> (i32, i32) {
    %c0_i32 = arith.constant 0 : i32
    %c0_i32_0 = arith.constant 0 : i32
    %c0_i32_1 = arith.constant 0 : i32
    return %c0_i32, %c0_i32_0 : i32, i32
  }
  func.func @transform_15(%arg0: i32) -> (i32, i32) {
    %c0_i32 = arith.constant 0 : i32
    %c0_i32_0 = arith.constant 0 : i32
    %c0_i32_1 = arith.constant 0 : i32
    return %c0_i32, %c0_i32_0 : i32, i32
  }
  func.func @transform_16(%arg0: i32) -> (i32, i32) {
    %c0_i32 = arith.constant 0 : i32
    %c0_i32_0 = arith.constant 0 : i32
    %c0_i32_1 = arith.constant 0 : i32
    return %c0_i32, %c0_i32_0 : i32, i32
  }
}

</mosaic_0001>

<bundles_post_ra>
// kernel: tpu_custom_call.1
= control target key start
LH: loop header
LB: loop body
LE: loop exit
PB: predicated region body
PF: predicated region fallthrough
CT: control target
= control target key end

     0   :  { %s18252_s0 = inlined_call_operand.vmem [shape: s32[16,1], index: 0, kind: input, shape index: {}]   ;;  %s18253_s1 = inlined_call_operand.hbm [shape: f32[64,128], index: 1, kind: input, shape index: {}]   ;;  %s18254_s2 = inlined_call_operand.hbm [shape: bf16[3,128,384], index: 2, kind: input, shape index: {}]   ;;  %s18255_s3 = inlined_call_operand.hbm [shape: f32[3,1,384], index: 3, kind: input, shape index: {}]   ;;  %s18256_s4 = inlined_call_operand.hbm [shape: bf16[3,128,128], index: 4, kind: input, shape index: {}]   ;;  %s18257_s5 = inlined_call_operand.vmem [shape: f32[3,1,128], index: 5, kind: input, shape index: {}]   ;;  %s18258_s6 = inlined_call_operand.hbm [shape: f32[3,1,128], index: 6, kind: input, shape index: {}]   ;;  %s18259_s7 = inlined_call_operand.hbm [shape: f32[3,1,128], index: 7, kind: input, shape index: {}]   ;;  %s18260_s8 = inlined_call_operand.hbm [shape: bf16[3,128,512], index: 8, kind: input, shape index: {}]   ;;  %s18261_s9 = inlined_call_operand.hbm [shape: f32[3,1,512], index: 9, kind: input, shape index: {}]   ;;  %s18262_s10 = inlined_call_operand.hbm [shape: bf16[3,512,128], index: 10, kind: input, shape index: {}]   ;;  %s18263_s11 = inlined_call_operand.hbm [shape: f32[3,1,128], index: 11, kind: input, shape index: {}]   ;;  %s18264_s12 = inlined_call_operand.hbm [shape: f32[3,1,128], index: 12, kind: input, shape index: {}]   ;;  %s18265_s13 = inlined_call_operand.hbm [shape: f32[3,1,128], index: 13, kind: input, shape index: {}]   ;;  %s18266_s14 = inlined_call_operand.vmem [shape: bf16[128,128], index: 14, kind: input, shape index: {}]   ;;  %s18267_s15 = inlined_call_operand.vmem [shape: f32[1,128], index: 15, kind: input, shape index: {}]   ;;  %s18268_s16 = inlined_call_operand.hbm [shape: f32[16,128], index: 16, kind: output, shape index: {}]  }
   0x1   :  { %18271 = sst [smem:[#allocation31_spill]] %s18252_s0 }
   0x2   :  { %21 = vsyncpa [#allocation3], 0 }
   0x3   :  { %22 = vsyncpa [#allocation6], 0 }
   0x4   :  { %23 = vsyncpa [#allocation9], 0 }
   0x5   :  { %24 = vsyncpa [#allocation12], 0 }
   0x6   :  { %25 = vsyncpa [#allocation15], 0 }
   0x7   :  { %26 = vsyncpa [#allocation18], 0 }
   0x8   :  { %27 = vsyncpa [#allocation21], 0 }
   0x9   :  { %28 = vsyncpa [#allocation4], 0  ;;  %s16592_s21 = smov [#allocation5]   ;;  %s16290_s25 = scalar_lea.hbm %s18254_s2, 9216 }
   0xa   :  { %s48_s22 = sshll.u32 %s16592_s21, 4  ;;  %p16291_p0 = scmp.ne.s32.totalorder %s18254_s2, %s16290_s25  ;;  %s49_s22 = int_to_ptr.vmem [resolvable:$true] %s48_s22 }
   0xb   :  { %p16294_p1 = scmp.lt.u32.totalorder %s16290_s25, %s18254_s2 }
   0xd   :  { %p16296_p2 = pnand %p16294_p1, %p16291_p0 }
   0xf   :  { %16299 = shalt.err (!%p16296_p2)
}
  0x10   :  { %s16300_s30 = scalar_lea.vmem %s49_s22, 9216  ;;  %p16305_p4 = scmp.lt.s32.totalorder %s49_s22, %s49_s22 }
  0x11   :  { %p16301_p3 = scmp.ne.s32.totalorder %s49_s22, %s16300_s30  ;;  %p16306_p5 = scmp.lt.s32.totalorder %s16300_s30, %s16300_s30 }
  0x13   :  { %p16307_p6 = por %p16306_p5, %p16305_p4 }
  0x15   :  { %p16308_p7 = pnand %p16307_p6, %p16301_p3 }
  0x17   :  { %16311 = shalt.err (!%p16308_p7)
}
  0x18   :  { %s16593_s0 = smov 192   ;;  %s16594_s17 = smov 12  }
  0x19   :  { %54 = dma.hbm_to_vmem [thread:$0]  %s18254_s2, 9216, %s49_s22, [#allocation6], %s16593_s0, %s16593_s0, %s16594_s17  }
  0x1a   :  { %s16595_s20 = smov [#allocation8]   ;;  %s16312_s25 = scalar_lea.hbm %s18256_s4, 3072 }
  0x1b   :  { %s72_s21 = sshll.u32 %s16595_s20, 4  ;;  %p16313_p8 = scmp.ne.s32.totalorder %s18256_s4, %s16312_s25  ;;  %s73_s21 = int_to_ptr.vmem [resolvable:$true] %s72_s21 }
  0x1c   :  { %p16316_p9 = scmp.lt.u32.totalorder %s16312_s25, %s18256_s4 }
  0x1e   :  { %p16318_p10 = pnand %p16316_p9, %p16313_p8 }
  0x20   :  { %16321 = shalt.err (!%p16318_p10)
}
  0x21   :  { %s16322_s30 = scalar_lea.vmem %s73_s21, 3072  ;;  %p16327_p12 = scmp.lt.s32.totalorder %s73_s21, %s73_s21 }
  0x22   :  { %p16323_p11 = scmp.ne.s32.totalorder %s73_s21, %s16322_s30  ;;  %p16328_p13 = scmp.lt.s32.totalorder %s16322_s30, %s16322_s30 }
  0x24   :  { %p16329_p0 = por %p16328_p13, %p16327_p12 }
  0x26   :  { %p16330_p1 = pnand %p16329_p0, %p16323_p11 }
  0x28   :  { %16333 = shalt.err (!%p16330_p1)
}
  0x29   :  { %s16596_s2 = smov 64   ;;  %s16597_s22 = smov 4  }
  0x2a   :  { %78 = dma.hbm_to_vmem [thread:$0]  %s18256_s4, 3072, %s73_s21, [#allocation9], %s16596_s2, %s16596_s2, %s16597_s22  }
  0x2b   :  { %s16598_s18 = smov [#allocation11]   ;;  %s16599_s20 = smov [#allocation14]  }
  0x2c   :  { %s98_s19 = sshll.u32 %s16598_s18, 4  ;;  %s122_s23 = sshll.u32 %s16599_s20, 4  ;;  %s99_s19 = int_to_ptr.vmem [resolvable:$true] %s98_s19  ;;  %s16735_s23 = int_to_ptr.vmem [resolvable:$true] %s122_s23 }
  0x2d   :  { %s16334_s26 = scalar_lea.hbm %s18259_s7, 48 }
  0x2e   :  { %p16335_p2 = scmp.ne.s32.totalorder %s18259_s7, %s16334_s26  ;;  %p16338_p3 = scmp.lt.u32.totalorder %s16334_s26, %s18259_s7 }
  0x30   :  { %p16340_p4 = pnand %p16338_p3, %p16335_p2 }
  0x32   :  { %16343 = shalt.err (!%p16340_p4)
}
  0x33   :  { %s16344_s4 = scalar_lea.vmem %s99_s19, 48  ;;  %s16348_s21 = scalar_lea.vmem %s99_s19, 64 }
  0x34   :  { %p16345_p5 = scmp.ne.s32.totalorder %s99_s19, %s16344_s4  ;;  %p16349_p6 = scmp.lt.s32.totalorder %s99_s19, %s99_s19 }
  0x35   :  { %p16350_p7 = scmp.lt.s32.totalorder %s16348_s21, %s16344_s4 }
  0x37   :  { %p16351_p8 = por %p16350_p7, %p16349_p6 }
  0x39   :  { %p16352_p9 = pnand %p16351_p8, %p16345_p5 }
  0x3b   :  { %16355 = shalt.err (!%p16352_p9)
}
  0x3c   :  { %s16600_s0 = smov 16   ;;  %s16601_s17 = smov 1  }
  0x3d   :  { %104 = dma.hbm_to_vmem [thread:$0]  %s18259_s7, 48, %s99_s19, [#allocation12], %s16600_s0, %s16600_s0, %s16601_s17  }
  0x3e   :  { %s16356_s26 = scalar_lea.hbm %s18261_s9, 192 }
  0x3f   :  { %p16357_p10 = scmp.ne.s32.totalorder %s18261_s9, %s16356_s26  ;;  %p16360_p11 = scmp.lt.u32.totalorder %s16356_s26, %s18261_s9 }
  0x41   :  { %p16362_p12 = pnand %p16360_p11, %p16357_p10 }
  0x43   :  { %16365 = shalt.err (!%p16362_p12)
}
  0x44   :  { %s16366_s4 = scalar_lea.vmem %s16735_s23, 192  ;;  %p16371_p0 = scmp.lt.s32.totalorder %s16735_s23, %s16735_s23 }
  0x45   :  { %p16367_p13 = scmp.ne.s32.totalorder %s16735_s23, %s16366_s4  ;;  %p16372_p1 = scmp.lt.s32.totalorder %s16366_s4, %s16366_s4 }
  0x47   :  { %p16373_p2 = por %p16372_p1, %p16371_p0 }
  0x49   :  { %p16374_p3 = pnand %p16373_p2, %p16367_p13 }
  0x4b   :  { %16377 = shalt.err (!%p16374_p3)
}
  0x4c   :  { %128 = dma.hbm_to_vmem [thread:$0]  %s18261_s9, 192, %s16735_s23, [#allocation15], %s16596_s2, %s16596_s2, %s16597_s22  }
  0x4d   :  { %s16602_s21 = smov [#allocation17]   ;;  %s16603_s20 = smov [#allocation2]  }
  0x4e   :  { %s146_s18 = sshll.u32 %s16602_s21, 4  ;;  %s36_s24 = sshll.u32 %s16603_s20, 4  ;;  %s147_s18 = int_to_ptr.vmem [resolvable:$true] %s146_s18  ;;  %s16772_s24 = int_to_ptr.vmem [resolvable:$true] %s36_s24 }
  0x4f   :  { %s16378_s27 = scalar_lea.hbm %s18263_s11, 48 }
  0x50   :  { %p16379_p4 = scmp.ne.s32.totalorder %s18263_s11, %s16378_s27  ;;  %p16382_p5 = scmp.lt.u32.totalorder %s16378_s27, %s18263_s11 }
  0x52   :  { %p16384_p6 = pnand %p16382_p5, %p16379_p4 }
  0x54   :  { %16387 = shalt.err (!%p16384_p6)
}
  0x55   :  { %s16388_s9 = scalar_lea.vmem %s147_s18, 48  ;;  %s16392_s23 = scalar_lea.vmem %s147_s18, 64 }
  0x56   :  { %p16389_p7 = scmp.ne.s32.totalorder %s147_s18, %s16388_s9  ;;  %p16393_p8 = scmp.lt.s32.totalorder %s147_s18, %s147_s18 }
  0x57   :  { %p16394_p9 = scmp.lt.s32.totalorder %s16392_s23, %s16388_s9 }
  0x59   :  { %p16395_p10 = por %p16394_p9, %p16393_p8 }
  0x5b   :  { %p16396_p11 = pnand %p16395_p10, %p16389_p7 }
  0x5d   :  { %16399 = shalt.err (!%p16396_p11)
}
  0x5e   :  { %152 = dma.hbm_to_vmem [thread:$0]  %s18263_s11, 48, %s147_s18, [#allocation18], %s16600_s0, %s16600_s0, %s16601_s17  }
  0x5f   :  { %s16400_s25 = scalar_lea.hbm %s18253_s1, 1024 }
  0x60   :  { %p16401_p12 = scmp.ne.s32.totalorder %s18253_s1, %s16400_s25  ;;  %p16404_p13 = scmp.lt.u32.totalorder %s16400_s25, %s18253_s1 }
  0x62   :  { %p16406_p0 = pnand %p16404_p13, %p16401_p12 }
  0x64   :  { %16409 = shalt.err (!%p16406_p0)
}
  0x65   :  { %s16410_s30 = scalar_lea.vmem %s16772_s24, 1024  ;;  %p16415_p2 = scmp.lt.s32.totalorder %s16772_s24, %s16772_s24 }
  0x66   :  { %p16411_p1 = scmp.ne.s32.totalorder %s16772_s24, %s16410_s30  ;;  %p16416_p3 = scmp.lt.s32.totalorder %s16410_s30, %s16410_s30 }
  0x68   :  { %p16417_p4 = por %p16416_p3, %p16415_p2 }
  0x6a   :  { %p16418_p5 = pnand %p16417_p4, %p16411_p1 }
  0x6c   :  { %16421 = shalt.err (!%p16418_p5)
}
  0x6d   :  { %s18270_s11 = smov 128   ;;  %s16605_s18 = smov 8  }
  0x6e   :  { %42 = dma.hbm_to_vmem [thread:$0]  %s18253_s1, 1024, %s16772_s24, [#allocation3], %s18270_s11, %s18270_s11, %s16605_s18  }
  0x6f   :  { %s16606_s23 = smov [#allocation7]   ;;  %s16422_s20 = scalar_lea.hbm %s18255_s3, 144 }
  0x70   :  { %s60_s7 = sshll.u32 %s16606_s23, 4  ;;  %p16423_p6 = scmp.ne.s32.totalorder %s18255_s3, %s16422_s20  ;;  %s61_s7 = int_to_ptr.vmem [resolvable:$true] %s60_s7 }
  0x71   :  { %p16426_p7 = scmp.lt.u32.totalorder %s16422_s20, %s18255_s3 }
  0x73   :  { %p16428_p8 = pnand %p16426_p7, %p16423_p6 }
  0x75   :  { %16431 = shalt.err (!%p16428_p8)
}
  0x76   :  { %s16432_s29 = scalar_lea.vmem %s61_s7, 144  ;;  %s16436_s1 = scalar_lea.vmem %s61_s7, 160 }
  0x77   :  { %p16433_p9 = scmp.ne.s32.totalorder %s61_s7, %s16432_s29  ;;  %p16437_p10 = scmp.lt.s32.totalorder %s61_s7, %s61_s7 }
  0x78   :  { %p16438_p11 = scmp.lt.s32.totalorder %s16436_s1, %s16432_s29 }
  0x7a   :  { %p16439_p12 = por %p16438_p11, %p16437_p10 }
  0x7c   :  { %p16440_p13 = pnand %p16439_p12, %p16433_p9 }
  0x7e   :  { %16443 = shalt.err (!%p16440_p13)
}
  0x7f   :  { %s16607_s24 = smov 48   ;;  %s16608_s30 = smov 3  }
  0x80   :  { %66 = dma.hbm_to_vmem [thread:$0]  %s18255_s3, 144, %s61_s7, [#allocation6], %s16607_s24, %s16607_s24, %s16608_s30  }
  0x81   :  { %s16609_s23 = smov [#allocation10]   ;;  %s16610_s21 = smov [#allocation13]  }
  0x82   :  { %s86_s19 = sshll.u32 %s16609_s23, 4  ;;  %s110_s20 = sshll.u32 %s16610_s21, 4  ;;  %s87_s19 = int_to_ptr.vmem [resolvable:$true] %s86_s19  ;;  %s111_s20 = int_to_ptr.vmem [resolvable:$true] %s110_s20 }
  0x83   :  { %s16444_s27 = scalar_lea.hbm %s18258_s6, 48 }
  0x84   :  { %p16445_p0 = scmp.ne.s32.totalorder %s18258_s6, %s16444_s27  ;;  %p16448_p1 = scmp.lt.u32.totalorder %s16444_s27, %s18258_s6 }
  0x86   :  { %p16450_p2 = pnand %p16448_p1, %p16445_p0 }
  0x88   :  { %16453 = shalt.err (!%p16450_p2)
}
  0x89   :  { %s16454_s3 = scalar_lea.vmem %s87_s19, 48  ;;  %s16458_s7 = scalar_lea.vmem %s87_s19, 64 }
  0x8a   :  { %p16455_p3 = scmp.ne.s32.totalorder %s87_s19, %s16454_s3  ;;  %p16459_p4 = scmp.lt.s32.totalorder %s87_s19, %s87_s19 }
  0x8b   :  { %p16460_p5 = scmp.lt.s32.totalorder %s16458_s7, %s16454_s3 }
  0x8d   :  { %p16461_p6 = por %p16460_p5, %p16459_p4 }
  0x8f   :  { %p16462_p7 = pnand %p16461_p6, %p16455_p3 }
  0x91   :  { %16465 = shalt.err (!%p16462_p7)
}
  0x92   :  { %92 = dma.hbm_to_vmem [thread:$0]  %s18258_s6, 48, %s87_s19, [#allocation9], %s16600_s0, %s16600_s0, %s16601_s17  }
  0x93   :  { %s16466_s23 = scalar_lea.hbm %s18260_s8, 12288 }
  0x94   :  { %p16467_p8 = scmp.ne.s32.totalorder %s18260_s8, %s16466_s23  ;;  %p16470_p9 = scmp.lt.u32.totalorder %s16466_s23, %s18260_s8 }
  0x96   :  { %p16472_p10 = pnand %p16470_p9, %p16467_p8 }
  0x98   :  { %16475 = shalt.err (!%p16472_p10)
}
  0x99   :  { %s16476_s28 = scalar_lea.vmem %s111_s20, 12288  ;;  %p16481_p12 = scmp.lt.s32.totalorder %s111_s20, %s111_s20 }
  0x9a   :  { %p16477_p11 = scmp.ne.s32.totalorder %s111_s20, %s16476_s28  ;;  %p16482_p13 = scmp.lt.s32.totalorder %s16476_s28, %s16476_s28 }
  0x9c   :  { %p16483_p0 = por %p16482_p13, %p16481_p12 }
  0x9e   :  { %p16484_p1 = pnand %p16483_p0, %p16477_p11 }
  0xa0   :  { %16487 = shalt.err (!%p16484_p1)
}
  0xa1   :  { %s16611_s6 = smov 256   ;;  %s16612_s1 = smov [#allocation16]  }
  0xa2   :  { %116 = dma.hbm_to_vmem [thread:$0]  %s18260_s8, 12288, %s111_s20, [#allocation12], %s16611_s6, %s16611_s6, %s16600_s0  }
  0xa3   :  { %s134_s3 = sshll.u32 %s16612_s1, 4  ;;  %s16613_s7 = smov [#allocation19]   ;;  %s135_s3 = int_to_ptr.vmem [resolvable:$true] %s134_s3 }
  0xa4   :  { %s158_s30 = sshll.u32 %s16613_s7, 4  ;;  %s16488_s9 = scalar_lea.hbm %s18262_s10, 12288  ;;  %s16851_s30 = int_to_ptr.vmem [resolvable:$true] %s158_s30 }
  0xa5   :  { %p16489_p2 = scmp.ne.s32.totalorder %s18262_s10, %s16488_s9  ;;  %p16492_p3 = scmp.lt.u32.totalorder %s16488_s9, %s18262_s10 }
  0xa7   :  { %p16494_p4 = pnand %p16492_p3, %p16489_p2 }
  0xa9   :  { %16497 = shalt.err (!%p16494_p4)
}
  0xaa   :  { %s16498_s8 = scalar_lea.vmem %s135_s3, 12288  ;;  %p16503_p6 = scmp.lt.s32.totalorder %s135_s3, %s135_s3 }
  0xab   :  { %p16499_p5 = scmp.ne.s32.totalorder %s135_s3, %s16498_s8  ;;  %p16504_p7 = scmp.lt.s32.totalorder %s16498_s8, %s16498_s8 }
  0xad   :  { %p16505_p8 = por %p16504_p7, %p16503_p6 }
  0xaf   :  { %p16506_p9 = pnand %p16505_p8, %p16499_p5 }
  0xb1   :  { %16509 = shalt.err (!%p16506_p9)
}
  0xb2   :  { %140 = dma.hbm_to_vmem [thread:$0]  %s18262_s10, 12288, %s135_s3, [#allocation15], %s16596_s2, %s16596_s2, %s16597_s22  }
  0xb3   :  { %s16510_s19 = scalar_lea.hbm %s18264_s12, 48 }
  0xb4   :  { %p16511_p10 = scmp.ne.s32.totalorder %s18264_s12, %s16510_s19  ;;  %p16514_p11 = scmp.lt.u32.totalorder %s16510_s19, %s18264_s12 }
  0xb6   :  { %p16516_p12 = pnand %p16514_p11, %p16511_p10 }
  0xb8   :  { %16519 = shalt.err (!%p16516_p12)
}
  0xb9   :  { %s16520_s11 = scalar_lea.vmem %s16851_s30, 48  ;;  %s16524_s10 = scalar_lea.vmem %s16851_s30, 64 }
  0xba   :  { %p16521_p13 = scmp.ne.s32.totalorder %s16851_s30, %s16520_s11  ;;  %p16525_p0 = scmp.lt.s32.totalorder %s16851_s30, %s16851_s30 }
  0xbb   :  { %p16526_p1 = scmp.lt.s32.totalorder %s16524_s10, %s16520_s11 }
  0xbd   :  { %p16527_p2 = por %p16526_p1, %p16525_p0 }
  0xbf   :  { %p16528_p3 = pnand %p16527_p2, %p16521_p13 }
  0xc1   :  { %16531 = shalt.err (!%p16528_p3)
}
  0xc2   :  { %164 = dma.hbm_to_vmem [thread:$0]  %s18264_s12, 48, %s16851_s30, [#allocation18], %s16600_s0, %s16600_s0, %s16601_s17  }
  0xc3   :  { %s16614_s9 = smov [#allocation20]   ;;  %s16532_s26 = scalar_lea.hbm %s18265_s13, 48 }
  0xc4   :  { %s170_s23 = sshll.u32 %s16614_s9, 4  ;;  %p16533_p4 = scmp.ne.s32.totalorder %s18265_s13, %s16532_s26  ;;  %s171_s23 = int_to_ptr.vmem [resolvable:$true] %s170_s23 }
  0xc5   :  { %p16536_p5 = scmp.lt.u32.totalorder %s16532_s26, %s18265_s13 }
  0xc7   :  { %p16538_p6 = pnand %p16536_p5, %p16533_p4 }
  0xc9   :  { %16541 = shalt.err (!%p16538_p6)
}
  0xca   :  { %s16542_s6 = scalar_lea.vmem %s171_s23, 48  ;;  %s16546_s12 = scalar_lea.vmem %s171_s23, 64 }
  0xcb   :  { %p16543_p7 = scmp.ne.s32.totalorder %s171_s23, %s16542_s6  ;;  %p16547_p8 = scmp.lt.s32.totalorder %s171_s23, %s171_s23 }
  0xcc   :  { %p16548_p9 = scmp.lt.s32.totalorder %s16546_s12, %s16542_s6 }
  0xce   :  { %p16549_p10 = por %p16548_p9, %p16547_p8 }
  0xd0   :  { %p16550_p11 = pnand %p16549_p10, %p16543_p7 }
  0xd2   :  { %16553 = shalt.err (!%p16550_p11)
}
  0xd3   :  { %176 = dma.hbm_to_vmem [thread:$0]  %s18265_s13, 48, %s171_s23, [#allocation21], %s16600_s0, %s16600_s0, %s16601_s17  }
  0xd4   :  { %16576 = dma.done.wait [#allocation3], 1024  }
  0xd5   :  { %16577 = vsyncadd [#allocation3], 4294966272 }
  0xd6   :  { %16578 = dma.done.wait [#allocation6], 9360  }
  0xd7   :  { %16579 = vsyncadd [#allocation6], 4294957936 }
  0xd8   :  { %16580 = dma.done.wait [#allocation9], 3120  }
  0xd9   :  { %16581 = vsyncadd [#allocation9], 4294964176 }
  0xda   :  { %16582 = dma.done.wait [#allocation12], 12336  }
  0xdb   :  { %16583 = vsyncadd [#allocation12], 4294954960 }
  0xdc   :  { %16584 = dma.done.wait [#allocation15], 12480  }
  0xdd   :  { %16585 = vsyncadd [#allocation15], 4294954816 }
  0xde   :  { %16586 = dma.done.wait [#allocation18], 96  }
  0xdf   :  { %16587 = vsyncadd [#allocation18], 4294967200 }
  0xe0   :  { %16588 = dma.done.wait [#allocation21], 48  }
  0xe1   :  { %16589 = vsyncadd [#allocation21], 4294967248  ;;  %v16615_v0 = vmov 0   ;;  %s18272_s29 = sld [smem:[#allocation31_spill]]  ;;  %v234_v2 = vld [vmem:[#allocation2] sm:$0xff]  ;;  %v235_v3 = vld [vmem:[#allocation2 + $0x8] sm:$0xff]  ;;  %v220_v30 = vlaneseq }
  0xe2   :  { %15705 = vset.pattern.permute.xlu0 %v16615_v0  ;;  %646 = vmatprep.mubr.bf16.mxu1 %v16615_v0  ;;  %v236_v4 = vld [vmem:[#allocation2 + $0x10] sm:$0xff]  ;;  %v237_v5 = vld [vmem:[#allocation2 + $0x18] sm:$0xff]  ;;  %v15658_v7 = vpack.c.bf16 %v235_v3, %v234_v2  ;;  %v238_v9 = vld [vmem:[#allocation2 + $0x20] sm:$0xff]  ;;  %v16616_v23 = vmov 0.0   ;;  %vm242_vm0 = vcmask 523264   ;;  %vm16617_vm3 = vmmov 0  }
  0xe3   :  { %v15662_v8 = vpack.c.bf16 %v237_v5, %v236_v4  ;;  %v239_v10 = vld [vmem:[#allocation2 + $0x28] sm:$0xff]  ;;  %v240_v11 = vld [vmem:[#allocation2 + $0x30] sm:$0xff]  ;;  %v241_v13 = vld [vmem:[#allocation2 + $0x38] sm:$0xff]  ;;  %v221_v31 = vand.u32 127, %v220_v30  ;;  %v16936_v49 = vshrl.u32 %v220_v30, 7  ;;  %vm698_vm4 = vcmask 130048  }
  0xe4   :  { %15659 = vmatprep.subr.bf16.mxu0 %v15658_v7  ;;  %v15666_v12 = vpack.c.bf16 %v239_v10, %v238_v9  ;;  %v15706_v14 = vld [vmem:[#allocation5 + $0x4] ss:$12 sps:$4 sm:$0xff]   ;;  %v15708_v15 = vld [vmem:[#allocation5] ss:$12 sps:$4 sm:$0xff]   ;;  %v15710_v16 = vld [vmem:[#allocation5 + $0x1c] ss:$12 sps:$4 sm:$0xff]   ;;  %v15670_v18 = vpack.c.bf16 %v241_v13, %v240_v11 }
  0xe5   :  { %15661 = vmatpush3.bf16.msra.mxu0 %v15658_v7  ;;  %614 = vmatprep.subr.bf16.mxu1 %v15706_v14  ;;  %v15712_v17 = vld [vmem:[#allocation5 + $0x18] ss:$12 sps:$4 sm:$0xff]   ;;  %v15714_v19 = vld [vmem:[#allocation5 + $0x34] ss:$12 sps:$4 sm:$0xff]   ;;  %v15716_v20 = vld [vmem:[#allocation5 + $0x30] ss:$12 sps:$4 sm:$0xff]  }
  0xe6   :  { %15663 = vmatprep.subr.bf16.mxu0 %v15662_v8  ;;  %615 = vmatpush1.bf16.msra.mxu1 %v15708_v15  ;;  %v15718_v21 = vld [vmem:[#allocation5 + $0x4c] ss:$12 sps:$4 sm:$0xff]   ;;  %v15720_v22 = vld [vmem:[#allocation5 + $0x48] ss:$12 sps:$4 sm:$0xff]   ;;  %v15722_v24 = vld [vmem:[#allocation5 + $0x64] ss:$12 sps:$4 sm:$0xff]  }
  0xe7   :  { %v218_v1 = vld [vmem:[%s18272_s29] sm:$0xff]  ;;  %v219_v6 = vld [vmem:[%s18272_s29 + $0x8] sm:$0xff]  ;;  %616 = vmatprep.subr.bf16.mxu1 %v15710_v16  ;;  %v15732_v29 = vld [vmem:[#allocation5 + $0x90] ss:$12 sps:$4 sm:$0xff]   ;;  %v16939_v50 = vsub.s32 1, %v16936_v49  ;;  %v16942_v52 = vsub.s32 0, %v16936_v49 }
  0xe8   :  { %223 = vperm.xlu0 %15705, %v218_v1   ;;  %v15724_v25 = vld [vmem:[#allocation5 + $0x60] ss:$12 sps:$4 sm:$0xff]   ;;  %v15726_v26 = vld [vmem:[#allocation5 + $0x7c] ss:$12 sps:$4 sm:$0xff]   ;;  %v15728_v27 = vld [vmem:[#allocation5 + $0x78] ss:$12 sps:$4 sm:$0xff]  }
  0xe9   :  { %15665 = vmatpush3.bf16.msra.mxu0 %v15662_v8  ;;  %v15730_v28 = vld [vmem:[#allocation5 + $0x94] ss:$12 sps:$4 sm:$0xff]   ;;  %v15717_v38 = vld [vmem:[#allocation5 + $0x38] ss:$12 sps:$4 sm:$0xff]   ;;  %v15721_v39 = vld [vmem:[#allocation5 + $0x50] ss:$12 sps:$4 sm:$0xff]  }
  0xea   :  { %15667 = vmatprep.subr.bf16.mxu0 %v15666_v12  ;;  %617 = vmatpush1.bf16.msra.mxu1 %v15712_v17  ;;  %v15709_v34 = vld [vmem:[#allocation5 + $0x8] ss:$12 sps:$4 sm:$0xff]   ;;  %v15713_v37 = vld [vmem:[#allocation5 + $0x20] ss:$12 sps:$4 sm:$0xff]   ;;  %v15733_v42 = vld [vmem:[#allocation5 + $0x98] ss:$12 sps:$4 sm:$0xff]  }
  0xeb   :  { %618 = vmatprep.subr.bf16.mxu1 %v15714_v19  ;;  %v15725_v40 = vld [vmem:[#allocation5 + $0x68] ss:$12 sps:$4 sm:$0xff]   ;;  %v15729_v41 = vld [vmem:[#allocation5 + $0x80] ss:$12 sps:$4 sm:$0xff]   ;;  %v15737_v45 = vld [vmem:[#allocation5 + $0xb0] ss:$12 sps:$4 sm:$0xff]  }
  0xec   :  { %226 = vperm.xlu0 %15705, %v219_v6   ;;  %v15734_v43 = vld [vmem:[#allocation5 + $0xac] ss:$12 sps:$4 sm:$0xff]   ;;  %v15736_v44 = vld [vmem:[#allocation5 + $0xa8] ss:$12 sps:$4 sm:$0xff]   ;;  %v469_v51 = vld [vmem:[#allocation7] sm:$0x7] }
  0xed   :  { %15669 = vmatpush3.bf16.msra.mxu0 %v15666_v12  ;;  %v16945_v53 = vsub.s32 2, %v16936_v49  ;;  %v478_v54 = vrot.slane %v469_v51, %v16939_v50  ;;  %v474_v57 = vrot.slane %v469_v51, %v16942_v52  ;;  %s16618_s4 = smov 112   ;;  %vm776_vm5 = vcmask 64512   ;;  %s16619_s11 = smov 96  }
  0xee   :  { %15671 = vmatprep.subr.bf16.mxu0 %v15670_v18  ;;  %619 = vmatpush1.bf16.msra.mxu1 %v15716_v20  ;;  %s16620_s10 = smov 80   ;;  %s16621_s22 = smov 32  }
  0xef   :  { %620 = vmatprep.subr.bf16.mxu1 %v15718_v21  ;;  %v482_v58 = vrot.slane %v469_v51, %v16945_v53 }
  0xf1   :  { %15673 = vmatpush3.bf16.msra.mxu0 %v15670_v18 }
  0xf2   :  { %14810 = vmatprep.subr.bf16.mxu0 %v16616_v23  ;;  %621 = vmatpush1.bf16.msra.mxu1 %v15720_v22 }
  0xf3   :  { %622 = vmatprep.subr.bf16.mxu1 %v15722_v24 }
  0xf6   :  { %623 = vmatpush1.bf16.msra.mxu1 %v15724_v25 }
  0xf7   :  { %624 = vmatprep.subr.bf16.mxu1 %v15726_v26 }
  0xfa   :  { %625 = vmatpush1.bf16.msra.mxu1 %v15728_v27 }
  0xfb   :  { %626 = vmatprep.subr.bf16.mxu1 %v15730_v28 }
  0xfe   :  { %627 = vmatpush1.bf16.msra.mxu1 %v15732_v29 }
  0xff   :  { %628 = vmatprep.subr.bf16.mxu1 %v15734_v43 }
 0x102   :  { %629 = vmatpush1.bf16.msra.mxu1 %v15736_v44 }
 0x103   :  { %14830 = vmatprep.subr.mxu1 %v16616_v23 }
 0x167   :  { %v224_v32 = vpop.permute.xlu0 %223 }
 0x168   :  { %vm228_vm1 = vcmp.eq.s32.totalorder %v224_v32, %v221_v31 }
 0x169   :  { %v13812_v33 = vsel %vm228_vm1, 1.0, %v16616_v23 }
 0x16a   :  { %14807 = vmatprep.mubr.msk.f32.mxu0 %vm242_vm0, %v13812_v33 }
 0x16b   :  { %v227_v35 = vpop.permute.xlu0 %226 }
 0x16c   :  { %vm229_vm2 = vcmp.eq.s32.totalorder %v227_v35, %v221_v31  ;;  %v16994_v35 = vld [vmem:[#allocation8 + $0x8] sm:$0xff]  }
 0x16d   :  { %v13813_v36 = vsel %vm229_vm2, 1.0, %v16616_v23 }
 0x16e   :  { %14808 = vmatmul.mubr.msk.f32.vlgmr.msra.gmra.mrb[0].mxu0 %vm242_vm0, %v13813_v36 }
 0x16f   :  { %14811 = vmatpush3.bf16.msra.mxu0 %v15709_v34  ;;  %14826 = vmatprep.mubr.msk.bf16.mxu0 %vm16617_vm3, %v16616_v23 }
 0x170   :  { %14812 = vmatprep.subr.bf16.mxu0 %v16616_v23 }
 0x173   :  { %14813 = vmatpush3.bf16.msra.mxu0 %v15713_v37 }
 0x174   :  { %14814 = vmatprep.subr.bf16.mxu0 %v16616_v23 }
 0x177   :  { %14815 = vmatpush3.bf16.msra.mxu0 %v15717_v38 }
 0x178   :  { %14816 = vmatprep.subr.bf16.mxu0 %v16616_v23 }
 0x17b   :  { %14817 = vmatpush3.bf16.msra.mxu0 %v15721_v39 }
 0x17c   :  { %14818 = vmatprep.subr.bf16.mxu0 %v16616_v23 }
 0x17f   :  { %14819 = vmatpush3.bf16.msra.mxu0 %v15725_v40  ;;  %v17001_v40 = vld [vmem:[#allocation8] sm:$0xff]  }
 0x180   :  { %14820 = vmatprep.subr.bf16.mxu0 %v16616_v23 }
 0x183   :  { %14821 = vmatpush3.bf16.msra.mxu0 %v15729_v41 }
 0x184   :  { %14822 = vmatprep.subr.bf16.mxu0 %v16616_v23 }
 0x187   :  { %14823 = vmatpush3.bf16.msra.mxu0 %v15733_v42 }
 0x188   :  { %14824 = vmatprep.subr.bf16.mxu0 %v16616_v23 }
 0x18b   :  { %14825 = vmatpush3.bf16.msra.mxu0 %v15737_v45 }
 0x18c   :  { %14850 = vmatprep.subr.bf16.mxu0 %v16616_v23 }
 0x241   :  { %v16926_v46 = vpop.f32.mrb[0].mxu0 }
 0x242   :  { %v16928_v47 = vpop.f32.mrb[1].mxu0 }
 0x243   :  { %v468_v48 = vpack.c.bf16 %v16926_v46, %v16928_v47 }
 0x245   :  { %647 = vmatmul.mubr.bf16.vlgmr.msra.gmra.mrb[0].mxu1 %v468_v48  ;;  %14827 = vmatmul.mubr.bf16.vlgmr.msra.gmra.mrb[4].mxu0 %v468_v48 }
 0x246   :  { %14832 = vmatprep.mubr.msk.f32.mxu1 %vm16617_vm3, %v16616_v23  ;;  %14852 = vmatprep.mubr.msk.bf16.mxu0 %vm16617_vm3, %v16616_v23 }
 0x247   :  { %14851 = vmatpush3.bf16.msra.mxu0 %v16994_v35 }
 0x248   :  { %14856 = vmatprep.subr.bf16.mxu0 %v16616_v23 }
 0x318   :  { %v648_v55 = vpop.f32.mrb[0].mxu1  ;;  %v691_v56 = vpop.f32.mrb[4].mxu0 }
 0x319   :  { %v650_v59 = vpop.f32.mrb[1].mxu1  ;;  %v14828_v60 = vpop.f32.mrb[5].mxu0  ;;  %v16962_v6 = vadd.f32 %v648_v55, %v474_v57  ;;  %v16965_v7 = vadd.f32 %v691_v56, %v482_v58 }
 0x31a   :  { %v16950_v61 = vadd.f32 %v650_v59, %v478_v54  ;;  %v652_v62 = vpop.f32.mrb[2].mxu1  ;;  %v694_v63 = vpop.f32.mrb[6].mxu0 }
 0x31b   :  { %v16952_v1 = vadd.f32 %v652_v62, %v474_v57  ;;  %v16954_v2 = vadd.f32 %v694_v63, %v482_v58  ;;  %v654_v3 = vpop.f32.mrb[3].mxu1  ;;  %v14829_v4 = vpop.f32.mrb[7].mxu0 }
 0x31c   :  { %v16956_v5 = vadd.f32 %v654_v3, %v478_v54  ;;  %864 = vrot.lane.b32.xlu0 %v16950_v61, %s16618_s4  ;;  %14831 = vmatpush3.xpose.msk.msra.mxu1 %vm698_vm4, %v16950_v61 }
 0x31d   :  { %14835 = vmatprep.subr.mxu1 %v16616_v23 }
 0x31f   :  { %14833 = vmatmul.mubr.msk.f32.vlgmr.msra.gmra.mrb[4].mxu1 %vm698_vm4, %v16962_v6 }
 0x320   :  { %14836 = vmatpush3.msra.mxu1 %v16965_v7  ;;  %14837 = vmatprep.mubr.msk.f32.mxu1 %vm16617_vm3, %v16616_v23 }
 0x321   :  { %14840 = vmatprep.subr.mxu1 %v16616_v23 }
 0x38e   :  { %v865_v20 = vpop.permute.xlu0 %864 }
 0x3f2   :  { %v771_v8 = vpop.f32.mrb[4].mxu1 }
 0x3f3   :  { %v775_v9 = vmul.f32 0.25, %v771_v8  ;;  %v14834_v10 = vpop.f32.mrb[5].mxu1 }
 0x3f5   :  { %v777_v11 = vsel %vm776_vm5, %v775_v9, -inf }
 0x3f6   :  { %778 = vmax.xlane.f32.xlu1 %v777_v11 }
 0x483   :  { %v779_v12 = vpop.xlane.xlu1 %778 }
 0x484   :  { %v780_v13 = vsub.f32 %v775_v9, %v779_v12 }
 0x486   :  { %v781_v14 = vmul.f32 1.442695, %v780_v13 }
 0x488   :  { %16074 = vpow2.f32 %v781_v14 }
 0x492   :  { %v16075_v15 = vpop.eup %16074 }
 0x493   :  { %v783_v16 = vsel %vm776_vm5, %v16075_v15, 0.0 }
 0x494   :  { %784 = vadd.xlane.f32.xlu1 %v783_v16 }
 0x4a5   :  { %862 = vrot.lane.b32.xlu1 %v16962_v6, %s16618_s4 }
 0x521   :  { %v785_v17 = vpop.xlane.xlu1 %784 }
 0x522   :  { %16076 = vrcp.f32 %v785_v17 }
 0x525   :  { %v863_v21 = vpop.permute.xlu1 %862 }
 0x52c   :  { %v16077_v18 = vpop.eup %16076 }
 0x52d   :  { %v787_v19 = vmul.f32 %v16077_v18, %v16075_v15 }
 0x52f   :  { %14838 = vmatmul.mubr.msk.f32.vlgmr.msra.gmra.mrb[6].mxu1 %vm776_vm5, %v787_v19  ;;  %v17033_v19 = vld [vmem:[#allocation8 + $0x10] sm:$0xff]  }
 0x530   :  { %14841 = vmatpush3.xpose.msk.msra.mxu1 %vm698_vm4, %v865_v20  ;;  %14842 = vmatprep.mubr.msk.f32.mxu1 %vm16617_vm3, %v16616_v23 }
 0x531   :  { %14845 = vmatprep.subr.mxu1 %v16616_v23 }
 0x533   :  { %14843 = vmatmul.mubr.msk.f32.vlgmr.msra.gmra.mrb[8].mxu1 %vm698_vm4, %v863_v21 }
 0x534   :  { %14847 = vmatprep.mubr.msk.f32.mxu1 %vm16617_vm3, %v16616_v23 }
 0x602   :  { %v857_v22 = vpop.f32.mrb[6].mxu1 }
 0x603   :  { %v14839_v24 = vpop.f32.mrb[7].mxu1  ;;  %v861_v43 = vpack.c.bf16 %v857_v22, %v857_v22 }
 0x606   :  { %v936_v25 = vpop.f32.mrb[8].mxu1 }
 0x607   :  { %v940_v26 = vmul.f32 0.25, %v936_v25  ;;  %v14844_v27 = vpop.f32.mrb[9].mxu1 }
 0x609   :  { %v941_v28 = vsel %vm776_vm5, %v940_v26, -inf }
 0x60a   :  { %942 = vmax.xlane.f32.xlu0 %v941_v28 }
 0x620   :  { %953 = vrot.lane.b32.xlu0 %v16965_v7, %s16618_s4 }
 0x624   :  { %1128 = vrot.lane.b32.xlu0 %v16962_v6, %s16619_s11 }
 0x697   :  { %v943_v29 = vpop.xlane.xlu0 %942 }
 0x698   :  { %v944_v30 = vsub.f32 %v940_v26, %v943_v29 }
 0x69a   :  { %v945_v31 = vmul.f32 1.442695, %v944_v30 }
 0x69b   :  { %v954_v32 = vpop.permute.xlu0 %953 }
 0x69c   :  { %16078 = vpow2.f32 %v945_v31  ;;  %14846 = vmatpush3.msra.mxu1 %v954_v32 }
 0x69d   :  { %14867 = vmatprep.subr.mxu1 %v16616_v23 }
 0x69f   :  { %v1129_v45 = vpop.permute.xlu0 %1128 }
 0x6a6   :  { %v16079_v33 = vpop.eup %16078 }
 0x6a7   :  { %v947_v34 = vsel %vm776_vm5, %v16079_v33, 0.0 }
 0x6a8   :  { %948 = vadd.xlane.f32.xlu1 %v947_v34 }
 0x6b9   :  { %1130 = vrot.lane.b32.xlu1 %v16950_v61, %s16619_s11 }
 0x735   :  { %v949_v36 = vpop.xlane.xlu1 %948 }
 0x736   :  { %16080 = vrcp.f32 %v949_v36 }
 0x739   :  { %v1131_v44 = vpop.permute.xlu1 %1130 }
 0x740   :  { %v16081_v37 = vpop.eup %16080 }
 0x741   :  { %v951_v38 = vmul.f32 %v16081_v37, %v16079_v33 }
 0x743   :  { %14848 = vmatmul.mubr.msk.f32.vlgmr.msra.gmra.mrb[10].mxu1 %vm776_vm5, %v951_v38 }
 0x744   :  { %14869 = vmatprep.mubr.msk.f32.mxu1 %vm16617_vm3, %v16616_v23 }
 0x816   :  { %v1025_v39 = vpop.f32.mrb[10].mxu1 }
 0x817   :  { %v1029_v41 = vpack.c.bf16 %v1025_v39, %v1025_v39  ;;  %v14849_v42 = vpop.f32.mrb[11].mxu1 }
 0x819   :  { %14853 = vmatmul.mubr.msk.bf16.vlgmr.msra.gmra.mrb[8].mxu0 %vm698_vm4, %v1029_v41 }
 0x81a   :  { %14857 = vmatpush3.bf16.msra.mxu0 %v17001_v40  ;;  %14858 = vmatprep.mubr.msk.bf16.mxu0 %vm16617_vm3, %v16616_v23 }
 0x81b   :  { %14862 = vmatprep.subr.mxu0 %v16616_v23 }
 0x821   :  { %14859 = vmatmul.mubr.msk.bf16.vlgmr.msra.gmra.mrb[12].mxu0 %vm698_vm4, %v861_v43 }
 0x822   :  { %14864 = vmatprep.mubr.msk.f32.mxu0 %vm16617_vm3, %v16616_v23 }
 0x823   :  { %14863 = vmatpush3.xpose.msk.msra.mxu0 %vm698_vm4, %v1131_v44 }
 0x824   :  { %14872 = vmatprep.subr.bf16.mxu0 %v16616_v23 }
 0x829   :  { %14865 = vmatmul.mubr.msk.f32.vlgmr.msra.gmra.mrb[2].mxu0 %vm698_vm4, %v1129_v45 }
 0x82a   :  { %14874 = vmatprep.mubr.msk.bf16.mxu0 %vm16617_vm3, %v16616_v23  ;;  %14873 = vmatpush3.bf16.msra.mxu0 %v17033_v19 }
 0x82b   :  { %14888 = vmatprep.subr.bf16.mxu0 %v16616_v23 }
 0x8ec   :  { %v1073_v48 = vpop.f32.mrb[8].mxu0 }
 0x8ed   :  { %v14854_v51 = vpop.f32.mrb[9].mxu0 }
 0x8ee   :  { %v1076_v54 = vpop.f32.mrb[10].mxu0 }
 0x8ef   :  { %v14855_v55 = vpop.f32.mrb[11].mxu0 }
 0x8f4   :  { %v1122_v56 = vpop.f32.mrb[12].mxu0 }
 0x8f5   :  { %v1123_v57 = vadd.f32 %v1122_v56, %v1073_v48  ;;  %v14860_v58 = vpop.f32.mrb[13].mxu0  ;;  %v17057_v48 = vld [vmem:[#allocation8 + $0x18] sm:$0xff]  }
 0x8f6   :  { %v1125_v59 = vpop.f32.mrb[14].mxu0 }
 0x8f7   :  { %v14861_v60 = vpop.f32.mrb[15].mxu0 }
 0x8fc   :  { %v1202_v62 = vpop.f32.mrb[2].mxu0 }
 0x8fd   :  { %v1206_v63 = vmul.f32 0.25, %v1202_v62  ;;  %v14866_v3 = vpop.f32.mrb[3].mxu0 }
 0x8ff   :  { %v1207_v4 = vsel %vm776_vm5, %v1206_v63, -inf }
 0x900   :  { %1208 = vmax.xlane.f32.xlu0 %v1207_v4 }
 0x916   :  { %1218 = vrot.lane.b32.xlu0 %v16965_v7, %s16619_s11 }
 0x91a   :  { %1345 = vrot.lane.b32.xlu0 %v16962_v6, %s16620_s10 }
 0x98d   :  { %v1209_v8 = vpop.xlane.xlu0 %1208 }
 0x98e   :  { %v1210_v9 = vsub.f32 %v1206_v63, %v1209_v8 }
 0x990   :  { %v1211_v10 = vmul.f32 1.442695, %v1210_v9 }
 0x991   :  { %v1219_v11 = vpop.permute.xlu0 %1218 }
 0x992   :  { %16082 = vpow2.f32 %v1211_v10  ;;  %14868 = vmatpush3.msra.mxu1 %v1219_v11 }
 0x993   :  { %14878 = vmatprep.subr.mxu1 %v16616_v23 }
 0x995   :  { %v1346_v18 = vpop.permute.xlu0 %1345 }
 0x99c   :  { %v16083_v12 = vpop.eup %16082 }
 0x99d   :  { %v1213_v13 = vsel %vm776_vm5, %v16083_v12, 0.0 }
 0x99e   :  { %1214 = vadd.xlane.f32.xlu1 %v1213_v13 }
 0x9af   :  { %1347 = vrot.lane.b32.xlu1 %v16950_v61, %s16620_s10 }
 0xa2b   :  { %v1215_v14 = vpop.xlane.xlu1 %1214 }
 0xa2c   :  { %16084 = vrcp.f32 %v1215_v14 }
 0xa2f   :  { %v1348_v17 = vpop.permute.xlu1 %1347 }
 0xa36   :  { %v16085_v15 = vpop.eup %16084 }
 0xa37   :  { %v1217_v16 = vmul.f32 %v16085_v15, %v16083_v12 }
 0xa39   :  { %14870 = vmatmul.mubr.msk.f32.vlgmr.msra.gmra.mrb[12].mxu1 %vm776_vm5, %v1217_v16 }
 0xa3a   :  { %14879 = vmatpush3.xpose.msk.msra.mxu1 %vm698_vm4, %v1348_v17  ;;  %14880 = vmatprep.mubr.msk.f32.mxu1 %vm16617_vm3, %v16616_v23 }
 0xa3b   :  { %14883 = vmatprep.subr.mxu1 %v16616_v23 }
 0xa3d   :  { %14881 = vmatmul.mubr.msk.f32.vlgmr.msra.gmra.mrb[14].mxu1 %vm698_vm4, %v1346_v18 }
 0xa3e   :  { %14885 = vmatprep.mubr.msk.f32.mxu1 %vm16617_vm3, %v16616_v23 }
 0xb0c   :  { %v1290_v20 = vpop.f32.mrb[12].mxu1 }
 0xb0d   :  { %v1294_v21 = vpack.c.bf16 %v1290_v20, %v1290_v20  ;;  %v14871_v22 = vpop.f32.mrb[13].mxu1  ;;  %v17081_v20 = vld [vmem:[#allocation8 + $0x20] sm:$0xff]  }
 0xb0f   :  { %14875 = vmatmul.mubr.msk.bf16.vlgmr.msra.gmra.mrb[16].mxu0 %vm698_vm4, %v1294_v21 }
 0xb10   :  { %v1419_v24 = vpop.f32.mrb[14].mxu1  ;;  %14890 = vmatprep.mubr.msk.bf16.mxu0 %vm16617_vm3, %v16616_v23  ;;  %14889 = vmatpush3.bf16.msra.mxu0 %v17057_v48 }
 0xb11   :  { %v1423_v25 = vmul.f32 0.25, %v1419_v24  ;;  %v14882_v26 = vpop.f32.mrb[15].mxu1  ;;  %14904 = vmatprep.subr.bf16.mxu0 %v16616_v23 }
 0xb13   :  { %v1424_v27 = vsel %vm776_vm5, %v1423_v25, -inf }
 0xb14   :  { %1425 = vmax.xlane.f32.xlu0 %v1424_v27 }
 0xb2a   :  { %1435 = vrot.lane.b32.xlu0 %v16965_v7, %s16620_s10 }
 0xb2e   :  { %1562 = vrot.lane.b32.xlu0 %v16962_v6, %s16596_s2 }
 0xba1   :  { %v1426_v28 = vpop.xlane.xlu0 %1425 }
 0xba2   :  { %v1427_v29 = vsub.f32 %v1423_v25, %v1426_v28 }
 0xba4   :  { %v1428_v30 = vmul.f32 1.442695, %v1427_v29 }
 0xba5   :  { %v1436_v31 = vpop.permute.xlu0 %1435 }
 0xba6   :  { %16086 = vpow2.f32 %v1428_v30  ;;  %14884 = vmatpush3.msra.mxu1 %v1436_v31 }
 0xba7   :  { %14894 = vmatprep.subr.mxu1 %v16616_v23 }
 0xba9   :  { %v1563_v45 = vpop.permute.xlu0 %1562 }
 0xbb0   :  { %v16087_v32 = vpop.eup %16086 }
 0xbb1   :  { %v1430_v33 = vsel %vm776_vm5, %v16087_v32, 0.0 }
 0xbb2   :  { %1431 = vadd.xlane.f32.xlu1 %v1430_v33 }
 0xbc3   :  { %1564 = vrot.lane.b32.xlu1 %v16950_v61, %s16596_s2 }
 0xbe2   :  { %v1338_v34 = vpop.f32.mrb[16].mxu0 }
 0xbe3   :  { %v1344_v36 = vadd.f32 %v1338_v34, %v1123_v57  ;;  %v14876_v37 = vpop.f32.mrb[17].mxu0 }
 0xbe4   :  { %v1341_v38 = vpop.f32.mrb[18].mxu0 }
 0xbe5   :  { %v14877_v39 = vpop.f32.mrb[19].mxu0 }
 0xc3f   :  { %v1432_v41 = vpop.xlane.xlu1 %1431 }
 0xc40   :  { %16088 = vrcp.f32 %v1432_v41 }
 0xc43   :  { %v1565_v44 = vpop.permute.xlu1 %1564 }
 0xc4a   :  { %v16089_v42 = vpop.eup %16088 }
 0xc4b   :  { %v1434_v43 = vmul.f32 %v16089_v42, %v16087_v32 }
 0xc4d   :  { %14886 = vmatmul.mubr.msk.f32.vlgmr.msra.gmra.mrb[16].mxu1 %vm776_vm5, %v1434_v43 }
 0xc4e   :  { %14895 = vmatpush3.xpose.msk.msra.mxu1 %vm698_vm4, %v1565_v44  ;;  %14896 = vmatprep.mubr.msk.f32.mxu1 %vm16617_vm3, %v16616_v23 }
 0xc4f   :  { %14899 = vmatprep.subr.mxu1 %v16616_v23 }
 0xc51   :  { %14897 = vmatmul.mubr.msk.f32.vlgmr.msra.gmra.mrb[18].mxu1 %vm698_vm4, %v1563_v45 }
 0xc52   :  { %14901 = vmatprep.mubr.msk.f32.mxu1 %vm16617_vm3, %v16616_v23 }
 0xd20   :  { %v1507_v51 = vpop.f32.mrb[16].mxu1 }
 0xd21   :  { %v1511_v54 = vpack.c.bf16 %v1507_v51, %v1507_v51  ;;  %v14887_v55 = vpop.f32.mrb[17].mxu1 }
 0xd23   :  { %14891 = vmatmul.mubr.msk.bf16.vlgmr.msra.gmra.mrb[20].mxu0 %vm698_vm4, %v1511_v54  ;;  %v17105_v54 = vld [vmem:[#allocation8 + $0x28] sm:$0xff]  }
 0xd24   :  { %v1636_v56 = vpop.f32.mrb[18].mxu1  ;;  %14906 = vmatprep.mubr.msk.bf16.mxu0 %vm16617_vm3, %v16616_v23  ;;  %14905 = vmatpush3.bf16.msra.mxu0 %v17081_v20 }
 0xd25   :  { %v1640_v57 = vmul.f32 0.25, %v1636_v56  ;;  %v14898_v58 = vpop.f32.mrb[19].mxu1  ;;  %14920 = vmatprep.subr.bf16.mxu0 %v16616_v23 }
 0xd27   :  { %v1641_v59 = vsel %vm776_vm5, %v1640_v57, -inf }
 0xd28   :  { %1642 = vmax.xlane.f32.xlu0 %v1641_v59 }
 0xd3e   :  { %1652 = vrot.lane.b32.xlu0 %v16965_v7, %s16596_s2 }
 0xd42   :  { %1779 = vrot.lane.b32.xlu0 %v16962_v6, %s16607_s24 }
 0xdb5   :  { %v1643_v60 = vpop.xlane.xlu0 %1642 }
 0xdb6   :  { %v1644_v62 = vsub.f32 %v1640_v57, %v1643_v60 }
 0xdb8   :  { %v1645_v63 = vmul.f32 1.442695, %v1644_v62 }
 0xdb9   :  { %v1653_v3 = vpop.permute.xlu0 %1652 }
 0xdba   :  { %16090 = vpow2.f32 %v1645_v63  ;;  %14900 = vmatpush3.msra.mxu1 %v1653_v3 }
 0xdbb   :  { %14910 = vmatprep.subr.mxu1 %v16616_v23 }
 0xdbd   :  { %v1780_v18 = vpop.permute.xlu0 %1779 }
 0xdc4   :  { %v16091_v4 = vpop.eup %16090 }
 0xdc5   :  { %v1647_v8 = vsel %vm776_vm5, %v16091_v4, 0.0 }
 0xdc6   :  { %1648 = vadd.xlane.f32.xlu1 %v1647_v8 }
 0xdd7   :  { %1781 = vrot.lane.b32.xlu1 %v16950_v61, %s16607_s24 }
 0xdf6   :  { %v1555_v9 = vpop.f32.mrb[20].mxu0 }
 0xdf7   :  { %v1561_v10 = vadd.f32 %v1555_v9, %v1344_v36  ;;  %v14892_v11 = vpop.f32.mrb[21].mxu0 }
 0xdf8   :  { %v1558_v12 = vpop.f32.mrb[22].mxu0 }
 0xdf9   :  { %v14893_v13 = vpop.f32.mrb[23].mxu0 }
 0xe53   :  { %v1649_v14 = vpop.xlane.xlu1 %1648 }
 0xe54   :  { %16092 = vrcp.f32 %v1649_v14 }
 0xe57   :  { %v1782_v17 = vpop.permute.xlu1 %1781 }
 0xe5e   :  { %v16093_v15 = vpop.eup %16092 }
 0xe5f   :  { %v1651_v16 = vmul.f32 %v16093_v15, %v16091_v4 }
 0xe61   :  { %14902 = vmatmul.mubr.msk.f32.vlgmr.msra.gmra.mrb[20].mxu1 %vm776_vm5, %v1651_v16 }
 0xe62   :  { %14911 = vmatpush3.xpose.msk.msra.mxu1 %vm698_vm4, %v1782_v17  ;;  %14912 = vmatprep.mubr.msk.f32.mxu1 %vm16617_vm3, %v16616_v23 }
 0xe63   :  { %14915 = vmatprep.subr.mxu1 %v16616_v23 }
 0xe65   :  { %14913 = vmatmul.mubr.msk.f32.vlgmr.msra.gmra.mrb[22].mxu1 %vm698_vm4, %v1780_v18 }
 0xe66   :  { %14917 = vmatprep.mubr.msk.f32.mxu1 %vm16617_vm3, %v16616_v23 }
 0xf34   :  { %v1724_v21 = vpop.f32.mrb[20].mxu1 }
 0xf35   :  { %v1728_v22 = vpack.c.bf16 %v1724_v21, %v1724_v21  ;;  %v14903_v24 = vpop.f32.mrb[21].mxu1  ;;  %v17129_v21 = vld [vmem:[#allocation8 + $0x30] sm:$0xff]  }
 0xf37   :  { %14907 = vmatmul.mubr.msk.bf16.vlgmr.msra.gmra.mrb[24].mxu0 %vm698_vm4, %v1728_v22 }
 0xf38   :  { %v1853_v25 = vpop.f32.mrb[22].mxu1  ;;  %14922 = vmatprep.mubr.msk.bf16.mxu0 %vm16617_vm3, %v16616_v23  ;;  %14921 = vmatpush3.bf16.msra.mxu0 %v17105_v54 }
 0xf39   :  { %v1857_v26 = vmul.f32 0.25, %v1853_v25  ;;  %v14914_v27 = vpop.f32.mrb[23].mxu1  ;;  %14936 = vmatprep.subr.bf16.mxu0 %v16616_v23 }
 0xf3b   :  { %v1858_v28 = vsel %vm776_vm5, %v1857_v26, -inf }
 0xf3c   :  { %1859 = vmax.xlane.f32.xlu1 %v1858_v28 }
 0xf4d   :  { %1998 = vrot.lane.b32.xlu1 %v16950_v61, %s16621_s22 }
 0xf51   :  { %1996 = vrot.lane.b32.xlu1 %v16962_v6, %s16621_s22 }
 0xfc9   :  { %v1860_v29 = vpop.xlane.xlu1 %1859 }
 0xfca   :  { %v1861_v30 = vsub.f32 %v1857_v26, %v1860_v29 }
 0xfcc   :  { %v1862_v31 = vmul.f32 1.442695, %v1861_v30 }
 0xfcd   :  { %v1999_v44 = vpop.permute.xlu1 %1998 }
 0xfce   :  { %16094 = vpow2.f32 %v1862_v31 }
 0xfd1   :  { %v1997_v51 = vpop.permute.xlu1 %1996 }
 0xfd8   :  { %v16095_v32 = vpop.eup %16094 }
 0xfd9   :  { %v1864_v33 = vsel %vm776_vm5, %v16095_v32, 0.0 }
 0xfda   :  { %1865 = vadd.xlane.f32.xlu0 %v1864_v33 }
 0xff0   :  { %1869 = vrot.lane.b32.xlu0 %v16965_v7, %s16607_s24 }
0x100a   :  { %v1772_v34 = vpop.f32.mrb[24].mxu0 }
0x100b   :  { %v1778_v36 = vadd.f32 %v1772_v34, %v1561_v10  ;;  %v14908_v37 = vpop.f32.mrb[25].mxu0 }
0x100c   :  { %v1775_v38 = vpop.f32.mrb[26].mxu0 }
0x100d   :  { %v14909_v39 = vpop.f32.mrb[27].mxu0 }
0x1067   :  { %v1866_v41 = vpop.xlane.xlu0 %1865 }
0x1068   :  { %16096 = vrcp.f32 %v1866_v41 }
0x106b   :  { %v1870_v42 = vpop.permute.xlu0 %1869 }
0x106c   :  { %14916 = vmatpush3.msra.mxu1 %v1870_v42 }
0x106d   :  { %14926 = vmatprep.subr.mxu1 %v16616_v23 }
0x1072   :  { %v16097_v43 = vpop.eup %16096 }
0x1073   :  { %v1868_v45 = vmul.f32 %v16097_v43, %v16095_v32 }
0x1075   :  { %14918 = vmatmul.mubr.msk.f32.vlgmr.msra.gmra.mrb[24].mxu1 %vm776_vm5, %v1868_v45 }
0x1076   :  { %14927 = vmatpush3.xpose.msk.msra.mxu1 %vm698_vm4, %v1999_v44  ;;  %14928 = vmatprep.mubr.msk.f32.mxu1 %vm16617_vm3, %v16616_v23 }
0x1077   :  { %14931 = vmatprep.subr.mxu1 %v16616_v23 }
0x1079   :  { %14929 = vmatmul.mubr.msk.f32.vlgmr.msra.gmra.mrb[26].mxu1 %vm698_vm4, %v1997_v51 }
0x107a   :  { %14933 = vmatprep.mubr.msk.f32.mxu1 %vm16617_vm3, %v16616_v23 }
0x1148   :  { %v1941_v55 = vpop.f32.mrb[24].mxu1 }
0x1149   :  { %v1945_v56 = vpack.c.bf16 %v1941_v55, %v1941_v55  ;;  %v14919_v57 = vpop.f32.mrb[25].mxu1 }
0x114b   :  { %14923 = vmatmul.mubr.msk.bf16.vlgmr.msra.gmra.mrb[28].mxu0 %vm698_vm4, %v1945_v56 }
0x114c   :  { %v2070_v58 = vpop.f32.mrb[26].mxu1  ;;  %14938 = vmatprep.mubr.msk.bf16.mxu0 %vm16617_vm3, %v16616_v23  ;;  %14937 = vmatpush3.bf16.msra.mxu0 %v17129_v21 }
0x114d   :  { %v2074_v59 = vmul.f32 0.25, %v2070_v58  ;;  %v14930_v60 = vpop.f32.mrb[27].mxu1  ;;  %14952 = vmatprep.subr.bf16.mxu0 %v16616_v23 }
0x114f   :  { %v2075_v62 = vsel %vm776_vm5, %v2074_v59, -inf }
0x1150   :  { %2076 = vmax.xlane.f32.xlu0 %v2075_v62 }
0x1166   :  { %2086 = vrot.lane.b32.xlu0 %v16965_v7, %s16621_s22 }
0x116a   :  { %2213 = vrot.lane.b32.xlu0 %v16962_v6, %s16600_s0 }
0x11dd   :  { %v2077_v63 = vpop.xlane.xlu0 %2076 }
0x11de   :  { %v2078_v3 = vsub.f32 %v2074_v59, %v2077_v63 }
0x11e0   :  { %v2079_v4 = vmul.f32 1.442695, %v2078_v3 }
0x11e1   :  { %v2087_v8 = vpop.permute.xlu0 %2086 }
0x11e2   :  { %16098 = vpow2.f32 %v2079_v4  ;;  %14932 = vmatpush3.msra.mxu1 %v2087_v8 }
0x11e3   :  { %14942 = vmatprep.subr.mxu1 %v16616_v23 }
0x11ec   :  { %v16099_v9 = vpop.eup %16098 }
0x11ed   :  { %v2081_v10 = vsel %vm776_vm5, %v16099_v9, 0.0 }
0x11ee   :  { %2082 = vadd.xlane.f32.xlu1 %v2081_v10 }
0x11ff   :  { %2215 = vrot.lane.b32.xlu1 %v16950_v61, %s16600_s0  ;;  %v2214_v61 = vpop.permute.xlu0 %2213 }
0x121e   :  { %v1989_v11 = vpop.f32.mrb[28].mxu0 }
0x121f   :  { %v1995_v12 = vadd.f32 %v1989_v11, %v1778_v36  ;;  %v14924_v13 = vpop.f32.mrb[29].mxu0  ;;  %v17144_v36 = vld [vmem:[#allocation8 + $0x38] sm:$0xff]  }
0x1220   :  { %v1992_v14 = vpop.f32.mrb[30].mxu0 }
0x1221   :  { %v14925_v6 = vpop.f32.mrb[31].mxu0 }
0x127b   :  { %v2083_v15 = vpop.xlane.xlu1 %2082 }
0x127c   :  { %16100 = vrcp.f32 %v2083_v15 }
0x127f   :  { %v2216_v18 = vpop.permute.xlu1 %2215 }
0x1286   :  { %v16101_v16 = vpop.eup %16100 }
0x1287   :  { %v2085_v17 = vmul.f32 %v16101_v16, %v16099_v9 }
0x1289   :  { %14934 = vmatmul.mubr.msk.f32.vlgmr.msra.gmra.mrb[28].mxu1 %vm776_vm5, %v2085_v17 }
0x128a   :  { %14943 = vmatpush3.xpose.msk.msra.mxu1 %vm698_vm4, %v2216_v18  ;;  %14944 = vmatprep.mubr.msk.f32.mxu1 %vm16617_vm3, %v16616_v23 }
0x128b   :  { %14947 = vmatprep.subr.mxu1 %v16616_v23 }
0x128d   :  { %14945 = vmatmul.mubr.msk.f32.vlgmr.msra.gmra.mrb[30].mxu1 %vm698_vm4, %v2214_v61 }
0x128e   :  { %14949 = vmatprep.mubr.msk.f32.mxu1 %vm16617_vm3, %v16616_v23 }
0x135c   :  { %v2158_v22 = vpop.f32.mrb[28].mxu1 }
0x135d   :  { %v2162_v24 = vpack.c.bf16 %v2158_v22, %v2158_v22  ;;  %v14935_v25 = vpop.f32.mrb[29].mxu1 }
0x135f   :  { %14939 = vmatmul.mubr.msk.bf16.vlgmr.msra.gmra.mrb[32].mxu0 %vm698_vm4, %v2162_v24 }
0x1360   :  { %v2287_v26 = vpop.f32.mrb[30].mxu1  ;;  %14954 = vmatprep.mubr.msk.bf16.mxu0 %vm16617_vm3, %v16616_v23  ;;  %14953 = vmatpush3.bf16.msra.mxu0 %v17144_v36 }
0x1361   :  { %v2291_v27 = vmul.f32 0.25, %v2287_v26  ;;  %v14946_v28 = vpop.f32.mrb[31].mxu1  ;;  %14968 = vmatprep.subr.mxu0 %v16616_v23 }
0x1363   :  { %v2292_v29 = vsel %vm776_vm5, %v2291_v27, -inf }
0x1364   :  { %2293 = vmax.xlane.f32.xlu1 %v2292_v29 }
0x1375   :  { %2594 = vrot.lane.b32.xlu1 %v16956_v5, %s16618_s4 }
0x1379   :  { %2592 = vrot.lane.b32.xlu1 %v16952_v1, %s16618_s4 }
0x13f1   :  { %v2294_v30 = vpop.xlane.xlu1 %2293 }
0x13f2   :  { %v2295_v31 = vsub.f32 %v2291_v27, %v2294_v30 }
0x13f4   :  { %v2296_v32 = vmul.f32 1.442695, %v2295_v31 }
0x13f5   :  { %v2595_v57 = vpop.permute.xlu1 %2594 }
0x13f6   :  { %16102 = vpow2.f32 %v2296_v32 }
0x13f9   :  { %v2593_v63 = vpop.permute.xlu1 %2592 }
0x1400   :  { %v16103_v33 = vpop.eup %16102 }
0x1401   :  { %v2298_v34 = vsel %vm776_vm5, %v16103_v33, 0.0 }
0x1402   :  { %2299 = vadd.xlane.f32.xlu0 %v2298_v34 }
0x1418   :  { %2303 = vrot.lane.b32.xlu0 %v16965_v7, %s16600_s0 }
0x1432   :  { %v2206_v37 = vpop.f32.mrb[32].mxu0 }
0x1433   :  { %v2212_v38 = vadd.f32 %v2206_v37, %v1995_v12  ;;  %v14940_v39 = vpop.f32.mrb[33].mxu0  ;;  %v17176_v12 = vld [vmem:[%s18257_s5] ss:$0 sm:$0xff] }
0x1434   :  { %v2209_v41 = vpop.f32.mrb[34].mxu0 }
0x1435   :  { %v14941_v42 = vpop.f32.mrb[35].mxu0 }
0x148f   :  { %v2300_v43 = vpop.xlane.xlu0 %2299 }
0x1490   :  { %16104 = vrcp.f32 %v2300_v43 }
0x1493   :  { %v2304_v44 = vpop.permute.xlu0 %2303 }
0x1494   :  { %14948 = vmatpush3.msra.mxu1 %v2304_v44 }
0x1495   :  { %14958 = vmatprep.subr.mxu1 %v16616_v23 }
0x149a   :  { %v16105_v45 = vpop.eup %16104 }
0x149b   :  { %v2302_v51 = vmul.f32 %v16105_v45, %v16103_v33 }
0x149d   :  { %14950 = vmatmul.mubr.msk.f32.vlgmr.msra.gmra.mrb[32].mxu1 %vm776_vm5, %v2302_v51 }
0x149e   :  { %14959 = vmatpush3.xpose.msk.msra.mxu1 %vm698_vm4, %v16956_v5  ;;  %14960 = vmatprep.mubr.msk.f32.mxu1 %vm16617_vm3, %v16616_v23 }
0x149f   :  { %14963 = vmatprep.subr.mxu1 %v16616_v23 }
0x14a1   :  { %14961 = vmatmul.mubr.msk.f32.vlgmr.msra.gmra.mrb[34].mxu1 %vm698_vm4, %v16952_v1 }
0x14a2   :  { %14964 = vmatpush3.msra.mxu1 %v16954_v2  ;;  %14965 = vmatprep.mubr.msk.f32.mxu1 %vm16617_vm3, %v16616_v23 }
0x14a3   :  { %14973 = vmatprep.subr.mxu1 %v16616_v23 }
0x1570   :  { %v2375_v7 = vpop.f32.mrb[32].mxu1 }
0x1571   :  { %v2379_v55 = vpack.c.bf16 %v2375_v7, %v2375_v7  ;;  %v14951_v56 = vpop.f32.mrb[33].mxu1 }
0x1573   :  { %14955 = vmatmul.mubr.msk.bf16.vlgmr.msra.gmra.mrb[36].mxu0 %vm698_vm4, %v2379_v55 }
0x1574   :  { %14969 = vmatpush3.xpose.msk.msra.mxu0 %vm698_vm4, %v2595_v57  ;;  %v2502_v58 = vpop.f32.mrb[34].mxu1  ;;  %14970 = vmatprep.mubr.msk.f32.mxu0 %vm16617_vm3, %v16616_v23 }
0x1575   :  { %v2506_v59 = vmul.f32 0.25, %v2502_v58  ;;  %v14962_v60 = vpop.f32.mrb[35].mxu1  ;;  %14978 = vmatprep.subr.bf16.mxu0 %v16616_v23 }
0x1577   :  { %v2507_v62 = vsel %vm776_vm5, %v2506_v59, -inf }
0x1578   :  { %2508 = vmax.xlane.f32.xlu0 %v2507_v62 }
0x157b   :  { %14971 = vmatmul.mubr.msk.f32.vlgmr.msra.gmra.mrb[40].mxu0 %vm698_vm4, %v2593_v63 }
0x157c   :  { %14979 = vmatpush3.bf16.msra.mxu0 %v16994_v35  ;;  %14980 = vmatprep.mubr.msk.bf16.mxu0 %vm16617_vm3, %v16616_v23 }
0x157d   :  { %14990 = vmatprep.subr.mxu0 %v16616_v23 }
0x1605   :  { %v2509_v3 = vpop.xlane.xlu0 %2508 }
0x1606   :  { %v2510_v4 = vsub.f32 %v2506_v59, %v2509_v3 }
0x1608   :  { %v2511_v8 = vmul.f32 1.442695, %v2510_v4 }
0x160a   :  { %16106 = vpow2.f32 %v2511_v8 }
0x1614   :  { %v16107_v9 = vpop.eup %16106 }
0x1615   :  { %v2513_v10 = vsel %vm776_vm5, %v16107_v9, 0.0 }
0x1616   :  { %2514 = vadd.xlane.f32.xlu0 %v2513_v10 }
0x1646   :  { %v2423_v11 = vpop.f32.mrb[36].mxu0 }
0x1647   :  { %v2429_v35 = vadd.f32 %v2423_v11, %v2212_v38  ;;  %v14956_v13 = vpop.f32.mrb[37].mxu0 }
0x1648   :  { %v2426_v14 = vpop.f32.mrb[38].mxu0 }
0x1649   :  { %v4119_v6 = vadd.f32 %v17176_v12, %v2429_v35  ;;  %v14957_v15 = vpop.f32.mrb[39].mxu0 }
0x164b   :  { %v17180_v16 = vadd.f32 %v4119_v6, %v16928_v47 }
0x164e   :  { %v2666_v17 = vpop.f32.mrb[40].mxu0 }
0x164f   :  { %v2670_v18 = vmul.f32 0.25, %v2666_v17  ;;  %v14972_v61 = vpop.f32.mrb[41].mxu0 }
0x1651   :  { %v2671_v22 = vsel %vm776_vm5, %v2670_v18, -inf }
0x1652   :  { %2672 = vmax.xlane.f32.xlu1 %v2671_v22 }
0x1663   :  { %2683 = vrot.lane.b32.xlu1 %v16954_v2, %s16618_s4 }
0x1667   :  { %2846 = vrot.lane.b32.xlu1 %v16952_v1, %s16619_s11 }
0x16a3   :  { %v2515_v24 = vpop.xlane.xlu0 %2514 }
0x16a4   :  { %16108 = vrcp.f32 %v2515_v24 }
0x16ae   :  { %v16109_v25 = vpop.eup %16108 }
0x16af   :  { %v2517_v26 = vmul.f32 %v16109_v25, %v16107_v9 }
0x16b1   :  { %14966 = vmatmul.mubr.msk.f32.vlgmr.msra.gmra.mrb[36].mxu1 %vm776_vm5, %v2517_v26 }
0x16b2   :  { %14975 = vmatprep.mubr.msk.f32.mxu1 %vm16617_vm3, %v16616_v23 }
0x16df   :  { %v2673_v47 = vpop.xlane.xlu1 %2672 }
0x16e0   :  { %v2674_v27 = vsub.f32 %v2670_v18, %v2673_v47 }
0x16e2   :  { %v2675_v28 = vmul.f32 1.442695, %v2674_v27 }
0x16e3   :  { %v2684_v29 = vpop.permute.xlu1 %2683 }
0x16e4   :  { %16110 = vpow2.f32 %v2675_v28  ;;  %14974 = vmatpush3.msra.mxu1 %v2684_v29 }
0x16e5   :  { %14984 = vmatprep.subr.bf16.mxu1 %v16616_v23 }
0x16e7   :  { %v2847_v55 = vpop.permute.xlu1 %2846 }
0x16ee   :  { %v16111_v30 = vpop.eup %16110 }
0x16ef   :  { %v2677_v31 = vsel %vm776_vm5, %v16111_v30, 0.0 }
0x16f0   :  { %2678 = vadd.xlane.f32.xlu0 %v2677_v31 }
0x1706   :  { %2848 = vrot.lane.b32.xlu0 %v16956_v5, %s16619_s11 }
0x177d   :  { %v2679_v32 = vpop.xlane.xlu0 %2678 }
0x177e   :  { %16112 = vrcp.f32 %v2679_v32 }
0x1781   :  { %v2849_v44 = vpop.permute.xlu0 %2848 }
0x1784   :  { %v2587_v33 = vpop.f32.mrb[36].mxu1 }
0x1785   :  { %v14967_v34 = vpop.f32.mrb[37].mxu1  ;;  %v2591_v39 = vpack.c.bf16 %v2587_v33, %v2587_v33 }
0x1788   :  { %v16113_v37 = vpop.eup %16112 }
0x1789   :  { %v2681_v38 = vmul.f32 %v16113_v37, %v16111_v30 }
0x178b   :  { %14976 = vmatmul.mubr.msk.f32.vlgmr.msra.gmra.mrb[38].mxu1 %vm776_vm5, %v2681_v38 }
0x178c   :  { %14985 = vmatpush3.bf16.msra.mxu1 %v17001_v40  ;;  %14986 = vmatprep.mubr.msk.bf16.mxu1 %vm16617_vm3, %v16616_v23 }
0x178d   :  { %14995 = vmatprep.subr.mxu1 %v16616_v23 }
0x178f   :  { %14987 = vmatmul.mubr.msk.bf16.vlgmr.msra.gmra.mrb[40].mxu1 %vm698_vm4, %v2591_v39 }
0x1790   :  { %14997 = vmatprep.mubr.msk.f32.mxu1 %vm16617_vm3, %v16616_v23 }
0x185e   :  { %v2755_v41 = vpop.f32.mrb[38].mxu1 }
0x185f   :  { %v2759_v42 = vpack.c.bf16 %v2755_v41, %v2755_v41  ;;  %v14977_v43 = vpop.f32.mrb[39].mxu1 }
0x1861   :  { %14981 = vmatmul.mubr.msk.bf16.vlgmr.msra.gmra.mrb[44].mxu0 %vm698_vm4, %v2759_v42 }
0x1862   :  { %14991 = vmatpush3.xpose.msk.msra.mxu0 %vm698_vm4, %v2849_v44  ;;  %v2840_v40 = vpop.f32.mrb[40].mxu1  ;;  %14992 = vmatprep.mubr.msk.f32.mxu0 %vm16617_vm3, %v16616_v23 }
0x1863   :  { %v14988_v45 = vpop.f32.mrb[41].mxu1  ;;  %15000 = vmatprep.subr.bf16.mxu0 %v16616_v23 }
0x1864   :  { %v2843_v51 = vpop.f32.mrb[42].mxu1 }
0x1865   :  { %v14989_v7 = vpop.f32.mrb[43].mxu1 }
0x1869   :  { %14993 = vmatmul.mubr.msk.f32.vlgmr.msra.gmra.mrb[42].mxu0 %vm698_vm4, %v2847_v55 }
0x186a   :  { %15001 = vmatpush3.bf16.msra.mxu0 %v17033_v19  ;;  %15002 = vmatprep.mubr.msk.bf16.mxu0 %vm16617_vm3, %v16616_v23 }
0x186b   :  { %15016 = vmatprep.subr.bf16.mxu0 %v16616_v23 }
0x1934   :  { %v2797_v56 = vpop.f32.mrb[44].mxu0 }
0x1935   :  { %v2841_v57 = vadd.f32 %v2840_v40, %v2797_v56  ;;  %v14982_v58 = vpop.f32.mrb[45].mxu0 }
0x1936   :  { %v2800_v59 = vpop.f32.mrb[46].mxu0 }
0x1937   :  { %v14983_v60 = vpop.f32.mrb[47].mxu0 }
0x193c   :  { %v2920_v62 = vpop.f32.mrb[42].mxu0 }
0x193d   :  { %v2924_v63 = vmul.f32 0.25, %v2920_v62  ;;  %v14994_v3 = vpop.f32.mrb[43].mxu0 }
0x193f   :  { %v2925_v4 = vsel %vm776_vm5, %v2924_v63, -inf }
0x1940   :  { %2926 = vmax.xlane.f32.xlu1 %v2925_v4 }
0x1951   :  { %3059 = vrot.lane.b32.xlu1 %v16956_v5, %s16620_s10 }
0x1955   :  { %3057 = vrot.lane.b32.xlu1 %v16952_v1, %s16620_s10 }
0x19cd   :  { %v2927_v19 = vpop.xlane.xlu1 %2926 }
0x19ce   :  { %v2928_v8 = vsub.f32 %v2924_v63, %v2927_v19 }
0x19d0   :  { %v2929_v9 = vmul.f32 1.442695, %v2928_v8 }
0x19d1   :  { %v3060_v6 = vpop.permute.xlu1 %3059 }
0x19d2   :  { %16114 = vpow2.f32 %v2929_v9 }
0x19d5   :  { %v3058_v17 = vpop.permute.xlu1 %3057 }
0x19dc   :  { %v16115_v10 = vpop.eup %16114 }
0x19dd   :  { %v2931_v11 = vsel %vm776_vm5, %v16115_v10, 0.0 }
0x19de   :  { %2932 = vadd.xlane.f32.xlu0 %v2931_v11 }
0x19f4   :  { %2936 = vrot.lane.b32.xlu0 %v16954_v2, %s16619_s11 }
0x1a6b   :  { %v2933_v35 = vpop.xlane.xlu0 %2932 }
0x1a6c   :  { %16116 = vrcp.f32 %v2933_v35 }
0x1a6f   :  { %v2937_v13 = vpop.permute.xlu0 %2936 }
0x1a70   :  { %14996 = vmatpush3.msra.mxu1 %v2937_v13 }
0x1a71   :  { %15006 = vmatprep.subr.mxu1 %v16616_v23 }
0x1a76   :  { %v16117_v14 = vpop.eup %16116 }
0x1a77   :  { %v2935_v15 = vmul.f32 %v16117_v14, %v16115_v10 }
0x1a79   :  { %14998 = vmatmul.mubr.msk.f32.vlgmr.msra.gmra.mrb[44].mxu1 %vm776_vm5, %v2935_v15 }
0x1a7a   :  { %15007 = vmatpush3.xpose.msk.msra.mxu1 %vm698_vm4, %v3060_v6  ;;  %15008 = vmatprep.mubr.msk.f32.mxu1 %vm16617_vm3, %v16616_v23 }
0x1a7b   :  { %15011 = vmatprep.subr.mxu1 %v16616_v23 }
0x1a7d   :  { %15009 = vmatmul.mubr.msk.f32.vlgmr.msra.gmra.mrb[46].mxu1 %vm698_vm4, %v3058_v17 }
0x1a7e   :  { %15013 = vmatprep.mubr.msk.f32.mxu1 %vm16617_vm3, %v16616_v23 }
0x1b4c   :  { %v3008_v18 = vpop.f32.mrb[44].mxu1 }
0x1b4d   :  { %v3012_v61 = vpack.c.bf16 %v3008_v18, %v3008_v18  ;;  %v14999_v22 = vpop.f32.mrb[45].mxu1 }
0x1b4f   :  { %15003 = vmatmul.mubr.msk.bf16.vlgmr.msra.gmra.mrb[48].mxu0 %vm698_vm4, %v3012_v61 }
0x1b50   :  { %v3131_v24 = vpop.f32.mrb[46].mxu1  ;;  %15017 = vmatpush3.bf16.msra.mxu0 %v17057_v48  ;;  %15018 = vmatprep.mubr.msk.bf16.mxu0 %vm16617_vm3, %v16616_v23 }
0x1b51   :  { %v3135_v25 = vmul.f32 0.25, %v3131_v24  ;;  %v15010_v26 = vpop.f32.mrb[47].mxu1  ;;  %15032 = vmatprep.subr.bf16.mxu0 %v16616_v23 }
0x1b53   :  { %v3136_v47 = vsel %vm776_vm5, %v3135_v25, -inf }
0x1b54   :  { %3137 = vmax.xlane.f32.xlu0 %v3136_v47 }
0x1b6a   :  { %3147 = vrot.lane.b32.xlu0 %v16954_v2, %s16620_s10 }
0x1b6e   :  { %3268 = vrot.lane.b32.xlu0 %v16952_v1, %s16596_s2 }
0x1be1   :  { %v3138_v27 = vpop.xlane.xlu0 %3137 }
0x1be2   :  { %v3139_v28 = vsub.f32 %v3135_v25, %v3138_v27 }
0x1be4   :  { %v3140_v29 = vmul.f32 1.442695, %v3139_v28 }
0x1be5   :  { %v3148_v48 = vpop.permute.xlu0 %3147 }
0x1be6   :  { %16118 = vpow2.f32 %v3140_v29  ;;  %15012 = vmatpush3.msra.mxu1 %v3148_v48 }
0x1be7   :  { %15022 = vmatprep.subr.mxu1 %v16616_v23 }
0x1be9   :  { %v3269_v44 = vpop.permute.xlu0 %3268 }
0x1bf0   :  { %v16119_v30 = vpop.eup %16118 }
0x1bf1   :  { %v3142_v31 = vsel %vm776_vm5, %v16119_v30, 0.0 }
0x1bf2   :  { %3143 = vadd.xlane.f32.xlu1 %v3142_v31 }
0x1c03   :  { %3270 = vrot.lane.b32.xlu1 %v16956_v5, %s16596_s2 }
0x1c22   :  { %v3050_v32 = vpop.f32.mrb[48].mxu0 }
0x1c23   :  { %v3056_v33 = vadd.f32 %v3050_v32, %v2841_v57  ;;  %v15004_v34 = vpop.f32.mrb[49].mxu0 }
0x1c24   :  { %v3053_v37 = vpop.f32.mrb[50].mxu0 }
0x1c25   :  { %v15005_v38 = vpop.f32.mrb[51].mxu0 }
0x1c7f   :  { %v3144_v39 = vpop.xlane.xlu1 %3143 }
0x1c80   :  { %16120 = vrcp.f32 %v3144_v39 }
0x1c83   :  { %v3271_v43 = vpop.permute.xlu1 %3270 }
0x1c8a   :  { %v16121_v41 = vpop.eup %16120 }
0x1c8b   :  { %v3146_v42 = vmul.f32 %v16121_v41, %v16119_v30 }
0x1c8d   :  { %15014 = vmatmul.mubr.msk.f32.vlgmr.msra.gmra.mrb[48].mxu1 %vm776_vm5, %v3146_v42 }
0x1c8e   :  { %15023 = vmatpush3.xpose.msk.msra.mxu1 %vm698_vm4, %v3271_v43  ;;  %15024 = vmatprep.mubr.msk.f32.mxu1 %vm16617_vm3, %v16616_v23 }
0x1c8f   :  { %15027 = vmatprep.subr.mxu1 %v16616_v23 }
0x1c91   :  { %15025 = vmatmul.mubr.msk.f32.vlgmr.msra.gmra.mrb[50].mxu1 %vm698_vm4, %v3269_v44 }
0x1c92   :  { %15029 = vmatprep.mubr.msk.f32.mxu1 %vm16617_vm3, %v16616_v23 }
0x1d60   :  { %v3219_v40 = vpop.f32.mrb[48].mxu1 }
0x1d61   :  { %v3223_v45 = vpack.c.bf16 %v3219_v40, %v3219_v40  ;;  %v15015_v51 = vpop.f32.mrb[49].mxu1 }
0x1d63   :  { %15019 = vmatmul.mubr.msk.bf16.vlgmr.msra.gmra.mrb[52].mxu0 %vm698_vm4, %v3223_v45 }
0x1d64   :  { %v3342_v7 = vpop.f32.mrb[50].mxu1  ;;  %15033 = vmatpush3.bf16.msra.mxu0 %v17081_v20  ;;  %15034 = vmatprep.mubr.msk.bf16.mxu0 %vm16617_vm3, %v16616_v23 }
0x1d65   :  { %v3346_v55 = vmul.f32 0.25, %v3342_v7  ;;  %v15026_v56 = vpop.f32.mrb[51].mxu1  ;;  %15048 = vmatprep.subr.bf16.mxu0 %v16616_v23 }
0x1d67   :  { %v3347_v57 = vsel %vm776_vm5, %v3346_v55, -inf }
0x1d68   :  { %3348 = vmax.xlane.f32.xlu1 %v3347_v57 }
0x1d79   :  { %3481 = vrot.lane.b32.xlu1 %v16956_v5, %s16607_s24 }
0x1d7d   :  { %3479 = vrot.lane.b32.xlu1 %v16952_v1, %s16607_s24 }
0x1df5   :  { %v3349_v58 = vpop.xlane.xlu1 %3348 }
0x1df6   :  { %v3350_v59 = vsub.f32 %v3346_v55, %v3349_v58 }
0x1df8   :  { %v3351_v60 = vmul.f32 1.442695, %v3350_v59 }
0x1df9   :  { %v3482_v35 = vpop.permute.xlu1 %3481 }
0x1dfa   :  { %16122 = vpow2.f32 %v3351_v60 }
0x1dfd   :  { %v3480_v14 = vpop.permute.xlu1 %3479 }
0x1e04   :  { %v16123_v20 = vpop.eup %16122 }
0x1e05   :  { %v3353_v62 = vsel %vm776_vm5, %v16123_v20, 0.0 }
0x1e06   :  { %3354 = vadd.xlane.f32.xlu0 %v3353_v62 }
0x1e1c   :  { %3358 = vrot.lane.b32.xlu0 %v16954_v2, %s16596_s2 }
0x1e36   :  { %v3261_v63 = vpop.f32.mrb[52].mxu0 }
0x1e37   :  { %v3267_v3 = vadd.f32 %v3261_v63, %v3056_v33  ;;  %v15020_v4 = vpop.f32.mrb[53].mxu0 }
0x1e38   :  { %v3264_v19 = vpop.f32.mrb[54].mxu0 }
0x1e39   :  { %v15021_v8 = vpop.f32.mrb[55].mxu0 }
0x1e93   :  { %v3355_v9 = vpop.xlane.xlu0 %3354 }
0x1e94   :  { %16124 = vrcp.f32 %v3355_v9 }
0x1e97   :  { %v3359_v10 = vpop.permute.xlu0 %3358 }
0x1e98   :  { %15028 = vmatpush3.msra.mxu1 %v3359_v10 }
0x1e99   :  { %15038 = vmatprep.subr.mxu1 %v16616_v23 }
0x1e9e   :  { %v16125_v11 = vpop.eup %16124 }
0x1e9f   :  { %v3357_v13 = vmul.f32 %v16125_v11, %v16123_v20 }
0x1ea1   :  { %15030 = vmatmul.mubr.msk.f32.vlgmr.msra.gmra.mrb[52].mxu1 %vm776_vm5, %v3357_v13 }
0x1ea2   :  { %15039 = vmatpush3.xpose.msk.msra.mxu1 %vm698_vm4, %v3482_v35  ;;  %15040 = vmatprep.mubr.msk.f32.mxu1 %vm16617_vm3, %v16616_v23 }
0x1ea3   :  { %15043 = vmatprep.subr.mxu1 %v16616_v23 }
0x1ea5   :  { %15041 = vmatmul.mubr.msk.f32.vlgmr.msra.gmra.mrb[54].mxu1 %vm698_vm4, %v3480_v14 }
0x1ea6   :  { %15045 = vmatprep.mubr.msk.f32.mxu1 %vm16617_vm3, %v16616_v23 }
0x1f74   :  { %v3430_v6 = vpop.f32.mrb[52].mxu1 }
0x1f75   :  { %v3434_v15 = vpack.c.bf16 %v3430_v6, %v3430_v6  ;;  %v15031_v17 = vpop.f32.mrb[53].mxu1 }
0x1f77   :  { %15035 = vmatmul.mubr.msk.bf16.vlgmr.msra.gmra.mrb[56].mxu0 %vm698_vm4, %v3434_v15 }
0x1f78   :  { %v3553_v18 = vpop.f32.mrb[54].mxu1  ;;  %15049 = vmatpush3.bf16.msra.mxu0 %v17105_v54  ;;  %15050 = vmatprep.mubr.msk.bf16.mxu0 %vm16617_vm3, %v16616_v23 }
0x1f79   :  { %v3557_v61 = vmul.f32 0.25, %v3553_v18  ;;  %v15042_v22 = vpop.f32.mrb[55].mxu1  ;;  %15064 = vmatprep.subr.bf16.mxu0 %v16616_v23 }
0x1f7b   :  { %v3558_v24 = vsel %vm776_vm5, %v3557_v61, -inf }
0x1f7c   :  { %3559 = vmax.xlane.f32.xlu0 %v3558_v24 }
0x1f92   :  { %3569 = vrot.lane.b32.xlu0 %v16954_v2, %s16607_s24 }
0x1f96   :  { %3690 = vrot.lane.b32.xlu0 %v16952_v1, %s16621_s22 }
0x2009   :  { %v3560_v25 = vpop.xlane.xlu0 %3559 }
0x200a   :  { %v3561_v26 = vsub.f32 %v3557_v61, %v3560_v25 }
0x200c   :  { %v3562_v47 = vmul.f32 1.442695, %v3561_v26 }
0x200d   :  { %v3570_v54 = vpop.permute.xlu0 %3569 }
0x200e   :  { %16126 = vpow2.f32 %v3562_v47  ;;  %15044 = vmatpush3.msra.mxu1 %v3570_v54 }
0x200f   :  { %15054 = vmatprep.subr.mxu1 %v16616_v23 }
0x2011   :  { %v3691_v39 = vpop.permute.xlu0 %3690 }
0x2018   :  { %v16127_v27 = vpop.eup %16126 }
0x2019   :  { %v3564_v28 = vsel %vm776_vm5, %v16127_v27, 0.0 }
0x201a   :  { %3565 = vadd.xlane.f32.xlu1 %v3564_v28 }
0x202b   :  { %3692 = vrot.lane.b32.xlu1 %v16956_v5, %s16621_s22 }
0x204a   :  { %v3472_v29 = vpop.f32.mrb[56].mxu0 }
0x204b   :  { %v3478_v48 = vadd.f32 %v3472_v29, %v3267_v3  ;;  %v15036_v30 = vpop.f32.mrb[57].mxu0 }
0x204c   :  { %v3475_v31 = vpop.f32.mrb[58].mxu0 }
0x204d   :  { %v15037_v32 = vpop.f32.mrb[59].mxu0 }
0x20a7   :  { %v3566_v33 = vpop.xlane.xlu1 %3565 }
0x20a8   :  { %16128 = vrcp.f32 %v3566_v33 }
0x20ab   :  { %v3693_v38 = vpop.permute.xlu1 %3692 }
0x20b2   :  { %v16129_v34 = vpop.eup %16128 }
0x20b3   :  { %v3568_v37 = vmul.f32 %v16129_v34, %v16127_v27 }
0x20b5   :  { %15046 = vmatmul.mubr.msk.f32.vlgmr.msra.gmra.mrb[56].mxu1 %vm776_vm5, %v3568_v37 }
0x20b6   :  { %15055 = vmatpush3.xpose.msk.msra.mxu1 %vm698_vm4, %v3693_v38  ;;  %15056 = vmatprep.mubr.msk.f32.mxu1 %vm16617_vm3, %v16616_v23 }
0x20b7   :  { %15059 = vmatprep.subr.mxu1 %v16616_v23 }
0x20b9   :  { %15057 = vmatmul.mubr.msk.f32.vlgmr.msra.gmra.mrb[58].mxu1 %vm698_vm4, %v3691_v39 }
0x20ba   :  { %15061 = vmatprep.mubr.msk.f32.mxu1 %vm16617_vm3, %v16616_v23 }
0x2188   :  { %v3641_v41 = vpop.f32.mrb[56].mxu1 }
0x2189   :  { %v3645_v42 = vpack.c.bf16 %v3641_v41, %v3641_v41  ;;  %v15047_v43 = vpop.f32.mrb[57].mxu1 }
0x218b   :  { %15051 = vmatmul.mubr.msk.bf16.vlgmr.msra.gmra.mrb[60].mxu0 %vm698_vm4, %v3645_v42 }
0x218c   :  { %v3764_v44 = vpop.f32.mrb[58].mxu1  ;;  %15065 = vmatpush3.bf16.msra.mxu0 %v17129_v21  ;;  %15066 = vmatprep.mubr.msk.bf16.mxu0 %vm16617_vm3, %v16616_v23 }
0x218d   :  { %v3768_v40 = vmul.f32 0.25, %v3764_v44  ;;  %v15058_v45 = vpop.f32.mrb[59].mxu1  ;;  %15080 = vmatprep.subr.bf16.mxu0 %v16616_v23  ;;  %v15746_v44 = vld [vmem:[#allocation13] ss:$16 sps:$4 sm:$0xff]  }
0x218e   :  { %v15749_v45 = vld [vmem:[#allocation13 + $0x8] ss:$16 sps:$4 sm:$0xff]  }
0x218f   :  { %v3769_v51 = vsel %vm776_vm5, %v3768_v40, -inf }
0x2190   :  { %3770 = vmax.xlane.f32.xlu1 %v3769_v51  ;;  %v15751_v51 = vld [vmem:[#allocation13 + $0xc] ss:$16 sps:$4 sm:$0xff]  }
0x21a1   :  { %3903 = vrot.lane.b32.xlu1 %v16956_v5, %s16600_s0 }
0x21a5   :  { %3901 = vrot.lane.b32.xlu1 %v16952_v1, %s16600_s0 }
0x221d   :  { %v3771_v7 = vpop.xlane.xlu1 %3770 }
0x221e   :  { %v3772_v55 = vsub.f32 %v3768_v40, %v3771_v7  ;;  %v15748_v40 = vld [vmem:[#allocation13 + $0x4] ss:$16 sps:$4 sm:$0xff]  }
0x221f   :  { %v15754_v7 = vld [vmem:[#allocation13 + $0x24] ss:$16 sps:$4 sm:$0xff]  }
0x2220   :  { %v3773_v56 = vmul.f32 1.442695, %v3772_v55  ;;  %v15757_v55 = vld [vmem:[#allocation13 + $0x2c] ss:$16 sps:$4 sm:$0xff]  }
0x2221   :  { %v3904_v3 = vpop.permute.xlu1 %3903 }
0x2222   :  { %16130 = vpow2.f32 %v3773_v56  ;;  %v15763_v56 = vld [vmem:[#allocation13 + $0x4c] ss:$16 sps:$4 sm:$0xff]  }
0x2225   :  { %v3902_v19 = vpop.permute.xlu1 %3901 }
0x222c   :  { %v16131_v21 = vpop.eup %16130 }
0x222d   :  { %v3775_v57 = vsel %vm776_vm5, %v16131_v21, 0.0 }
0x222e   :  { %3776 = vadd.xlane.f32.xlu0 %v3775_v57  ;;  %v15761_v57 = vld [vmem:[#allocation13 + $0x48] ss:$16 sps:$4 sm:$0xff]  }
0x2244   :  { %3780 = vrot.lane.b32.xlu0 %v16954_v2, %s16621_s22 }
0x225e   :  { %v3683_v58 = vpop.f32.mrb[60].mxu0 }
0x225f   :  { %v3689_v59 = vadd.f32 %v3683_v58, %v3478_v48  ;;  %v15052_v60 = vpop.f32.mrb[61].mxu0 }
0x2260   :  { %v3686_v20 = vpop.f32.mrb[62].mxu0 }
0x2261   :  { %v15053_v62 = vpop.f32.mrb[63].mxu0 }
0x2262   :  { %v15766_v62 = vld [vmem:[#allocation13 + $0x64] ss:$16 sps:$4 sm:$0xff]  }
0x22bb   :  { %v3777_v5 = vpop.xlane.xlu0 %3776 }
0x22bc   :  { %16132 = vrcp.f32 %v3777_v5  ;;  %v15769_v5 = vld [vmem:[#allocation13 + $0x6c] ss:$16 sps:$4 sm:$0xff]  }
0x22bf   :  { %v3781_v63 = vpop.permute.xlu0 %3780 }
0x22c0   :  { %15060 = vmatpush3.msra.mxu1 %v3781_v63  ;;  %v15764_v63 = vld [vmem:[#allocation13 + $0x60] ss:$16 sps:$4 sm:$0xff]  }
0x22c1   :  { %15070 = vmatprep.subr.mxu1 %v16616_v23 }
0x22c6   :  { %v16133_v1 = vpop.eup %16132 }
0x22c7   :  { %v3779_v4 = vmul.f32 %v16133_v1, %v16131_v21  ;;  %v15758_v21 = vld [vmem:[#allocation13 + $0x40] ss:$16 sps:$4 sm:$0xff]   ;;  %v15767_v1 = vld [vmem:[#allocation13 + $0x68] ss:$16 sps:$4 sm:$0xff]  }
0x22c9   :  { %15062 = vmatmul.mubr.msk.f32.vlgmr.msra.gmra.mrb[60].mxu1 %vm776_vm5, %v3779_v4  ;;  %v15770_v4 = vld [vmem:[#allocation13 + $0x80] ss:$16 sps:$4 sm:$0xff]  }
0x22ca   :  { %15071 = vmatpush3.xpose.msk.msra.mxu1 %vm698_vm4, %v3904_v3  ;;  %15072 = vmatprep.mubr.msk.f32.mxu1 %vm16617_vm3, %v16616_v23  ;;  %v15772_v3 = vld [vmem:[#allocation13 + $0x84] ss:$16 sps:$4 sm:$0xff]  }
0x22cb   :  { %15075 = vmatprep.subr.mxu1 %v16616_v23 }
0x22cd   :  { %15073 = vmatmul.mubr.msk.f32.vlgmr.msra.gmra.mrb[62].mxu1 %vm698_vm4, %v3902_v19  ;;  %v15773_v19 = vld [vmem:[#allocation13 + $0x88] ss:$16 sps:$4 sm:$0xff]  }
0x22ce   :  { %15077 = vmatprep.mubr.msk.f32.mxu1 %vm16617_vm3, %v16616_v23 }
0x239c   :  { %v3852_v8 = vpop.f32.mrb[60].mxu1 }
0x239d   :  { %v3856_v9 = vpack.c.bf16 %v3852_v8, %v3852_v8  ;;  %v15063_v10 = vpop.f32.mrb[61].mxu1  ;;  %v15775_v8 = vld [vmem:[#allocation13 + $0x8c] ss:$16 sps:$4 sm:$0xff]  }
0x239e   :  { %v15781_v10 = vld [vmem:[#allocation13 + $0xac] ss:$16 sps:$4 sm:$0xff]  }
0x239f   :  { %15067 = vmatmul.mubr.msk.bf16.vlgmr.msra.gmra.mrb[64].mxu0 %vm698_vm4, %v3856_v9  ;;  %v15778_v9 = vld [vmem:[#allocation13 + $0xa4] ss:$16 sps:$4 sm:$0xff]  }
0x23a0   :  { %v3975_v11 = vpop.f32.mrb[62].mxu1  ;;  %15081 = vmatpush3.bf16.msra.mxu0 %v17144_v36  ;;  %15082 = vmatprep.mubr.msk.bf16.mxu0 %vm16617_vm3, %v16616_v23 }
0x23a1   :  { %v3979_v35 = vmul.f32 0.25, %v3975_v11  ;;  %v15074_v13 = vpop.f32.mrb[63].mxu1  ;;  %4390 = vmatprep.subr.bf16.mxu0 %v15751_v51  ;;  %v15776_v11 = vld [vmem:[#allocation13 + $0xa0] ss:$16 sps:$4 sm:$0xff]  }
0x23a2   :  { %v15784_v13 = vld [vmem:[#allocation13 + $0xc4] ss:$16 sps:$4 sm:$0xff]   ;;  %v15802_v51 = vld [vmem:[#allocation16 + $0x50] sm:$0xff]  }
0x23a3   :  { %v3980_v14 = vsel %vm776_vm5, %v3979_v35, -inf }
0x23a4   :  { %3981 = vmax.xlane.f32.xlu0 %v3980_v14  ;;  %v15787_v14 = vld [vmem:[#allocation13 + $0xcc] ss:$16 sps:$4 sm:$0xff]  }
0x23ba   :  { %3991 = vrot.lane.b32.xlu0 %v16954_v2, %s16600_s0 }
0x2431   :  { %v3982_v6 = vpop.xlane.xlu0 %3981 }
0x2432   :  { %v3983_v15 = vsub.f32 %v3979_v35, %v3982_v6  ;;  %v15779_v35 = vld [vmem:[#allocation13 + $0xa8] ss:$16 sps:$4 sm:$0xff]   ;;  %v15782_v6 = vld [vmem:[#allocation13 + $0xc0] ss:$16 sps:$4 sm:$0xff]  }
0x2434   :  { %v3984_v17 = vmul.f32 1.442695, %v3983_v15  ;;  %v15785_v15 = vld [vmem:[#allocation13 + $0xc8] ss:$16 sps:$4 sm:$0xff]  }
0x2435   :  { %v3992_v18 = vpop.permute.xlu0 %3991 }
0x2436   :  { %16134 = vpow2.f32 %v3984_v17  ;;  %15076 = vmatpush3.msra.mxu1 %v3992_v18  ;;  %v15790_v17 = vld [vmem:[#allocation13 + $0xe4] ss:$16 sps:$4 sm:$0xff]   ;;  %v15793_v18 = vld [vmem:[#allocation13 + $0xec] ss:$16 sps:$4 sm:$0xff]  }
0x2437   :  { %4347 = vmatprep.subr.bf16.mxu1 %v15748_v40  ;;  %v15799_v40 = vld [vmem:[#allocation16 + $0xc8] sm:$0xff]  }
0x2440   :  { %v16135_v61 = vpop.eup %16134 }
0x2441   :  { %v3986_v36 = vsel %vm776_vm5, %v16135_v61, 0.0 }
0x2442   :  { %3987 = vadd.xlane.f32.xlu1 %v3986_v36  ;;  %v15791_v36 = vld [vmem:[#allocation13 + $0xe8] ss:$16 sps:$4 sm:$0xff]  }
0x2446   :  { %4125 = vadd.xlane.f32.xlu1 %v17180_v16 }
0x2472   :  { %v3894_v22 = vpop.f32.mrb[64].mxu0 }
0x2473   :  { %v3900_v24 = vadd.f32 %v3894_v22, %v3689_v59  ;;  %v15068_v25 = vpop.f32.mrb[65].mxu0  ;;  %v15794_v22 = vld [vmem:[#allocation16 + $0x40] sm:$0xff]  }
0x2474   :  { %v3897_v26 = vpop.f32.mrb[66].mxu0 }
0x2475   :  { %v15069_v47 = vpop.f32.mrb[67].mxu0 }
0x24cf   :  { %v3988_v54 = vpop.xlane.xlu1 %3987 }
0x24d0   :  { %16136 = vrcp.f32 %v3988_v54 }
0x24d3   :  { %v4126_v30 = vpop.xlane.xlu1 %4125 }
0x24d4   :  { %v4130_v32 = vmul.f32 0.0078125, %v4126_v30 }
0x24d6   :  { %v17333_v42 = vsub.f32 %v17180_v16, %v4130_v32  ;;  %v15760_v16 = vld [vmem:[#allocation13 + $0x44] ss:$16 sps:$4 sm:$0xff]  }
0x24d8   :  { %v4134_v43 = vmul.f32 %v17333_v42, %v17333_v42 }
0x24da   :  { %v16137_v2 = vpop.eup %16136 }
0x24db   :  { %v3990_v27 = vmul.f32 %v16137_v2, %v16135_v61  ;;  %v15788_v61 = vld [vmem:[#allocation13 + $0xe0] ss:$16 sps:$4 sm:$0xff]  }
0x24dd   :  { %15078 = vmatmul.mubr.msk.f32.vlgmr.msra.gmra.mrb[64].mxu1 %vm776_vm5, %v3990_v27 }
0x24de   :  { %4379 = vmatprep.mubr.bf16.mxu1 %v16615_v0  ;;  %4348 = vmatpush1.bf16.msra.mxu1 %v15746_v44  ;;  %v15798_v44 = vld [vmem:[#allocation16 + $0x48] sm:$0xff]  }
0x24df   :  { %4349 = vmatprep.subr.bf16.mxu1 %v15754_v7  ;;  %v15803_v7 = vld [vmem:[#allocation16 + $0xd0] sm:$0xff]  }
0x25b0   :  { %v4063_v28 = vpop.f32.mrb[64].mxu1 }
0x25b1   :  { %v4067_v29 = vpack.c.bf16 %v4063_v28, %v4063_v28  ;;  %v15079_v48 = vpop.f32.mrb[65].mxu1 }
0x25b2   :  { %v13913_v48 = vld [vmem:[#allocation10] ss:$0 sm:$0xff] }
0x25b3   :  { %15083 = vmatmul.mubr.msk.bf16.vlgmr.msra.gmra.mrb[68].mxu0 %vm698_vm4, %v4067_v29 }
0x25b4   :  { %4422 = vmatprep.mubr.bf16.mxu0 %v16615_v0  ;;  %4391 = vmatpush1.bf16.msra.mxu0 %v15749_v45  ;;  %v15801_v45 = vld [vmem:[#allocation16 + $0x88] sm:$0xff]  }
0x25b5   :  { %4392 = vmatprep.subr.bf16.mxu0 %v15757_v55  ;;  %v15804_v55 = vld [vmem:[#allocation16 + $0x10] sm:$0xff]  }
0x2686   :  { %v4105_v31 = vpop.f32.mrb[68].mxu0 }
0x2687   :  { %v4111_v33 = vadd.f32 %v4105_v31, %v3900_v24  ;;  %v15084_v34 = vpop.f32.mrb[69].mxu0  ;;  %v15795_v24 = vld [vmem:[#allocation16 + $0xc0] sm:$0xff]  }
0x2688   :  { %v4108_v37 = vpop.f32.mrb[70].mxu0 }
0x2689   :  { %v4120_v38 = vadd.f32 %v17176_v12, %v4111_v33  ;;  %v15085_v39 = vpop.f32.mrb[71].mxu0  ;;  %v15752_v12 = vld [vmem:[#allocation13 + $0x20] ss:$16 sps:$4 sm:$0xff]   ;;  %v13914_v33 = vld [vmem:[#allocation11] ss:$0 sm:$0xff] }
0x268a   :  { %4350 = vmatpush1.bf16.msra.mxu1 %v15752_v12  ;;  %v15796_v39 = vld [vmem:[#allocation16] sm:$0xff]   ;;  %v15805_v12 = vld [vmem:[#allocation16 + $0x90] sm:$0xff]  }
0x268b   :  { %v4122_v41 = vadd.f32 %v16926_v46, %v4120_v38  ;;  %v15755_v46 = vld [vmem:[#allocation13 + $0x28] ss:$16 sps:$4 sm:$0xff]   ;;  %4351 = vmatprep.subr.bf16.mxu1 %v15760_v16 }
0x268c   :  { %4393 = vmatpush1.bf16.msra.mxu0 %v15755_v46  ;;  %v15806_v46 = vld [vmem:[#allocation16 + $0x58] sm:$0xff]  }
0x268d   :  { %4127 = vadd.xlane.f32.xlu1 %v4122_v41  ;;  %4394 = vmatprep.subr.bf16.mxu0 %v15763_v56  ;;  %v15807_v16 = vld [vmem:[#allocation16 + $0xd8] sm:$0xff]  }
0x268e   :  { %4352 = vmatpush1.bf16.msra.mxu1 %v15758_v21  ;;  %v15808_v56 = vld [vmem:[#allocation16 + $0x18] sm:$0xff]  }
0x268f   :  { %4353 = vmatprep.subr.bf16.mxu1 %v15766_v62  ;;  %v15809_v21 = vld [vmem:[#allocation16 + $0x98] sm:$0xff]   ;;  %v15815_v62 = vld [vmem:[#allocation16 + $0xe8] sm:$0xff]  }
0x2690   :  { %4395 = vmatpush1.bf16.msra.mxu0 %v15761_v57  ;;  %v15810_v57 = vld [vmem:[#allocation16 + $0x60] sm:$0xff]  }
0x2691   :  { %4136 = vadd.xlane.f32.xlu1 %v4134_v43  ;;  %4396 = vmatprep.subr.bf16.mxu0 %v15769_v5  ;;  %v15816_v5 = vld [vmem:[#allocation16 + $0x28] sm:$0xff]  }
0x2692   :  { %4354 = vmatpush1.bf16.msra.mxu1 %v15764_v63  ;;  %v15817_v63 = vld [vmem:[#allocation16 + $0xa8] sm:$0xff]  }
0x2693   :  { %4355 = vmatprep.subr.bf16.mxu1 %v15772_v3  ;;  %v15819_v3 = vld [vmem:[#allocation16 + $0xf0] sm:$0xff]  }
0x2694   :  { %4397 = vmatpush1.bf16.msra.mxu0 %v15767_v1  ;;  %v15818_v1 = vld [vmem:[#allocation16 + $0x70] sm:$0xff]  }
0x2695   :  { %4398 = vmatprep.subr.bf16.mxu0 %v15775_v8  ;;  %v15822_v8 = vld [vmem:[#allocation16 + $0x78] sm:$0xff]  }
0x2696   :  { %4356 = vmatpush1.bf16.msra.mxu1 %v15770_v4  ;;  %v15820_v4 = vld [vmem:[#allocation16 + $0x30] sm:$0xff]  }
0x2697   :  { %4357 = vmatprep.subr.bf16.mxu1 %v15778_v9  ;;  %v15823_v9 = vld [vmem:[#allocation16 + $0xf8] sm:$0xff]  }
0x2698   :  { %4399 = vmatpush1.bf16.msra.mxu0 %v15773_v19  ;;  %v15821_v19 = vld [vmem:[#allocation16 + $0xb0] sm:$0xff]  }
0x2699   :  { %4400 = vmatprep.subr.bf16.mxu0 %v15781_v10  ;;  %v15824_v10 = vld [vmem:[#allocation16 + $0x38] sm:$0xff]  }
0x269a   :  { %4358 = vmatpush1.bf16.msra.mxu1 %v15776_v11  ;;  %v15825_v11 = vld [vmem:[#allocation16 + $0xb8] sm:$0xff]  }
0x269b   :  { %4359 = vmatprep.subr.bf16.mxu1 %v15784_v13  ;;  %v17346_v13 = vsub.s32 3, %v16936_v49 }
0x269c   :  { %4401 = vmatpush1.bf16.msra.mxu0 %v15779_v35  ;;  %v4165_v35 = vld [vmem:[#allocation14] sm:$0xf] }
0x269d   :  { %4402 = vmatprep.subr.bf16.mxu0 %v15787_v14  ;;  %v4170_v14 = vrot.slane %v4165_v35, %v16942_v52 }
0x269e   :  { %4360 = vmatpush1.bf16.msra.mxu1 %v15782_v6  ;;  %v4178_v6 = vrot.slane %v4165_v35, %v16945_v53 }
0x269f   :  { %4361 = vmatprep.subr.bf16.mxu1 %v15790_v17  ;;  %v4182_v17 = vrot.slane %v4165_v35, %v17346_v13 }
0x26a0   :  { %4403 = vmatpush1.bf16.msra.mxu0 %v15785_v15  ;;  %v4174_v15 = vrot.slane %v4165_v35, %v16939_v50  ;;  %v15830_v35 = vld [vmem:[#allocation5 + $0xd8] ss:$12 sps:$4 sm:$0xff]  }
0x26a1   :  { %4404 = vmatprep.subr.bf16.mxu0 %v15793_v18 }
0x26a2   :  { %4362 = vmatpush1.bf16.msra.mxu1 %v15788_v61 }
0x26a3   :  { %14440 = vmatprep.subr.bf16.mxu1 %v15794_v22 }
0x26a4   :  { %4405 = vmatpush1.bf16.msra.mxu0 %v15791_v36 }
0x26a5   :  { %14462 = vmatprep.subr.bf16.mxu0 %v15795_v24 }
0x271a   :  { %v4128_v58 = vpop.xlane.xlu1 %4127 }
0x271b   :  { %v4131_v59 = vmul.f32 0.0078125, %v4128_v58  ;;  %v15811_v58 = vld [vmem:[#allocation16 + $0xe0] sm:$0xff]  }
0x271d   :  { %v4133_v60 = vsub.f32 %v4122_v41, %v4131_v59  ;;  %v15797_v41 = vld [vmem:[#allocation16 + $0x80] sm:$0xff]  }
0x271e   :  { %v4137_v25 = vpop.xlane.xlu1 %4136  ;;  %v15812_v59 = vld [vmem:[#allocation16 + $0x20] sm:$0xff]  }
0x271f   :  { %v4135_v20 = vmul.f32 %v4133_v60, %v4133_v60  ;;  %v4140_v26 = vmul.f32 0.0078125, %v4137_v25 }
0x2721   :  { %4138 = vadd.xlane.f32.xlu1 %v4135_v20  ;;  %v4142_v47 = vadd.f32 1e-05, %v4140_v26  ;;  %v15814_v20 = vld [vmem:[#allocation16 + $0x68] sm:$0xff]  }
0x2723   :  { %16138 = vrsqrt.f32 %v4142_v47 }
0x272d   :  { %v16139_v28 = vpop.eup %16138 }
0x272e   :  { %v4146_v29 = vmul.f32 %v16139_v28, %v17333_v42  ;;  %v15800_v42 = vld [vmem:[#allocation16 + $0x8] sm:$0xff]  }
0x2730   :  { %v4154_v32 = vmul.f32 %v13913_v48, %v4146_v29 }
0x2732   :  { %v17338_v37 = vadd.f32 %v13914_v33, %v4154_v32 }
0x27ae   :  { %v4139_v54 = vpop.xlane.xlu1 %4138 }
0x27af   :  { %v4141_v2 = vmul.f32 0.0078125, %v4139_v54 }
0x27b1   :  { %v4143_v27 = vadd.f32 1e-05, %v4141_v2 }
0x27b3   :  { %16140 = vrsqrt.f32 %v4143_v27 }
0x27bd   :  { %v16141_v30 = vpop.eup %16140 }
0x27be   :  { %v4147_v31 = vmul.f32 %v16141_v30, %v4133_v60  ;;  %v15813_v60 = vld [vmem:[#allocation16 + $0xa0] sm:$0xff]  }
0x27c0   :  { %v4155_v34 = vmul.f32 %v13913_v48, %v4147_v31 }
0x27c2   :  { %v17340_v38 = vadd.f32 %v13914_v33, %v4155_v34 }
0x27c4   :  { %v4164_v43 = vpack.c.bf16 %v17340_v38, %v17338_v37 }
0x27c6   :  { %4380 = vmatmul.mubr.bf16.vlgmr.msra.gmra.mrb[68].mxu1 %v4164_v43  ;;  %4423 = vmatmul.mubr.bf16.vlgmr.msra.gmra.mrb[72].mxu0 %v4164_v43 }
0x27c7   :  { %14441 = vmatpush3.bf16.msra.mxu1 %v15796_v39  ;;  %14463 = vmatpush3.bf16.msra.mxu0 %v15797_v41 }
0x27c8   :  { %14442 = vmatprep.subr.bf16.mxu1 %v15798_v44  ;;  %14464 = vmatprep.subr.bf16.mxu0 %v15799_v40 }
0x27cb   :  { %14443 = vmatpush3.bf16.msra.mxu1 %v15800_v42  ;;  %14465 = vmatpush3.bf16.msra.mxu0 %v15801_v45 }
0x27cc   :  { %14444 = vmatprep.subr.bf16.mxu1 %v15802_v51  ;;  %14466 = vmatprep.subr.bf16.mxu0 %v15803_v7 }
0x27cf   :  { %14445 = vmatpush3.bf16.msra.mxu1 %v15804_v55  ;;  %14467 = vmatpush3.bf16.msra.mxu0 %v15805_v12  ;;  %v13947_v12 = vld [vmem:[#allocation17] ss:$0 sm:$0xff] }
0x27d0   :  { %14446 = vmatprep.subr.bf16.mxu1 %v15806_v46  ;;  %14468 = vmatprep.subr.bf16.mxu0 %v15807_v16 }
0x27d3   :  { %14447 = vmatpush3.bf16.msra.mxu1 %v15808_v56  ;;  %14469 = vmatpush3.bf16.msra.mxu0 %v15809_v21 }
0x27d4   :  { %14448 = vmatprep.subr.bf16.mxu1 %v15810_v57  ;;  %14470 = vmatprep.subr.bf16.mxu0 %v15811_v58 }
0x27d7   :  { %14449 = vmatpush3.bf16.msra.mxu1 %v15812_v59  ;;  %14471 = vmatpush3.bf16.msra.mxu0 %v15813_v60 }
0x27d8   :  { %14450 = vmatprep.subr.bf16.mxu1 %v15814_v20  ;;  %14472 = vmatprep.subr.bf16.mxu0 %v15815_v62 }
0x27db   :  { %14451 = vmatpush3.bf16.msra.mxu1 %v15816_v5  ;;  %14473 = vmatpush3.bf16.msra.mxu0 %v15817_v63 }
0x27dc   :  { %14452 = vmatprep.subr.bf16.mxu1 %v15818_v1  ;;  %14474 = vmatprep.subr.bf16.mxu0 %v15819_v3 }
0x27df   :  { %14453 = vmatpush3.bf16.msra.mxu1 %v15820_v4  ;;  %14475 = vmatpush3.bf16.msra.mxu0 %v15821_v19 }
0x27e0   :  { %14454 = vmatprep.subr.bf16.mxu1 %v15822_v8  ;;  %14476 = vmatprep.subr.bf16.mxu0 %v15823_v9  ;;  %v15826_v8 = vld [vmem:[#allocation5 + $0xc0] ss:$12 sps:$4 sm:$0xff]   ;;  %v15828_v9 = vld [vmem:[#allocation5 + $0xc4] ss:$12 sps:$4 sm:$0xff]  }
0x27e3   :  { %14455 = vmatpush3.bf16.msra.mxu1 %v15824_v10  ;;  %14477 = vmatpush3.bf16.msra.mxu0 %v15825_v11  ;;  %v15829_v10 = vld [vmem:[#allocation5 + $0xc8] ss:$12 sps:$4 sm:$0xff]  }
0x27e4   :  { %15086 = vmatprep.subr.bf16.mxu0 %v16616_v23  ;;  %v15832_v11 = vld [vmem:[#allocation5 + $0xdc] ss:$12 sps:$4 sm:$0xff]   ;;  %5063 = vmatprep.subr.bf16.mxu1 %v15828_v9 }
0x2899   :  { %v4381_v18 = vpop.f32.mrb[68].mxu1  ;;  %v4424_v61 = vpop.f32.mrb[72].mxu0 }
0x289a   :  { %v4382_v36 = vadd.f32 %v4381_v18, %v4170_v14  ;;  %v4425_v22 = vadd.f32 %v4424_v61, %v4178_v6  ;;  %v4383_v24 = vpop.f32.mrb[69].mxu1  ;;  %v4426_v25 = vpop.f32.mrb[73].mxu0 }
0x289b   :  { %v4384_v26 = vadd.f32 %v4383_v24, %v4174_v15  ;;  %v4427_v47 = vadd.f32 %v4426_v25, %v4182_v17  ;;  %v4385_v54 = vpop.f32.mrb[70].mxu1  ;;  %v4428_v2 = vpop.f32.mrb[74].mxu0  ;;  %v15834_v24 = vld [vmem:[#allocation5 + $0xf0] ss:$12 sps:$4 sm:$0xff]   ;;  %v15837_v25 = vld [vmem:[#allocation5 + $0xf8] ss:$12 sps:$4 sm:$0xff]  }
0x289c   :  { %v4386_v49 = vadd.f32 %v4385_v54, %v4170_v14  ;;  %v4429_v27 = vadd.f32 %v4428_v2, %v4178_v6  ;;  %v4387_v28 = vpop.f32.mrb[71].mxu1  ;;  %v4430_v29 = vpop.f32.mrb[75].mxu0  ;;  %v4433_v31 = vmax.f32 %v4382_v36, 0.0  ;;  %v4435_v32 = vmax.f32 %v4425_v22, 0.0  ;;  %v15833_v36 = vld [vmem:[#allocation5 + $0xe0] ss:$12 sps:$4 sm:$0xff]  }
0x289d   :  { %v4388_v48 = vadd.f32 %v4387_v28, %v4174_v15  ;;  %v4431_v30 = vadd.f32 %v4430_v29, %v4182_v17  ;;  %v4434_v39 = vmax.f32 %v4384_v26, 0.0  ;;  %v4436_v41 = vmax.f32 %v4427_v47, 0.0  ;;  %v15836_v22 = vld [vmem:[#allocation5 + $0xf4] ss:$12 sps:$4 sm:$0xff]   ;;  %v15840_v26 = vld [vmem:[#allocation5 + $0x10c] ss:$12 sps:$4 sm:$0xff]  }
0x289e   :  { %v4437_v33 = vmax.f32 %v4386_v49, 0.0  ;;  %v4439_v34 = vmax.f32 %v4429_v27, 0.0  ;;  %v15838_v47 = vld [vmem:[#allocation5 + $0x108] ss:$12 sps:$4 sm:$0xff]   ;;  %v15841_v54 = vld [vmem:[#allocation5 + $0x110] ss:$12 sps:$4 sm:$0xff]  }
0x289f   :  { %v4438_v43 = vmax.f32 %v4388_v48, 0.0  ;;  %v4440_v44 = vmax.f32 %v4431_v30, 0.0  ;;  %v15844_v2 = vld [vmem:[#allocation5 + $0x124] ss:$12 sps:$4 sm:$0xff]   ;;  %v15842_v49 = vld [vmem:[#allocation5 + $0x120] ss:$12 sps:$4 sm:$0xff]  }
0x28a0   :  { %v4441_v40 = vpack.c.bf16 %v4437_v33, %v4433_v31  ;;  %v4443_v42 = vpack.c.bf16 %v4439_v34, %v4435_v32  ;;  %v15845_v27 = vld [vmem:[#allocation5 + $0x128] ss:$12 sps:$4 sm:$0xff]   ;;  %v15846_v29 = vld [vmem:[#allocation5 + $0x138] ss:$12 sps:$4 sm:$0xff]   ;;  %v15849_v48 = vld [vmem:[#allocation5 + $0x140] ss:$12 sps:$4 sm:$0xff]  }
0x28a1   :  { %v4442_v45 = vpack.c.bf16 %v4438_v43, %v4434_v39  ;;  %v4444_v51 = vpack.c.bf16 %v4440_v44, %v4436_v41  ;;  %v15848_v28 = vld [vmem:[#allocation5 + $0x13c] ss:$12 sps:$4 sm:$0xff]   ;;  %v15852_v30 = vld [vmem:[#allocation5 + $0x154] ss:$12 sps:$4 sm:$0xff]   ;;  %v15853_v32 = vld [vmem:[#allocation5 + $0x158] ss:$12 sps:$4 sm:$0xff]  }
0x28a2   :  { %v15850_v31 = vld [vmem:[#allocation5 + $0x150] ss:$12 sps:$4 sm:$0xff]   ;;  %v15856_v33 = vld [vmem:[#allocation5 + $0x16c] ss:$12 sps:$4 sm:$0xff]   ;;  %v15854_v34 = vld [vmem:[#allocation5 + $0x168] ss:$12 sps:$4 sm:$0xff]  }
0x28a3   :  { %4676 = vmatprep.mubr.bf16.mxu1 %v4442_v45  ;;  %4717 = vmatprep.mubr.bf16.mxu0 %v4444_v51  ;;  %v15857_v39 = vld [vmem:[#allocation5 + $0x170] ss:$12 sps:$4 sm:$0xff]  }
0x28a4   :  { %4677 = vmatmul.mubr.bf16.vlgmr.msra.gmra.mrb[72].mxu1 %v4441_v40  ;;  %4718 = vmatmul.mubr.bf16.vlgmr.msra.gmra.mrb[76].mxu0 %v4443_v42 }
0x28a5   :  { %5095 = vmatprep.mubr.bf16.mxu1 %v16615_v0  ;;  %15102 = vmatprep.mubr.msk.bf16.mxu0 %vm16617_vm3, %v16616_v23 }
0x28a6   :  { %15087 = vmatpush3.bf16.msra.mxu0 %v15829_v10  ;;  %5064 = vmatpush1.bf16.msra.mxu1 %v15826_v8 }
0x28a7   :  { %15088 = vmatprep.subr.bf16.mxu0 %v16616_v23  ;;  %5065 = vmatprep.subr.bf16.mxu1 %v15832_v11 }
0x28aa   :  { %5066 = vmatpush1.bf16.msra.mxu1 %v15830_v35  ;;  %15089 = vmatpush3.bf16.msra.mxu0 %v15833_v36 }
0x28ab   :  { %15090 = vmatprep.subr.bf16.mxu0 %v16616_v23  ;;  %5067 = vmatprep.subr.bf16.mxu1 %v15836_v22 }
0x28ae   :  { %5068 = vmatpush1.bf16.msra.mxu1 %v15834_v24  ;;  %15091 = vmatpush3.bf16.msra.mxu0 %v15837_v25 }
0x28af   :  { %15092 = vmatprep.subr.bf16.mxu0 %v16616_v23  ;;  %5069 = vmatprep.subr.bf16.mxu1 %v15840_v26 }
0x28b2   :  { %5070 = vmatpush1.bf16.msra.mxu1 %v15838_v47  ;;  %15093 = vmatpush3.bf16.msra.mxu0 %v15841_v54 }
0x28b3   :  { %5071 = vmatprep.subr.bf16.mxu1 %v15844_v2  ;;  %15094 = vmatprep.subr.bf16.mxu0 %v16616_v23 }
0x28b6   :  { %5072 = vmatpush1.bf16.msra.mxu1 %v15842_v49  ;;  %15095 = vmatpush3.bf16.msra.mxu0 %v15845_v27 }
0x28b7   :  { %5073 = vmatprep.subr.bf16.mxu1 %v15848_v28  ;;  %15096 = vmatprep.subr.bf16.mxu0 %v16616_v23 }
0x28ba   :  { %5074 = vmatpush1.bf16.msra.mxu1 %v15846_v29  ;;  %15097 = vmatpush3.bf16.msra.mxu0 %v15849_v48 }
0x28bb   :  { %5075 = vmatprep.subr.bf16.mxu1 %v15852_v30  ;;  %15098 = vmatprep.subr.bf16.mxu0 %v16616_v23 }
0x28be   :  { %5076 = vmatpush1.bf16.msra.mxu1 %v15850_v31  ;;  %15099 = vmatpush3.bf16.msra.mxu0 %v15853_v32 }
0x28bf   :  { %5077 = vmatprep.subr.bf16.mxu1 %v15856_v33  ;;  %15100 = vmatprep.subr.bf16.mxu0 %v16616_v23 }
0x28c2   :  { %5078 = vmatpush1.bf16.msra.mxu1 %v15854_v34  ;;  %15101 = vmatpush3.bf16.msra.mxu0 %v15857_v39 }
0x28c3   :  { %15111 = vmatprep.subr.mxu0 %v16616_v23  ;;  %15106 = vmatprep.subr.mxu1 %v16616_v23 }
0x2977   :  { %v14456_v7 = vpop.f32.mrb[72].mxu1  ;;  %v14478_v55 = vpop.f32.mrb[76].mxu0 }
0x2978   :  { %v14457_v46 = vpop.f32.mrb[73].mxu1  ;;  %v14479_v16 = vpop.f32.mrb[77].mxu0 }
0x2979   :  { %v14458_v56 = vadd.f32 %v14457_v46, %v14456_v7  ;;  %v14480_v21 = vadd.f32 %v14479_v16, %v14478_v55  ;;  %v14459_v57 = vpop.f32.mrb[74].mxu1  ;;  %v14481_v58 = vpop.f32.mrb[78].mxu0  ;;  %v13980_v55 = vld [vmem:[#allocation19] ss:$0 sm:$0xff] }
0x297a   :  { %v14460_v59 = vpop.f32.mrb[75].mxu1  ;;  %v14482_v60 = vpop.f32.mrb[79].mxu0 }
0x297b   :  { %v4679_v20 = vadd.f32 %v14458_v56, %v13947_v12  ;;  %v14461_v62 = vadd.f32 %v14460_v59, %v14459_v57  ;;  %v14483_v5 = vadd.f32 %v14482_v60, %v14481_v58  ;;  %v13981_v56 = vld [vmem:[#allocation20] ss:$0 sm:$0xff]  ;;  %v4918_v60 = vld [vmem:[#allocation7 + $0x3] sm:$0x7] }
0x297d   :  { %v4720_v63 = vadd.f32 %v14480_v21, %v4679_v20  ;;  %v4682_v1 = vadd.f32 %v14461_v62, %v13947_v12  ;;  %v4931_v20 = vrot.slane %v4918_v60, %v16945_v53  ;;  %v4927_v62 = vrot.slane %v4918_v60, %v16939_v50 }
0x297f   :  { %v4723_v3 = vadd.f32 %v14483_v5, %v4682_v1  ;;  %v4726_v4 = vadd.f32 %v4720_v63, %v17338_v37  ;;  %v4923_v1 = vrot.slane %v4918_v60, %v16942_v52 }
0x2981   :  { %4730 = vadd.xlane.f32.xlu0 %v4726_v4  ;;  %v4727_v19 = vadd.f32 %v4723_v3, %v17340_v38 }
0x2983   :  { %4732 = vadd.xlane.f32.xlu1 %v4727_v19 }
0x2a0e   :  { %v4731_v14 = vpop.xlane.xlu0 %4730 }
0x2a0f   :  { %v4734_v6 = vmul.f32 0.0078125, %v4731_v14 }
0x2a10   :  { %v4733_v15 = vpop.xlane.xlu1 %4732 }
0x2a11   :  { %v4735_v37 = vmul.f32 0.0078125, %v4733_v15  ;;  %v4736_v17 = vsub.f32 %v4726_v4, %v4734_v6 }
0x2a13   :  { %v4738_v18 = vmul.f32 %v4736_v17, %v4736_v17  ;;  %v4737_v38 = vsub.f32 %v4727_v19, %v4735_v37 }
0x2a15   :  { %4740 = vadd.xlane.f32.xlu1 %v4738_v18  ;;  %v4739_v61 = vmul.f32 %v4737_v38, %v4737_v38 }
0x2a19   :  { %4742 = vadd.xlane.f32.xlu1 %v4739_v61 }
0x2aa2   :  { %v4741_v41 = vpop.xlane.xlu1 %4740 }
0x2aa3   :  { %v4744_v43 = vmul.f32 0.0078125, %v4741_v41  ;;  %v17422_v41 = vld [vmem:[#allocation8 + $0x48] sm:$0xff]  }
0x2aa5   :  { %v4746_v44 = vadd.f32 1e-05, %v4744_v43 }
0x2aa6   :  { %v4743_v40 = vpop.xlane.xlu1 %4742 }
0x2aa7   :  { %16142 = vrsqrt.f32 %v4746_v44  ;;  %v4745_v42 = vmul.f32 0.0078125, %v4743_v40 }
0x2aa9   :  { %v4747_v45 = vadd.f32 1e-05, %v4745_v42  ;;  %v17427_v42 = vld [vmem:[#allocation8 + $0x40] sm:$0xff]  }
0x2aab   :  { %16144 = vrsqrt.f32 %v4747_v45 }
0x2ab1   :  { %v16143_v51 = vpop.eup %16142 }
0x2ab2   :  { %v4750_v7 = vmul.f32 %v16143_v51, %v4736_v17 }
0x2ab4   :  { %v4758_v16 = vmul.f32 %v13980_v55, %v4750_v7 }
0x2ab5   :  { %v16145_v12 = vpop.eup %16144 }
0x2ab6   :  { %v4751_v46 = vmul.f32 %v16145_v12, %v4737_v38  ;;  %v17366_v57 = vadd.f32 %v13981_v56, %v4758_v16 }
0x2ab8   :  { %v4759_v21 = vmul.f32 %v13980_v55, %v4751_v46 }
0x2aba   :  { %v17368_v58 = vadd.f32 %v13981_v56, %v4759_v21 }
0x2abc   :  { %v4916_v59 = vpack.c.bf16 %v17368_v58, %v17366_v57 }
0x2abe   :  { %5096 = vmatmul.mubr.bf16.vlgmr.msra.gmra.mrb[76].mxu1 %v4916_v59  ;;  %15103 = vmatmul.mubr.bf16.vlgmr.msra.gmra.mrb[80].mxu0 %v4916_v59 }
0x2abf   :  { %15108 = vmatprep.mubr.msk.f32.mxu1 %vm16617_vm3, %v16616_v23  ;;  %15113 = vmatprep.mubr.msk.f32.mxu0 %vm16617_vm3, %v16616_v23 }
0x2b91   :  { %v5097_v5 = vpop.f32.mrb[76].mxu1  ;;  %v5140_v63 = vpop.f32.mrb[80].mxu0 }
0x2b92   :  { %v17379_v3 = vadd.f32 %v5140_v63, %v4931_v20  ;;  %v5099_v4 = vpop.f32.mrb[77].mxu1  ;;  %v15104_v19 = vpop.f32.mrb[81].mxu0  ;;  %v17394_v37 = vadd.f32 %v5097_v5, %v4923_v1 }
0x2b93   :  { %v17381_v8 = vadd.f32 %v5099_v4, %v4927_v62  ;;  %v5101_v9 = vpop.f32.mrb[78].mxu1  ;;  %v5143_v10 = vpop.f32.mrb[82].mxu0 }
0x2b94   :  { %v17383_v11 = vadd.f32 %v5101_v9, %v4923_v1  ;;  %v17385_v35 = vadd.f32 %v5143_v10, %v4931_v20  ;;  %v5103_v14 = vpop.f32.mrb[79].mxu1  ;;  %v15105_v6 = vpop.f32.mrb[83].mxu0  ;;  %15112 = vmatpush3.msra.mxu0 %v17379_v3 }
0x2b95   :  { %v17388_v15 = vadd.f32 %v5103_v14, %v4927_v62  ;;  %5311 = vrot.lane.b32.xlu1 %v17381_v8, %s16618_s4  ;;  %15107 = vmatpush3.xpose.msk.msra.mxu1 %vm698_vm4, %v17381_v8 }
0x2b96   :  { %15116 = vmatprep.subr.mxu1 %v16616_v23  ;;  %15121 = vmatprep.subr.mxu0 %v16616_v23 }
0x2b98   :  { %15109 = vmatmul.mubr.msk.f32.vlgmr.msra.gmra.mrb[66].mxu1 %vm698_vm4, %v17394_v37 }
0x2b99   :  { %5309 = vrot.lane.b32.xlu1 %v17394_v37, %s16618_s4  ;;  %15118 = vmatprep.mubr.msk.f32.mxu1 %vm16617_vm3, %v16616_v23 }
0x2c07   :  { %v5312_v17 = vpop.permute.xlu1 %5311 }
0x2c08   :  { %15117 = vmatpush3.xpose.msk.msra.mxu1 %vm698_vm4, %v5312_v17 }
0x2c09   :  { %15126 = vmatprep.subr.bf16.mxu1 %v16616_v23 }
0x2c0b   :  { %v5310_v18 = vpop.permute.xlu1 %5309 }
0x2c0c   :  { %15119 = vmatmul.mubr.msk.f32.vlgmr.msra.gmra.mrb[80].mxu1 %vm698_vm4, %v5310_v18 }
0x2c0d   :  { %15128 = vmatprep.mubr.msk.bf16.mxu1 %vm16617_vm3, %v16616_v23  ;;  %15127 = vmatpush3.bf16.msra.mxu1 %v17422_v41 }
0x2c0e   :  { %15138 = vmatprep.subr.mxu1 %v16616_v23 }
0x2c6b   :  { %v5219_v38 = vpop.f32.mrb[66].mxu1 }
0x2c6c   :  { %v5223_v61 = vmul.f32 0.25, %v5219_v38  ;;  %v15110_v36 = vpop.f32.mrb[67].mxu1 }
0x2c6e   :  { %v5224_v22 = vsel %vm776_vm5, %v5223_v61, -inf }
0x2c6f   :  { %5225 = vmax.xlane.f32.xlu0 %v5224_v22 }
0x2cdf   :  { %v5383_v24 = vpop.f32.mrb[80].mxu1 }
0x2ce0   :  { %v5387_v25 = vmul.f32 0.25, %v5383_v24  ;;  %v15120_v26 = vpop.f32.mrb[81].mxu1 }
0x2ce2   :  { %v5388_v47 = vsel %vm776_vm5, %v5387_v25, -inf }
0x2ce3   :  { %5389 = vmax.xlane.f32.xlu1 %v5388_v47 }
0x2cfc   :  { %v5226_v54 = vpop.xlane.xlu0 %5225 }
0x2cfd   :  { %v5227_v2 = vsub.f32 %v5223_v61, %v5226_v54 }
0x2cff   :  { %v5228_v49 = vmul.f32 1.442695, %v5227_v2 }
0x2d01   :  { %16146 = vpow2.f32 %v5228_v49  ;;  %v17467_v49 = vld [vmem:[#allocation8 + $0x50] sm:$0xff]  }
0x2d0b   :  { %v16147_v27 = vpop.eup %16146 }
0x2d0c   :  { %v5230_v28 = vsel %vm776_vm5, %v16147_v27, 0.0 }
0x2d0d   :  { %5231 = vadd.xlane.f32.xlu0 %v5230_v28 }
0x2d70   :  { %v5390_v29 = vpop.xlane.xlu1 %5389 }
0x2d71   :  { %v5391_v48 = vsub.f32 %v5387_v25, %v5390_v29 }
0x2d73   :  { %v5392_v30 = vmul.f32 1.442695, %v5391_v48 }
0x2d75   :  { %16148 = vpow2.f32 %v5392_v30 }
0x2d7f   :  { %v16149_v31 = vpop.eup %16148 }
0x2d80   :  { %v5394_v32 = vsel %vm776_vm5, %v16149_v31, 0.0 }
0x2d81   :  { %5395 = vadd.xlane.f32.xlu0 %v5394_v32 }
0x2d97   :  { %5400 = vrot.lane.b32.xlu0 %v17379_v3, %s16618_s4 }
0x2d9a   :  { %v5232_v33 = vpop.xlane.xlu0 %5231 }
0x2d9b   :  { %16150 = vrcp.f32 %v5232_v33  ;;  %5577 = vrot.lane.b32.xlu0 %v17381_v8, %s16619_s11 }
0x2d9f   :  { %5575 = vrot.lane.b32.xlu0 %v17394_v37, %s16619_s11 }
0x2da5   :  { %v16151_v34 = vpop.eup %16150 }
0x2da6   :  { %v5234_v39 = vmul.f32 %v16151_v34, %v16147_v27 }
0x2da8   :  { %15114 = vmatmul.mubr.msk.f32.vlgmr.msra.gmra.mrb[84].mxu0 %vm776_vm5, %v5234_v39 }
0x2da9   :  { %15123 = vmatprep.mubr.msk.f32.mxu0 %vm16617_vm3, %v16616_v23 }
0x2e0e   :  { %v5396_v43 = vpop.xlane.xlu0 %5395 }
0x2e0f   :  { %16152 = vrcp.f32 %v5396_v43 }
0x2e12   :  { %v5401_v44 = vpop.permute.xlu0 %5400 }
0x2e13   :  { %15122 = vmatpush3.msra.mxu0 %v5401_v44 }
0x2e14   :  { %15132 = vmatprep.subr.bf16.mxu0 %v16616_v23 }
0x2e16   :  { %v5578_v56 = vpop.permute.xlu0 %5577 }
0x2e19   :  { %v16153_v40 = vpop.eup %16152 }
0x2e1a   :  { %v5398_v45 = vmul.f32 %v16153_v40, %v16149_v31  ;;  %v5576_v21 = vpop.permute.xlu0 %5575 }
0x2e1c   :  { %15124 = vmatmul.mubr.msk.f32.vlgmr.msra.gmra.mrb[86].mxu0 %vm776_vm5, %v5398_v45 }
0x2e1d   :  { %15133 = vmatpush3.bf16.msra.mxu0 %v17427_v42  ;;  %15134 = vmatprep.mubr.msk.bf16.mxu0 %vm16617_vm3, %v16616_v23 }
0x2e1e   :  { %15143 = vmatprep.subr.mxu0 %v16616_v23 }
0x2e7b   :  { %v5304_v51 = vpop.f32.mrb[84].mxu0 }
0x2e7c   :  { %v5308_v7 = vpack.c.bf16 %v5304_v51, %v5304_v51  ;;  %v15115_v55 = vpop.f32.mrb[85].mxu0 }
0x2e7e   :  { %15135 = vmatmul.mubr.msk.bf16.vlgmr.msra.gmra.mrb[88].mxu0 %vm698_vm4, %v5308_v7 }
0x2e7f   :  { %15145 = vmatprep.mubr.msk.f32.mxu0 %vm16617_vm3, %v16616_v23 }
0x2eef   :  { %v5472_v12 = vpop.f32.mrb[86].mxu0 }
0x2ef0   :  { %v5476_v46 = vpack.c.bf16 %v5472_v12, %v5472_v12  ;;  %v15125_v16 = vpop.f32.mrb[87].mxu0 }
0x2ef2   :  { %15129 = vmatmul.mubr.msk.bf16.vlgmr.msra.gmra.mrb[84].mxu1 %vm698_vm4, %v5476_v46 }
0x2ef3   :  { %15139 = vmatpush3.xpose.msk.msra.mxu1 %vm698_vm4, %v5578_v56  ;;  %15140 = vmatprep.mubr.msk.f32.mxu1 %vm16617_vm3, %v16616_v23 }
0x2ef4   :  { %15148 = vmatprep.subr.bf16.mxu1 %v16616_v23 }
0x2efa   :  { %15141 = vmatmul.mubr.msk.f32.vlgmr.msra.gmra.mrb[82].mxu1 %vm698_vm4, %v5576_v21 }
0x2efb   :  { %15150 = vmatprep.mubr.msk.bf16.mxu1 %vm16617_vm3, %v16616_v23  ;;  %15149 = vmatpush3.bf16.msra.mxu1 %v17467_v49 }
0x2efc   :  { %15164 = vmatprep.subr.bf16.mxu1 %v16616_v23 }
0x2f51   :  { %v5569_v59 = vpop.f32.mrb[88].mxu0 }
0x2f52   :  { %v15136_v60 = vpop.f32.mrb[89].mxu0 }
0x2f53   :  { %v5572_v20 = vpop.f32.mrb[90].mxu0 }
0x2f54   :  { %v15137_v62 = vpop.f32.mrb[91].mxu0 }
0x2fc5   :  { %v5520_v5 = vpop.f32.mrb[84].mxu1 }
0x2fc6   :  { %v5570_v63 = vadd.f32 %v5569_v59, %v5520_v5  ;;  %v15130_v1 = vpop.f32.mrb[85].mxu1  ;;  %v17486_v59 = vld [vmem:[#allocation8 + $0x58] sm:$0xff]  }
0x2fc7   :  { %v5523_v4 = vpop.f32.mrb[86].mxu1 }
0x2fc8   :  { %v15131_v19 = vpop.f32.mrb[87].mxu1 }
0x2fcd   :  { %v5649_v9 = vpop.f32.mrb[82].mxu1 }
0x2fce   :  { %v5653_v10 = vmul.f32 0.25, %v5649_v9  ;;  %v15142_v14 = vpop.f32.mrb[83].mxu1 }
0x2fd0   :  { %v5654_v6 = vsel %vm776_vm5, %v5653_v10, -inf }
0x2fd1   :  { %5655 = vmax.xlane.f32.xlu1 %v5654_v6 }
0x2fe2   :  { %5665 = vrot.lane.b32.xlu1 %v17379_v3, %s16619_s11 }
0x2fe6   :  { %5794 = vrot.lane.b32.xlu1 %v17381_v8, %s16620_s10 }
0x2fea   :  { %5792 = vrot.lane.b32.xlu1 %v17394_v37, %s16620_s10 }
0x305e   :  { %v5656_v17 = vpop.xlane.xlu1 %5655 }
0x305f   :  { %v5657_v18 = vsub.f32 %v5653_v10, %v5656_v17 }
0x3061   :  { %v5658_v38 = vmul.f32 1.442695, %v5657_v18 }
0x3062   :  { %v5666_v61 = vpop.permute.xlu1 %5665 }
0x3063   :  { %16154 = vpow2.f32 %v5658_v38  ;;  %15144 = vmatpush3.msra.mxu0 %v5666_v61 }
0x3064   :  { %15154 = vmatprep.subr.mxu0 %v16616_v23 }
0x3066   :  { %v5795_v26 = vpop.permute.xlu1 %5794 }
0x306a   :  { %v5793_v54 = vpop.permute.xlu1 %5792 }
0x306d   :  { %v16155_v36 = vpop.eup %16154 }
0x306e   :  { %v5660_v22 = vsel %vm776_vm5, %v16155_v36, 0.0 }
0x306f   :  { %5661 = vadd.xlane.f32.xlu0 %v5660_v22 }
0x3085   :  { %5882 = vrot.lane.b32.xlu0 %v17379_v3, %s16620_s10 }
0x3089   :  { %6011 = vrot.lane.b32.xlu0 %v17381_v8, %s16596_s2 }
0x30fc   :  { %v5662_v24 = vpop.xlane.xlu0 %5661 }
0x30fd   :  { %16156 = vrcp.f32 %v5662_v24 }
0x3100   :  { %v5883_v2 = vpop.permute.xlu0 %5882 }
0x3104   :  { %v6012_v12 = vpop.permute.xlu0 %6011 }
0x3107   :  { %v16157_v25 = vpop.eup %16156 }
0x3108   :  { %v5664_v47 = vmul.f32 %v16157_v25, %v16155_v36 }
0x310a   :  { %15146 = vmatmul.mubr.msk.f32.vlgmr.msra.gmra.mrb[92].mxu0 %vm776_vm5, %v5664_v47 }
0x310b   :  { %15155 = vmatpush3.xpose.msk.msra.mxu0 %vm698_vm4, %v5795_v26  ;;  %15156 = vmatprep.mubr.msk.f32.mxu0 %vm16617_vm3, %v16616_v23 }
0x310c   :  { %15159 = vmatprep.subr.mxu0 %v16616_v23 }
0x310e   :  { %15157 = vmatmul.mubr.msk.f32.vlgmr.msra.gmra.mrb[94].mxu0 %vm698_vm4, %v5793_v54 }
0x310f   :  { %15160 = vmatpush3.msra.mxu0 %v5883_v2  ;;  %15161 = vmatprep.mubr.msk.f32.mxu0 %vm16617_vm3, %v16616_v23 }
0x3110   :  { %15170 = vmatprep.subr.mxu0 %v16616_v23 }
0x31dd   :  { %v5737_v27 = vpop.f32.mrb[92].mxu0 }
0x31de   :  { %v5741_v28 = vpack.c.bf16 %v5737_v27, %v5737_v27  ;;  %v15147_v29 = vpop.f32.mrb[93].mxu0  ;;  %v17515_v27 = vld [vmem:[#allocation8 + $0x60] sm:$0xff]  }
0x31e0   :  { %15151 = vmatmul.mubr.msk.bf16.vlgmr.msra.gmra.mrb[88].mxu1 %vm698_vm4, %v5741_v28 }
0x31e1   :  { %v5866_v48 = vpop.f32.mrb[94].mxu0  ;;  %15166 = vmatprep.mubr.msk.bf16.mxu1 %vm16617_vm3, %v16616_v23  ;;  %15165 = vmatpush3.bf16.msra.mxu1 %v17486_v59 }
0x31e2   :  { %v5870_v30 = vmul.f32 0.25, %v5866_v48  ;;  %v15158_v31 = vpop.f32.mrb[95].mxu0  ;;  %15180 = vmatprep.subr.bf16.mxu1 %v16616_v23 }
0x31e4   :  { %v5871_v32 = vsel %vm776_vm5, %v5870_v30, -inf }
0x31e5   :  { %5872 = vmax.xlane.f32.xlu1 %v5871_v32 }
0x3272   :  { %v5873_v33 = vpop.xlane.xlu1 %5872 }
0x3273   :  { %v5874_v34 = vsub.f32 %v5870_v30, %v5873_v33 }
0x3275   :  { %v5875_v39 = vmul.f32 1.442695, %v5874_v34 }
0x3277   :  { %16158 = vpow2.f32 %v5875_v39 }
0x3281   :  { %v16159_v43 = vpop.eup %16158 }
0x3282   :  { %v5877_v44 = vsel %vm776_vm5, %v16159_v43, 0.0 }
0x3283   :  { %5878 = vadd.xlane.f32.xlu0 %v5877_v44 }
0x3299   :  { %6009 = vrot.lane.b32.xlu0 %v17394_v37, %s16596_s2 }
0x32b3   :  { %v5785_v40 = vpop.f32.mrb[88].mxu1 }
0x32b4   :  { %v5791_v45 = vadd.f32 %v5785_v40, %v5570_v63  ;;  %v15152_v51 = vpop.f32.mrb[89].mxu1 }
0x32b5   :  { %v5788_v7 = vpop.f32.mrb[90].mxu1 }
0x32b6   :  { %v15153_v55 = vpop.f32.mrb[91].mxu1 }
0x3310   :  { %v5879_v46 = vpop.xlane.xlu0 %5878 }
0x3311   :  { %16160 = vrcp.f32 %v5879_v46 }
0x3314   :  { %v6010_v21 = vpop.permute.xlu0 %6009 }
0x331b   :  { %v16161_v16 = vpop.eup %16160 }
0x331c   :  { %v5881_v56 = vmul.f32 %v16161_v16, %v16159_v43 }
0x331e   :  { %15162 = vmatmul.mubr.msk.f32.vlgmr.msra.gmra.mrb[96].mxu0 %vm776_vm5, %v5881_v56 }
0x331f   :  { %15171 = vmatpush3.xpose.msk.msra.mxu0 %vm698_vm4, %v6012_v12  ;;  %15172 = vmatprep.mubr.msk.f32.mxu0 %vm16617_vm3, %v16616_v23 }
0x3320   :  { %15175 = vmatprep.subr.mxu0 %v16616_v23 }
0x3322   :  { %15173 = vmatmul.mubr.msk.f32.vlgmr.msra.gmra.mrb[98].mxu0 %vm698_vm4, %v6010_v21 }
0x3323   :  { %15177 = vmatprep.mubr.msk.f32.mxu0 %vm16617_vm3, %v16616_v23 }
0x33f1   :  { %v5954_v60 = vpop.f32.mrb[96].mxu0 }
0x33f2   :  { %v5958_v20 = vpack.c.bf16 %v5954_v60, %v5954_v60  ;;  %v15163_v62 = vpop.f32.mrb[97].mxu0 }
0x33f4   :  { %15167 = vmatmul.mubr.msk.bf16.vlgmr.msra.gmra.mrb[92].mxu1 %vm698_vm4, %v5958_v20  ;;  %v17534_v20 = vld [vmem:[#allocation8 + $0x68] sm:$0xff]  }
0x33f5   :  { %v6083_v5 = vpop.f32.mrb[98].mxu0  ;;  %15182 = vmatprep.mubr.msk.bf16.mxu1 %vm16617_vm3, %v16616_v23  ;;  %15181 = vmatpush3.bf16.msra.mxu1 %v17515_v27 }
0x33f6   :  { %v6087_v63 = vmul.f32 0.25, %v6083_v5  ;;  %v15174_v1 = vpop.f32.mrb[99].mxu0  ;;  %15196 = vmatprep.subr.bf16.mxu1 %v16616_v23 }
0x33f8   :  { %v6088_v4 = vsel %vm776_vm5, %v6087_v63, -inf }
0x33f9   :  { %6089 = vmax.xlane.f32.xlu1 %v6088_v4 }
0x340a   :  { %6099 = vrot.lane.b32.xlu1 %v17379_v3, %s16596_s2 }
0x340e   :  { %6228 = vrot.lane.b32.xlu1 %v17381_v8, %s16607_s24 }
0x3412   :  { %6226 = vrot.lane.b32.xlu1 %v17394_v37, %s16607_s24 }
0x3486   :  { %v6090_v19 = vpop.xlane.xlu1 %6089 }
0x3487   :  { %v6091_v9 = vsub.f32 %v6087_v63, %v6090_v19 }
0x3489   :  { %v6092_v10 = vmul.f32 1.442695, %v6091_v9 }
0x348a   :  { %v6100_v14 = vpop.permute.xlu1 %6099 }
0x348b   :  { %16162 = vpow2.f32 %v6092_v10  ;;  %15176 = vmatpush3.msra.mxu0 %v6100_v14 }
0x348c   :  { %15186 = vmatprep.subr.mxu0 %v16616_v23 }
0x348e   :  { %v6229_v26 = vpop.permute.xlu1 %6228 }
0x3492   :  { %v6227_v54 = vpop.permute.xlu1 %6226 }
0x3495   :  { %v16163_v6 = vpop.eup %16162 }
0x3496   :  { %v6094_v17 = vsel %vm776_vm5, %v16163_v6, 0.0 }
0x3497   :  { %6095 = vadd.xlane.f32.xlu0 %v6094_v17 }
0x34ad   :  { %6316 = vrot.lane.b32.xlu0 %v17379_v3, %s16607_s24 }
0x34b1   :  { %6445 = vrot.lane.b32.xlu0 %v17381_v8, %s16621_s22 }
0x34c7   :  { %v6002_v18 = vpop.f32.mrb[92].mxu1 }
0x34c8   :  { %v6008_v38 = vadd.f32 %v6002_v18, %v5791_v45  ;;  %v15168_v61 = vpop.f32.mrb[93].mxu1 }
0x34c9   :  { %v6005_v36 = vpop.f32.mrb[94].mxu1 }
0x34ca   :  { %v15169_v22 = vpop.f32.mrb[95].mxu1 }
0x3524   :  { %v6096_v24 = vpop.xlane.xlu0 %6095 }
0x3525   :  { %16164 = vrcp.f32 %v6096_v24 }
0x3528   :  { %v6317_v2 = vpop.permute.xlu0 %6316 }
0x352c   :  { %v6446_v46 = vpop.permute.xlu0 %6445 }
0x352f   :  { %v16165_v25 = vpop.eup %16164 }
0x3530   :  { %v6098_v47 = vmul.f32 %v16165_v25, %v16163_v6 }
0x3532   :  { %15178 = vmatmul.mubr.msk.f32.vlgmr.msra.gmra.mrb[100].mxu0 %vm776_vm5, %v6098_v47 }
0x3533   :  { %15187 = vmatpush3.xpose.msk.msra.mxu0 %vm698_vm4, %v6229_v26  ;;  %15188 = vmatprep.mubr.msk.f32.mxu0 %vm16617_vm3, %v16616_v23 }
0x3534   :  { %15191 = vmatprep.subr.mxu0 %v16616_v23 }
0x3536   :  { %15189 = vmatmul.mubr.msk.f32.vlgmr.msra.gmra.mrb[102].mxu0 %vm698_vm4, %v6227_v54 }
0x3537   :  { %15192 = vmatpush3.msra.mxu0 %v6317_v2  ;;  %15193 = vmatprep.mubr.msk.f32.mxu0 %vm16617_vm3, %v16616_v23  ;;  %v17558_v2 = vld [vmem:[#allocation8 + $0x70] sm:$0xff]  }
0x3538   :  { %15202 = vmatprep.subr.mxu0 %v16616_v23 }
0x3605   :  { %v6171_v28 = vpop.f32.mrb[100].mxu0 }
0x3606   :  { %v6175_v29 = vpack.c.bf16 %v6171_v28, %v6171_v28  ;;  %v15179_v48 = vpop.f32.mrb[101].mxu0 }
0x3608   :  { %15183 = vmatmul.mubr.msk.bf16.vlgmr.msra.gmra.mrb[96].mxu1 %vm698_vm4, %v6175_v29 }
0x3609   :  { %v6300_v30 = vpop.f32.mrb[102].mxu0  ;;  %15198 = vmatprep.mubr.msk.bf16.mxu1 %vm16617_vm3, %v16616_v23  ;;  %15197 = vmatpush3.bf16.msra.mxu1 %v17534_v20 }
0x360a   :  { %v6304_v31 = vmul.f32 0.25, %v6300_v30  ;;  %v15190_v32 = vpop.f32.mrb[103].mxu0  ;;  %15212 = vmatprep.subr.bf16.mxu1 %v16616_v23 }
0x360c   :  { %v6305_v33 = vsel %vm776_vm5, %v6304_v31, -inf }
0x360d   :  { %6306 = vmax.xlane.f32.xlu1 %v6305_v33 }
0x369a   :  { %v6307_v34 = vpop.xlane.xlu1 %6306 }
0x369b   :  { %v6308_v39 = vsub.f32 %v6304_v31, %v6307_v34 }
0x369d   :  { %v6309_v43 = vmul.f32 1.442695, %v6308_v39 }
0x369f   :  { %16166 = vpow2.f32 %v6309_v43 }
0x36a9   :  { %v16167_v44 = vpop.eup %16166 }
0x36aa   :  { %v6311_v40 = vsel %vm776_vm5, %v16167_v44, 0.0 }
0x36ab   :  { %6312 = vadd.xlane.f32.xlu0 %v6311_v40 }
0x36c1   :  { %6443 = vrot.lane.b32.xlu0 %v17394_v37, %s16621_s22 }
0x36db   :  { %v6219_v45 = vpop.f32.mrb[96].mxu1 }
0x36dc   :  { %v6225_v51 = vadd.f32 %v6219_v45, %v6008_v38  ;;  %v15184_v7 = vpop.f32.mrb[97].mxu1  ;;  %v17573_v45 = vld [vmem:[#allocation8 + $0x78] sm:$0xff]  }
0x36dd   :  { %v6222_v55 = vpop.f32.mrb[98].mxu1 }
0x36de   :  { %v15185_v12 = vpop.f32.mrb[99].mxu1 }
0x3738   :  { %v6313_v16 = vpop.xlane.xlu0 %6312 }
0x3739   :  { %16168 = vrcp.f32 %v6313_v16 }
0x373c   :  { %v6444_v60 = vpop.permute.xlu0 %6443 }
0x3743   :  { %v16169_v56 = vpop.eup %16168 }
0x3744   :  { %v6315_v21 = vmul.f32 %v16169_v56, %v16167_v44 }
0x3746   :  { %15194 = vmatmul.mubr.msk.f32.vlgmr.msra.gmra.mrb[104].mxu0 %vm776_vm5, %v6315_v21 }
0x3747   :  { %15203 = vmatpush3.xpose.msk.msra.mxu0 %vm698_vm4, %v6446_v46  ;;  %15204 = vmatprep.mubr.msk.f32.mxu0 %vm16617_vm3, %v16616_v23 }
0x3748   :  { %15207 = vmatprep.subr.mxu0 %v16616_v23 }
0x374a   :  { %15205 = vmatmul.mubr.msk.f32.vlgmr.msra.gmra.mrb[106].mxu0 %vm698_vm4, %v6444_v60 }
0x374b   :  { %15209 = vmatprep.mubr.msk.f32.mxu0 %vm16617_vm3, %v16616_v23 }
0x3819   :  { %v6388_v62 = vpop.f32.mrb[104].mxu0 }
0x381a   :  { %v6392_v5 = vpack.c.bf16 %v6388_v62, %v6388_v62  ;;  %v15195_v63 = vpop.f32.mrb[105].mxu0 }
0x381c   :  { %15199 = vmatmul.mubr.msk.bf16.vlgmr.msra.gmra.mrb[100].mxu1 %vm698_vm4, %v6392_v5 }
0x381d   :  { %v6517_v1 = vpop.f32.mrb[106].mxu0  ;;  %15214 = vmatprep.mubr.msk.bf16.mxu1 %vm16617_vm3, %v16616_v23  ;;  %15213 = vmatpush3.bf16.msra.mxu1 %v17558_v2 }
0x381e   :  { %v6521_v4 = vmul.f32 0.25, %v6517_v1  ;;  %v15206_v19 = vpop.f32.mrb[107].mxu0  ;;  %15228 = vmatprep.subr.bf16.mxu1 %v16616_v23 }
0x3820   :  { %v6522_v9 = vsel %vm776_vm5, %v6521_v4, -inf }
0x3821   :  { %6523 = vmax.xlane.f32.xlu1 %v6522_v9 }
0x3832   :  { %6533 = vrot.lane.b32.xlu1 %v17379_v3, %s16621_s22 }
0x3836   :  { %6662 = vrot.lane.b32.xlu1 %v17381_v8, %s16600_s0 }
0x383a   :  { %6660 = vrot.lane.b32.xlu1 %v17394_v37, %s16600_s0 }
0x38ae   :  { %v6524_v10 = vpop.xlane.xlu1 %6523 }
0x38af   :  { %v6525_v14 = vsub.f32 %v6521_v4, %v6524_v10 }
0x38b1   :  { %v6526_v6 = vmul.f32 1.442695, %v6525_v14 }
0x38b2   :  { %v6534_v17 = vpop.permute.xlu1 %6533 }
0x38b3   :  { %16170 = vpow2.f32 %v6526_v6  ;;  %15208 = vmatpush3.msra.mxu0 %v6534_v17 }
0x38b4   :  { %15218 = vmatprep.subr.mxu0 %v16616_v23 }
0x38b6   :  { %v6663_v26 = vpop.permute.xlu1 %6662 }
0x38ba   :  { %v6661_v54 = vpop.permute.xlu1 %6660 }
0x38bd   :  { %v16171_v18 = vpop.eup %16170 }
0x38be   :  { %v6528_v38 = vsel %vm776_vm5, %v16171_v18, 0.0 }
0x38bf   :  { %6529 = vadd.xlane.f32.xlu0 %v6528_v38 }
0x38ef   :  { %v6436_v61 = vpop.f32.mrb[100].mxu1 }
0x38f0   :  { %v6442_v36 = vadd.f32 %v6436_v61, %v6225_v51  ;;  %v15200_v22 = vpop.f32.mrb[101].mxu1 }
0x38f1   :  { %v6439_v24 = vpop.f32.mrb[102].mxu1 }
0x38f2   :  { %v15201_v8 = vpop.f32.mrb[103].mxu1 }
0x394c   :  { %v6530_v25 = vpop.xlane.xlu0 %6529 }
0x394d   :  { %16172 = vrcp.f32 %v6530_v25 }
0x3957   :  { %v16173_v37 = vpop.eup %16172 }
0x3958   :  { %v6532_v47 = vmul.f32 %v16173_v37, %v16171_v18 }
0x395a   :  { %15210 = vmatmul.mubr.msk.f32.vlgmr.msra.gmra.mrb[108].mxu0 %vm776_vm5, %v6532_v47 }
0x395b   :  { %15219 = vmatpush3.xpose.msk.msra.mxu0 %vm698_vm4, %v6663_v26  ;;  %15220 = vmatprep.mubr.msk.f32.mxu0 %vm16617_vm3, %v16616_v23 }
0x395c   :  { %15223 = vmatprep.subr.mxu0 %v16616_v23 }
0x395e   :  { %15221 = vmatmul.mubr.msk.f32.vlgmr.msra.gmra.mrb[110].mxu0 %vm698_vm4, %v6661_v54 }
0x395f   :  { %15225 = vmatprep.mubr.msk.f32.mxu0 %vm16617_vm3, %v16616_v23 }
0x3a2d   :  { %v6605_v28 = vpop.f32.mrb[108].mxu0 }
0x3a2e   :  { %v6609_v29 = vpack.c.bf16 %v6605_v28, %v6605_v28  ;;  %v15211_v48 = vpop.f32.mrb[109].mxu0 }
0x3a30   :  { %15215 = vmatmul.mubr.msk.bf16.vlgmr.msra.gmra.mrb[104].mxu1 %vm698_vm4, %v6609_v29 }
0x3a31   :  { %v6734_v30 = vpop.f32.mrb[110].mxu0  ;;  %15230 = vmatprep.mubr.msk.bf16.mxu1 %vm16617_vm3, %v16616_v23  ;;  %15229 = vmatpush3.bf16.msra.mxu1 %v17573_v45 }
0x3a32   :  { %v6738_v31 = vmul.f32 0.25, %v6734_v30  ;;  %v15222_v32 = vpop.f32.mrb[111].mxu0  ;;  %15244 = vmatprep.subr.mxu1 %v16616_v23 }
0x3a34   :  { %v6739_v33 = vsel %vm776_vm5, %v6738_v31, -inf }
0x3a35   :  { %6740 = vmax.xlane.f32.xlu1 %v6739_v33 }
0x3ac2   :  { %v6741_v34 = vpop.xlane.xlu1 %6740 }
0x3ac3   :  { %v6742_v39 = vsub.f32 %v6738_v31, %v6741_v34 }
0x3ac5   :  { %v6743_v43 = vmul.f32 1.442695, %v6742_v39 }
0x3ac7   :  { %16174 = vpow2.f32 %v6743_v43 }
0x3ad1   :  { %v16175_v44 = vpop.eup %16174 }
0x3ad2   :  { %v6745_v40 = vsel %vm776_vm5, %v16175_v44, 0.0 }
0x3ad3   :  { %6746 = vadd.xlane.f32.xlu0 %v6745_v40 }
0x3ae9   :  { %6750 = vrot.lane.b32.xlu0 %v17379_v3, %s16600_s0 }
0x3aed   :  { %7041 = vrot.lane.b32.xlu0 %v17388_v15, %s16618_s4 }
0x3af1   :  { %7039 = vrot.lane.b32.xlu0 %v17383_v11, %s16618_s4 }
0x3b03   :  { %v6653_v51 = vpop.f32.mrb[104].mxu1 }
0x3b04   :  { %v6659_v7 = vadd.f32 %v6653_v51, %v6442_v36  ;;  %v15216_v55 = vpop.f32.mrb[105].mxu1 }
0x3b05   :  { %v6656_v12 = vpop.f32.mrb[106].mxu1 }
0x3b06   :  { %v15217_v46 = vpop.f32.mrb[107].mxu1 }
0x3b60   :  { %v6747_v16 = vpop.xlane.xlu0 %6746 }
0x3b61   :  { %16176 = vrcp.f32 %v6747_v16 }
0x3b64   :  { %v6751_v3 = vpop.permute.xlu0 %6750 }
0x3b65   :  { %15224 = vmatpush3.msra.mxu0 %v6751_v3 }
0x3b66   :  { %15234 = vmatprep.subr.mxu0 %v16616_v23 }
0x3b68   :  { %v7042_v63 = vpop.permute.xlu0 %7041 }
0x3b6b   :  { %v16177_v56 = vpop.eup %16176 }
0x3b6c   :  { %v6749_v21 = vmul.f32 %v16177_v56, %v16175_v44  ;;  %v7040_v10 = vpop.permute.xlu0 %7039 }
0x3b6e   :  { %15226 = vmatmul.mubr.msk.f32.vlgmr.msra.gmra.mrb[112].mxu0 %vm776_vm5, %v6749_v21 }
0x3b6f   :  { %15235 = vmatpush3.xpose.msk.msra.mxu0 %vm698_vm4, %v17388_v15  ;;  %15236 = vmatprep.mubr.msk.f32.mxu0 %vm16617_vm3, %v16616_v23 }
0x3b70   :  { %15239 = vmatprep.subr.mxu0 %v16616_v23 }
0x3b72   :  { %15237 = vmatmul.mubr.msk.f32.vlgmr.msra.gmra.mrb[114].mxu0 %vm698_vm4, %v17383_v11 }
0x3b73   :  { %15240 = vmatpush3.msra.mxu0 %v17385_v35  ;;  %15241 = vmatprep.mubr.msk.f32.mxu0 %vm16617_vm3, %v16616_v23 }
0x3b74   :  { %15249 = vmatprep.subr.mxu0 %v16616_v23 }
0x3c41   :  { %v6822_v60 = vpop.f32.mrb[112].mxu0 }
0x3c42   :  { %v6826_v62 = vpack.c.bf16 %v6822_v60, %v6822_v60  ;;  %v15227_v5 = vpop.f32.mrb[113].mxu0 }
0x3c44   :  { %15231 = vmatmul.mubr.msk.bf16.vlgmr.msra.gmra.mrb[108].mxu1 %vm698_vm4, %v6826_v62 }
0x3c45   :  { %15245 = vmatpush3.xpose.msk.msra.mxu1 %vm698_vm4, %v7042_v63  ;;  %v6949_v1 = vpop.f32.mrb[114].mxu0  ;;  %15246 = vmatprep.mubr.msk.f32.mxu1 %vm16617_vm3, %v16616_v23 }
0x3c46   :  { %v6953_v4 = vmul.f32 0.25, %v6949_v1  ;;  %v15238_v19 = vpop.f32.mrb[115].mxu0  ;;  %15254 = vmatprep.subr.bf16.mxu1 %v16616_v23 }
0x3c48   :  { %v6954_v9 = vsel %vm776_vm5, %v6953_v4, -inf }
0x3c49   :  { %6955 = vmax.xlane.f32.xlu1 %v6954_v9 }
0x3c4c   :  { %15247 = vmatmul.mubr.msk.f32.vlgmr.msra.gmra.mrb[112].mxu1 %vm698_vm4, %v7040_v10 }
0x3c4d   :  { %15255 = vmatpush3.bf16.msra.mxu1 %v17422_v41  ;;  %15256 = vmatprep.mubr.msk.bf16.mxu1 %vm16617_vm3, %v16616_v23 }
0x3c4e   :  { %15266 = vmatprep.subr.mxu1 %v16616_v23 }
0x3cd6   :  { %v6956_v14 = vpop.xlane.xlu1 %6955 }
0x3cd7   :  { %v6957_v6 = vsub.f32 %v6953_v4, %v6956_v14 }
0x3cd9   :  { %v6958_v17 = vmul.f32 1.442695, %v6957_v6 }
0x3cdb   :  { %16178 = vpow2.f32 %v6958_v17 }
0x3ce5   :  { %v16179_v18 = vpop.eup %16178 }
0x3ce6   :  { %v6960_v38 = vsel %vm776_vm5, %v16179_v18, 0.0 }
0x3ce7   :  { %6961 = vadd.xlane.f32.xlu1 %v6960_v38 }
0x3d17   :  { %v6870_v61 = vpop.f32.mrb[108].mxu1 }
0x3d18   :  { %v17602_v36 = vadd.f32 %v6870_v61, %v6659_v7  ;;  %v15232_v22 = vpop.f32.mrb[109].mxu1 }
0x3d19   :  { %v6873_v24 = vpop.f32.mrb[110].mxu1 }
0x3d1a   :  { %v15233_v8 = vpop.f32.mrb[111].mxu1 }
0x3d1f   :  { %v7113_v41 = vpop.f32.mrb[112].mxu1 }
0x3d20   :  { %v7117_v25 = vmul.f32 0.25, %v7113_v41  ;;  %v15248_v37 = vpop.f32.mrb[113].mxu1 }
0x3d22   :  { %v7118_v26 = vsel %vm776_vm5, %v7117_v25, -inf }
0x3d23   :  { %7119 = vmax.xlane.f32.xlu0 %v7118_v26 }
0x3d74   :  { %v6962_v47 = vpop.xlane.xlu1 %6961 }
0x3d75   :  { %16180 = vrcp.f32 %v6962_v47 }
0x3d7f   :  { %v16181_v54 = vpop.eup %16180 }
0x3d80   :  { %v6964_v28 = vmul.f32 %v16181_v54, %v16179_v18 }
0x3d82   :  { %15242 = vmatmul.mubr.msk.f32.vlgmr.msra.gmra.mrb[116].mxu0 %vm776_vm5, %v6964_v28 }
0x3d83   :  { %15251 = vmatprep.mubr.msk.f32.mxu0 %vm16617_vm3, %v16616_v23 }
0x3db0   :  { %v7120_v29 = vpop.xlane.xlu0 %7119 }
0x3db1   :  { %v7121_v48 = vsub.f32 %v7117_v25, %v7120_v29 }
0x3db3   :  { %v7122_v30 = vmul.f32 1.442695, %v7121_v48 }
0x3db5   :  { %16182 = vpow2.f32 %v7122_v30 }
0x3dbf   :  { %v16183_v31 = vpop.eup %16182 }
0x3dc0   :  { %v7124_v32 = vsel %vm776_vm5, %v16183_v31, 0.0 }
0x3dc1   :  { %7125 = vadd.xlane.f32.xlu1 %v7124_v32 }
0x3dd2   :  { %7130 = vrot.lane.b32.xlu1 %v17385_v35, %s16618_s4 }
0x3dd6   :  { %7295 = vrot.lane.b32.xlu1 %v17388_v15, %s16619_s11 }
0x3dda   :  { %7293 = vrot.lane.b32.xlu1 %v17383_v11, %s16619_s11 }
0x3e4e   :  { %v7126_v33 = vpop.xlane.xlu1 %7125 }
0x3e4f   :  { %16184 = vrcp.f32 %v7126_v33 }
0x3e52   :  { %v7131_v34 = vpop.permute.xlu1 %7130 }
0x3e53   :  { %15250 = vmatpush3.msra.mxu0 %v7131_v34 }
0x3e54   :  { %15260 = vmatprep.subr.bf16.mxu0 %v16616_v23 }
0x3e55   :  { %v7034_v39 = vpop.f32.mrb[116].mxu0 }
0x3e56   :  { %v15243_v43 = vpop.f32.mrb[117].mxu0  ;;  %v7038_v51 = vpack.c.bf16 %v7034_v39, %v7034_v39  ;;  %v7296_v46 = vpop.permute.xlu1 %7295 }
0x3e59   :  { %v16185_v44 = vpop.eup %16184 }
0x3e5a   :  { %v7128_v40 = vmul.f32 %v16185_v44, %v16183_v31  ;;  %v7294_v21 = vpop.permute.xlu1 %7293 }
0x3e5c   :  { %15252 = vmatmul.mubr.msk.f32.vlgmr.msra.gmra.mrb[118].mxu0 %vm776_vm5, %v7128_v40 }
0x3e5d   :  { %15261 = vmatpush3.bf16.msra.mxu0 %v17427_v42  ;;  %15262 = vmatprep.mubr.msk.bf16.mxu0 %vm16617_vm3, %v16616_v23 }
0x3e5e   :  { %15271 = vmatprep.subr.mxu0 %v16616_v23 }
0x3e60   :  { %15263 = vmatmul.mubr.msk.bf16.vlgmr.msra.gmra.mrb[120].mxu0 %vm698_vm4, %v7038_v51 }
0x3e61   :  { %15273 = vmatprep.mubr.msk.f32.mxu0 %vm16617_vm3, %v16616_v23 }
0x3f2f   :  { %v7202_v7 = vpop.f32.mrb[118].mxu0 }
0x3f30   :  { %v7206_v55 = vpack.c.bf16 %v7202_v7, %v7202_v7  ;;  %v15253_v12 = vpop.f32.mrb[119].mxu0 }
0x3f32   :  { %15257 = vmatmul.mubr.msk.bf16.vlgmr.msra.gmra.mrb[116].mxu1 %vm698_vm4, %v7206_v55 }
0x3f33   :  { %15267 = vmatpush3.xpose.msk.msra.mxu1 %vm698_vm4, %v7296_v46  ;;  %v7287_v42 = vpop.f32.mrb[120].mxu0  ;;  %15268 = vmatprep.mubr.msk.f32.mxu1 %vm16617_vm3, %v16616_v23 }
0x3f34   :  { %v15264_v16 = vpop.f32.mrb[121].mxu0  ;;  %15276 = vmatprep.subr.bf16.mxu1 %v16616_v23 }
0x3f35   :  { %v7290_v3 = vpop.f32.mrb[122].mxu0 }
0x3f36   :  { %v15265_v56 = vpop.f32.mrb[123].mxu0 }
0x3f3a   :  { %15269 = vmatmul.mubr.msk.f32.vlgmr.msra.gmra.mrb[114].mxu1 %vm698_vm4, %v7294_v21 }
0x3f3b   :  { %15277 = vmatpush3.bf16.msra.mxu1 %v17467_v49  ;;  %15278 = vmatprep.mubr.msk.bf16.mxu1 %vm16617_vm3, %v16616_v23 }
0x3f3c   :  { %15292 = vmatprep.subr.bf16.mxu1 %v16616_v23 }
0x4005   :  { %v7244_v60 = vpop.f32.mrb[116].mxu1 }
0x4006   :  { %v7288_v62 = vadd.f32 %v7287_v42, %v7244_v60  ;;  %v15258_v5 = vpop.f32.mrb[117].mxu1 }
0x4007   :  { %v7247_v63 = vpop.f32.mrb[118].mxu1 }
0x4008   :  { %v15259_v1 = vpop.f32.mrb[119].mxu1 }
0x400d   :  { %v7367_v4 = vpop.f32.mrb[114].mxu1 }
0x400e   :  { %v7371_v19 = vmul.f32 0.25, %v7367_v4  ;;  %v15270_v9 = vpop.f32.mrb[115].mxu1 }
0x4010   :  { %v7372_v10 = vsel %vm776_vm5, %v7371_v19, -inf }
0x4011   :  { %7373 = vmax.xlane.f32.xlu0 %v7372_v10 }
0x4027   :  { %7383 = vrot.lane.b32.xlu0 %v17385_v35, %s16619_s11 }
0x402b   :  { %7506 = vrot.lane.b32.xlu0 %v17388_v15, %s16620_s10 }
0x402f   :  { %7504 = vrot.lane.b32.xlu0 %v17383_v11, %s16620_s10 }
0x409e   :  { %v7374_v49 = vpop.xlane.xlu0 %7373 }
0x409f   :  { %v7375_v14 = vsub.f32 %v7371_v19, %v7374_v49 }
0x40a1   :  { %v7376_v6 = vmul.f32 1.442695, %v7375_v14 }
0x40a2   :  { %v7384_v17 = vpop.permute.xlu0 %7383 }
0x40a3   :  { %16186 = vpow2.f32 %v7376_v6  ;;  %15272 = vmatpush3.msra.mxu0 %v7384_v17 }
0x40a4   :  { %15282 = vmatprep.subr.mxu0 %v16616_v23 }
0x40a6   :  { %v7507_v24 = vpop.permute.xlu0 %7506 }
0x40aa   :  { %v7505_v41 = vpop.permute.xlu0 %7504 }
0x40ad   :  { %v16187_v18 = vpop.eup %16186 }
0x40ae   :  { %v7378_v38 = vsel %vm776_vm5, %v16187_v18, 0.0 }
0x40af   :  { %7379 = vadd.xlane.f32.xlu1 %v7378_v38 }
0x40c0   :  { %7594 = vrot.lane.b32.xlu1 %v17385_v35, %s16620_s10 }
0x40c4   :  { %7717 = vrot.lane.b32.xlu1 %v17388_v15, %s16596_s2 }
0x413c   :  { %v7380_v61 = vpop.xlane.xlu1 %7379 }
0x413d   :  { %16188 = vrcp.f32 %v7380_v61 }
0x4140   :  { %v7595_v25 = vpop.permute.xlu1 %7594 }
0x4144   :  { %v7718_v51 = vpop.permute.xlu1 %7717 }
0x4147   :  { %v16189_v22 = vpop.eup %16188 }
0x4148   :  { %v7382_v8 = vmul.f32 %v16189_v22, %v16187_v18 }
0x414a   :  { %15274 = vmatmul.mubr.msk.f32.vlgmr.msra.gmra.mrb[124].mxu0 %vm776_vm5, %v7382_v8 }
0x414b   :  { %15283 = vmatpush3.xpose.msk.msra.mxu0 %vm698_vm4, %v7507_v24  ;;  %15284 = vmatprep.mubr.msk.f32.mxu0 %vm16617_vm3, %v16616_v23 }
0x414c   :  { %15287 = vmatprep.subr.mxu0 %v16616_v23 }
0x414e   :  { %15285 = vmatmul.mubr.msk.f32.vlgmr.msra.gmra.mrb[126].mxu0 %vm698_vm4, %v7505_v41 }
0x414f   :  { %15288 = vmatpush3.msra.mxu0 %v7595_v25  ;;  %15289 = vmatprep.mubr.msk.f32.mxu0 %vm16617_vm3, %v16616_v23 }
0x4150   :  { %15298 = vmatprep.subr.mxu0 %v16616_v23 }
0x421d   :  { %v7455_v37 = vpop.f32.mrb[124].mxu0 }
0x421e   :  { %v7459_v26 = vpack.c.bf16 %v7455_v37, %v7455_v37  ;;  %v15275_v47 = vpop.f32.mrb[125].mxu0 }
0x4220   :  { %15279 = vmatmul.mubr.msk.bf16.vlgmr.msra.gmra.mrb[120].mxu1 %vm698_vm4, %v7459_v26 }
0x4221   :  { %v7578_v54 = vpop.f32.mrb[126].mxu0  ;;  %15293 = vmatpush3.bf16.msra.mxu1 %v17486_v59  ;;  %15294 = vmatprep.mubr.msk.bf16.mxu1 %vm16617_vm3, %v16616_v23 }
0x4222   :  { %v7582_v28 = vmul.f32 0.25, %v7578_v54  ;;  %v15286_v29 = vpop.f32.mrb[127].mxu0  ;;  %15308 = vmatprep.subr.bf16.mxu1 %v16616_v23 }
0x4224   :  { %v7583_v48 = vsel %vm776_vm5, %v7582_v28, -inf }
0x4225   :  { %7584 = vmax.xlane.f32.xlu0 %v7583_v48 }
0x42b2   :  { %v7585_v30 = vpop.xlane.xlu0 %7584 }
0x42b3   :  { %v7586_v31 = vsub.f32 %v7582_v28, %v7585_v30 }
0x42b5   :  { %v7587_v32 = vmul.f32 1.442695, %v7586_v31 }
0x42b7   :  { %16190 = vpow2.f32 %v7587_v32 }
0x42c1   :  { %v16191_v33 = vpop.eup %16190 }
0x42c2   :  { %v7589_v34 = vsel %vm776_vm5, %v16191_v33, 0.0 }
0x42c3   :  { %7590 = vadd.xlane.f32.xlu1 %v7589_v34 }
0x42d4   :  { %7715 = vrot.lane.b32.xlu1 %v17383_v11, %s16596_s2 }
0x42f3   :  { %v7497_v59 = vpop.f32.mrb[120].mxu1 }
0x42f4   :  { %v7503_v39 = vadd.f32 %v7497_v59, %v7288_v62  ;;  %v15280_v43 = vpop.f32.mrb[121].mxu1 }
0x42f5   :  { %v7500_v44 = vpop.f32.mrb[122].mxu1 }
0x42f6   :  { %v15281_v40 = vpop.f32.mrb[123].mxu1 }
0x4350   :  { %v7591_v7 = vpop.xlane.xlu1 %7590 }
0x4351   :  { %16192 = vrcp.f32 %v7591_v7 }
0x4354   :  { %v7716_v46 = vpop.permute.xlu1 %7715 }
0x435b   :  { %v16193_v55 = vpop.eup %16192 }
0x435c   :  { %v7593_v12 = vmul.f32 %v16193_v55, %v16191_v33 }
0x435e   :  { %15290 = vmatmul.mubr.msk.f32.vlgmr.msra.gmra.mrb[128].mxu0 %vm776_vm5, %v7593_v12 }
0x435f   :  { %15299 = vmatpush3.xpose.msk.msra.mxu0 %vm698_vm4, %v7718_v51  ;;  %15300 = vmatprep.mubr.msk.f32.mxu0 %vm16617_vm3, %v16616_v23 }
0x4360   :  { %15303 = vmatprep.subr.mxu0 %v16616_v23 }
0x4362   :  { %15301 = vmatmul.mubr.msk.f32.vlgmr.msra.gmra.mrb[130].mxu0 %vm698_vm4, %v7716_v46 }
0x4363   :  { %15305 = vmatprep.mubr.msk.f32.mxu0 %vm16617_vm3, %v16616_v23 }
0x4431   :  { %v7666_v42 = vpop.f32.mrb[128].mxu0 }
0x4432   :  { %v7670_v16 = vpack.c.bf16 %v7666_v42, %v7666_v42  ;;  %v15291_v3 = vpop.f32.mrb[129].mxu0 }
0x4434   :  { %15295 = vmatmul.mubr.msk.bf16.vlgmr.msra.gmra.mrb[124].mxu1 %vm698_vm4, %v7670_v16 }
0x4435   :  { %v7789_v56 = vpop.f32.mrb[130].mxu0  ;;  %15309 = vmatpush3.bf16.msra.mxu1 %v17515_v27  ;;  %15310 = vmatprep.mubr.msk.bf16.mxu1 %vm16617_vm3, %v16616_v23 }
0x4436   :  { %v7793_v21 = vmul.f32 0.25, %v7789_v56  ;;  %v15302_v60 = vpop.f32.mrb[131].mxu0  ;;  %15324 = vmatprep.subr.bf16.mxu1 %v16616_v23 }
0x4438   :  { %v7794_v62 = vsel %vm776_vm5, %v7793_v21, -inf }
0x4439   :  { %7795 = vmax.xlane.f32.xlu0 %v7794_v62 }
0x444f   :  { %7805 = vrot.lane.b32.xlu0 %v17385_v35, %s16596_s2 }
0x4453   :  { %7928 = vrot.lane.b32.xlu0 %v17388_v15, %s16607_s24 }
0x4457   :  { %7926 = vrot.lane.b32.xlu0 %v17383_v11, %s16607_s24 }
0x44c6   :  { %v7796_v27 = vpop.xlane.xlu0 %7795 }
0x44c7   :  { %v7797_v5 = vsub.f32 %v7793_v21, %v7796_v27 }
0x44c9   :  { %v7798_v63 = vmul.f32 1.442695, %v7797_v5 }
0x44ca   :  { %v7806_v1 = vpop.permute.xlu0 %7805 }
0x44cb   :  { %16194 = vpow2.f32 %v7798_v63  ;;  %15304 = vmatpush3.msra.mxu0 %v7806_v1 }
0x44cc   :  { %15314 = vmatprep.subr.mxu0 %v16616_v23 }
0x44ce   :  { %v7929_v38 = vpop.permute.xlu0 %7928 }
0x44d2   :  { %v7927_v22 = vpop.permute.xlu0 %7926 }
0x44d5   :  { %v16195_v4 = vpop.eup %16194 }
0x44d6   :  { %v7800_v19 = vsel %vm776_vm5, %v16195_v4, 0.0 }
0x44d7   :  { %7801 = vadd.xlane.f32.xlu1 %v7800_v19 }
0x44e8   :  { %8016 = vrot.lane.b32.xlu1 %v17385_v35, %s16607_s24 }
0x44ec   :  { %8139 = vrot.lane.b32.xlu1 %v17388_v15, %s16621_s22 }
0x4507   :  { %v7708_v9 = vpop.f32.mrb[124].mxu1 }
0x4508   :  { %v7714_v10 = vadd.f32 %v7708_v9, %v7503_v39  ;;  %v15296_v49 = vpop.f32.mrb[125].mxu1 }
0x4509   :  { %v7711_v14 = vpop.f32.mrb[126].mxu1 }
0x450a   :  { %v15297_v6 = vpop.f32.mrb[127].mxu1 }
0x4564   :  { %v7802_v17 = vpop.xlane.xlu1 %7801 }
0x4565   :  { %16196 = vrcp.f32 %v7802_v17 }
0x4568   :  { %v8017_v24 = vpop.permute.xlu1 %8016 }
0x456c   :  { %v8140_v39 = vpop.permute.xlu1 %8139 }
0x456f   :  { %v16197_v18 = vpop.eup %16196 }
0x4570   :  { %v7804_v61 = vmul.f32 %v16197_v18, %v16195_v4 }
0x4572   :  { %15306 = vmatmul.mubr.msk.f32.vlgmr.msra.gmra.mrb[132].mxu0 %vm776_vm5, %v7804_v61 }
0x4573   :  { %15315 = vmatpush3.xpose.msk.msra.mxu0 %vm698_vm4, %v7929_v38  ;;  %15316 = vmatprep.mubr.msk.f32.mxu0 %vm16617_vm3, %v16616_v23 }
0x4574   :  { %15319 = vmatprep.subr.mxu0 %v16616_v23 }
0x4576   :  { %15317 = vmatmul.mubr.msk.f32.vlgmr.msra.gmra.mrb[134].mxu0 %vm698_vm4, %v7927_v22 }
0x4577   :  { %15320 = vmatpush3.msra.mxu0 %v8017_v24  ;;  %15321 = vmatprep.mubr.msk.f32.mxu0 %vm16617_vm3, %v16616_v23 }
0x4578   :  { %15330 = vmatprep.subr.mxu0 %v16616_v23 }
0x4645   :  { %v7877_v8 = vpop.f32.mrb[132].mxu0 }
0x4646   :  { %v7881_v41 = vpack.c.bf16 %v7877_v8, %v7877_v8  ;;  %v15307_v25 = vpop.f32.mrb[133].mxu0 }
0x4648   :  { %15311 = vmatmul.mubr.msk.bf16.vlgmr.msra.gmra.mrb[128].mxu1 %vm698_vm4, %v7881_v41 }
0x4649   :  { %v8000_v37 = vpop.f32.mrb[134].mxu0  ;;  %15325 = vmatpush3.bf16.msra.mxu1 %v17534_v20  ;;  %15326 = vmatprep.mubr.msk.bf16.mxu1 %vm16617_vm3, %v16616_v23 }
0x464a   :  { %v8004_v26 = vmul.f32 0.25, %v8000_v37  ;;  %v15318_v47 = vpop.f32.mrb[135].mxu0  ;;  %15340 = vmatprep.subr.bf16.mxu1 %v16616_v23 }
0x464c   :  { %v8005_v54 = vsel %vm776_vm5, %v8004_v26, -inf }
0x464d   :  { %8006 = vmax.xlane.f32.xlu0 %v8005_v54 }
0x46da   :  { %v8007_v28 = vpop.xlane.xlu0 %8006 }
0x46db   :  { %v8008_v29 = vsub.f32 %v8004_v26, %v8007_v28  ;;  %v14079_v26 = vld [vmem:[%s18257_s5 + $0x1] ss:$0 sm:$0xff] }
0x46dc   :  { %v8567_v47 = vadd.f32 %v14079_v26, %v17602_v36 }
0x46dd   :  { %v8009_v48 = vmul.f32 1.442695, %v8008_v29 }
0x46df   :  { %16198 = vpow2.f32 %v8009_v48 }
0x46e9   :  { %v16199_v30 = vpop.eup %16198 }
0x46ea   :  { %v8011_v31 = vsel %vm776_vm5, %v16199_v30, 0.0 }
0x46eb   :  { %8012 = vadd.xlane.f32.xlu1 %v8011_v31  ;;  %v8569_v31 = vadd.f32 %v8567_v47, %v17366_v57  ;;  %v15913_v47 = vld [vmem:[#allocation13 + $0x1ec] ss:$16 sps:$4 sm:$0xff]  }
0x46fc   :  { %8137 = vrot.lane.b32.xlu1 %v17383_v11, %s16621_s22 }
0x471b   :  { %v7919_v20 = vpop.f32.mrb[128].mxu1 }
0x471c   :  { %v7925_v32 = vadd.f32 %v7919_v20, %v7714_v10  ;;  %v15312_v33 = vpop.f32.mrb[129].mxu1 }
0x471d   :  { %v7922_v34 = vpop.f32.mrb[130].mxu1 }
0x471e   :  { %v15313_v59 = vpop.f32.mrb[131].mxu1 }
0x4778   :  { %v8013_v43 = vpop.xlane.xlu1 %8012 }
0x4779   :  { %16200 = vrcp.f32 %v8013_v43 }
0x477c   :  { %v8138_v51 = vpop.permute.xlu1 %8137 }
0x4783   :  { %v16201_v44 = vpop.eup %16200 }
0x4784   :  { %v8015_v40 = vmul.f32 %v16201_v44, %v16199_v30 }
0x4786   :  { %15322 = vmatmul.mubr.msk.f32.vlgmr.msra.gmra.mrb[136].mxu0 %vm776_vm5, %v8015_v40 }
0x4787   :  { %15331 = vmatpush3.xpose.msk.msra.mxu0 %vm698_vm4, %v8140_v39  ;;  %15332 = vmatprep.mubr.msk.f32.mxu0 %vm16617_vm3, %v16616_v23 }
0x4788   :  { %15335 = vmatprep.subr.mxu0 %v16616_v23 }
0x478a   :  { %15333 = vmatmul.mubr.msk.f32.vlgmr.msra.gmra.mrb[138].mxu0 %vm698_vm4, %v8138_v51 }
0x478b   :  { %15337 = vmatprep.mubr.msk.f32.mxu0 %vm16617_vm3, %v16616_v23 }
0x4859   :  { %v8088_v7 = vpop.f32.mrb[136].mxu0 }
0x485a   :  { %v8092_v55 = vpack.c.bf16 %v8088_v7, %v8088_v7  ;;  %v15323_v12 = vpop.f32.mrb[137].mxu0 }
0x485c   :  { %15327 = vmatmul.mubr.msk.bf16.vlgmr.msra.gmra.mrb[132].mxu1 %vm698_vm4, %v8092_v55 }
0x485d   :  { %v8211_v46 = vpop.f32.mrb[138].mxu0  ;;  %15341 = vmatpush3.bf16.msra.mxu1 %v17558_v2  ;;  %15342 = vmatprep.mubr.msk.bf16.mxu1 %vm16617_vm3, %v16616_v23 }
0x485e   :  { %v8215_v42 = vmul.f32 0.25, %v8211_v46  ;;  %v15334_v16 = vpop.f32.mrb[139].mxu0 }
0x485f   :  { %v15868_v16 = vld [vmem:[#allocation13 + $0x104] ss:$16 sps:$4 sm:$0xff]  }
0x4860   :  { %v8216_v3 = vsel %vm776_vm5, %v8215_v42, -inf }
0x4861   :  { %8217 = vmax.xlane.f32.xlu0 %v8216_v3  ;;  %v15869_v3 = vld [vmem:[#allocation13 + $0x108] ss:$16 sps:$4 sm:$0xff]  }
0x4877   :  { %8227 = vrot.lane.b32.xlu0 %v17385_v35, %s16621_s22 }
0x487b   :  { %8350 = vrot.lane.b32.xlu0 %v17388_v15, %s16600_s0 }
0x487f   :  { %8348 = vrot.lane.b32.xlu0 %v17383_v11, %s16600_s0 }
0x48ee   :  { %v8218_v56 = vpop.xlane.xlu0 %8217 }
0x48ef   :  { %v8219_v21 = vsub.f32 %v8215_v42, %v8218_v56  ;;  %v15866_v42 = vld [vmem:[#allocation13 + $0x100] ss:$16 sps:$4 sm:$0xff]   ;;  %v15871_v56 = vld [vmem:[#allocation13 + $0x10c] ss:$16 sps:$4 sm:$0xff]  }
0x48f0   :  { %8840 = vmatprep.subr.bf16.mxu1 %v15871_v56  ;;  %v15922_v56 = vld [vmem:[#allocation16 + $0x150] sm:$0xff]  }
0x48f1   :  { %v8220_v2 = vmul.f32 1.442695, %v8219_v21  ;;  %v15874_v21 = vld [vmem:[#allocation13 + $0x124] ss:$16 sps:$4 sm:$0xff]  }
0x48f2   :  { %v8228_v60 = vpop.permute.xlu0 %8227 }
0x48f3   :  { %16202 = vpow2.f32 %v8220_v2  ;;  %15336 = vmatpush3.msra.mxu0 %v8228_v60  ;;  %v15877_v2 = vld [vmem:[#allocation13 + $0x12c] ss:$16 sps:$4 sm:$0xff]   ;;  %v15872_v60 = vld [vmem:[#allocation13 + $0x120] ss:$16 sps:$4 sm:$0xff]  }
0x48f4   :  { %15346 = vmatprep.subr.mxu0 %v16616_v23 }
0x48f6   :  { %v8351_v9 = vpop.permute.xlu0 %8350 }
0x48fa   :  { %v8349_v49 = vpop.permute.xlu0 %8348 }
0x48fd   :  { %v16203_v62 = vpop.eup %16202 }
0x48fe   :  { %v8222_v27 = vsel %vm776_vm5, %v16203_v62, 0.0 }
0x48ff   :  { %8223 = vadd.xlane.f32.xlu1 %v8222_v27  ;;  %v15880_v27 = vld [vmem:[#allocation13 + $0x144] ss:$16 sps:$4 sm:$0xff]  }
0x492f   :  { %v8130_v5 = vpop.f32.mrb[132].mxu1 }
0x4930   :  { %v8136_v63 = vadd.f32 %v8130_v5, %v7925_v32  ;;  %v15328_v1 = vpop.f32.mrb[133].mxu1  ;;  %v15878_v5 = vld [vmem:[#allocation13 + $0x140] ss:$16 sps:$4 sm:$0xff]  }
0x4931   :  { %v8133_v4 = vpop.f32.mrb[134].mxu1 }
0x4932   :  { %v15329_v15 = vpop.f32.mrb[135].mxu1 }
0x498c   :  { %v8224_v19 = vpop.xlane.xlu1 %8223 }
0x498d   :  { %16204 = vrcp.f32 %v8224_v19 }
0x4997   :  { %v16205_v11 = vpop.eup %16204 }
0x4998   :  { %v8226_v10 = vmul.f32 %v16205_v11, %v16203_v62  ;;  %v15875_v62 = vld [vmem:[#allocation13 + $0x128] ss:$16 sps:$4 sm:$0xff]   ;;  %v15886_v11 = vld [vmem:[#allocation13 + $0x164] ss:$16 sps:$4 sm:$0xff]  }
0x499a   :  { %15338 = vmatmul.mubr.msk.f32.vlgmr.msra.gmra.mrb[140].mxu0 %vm776_vm5, %v8226_v10  ;;  %v15884_v10 = vld [vmem:[#allocation13 + $0x160] ss:$16 sps:$4 sm:$0xff]  }
0x499b   :  { %15347 = vmatpush3.xpose.msk.msra.mxu0 %vm698_vm4, %v8351_v9  ;;  %15348 = vmatprep.mubr.msk.f32.mxu0 %vm16617_vm3, %v16616_v23  ;;  %v15889_v9 = vld [vmem:[#allocation13 + $0x16c] ss:$16 sps:$4 sm:$0xff]  }
0x499c   :  { %15351 = vmatprep.subr.mxu0 %v16616_v23 }
0x499e   :  { %15349 = vmatmul.mubr.msk.f32.vlgmr.msra.gmra.mrb[142].mxu0 %vm698_vm4, %v8349_v49  ;;  %v15887_v49 = vld [vmem:[#allocation13 + $0x168] ss:$16 sps:$4 sm:$0xff]  }
0x499f   :  { %15353 = vmatprep.mubr.msk.f32.mxu0 %vm16617_vm3, %v16616_v23 }
0x4a6d   :  { %v8299_v14 = vpop.f32.mrb[140].mxu0 }
0x4a6e   :  { %v8303_v6 = vpack.c.bf16 %v8299_v14, %v8299_v14  ;;  %v15339_v17 = vpop.f32.mrb[141].mxu0  ;;  %v15892_v14 = vld [vmem:[#allocation13 + $0x184] ss:$16 sps:$4 sm:$0xff]  }
0x4a6f   :  { %v15890_v17 = vld [vmem:[#allocation13 + $0x180] ss:$16 sps:$4 sm:$0xff]  }
0x4a70   :  { %15343 = vmatmul.mubr.msk.bf16.vlgmr.msra.gmra.mrb[136].mxu1 %vm698_vm4, %v8303_v6  ;;  %v15895_v6 = vld [vmem:[#allocation13 + $0x18c] ss:$16 sps:$4 sm:$0xff]  }
0x4a71   :  { %v8422_v18 = vpop.f32.mrb[142].mxu0  ;;  %8872 = vmatprep.mubr.bf16.mxu1 %v16615_v0  ;;  %8841 = vmatpush1.bf16.msra.mxu1 %v15869_v3  ;;  %v15921_v3 = vld [vmem:[#allocation16 + $0x188] sm:$0xff]  }
0x4a72   :  { %v8426_v38 = vmul.f32 0.25, %v8422_v18  ;;  %v15350_v61 = vpop.f32.mrb[143].mxu0  ;;  %8842 = vmatprep.subr.bf16.mxu1 %v15877_v2  ;;  %v15893_v18 = vld [vmem:[#allocation13 + $0x188] ss:$16 sps:$4 sm:$0xff]   ;;  %v15924_v2 = vld [vmem:[#allocation16 + $0x110] sm:$0xff]  }
0x4a73   :  { %v15901_v61 = vld [vmem:[#allocation13 + $0x1ac] ss:$16 sps:$4 sm:$0xff]  }
0x4a74   :  { %v8427_v22 = vsel %vm776_vm5, %v8426_v38, -inf }
0x4a75   :  { %8428 = vmax.xlane.f32.xlu0 %v8427_v22  ;;  %8843 = vmatpush1.bf16.msra.mxu1 %v15875_v62  ;;  %v15896_v22 = vld [vmem:[#allocation13 + $0x1a0] ss:$16 sps:$4 sm:$0xff]   ;;  %v15926_v62 = vld [vmem:[#allocation16 + $0x158] sm:$0xff]  }
0x4b02   :  { %v8429_v24 = vpop.xlane.xlu0 %8428 }
0x4b03   :  { %v8430_v8 = vsub.f32 %v8426_v38, %v8429_v24  ;;  %v15898_v38 = vld [vmem:[#allocation13 + $0x1a4] ss:$16 sps:$4 sm:$0xff]   ;;  %v15899_v24 = vld [vmem:[#allocation13 + $0x1a8] ss:$16 sps:$4 sm:$0xff]  }
0x4b05   :  { %v8431_v41 = vmul.f32 1.442695, %v8430_v8  ;;  %v15904_v8 = vld [vmem:[#allocation13 + $0x1c4] ss:$16 sps:$4 sm:$0xff]  }
0x4b07   :  { %16206 = vpow2.f32 %v8431_v41  ;;  %v15907_v41 = vld [vmem:[#allocation13 + $0x1cc] ss:$16 sps:$4 sm:$0xff]  }
0x4b11   :  { %v16207_v25 = vpop.eup %16206 }
0x4b12   :  { %v8433_v37 = vsel %vm776_vm5, %v16207_v25, 0.0 }
0x4b13   :  { %8434 = vadd.xlane.f32.xlu1 %v8433_v37  ;;  %v15905_v37 = vld [vmem:[#allocation13 + $0x1c8] ss:$16 sps:$4 sm:$0xff]  }
0x4b24   :  { %8438 = vrot.lane.b32.xlu1 %v17385_v35, %s16600_s0 }
0x4b43   :  { %v8341_v54 = vpop.f32.mrb[136].mxu1 }
0x4b44   :  { %v8347_v28 = vadd.f32 %v8341_v54, %v8136_v63  ;;  %v15344_v29 = vpop.f32.mrb[137].mxu1  ;;  %v15881_v63 = vld [vmem:[#allocation13 + $0x148] ss:$16 sps:$4 sm:$0xff]   ;;  %v15908_v54 = vld [vmem:[#allocation13 + $0x1e0] ss:$16 sps:$4 sm:$0xff]  }
0x4b45   :  { %v8344_v48 = vpop.f32.mrb[138].mxu1  ;;  %v15914_v29 = vld [vmem:[#allocation16 + $0x140] sm:$0xff]  }
0x4b46   :  { %v15345_v30 = vpop.f32.mrb[139].mxu1  ;;  %v15915_v48 = vld [vmem:[#allocation16 + $0x1c0] sm:$0xff]  }
0x4b48   :  { %8575 = vadd.xlane.f32.xlu1 %v8569_v31 }
0x4ba0   :  { %v8435_v20 = vpop.xlane.xlu1 %8434 }
0x4ba1   :  { %16208 = vrcp.f32 %v8435_v20 }
0x4ba4   :  { %v8439_v32 = vpop.permute.xlu1 %8438 }
0x4ba5   :  { %15352 = vmatpush3.msra.mxu0 %v8439_v32 }
0x4ba6   :  { %15356 = vmatprep.subr.bf16.mxu0 %v16616_v23 }
0x4bab   :  { %v16209_v35 = vpop.eup %16208 }
0x4bac   :  { %v8437_v33 = vmul.f32 %v16209_v35, %v16207_v25  ;;  %v15902_v25 = vld [vmem:[#allocation13 + $0x1c0] ss:$16 sps:$4 sm:$0xff]  }
0x4bae   :  { %15354 = vmatmul.mubr.msk.f32.vlgmr.msra.gmra.mrb[144].mxu0 %vm776_vm5, %v8437_v33 }
0x4baf   :  { %15357 = vmatpush3.bf16.msra.mxu0 %v17573_v45  ;;  %15358 = vmatprep.mubr.msk.bf16.mxu0 %vm16617_vm3, %v16616_v23 }
0x4bb0   :  { %8797 = vmatprep.subr.bf16.mxu0 %v15868_v16  ;;  %v15919_v16 = vld [vmem:[#allocation16 + $0x1c8] sm:$0xff]  }
0x4bd5   :  { %v8576_v57 = vpop.xlane.xlu1 %8575 }
0x4bd6   :  { %v8579_v43 = vmul.f32 0.0078125, %v8576_v57 }
0x4bd8   :  { %v17756_v12 = vsub.f32 %v8569_v31, %v8579_v43 }
0x4bda   :  { %v8583_v46 = vmul.f32 %v17756_v12, %v17756_v12 }
0x4c81   :  { %v8510_v36 = vpop.f32.mrb[144].mxu0 }
0x4c82   :  { %v8514_v34 = vpack.c.bf16 %v8510_v36, %v8510_v36  ;;  %v15355_v59 = vpop.f32.mrb[145].mxu0 }
0x4c83   :  { %v14080_v59 = vld [vmem:[#allocation10 + $0x1] ss:$0 sm:$0xff] }
0x4c84   :  { %15359 = vmatmul.mubr.msk.bf16.vlgmr.msra.gmra.mrb[148].mxu0 %vm698_vm4, %v8514_v34 }
0x4c85   :  { %8829 = vmatprep.mubr.bf16.mxu0 %v16615_v0  ;;  %8798 = vmatpush1.bf16.msra.mxu0 %v15866_v42  ;;  %v15918_v42 = vld [vmem:[#allocation16 + $0x148] sm:$0xff]  }
0x4c86   :  { %8799 = vmatprep.subr.bf16.mxu0 %v15874_v21  ;;  %v15923_v21 = vld [vmem:[#allocation16 + $0x1d0] sm:$0xff]  }
0x4c89   :  { %8800 = vmatpush1.bf16.msra.mxu0 %v15872_v60  ;;  %v15925_v60 = vld [vmem:[#allocation16 + $0x190] sm:$0xff]  }
0x4c8a   :  { %8801 = vmatprep.subr.bf16.mxu0 %v15880_v27  ;;  %v15927_v27 = vld [vmem:[#allocation16 + $0x1d8] sm:$0xff]  }
0x4c8d   :  { %8802 = vmatpush1.bf16.msra.mxu0 %v15878_v5  ;;  %v15929_v5 = vld [vmem:[#allocation16 + $0x198] sm:$0xff]  }
0x4c8e   :  { %8803 = vmatprep.subr.bf16.mxu0 %v15886_v11  ;;  %v15935_v11 = vld [vmem:[#allocation16 + $0x1e8] sm:$0xff]  }
0x4c91   :  { %8804 = vmatpush1.bf16.msra.mxu0 %v15884_v10  ;;  %v15937_v10 = vld [vmem:[#allocation16 + $0x1a8] sm:$0xff]  }
0x4c92   :  { %8805 = vmatprep.subr.bf16.mxu0 %v15892_v14  ;;  %v15939_v14 = vld [vmem:[#allocation16 + $0x1f0] sm:$0xff]  }
0x4c95   :  { %8806 = vmatpush1.bf16.msra.mxu0 %v15890_v17  ;;  %v15941_v17 = vld [vmem:[#allocation16 + $0x1b0] sm:$0xff]  }
0x4c96   :  { %8807 = vmatprep.subr.bf16.mxu0 %v15898_v38  ;;  %v15943_v38 = vld [vmem:[#allocation16 + $0x1f8] sm:$0xff]  }
0x4c99   :  { %8808 = vmatpush1.bf16.msra.mxu0 %v15896_v22  ;;  %v15945_v22 = vld [vmem:[#allocation16 + $0x1b8] sm:$0xff]  }
0x4c9a   :  { %8809 = vmatprep.subr.bf16.mxu0 %v15904_v8 }
0x4c9d   :  { %8810 = vmatpush1.bf16.msra.mxu0 %v15902_v25 }
0x4d57   :  { %v8552_v39 = vpop.f32.mrb[148].mxu0 }
0x4d58   :  { %v8558_v44 = vadd.f32 %v8552_v39, %v8347_v28  ;;  %v15360_v40 = vpop.f32.mrb[149].mxu0  ;;  %v15911_v28 = vld [vmem:[#allocation13 + $0x1e8] ss:$16 sps:$4 sm:$0xff]  }
0x4d59   :  { %v8555_v51 = vpop.f32.mrb[150].mxu0 }
0x4d5a   :  { %v8568_v7 = vadd.f32 %v14079_v26, %v8558_v44  ;;  %v15361_v55 = vpop.f32.mrb[151].mxu0  ;;  %v15910_v26 = vld [vmem:[#allocation13 + $0x1e4] ss:$16 sps:$4 sm:$0xff]   ;;  %v14081_v44 = vld [vmem:[#allocation11 + $0x1] ss:$0 sm:$0xff] }
0x4d5b   :  { %8811 = vmatprep.subr.bf16.mxu0 %v15910_v26  ;;  %v15916_v55 = vld [vmem:[#allocation16 + $0x100] sm:$0xff]  }
0x4d5c   :  { %v8570_v45 = vadd.f32 %v8568_v7, %v17368_v58  ;;  %v15883_v58 = vld [vmem:[#allocation13 + $0x14c] ss:$16 sps:$4 sm:$0xff]   ;;  %8812 = vmatpush1.bf16.msra.mxu0 %v15908_v54 }
0x4d5d   :  { %8844 = vmatprep.subr.bf16.mxu1 %v15883_v58  ;;  %14589 = vmatprep.subr.bf16.mxu0 %v15914_v29  ;;  %v15928_v58 = vld [vmem:[#allocation16 + $0x118] sm:$0xff]  }
0x4d5e   :  { %8577 = vadd.xlane.f32.xlu0 %v8570_v45  ;;  %8845 = vmatpush1.bf16.msra.mxu1 %v15881_v63  ;;  %v15930_v63 = vld [vmem:[#allocation16 + $0x160] sm:$0xff]  }
0x4d5f   :  { %8846 = vmatprep.subr.bf16.mxu1 %v15889_v9  ;;  %v15936_v9 = vld [vmem:[#allocation16 + $0x128] sm:$0xff]  }
0x4d62   :  { %8585 = vadd.xlane.f32.xlu0 %v8583_v46  ;;  %8847 = vmatpush1.bf16.msra.mxu1 %v15887_v49  ;;  %v15938_v49 = vld [vmem:[#allocation16 + $0x170] sm:$0xff]  }
0x4d63   :  { %8848 = vmatprep.subr.bf16.mxu1 %v15895_v6  ;;  %v15940_v6 = vld [vmem:[#allocation16 + $0x130] sm:$0xff]  }
0x4d66   :  { %8849 = vmatpush1.bf16.msra.mxu1 %v15893_v18  ;;  %v15942_v18 = vld [vmem:[#allocation16 + $0x178] sm:$0xff]  }
0x4d67   :  { %8850 = vmatprep.subr.bf16.mxu1 %v15901_v61  ;;  %v15944_v61 = vld [vmem:[#allocation16 + $0x138] sm:$0xff]  }
0x4d6a   :  { %8851 = vmatpush1.bf16.msra.mxu1 %v15899_v24  ;;  %v8615_v24 = vld [vmem:[#allocation14 + $0x4] sm:$0xf] }
0x4d6b   :  { %8852 = vmatprep.subr.bf16.mxu1 %v15907_v41  ;;  %v8620_v8 = vrot.slane %v8615_v24, %v16942_v52  ;;  %v8628_v41 = vrot.slane %v8615_v24, %v16945_v53  ;;  %v8624_v25 = vrot.slane %v8615_v24, %v16939_v50 }
0x4d6e   :  { %8853 = vmatpush1.bf16.msra.mxu1 %v15905_v37  ;;  %v8632_v37 = vrot.slane %v8615_v24, %v17346_v13  ;;  %v15950_v24 = vld [vmem:[#allocation5 + $0x198] ss:$12 sps:$4 sm:$0xff]  }
0x4d6f   :  { %8854 = vmatprep.subr.bf16.mxu1 %v15913_v47 }
0x4d72   :  { %8855 = vmatpush1.bf16.msra.mxu1 %v15911_v28 }
0x4d73   :  { %14611 = vmatprep.subr.bf16.mxu1 %v15915_v48 }
0x4deb   :  { %v8578_v1 = vpop.xlane.xlu0 %8577 }
0x4dec   :  { %v8580_v4 = vmul.f32 0.0078125, %v8578_v1  ;;  %v15931_v1 = vld [vmem:[#allocation16 + $0x1e0] sm:$0xff]  }
0x4dee   :  { %v8582_v15 = vsub.f32 %v8570_v45, %v8580_v4  ;;  %v15917_v45 = vld [vmem:[#allocation16 + $0x180] sm:$0xff]  }
0x4def   :  { %v8586_v30 = vpop.xlane.xlu0 %8585  ;;  %v15932_v4 = vld [vmem:[#allocation16 + $0x120] sm:$0xff]  }
0x4df0   :  { %v8584_v19 = vmul.f32 %v8582_v15, %v8582_v15  ;;  %v8589_v31 = vmul.f32 0.0078125, %v8586_v30 }
0x4df2   :  { %8587 = vadd.xlane.f32.xlu0 %v8584_v19  ;;  %v8591_v20 = vadd.f32 1e-05, %v8589_v31  ;;  %v15934_v19 = vld [vmem:[#allocation16 + $0x168] sm:$0xff]  }
0x4df4   :  { %16210 = vrsqrt.f32 %v8591_v20 }
0x4dfe   :  { %v16211_v36 = vpop.eup %16210 }
0x4dff   :  { %v8595_v34 = vmul.f32 %v16211_v36, %v17756_v12  ;;  %v15920_v12 = vld [vmem:[#allocation16 + $0x108] sm:$0xff]  }
0x4e01   :  { %v8603_v43 = vmul.f32 %v14080_v59, %v8595_v34 }
0x4e03   :  { %v17762_v51 = vadd.f32 %v14081_v44, %v8603_v43 }
0x4e7f   :  { %v8588_v32 = vpop.xlane.xlu0 %8587 }
0x4e80   :  { %v8590_v35 = vmul.f32 0.0078125, %v8588_v32 }
0x4e82   :  { %v8592_v33 = vadd.f32 1e-05, %v8590_v35 }
0x4e84   :  { %16212 = vrsqrt.f32 %v8592_v33 }
0x4e8e   :  { %v16213_v57 = vpop.eup %16212 }
0x4e8f   :  { %v8596_v39 = vmul.f32 %v16213_v57, %v8582_v15  ;;  %v15933_v15 = vld [vmem:[#allocation16 + $0x1a0] sm:$0xff]  }
0x4e91   :  { %v8604_v40 = vmul.f32 %v14080_v59, %v8596_v39 }
0x4e93   :  { %v17764_v7 = vadd.f32 %v14081_v44, %v8604_v40 }
0x4e95   :  { %v8613_v46 = vpack.c.bf16 %v17764_v7, %v17762_v51 }
0x4e97   :  { %8830 = vmatmul.mubr.bf16.vlgmr.msra.gmra.mrb[152].mxu0 %v8613_v46  ;;  %8873 = vmatmul.mubr.bf16.vlgmr.msra.gmra.mrb[140].mxu1 %v8613_v46 }
0x4e98   :  { %14590 = vmatpush3.bf16.msra.mxu0 %v15916_v55  ;;  %14612 = vmatpush3.bf16.msra.mxu1 %v15917_v45 }
0x4e99   :  { %14591 = vmatprep.subr.bf16.mxu0 %v15918_v42  ;;  %14613 = vmatprep.subr.bf16.mxu1 %v15919_v16 }
0x4e9c   :  { %14592 = vmatpush3.bf16.msra.mxu0 %v15920_v12  ;;  %14614 = vmatpush3.bf16.msra.mxu1 %v15921_v3 }
0x4e9d   :  { %14593 = vmatprep.subr.bf16.mxu0 %v15922_v56  ;;  %14615 = vmatprep.subr.bf16.mxu1 %v15923_v21 }
0x4ea0   :  { %14594 = vmatpush3.bf16.msra.mxu0 %v15924_v2  ;;  %14616 = vmatpush3.bf16.msra.mxu1 %v15925_v60  ;;  %v14114_v60 = vld [vmem:[#allocation17 + $0x1] ss:$0 sm:$0xff] }
0x4ea1   :  { %14595 = vmatprep.subr.bf16.mxu0 %v15926_v62  ;;  %14617 = vmatprep.subr.bf16.mxu1 %v15927_v27 }
0x4ea4   :  { %14596 = vmatpush3.bf16.msra.mxu0 %v15928_v58  ;;  %14618 = vmatpush3.bf16.msra.mxu1 %v15929_v5 }
0x4ea5   :  { %14597 = vmatprep.subr.bf16.mxu0 %v15930_v63  ;;  %14619 = vmatprep.subr.bf16.mxu1 %v15931_v1 }
0x4ea8   :  { %14598 = vmatpush3.bf16.msra.mxu0 %v15932_v4  ;;  %14620 = vmatpush3.bf16.msra.mxu1 %v15933_v15 }
0x4ea9   :  { %14599 = vmatprep.subr.bf16.mxu0 %v15934_v19  ;;  %14621 = vmatprep.subr.bf16.mxu1 %v15935_v11 }
0x4eac   :  { %14600 = vmatpush3.bf16.msra.mxu0 %v15936_v9  ;;  %14622 = vmatpush3.bf16.msra.mxu1 %v15937_v10 }
0x4ead   :  { %14601 = vmatprep.subr.bf16.mxu0 %v15938_v49  ;;  %14623 = vmatprep.subr.bf16.mxu1 %v15939_v14 }
0x4eb0   :  { %14602 = vmatpush3.bf16.msra.mxu0 %v15940_v6  ;;  %14624 = vmatpush3.bf16.msra.mxu1 %v15941_v17 }
0x4eb1   :  { %14603 = vmatprep.subr.bf16.mxu0 %v15942_v18  ;;  %14625 = vmatprep.subr.bf16.mxu1 %v15943_v38  ;;  %v15946_v18 = vld [vmem:[#allocation5 + $0x180] ss:$12 sps:$4 sm:$0xff]   ;;  %v15948_v38 = vld [vmem:[#allocation5 + $0x184] ss:$12 sps:$4 sm:$0xff]  }
0x4eb4   :  { %14604 = vmatpush3.bf16.msra.mxu0 %v15944_v61  ;;  %14626 = vmatpush3.bf16.msra.mxu1 %v15945_v22  ;;  %v15949_v61 = vld [vmem:[#allocation5 + $0x188] ss:$12 sps:$4 sm:$0xff]  }
0x4eb5   :  { %15362 = vmatprep.subr.bf16.mxu1 %v16616_v23  ;;  %v15952_v22 = vld [vmem:[#allocation5 + $0x19c] ss:$12 sps:$4 sm:$0xff]   ;;  %9516 = vmatprep.subr.bf16.mxu0 %v15948_v38 }
0x4f6a   :  { %v8831_v26 = vpop.f32.mrb[152].mxu0  ;;  %v8874_v47 = vpop.f32.mrb[140].mxu1 }
0x4f6b   :  { %v8832_v54 = vadd.f32 %v8831_v26, %v8620_v8  ;;  %v8875_v28 = vadd.f32 %v8874_v47, %v8628_v41  ;;  %v8833_v29 = vpop.f32.mrb[153].mxu0  ;;  %v8876_v48 = vpop.f32.mrb[141].mxu1 }
0x4f6c   :  { %v8834_v30 = vadd.f32 %v8833_v29, %v8624_v25  ;;  %v8877_v31 = vadd.f32 %v8876_v48, %v8632_v37  ;;  %v8835_v20 = vpop.f32.mrb[154].mxu0  ;;  %v8878_v32 = vpop.f32.mrb[142].mxu1  ;;  %v15954_v29 = vld [vmem:[#allocation5 + $0x1b0] ss:$12 sps:$4 sm:$0xff]   ;;  %v15957_v48 = vld [vmem:[#allocation5 + $0x1b8] ss:$12 sps:$4 sm:$0xff]  }
0x4f6d   :  { %v8836_v35 = vadd.f32 %v8835_v20, %v8620_v8  ;;  %v8879_v33 = vadd.f32 %v8878_v32, %v8628_v41  ;;  %v8837_v36 = vpop.f32.mrb[155].mxu0  ;;  %v8880_v34 = vpop.f32.mrb[143].mxu1  ;;  %v8883_v39 = vmax.f32 %v8832_v54, 0.0  ;;  %v8885_v43 = vmax.f32 %v8875_v28, 0.0  ;;  %v15953_v54 = vld [vmem:[#allocation5 + $0x1a0] ss:$12 sps:$4 sm:$0xff]  }
0x4f6e   :  { %v8838_v59 = vadd.f32 %v8837_v36, %v8624_v25  ;;  %v8881_v57 = vadd.f32 %v8880_v34, %v8632_v37  ;;  %v8884_v55 = vmax.f32 %v8834_v30, 0.0  ;;  %v8886_v45 = vmax.f32 %v8877_v31, 0.0  ;;  %v15956_v28 = vld [vmem:[#allocation5 + $0x1b4] ss:$12 sps:$4 sm:$0xff]   ;;  %v15960_v30 = vld [vmem:[#allocation5 + $0x1cc] ss:$12 sps:$4 sm:$0xff]  }
0x4f6f   :  { %v8887_v44 = vmax.f32 %v8836_v35, 0.0  ;;  %v8889_v40 = vmax.f32 %v8879_v33, 0.0  ;;  %v15958_v31 = vld [vmem:[#allocation5 + $0x1c8] ss:$12 sps:$4 sm:$0xff]   ;;  %v15961_v20 = vld [vmem:[#allocation5 + $0x1d0] ss:$12 sps:$4 sm:$0xff]  }
0x4f70   :  { %v8888_v46 = vmax.f32 %v8838_v59, 0.0  ;;  %v8890_v42 = vmax.f32 %v8881_v57, 0.0  ;;  %v15964_v32 = vld [vmem:[#allocation5 + $0x1e4] ss:$12 sps:$4 sm:$0xff]   ;;  %v15962_v35 = vld [vmem:[#allocation5 + $0x1e0] ss:$12 sps:$4 sm:$0xff]  }
0x4f71   :  { %v8891_v16 = vpack.c.bf16 %v8887_v44, %v8883_v39  ;;  %v8893_v12 = vpack.c.bf16 %v8889_v40, %v8885_v43  ;;  %v15965_v33 = vld [vmem:[#allocation5 + $0x1e8] ss:$12 sps:$4 sm:$0xff]   ;;  %v15966_v34 = vld [vmem:[#allocation5 + $0x1f8] ss:$12 sps:$4 sm:$0xff]   ;;  %v15969_v59 = vld [vmem:[#allocation5 + $0x200] ss:$12 sps:$4 sm:$0xff]  }
0x4f72   :  { %v8892_v3 = vpack.c.bf16 %v8888_v46, %v8884_v55  ;;  %v8894_v56 = vpack.c.bf16 %v8890_v42, %v8886_v45  ;;  %v15968_v36 = vld [vmem:[#allocation5 + $0x1fc] ss:$12 sps:$4 sm:$0xff]   ;;  %v15972_v57 = vld [vmem:[#allocation5 + $0x214] ss:$12 sps:$4 sm:$0xff]   ;;  %v15973_v43 = vld [vmem:[#allocation5 + $0x218] ss:$12 sps:$4 sm:$0xff]  }
0x4f73   :  { %v15970_v39 = vld [vmem:[#allocation5 + $0x210] ss:$12 sps:$4 sm:$0xff]   ;;  %v15976_v44 = vld [vmem:[#allocation5 + $0x22c] ss:$12 sps:$4 sm:$0xff]   ;;  %v15974_v40 = vld [vmem:[#allocation5 + $0x228] ss:$12 sps:$4 sm:$0xff]  }
0x4f74   :  { %9127 = vmatprep.mubr.bf16.mxu0 %v8892_v3  ;;  %9168 = vmatprep.mubr.bf16.mxu1 %v8894_v56  ;;  %v15977_v55 = vld [vmem:[#allocation5 + $0x230] ss:$12 sps:$4 sm:$0xff]  }
0x4f75   :  { %9128 = vmatmul.mubr.bf16.vlgmr.msra.gmra.mrb[156].mxu0 %v8891_v16  ;;  %9169 = vmatmul.mubr.bf16.vlgmr.msra.gmra.mrb[144].mxu1 %v8893_v12 }
0x4f76   :  { %9548 = vmatprep.mubr.bf16.mxu0 %v16615_v0  ;;  %15378 = vmatprep.mubr.msk.bf16.mxu1 %vm16617_vm3, %v16616_v23 }
0x4f77   :  { %15363 = vmatpush3.bf16.msra.mxu1 %v15949_v61  ;;  %9517 = vmatpush1.bf16.msra.mxu0 %v15946_v18 }
0x4f78   :  { %15364 = vmatprep.subr.bf16.mxu1 %v16616_v23  ;;  %9518 = vmatprep.subr.bf16.mxu0 %v15952_v22 }
0x4f7b   :  { %9519 = vmatpush1.bf16.msra.mxu0 %v15950_v24  ;;  %15365 = vmatpush3.bf16.msra.mxu1 %v15953_v54 }
0x4f7c   :  { %15366 = vmatprep.subr.bf16.mxu1 %v16616_v23  ;;  %9520 = vmatprep.subr.bf16.mxu0 %v15956_v28 }
0x4f7f   :  { %9521 = vmatpush1.bf16.msra.mxu0 %v15954_v29  ;;  %15367 = vmatpush3.bf16.msra.mxu1 %v15957_v48 }
0x4f80   :  { %15368 = vmatprep.subr.bf16.mxu1 %v16616_v23  ;;  %9522 = vmatprep.subr.bf16.mxu0 %v15960_v30 }
0x4f83   :  { %9523 = vmatpush1.bf16.msra.mxu0 %v15958_v31  ;;  %15369 = vmatpush3.bf16.msra.mxu1 %v15961_v20 }
0x4f84   :  { %15370 = vmatprep.subr.bf16.mxu1 %v16616_v23  ;;  %9524 = vmatprep.subr.bf16.mxu0 %v15964_v32 }
0x4f87   :  { %9525 = vmatpush1.bf16.msra.mxu0 %v15962_v35  ;;  %15371 = vmatpush3.bf16.msra.mxu1 %v15965_v33 }
0x4f88   :  { %15372 = vmatprep.subr.bf16.mxu1 %v16616_v23  ;;  %9526 = vmatprep.subr.bf16.mxu0 %v15968_v36 }
0x4f8b   :  { %9527 = vmatpush1.bf16.msra.mxu0 %v15966_v34  ;;  %15373 = vmatpush3.bf16.msra.mxu1 %v15969_v59 }
0x4f8c   :  { %15374 = vmatprep.subr.bf16.mxu1 %v16616_v23  ;;  %9528 = vmatprep.subr.bf16.mxu0 %v15972_v57 }
0x4f8f   :  { %9529 = vmatpush1.bf16.msra.mxu0 %v15970_v39  ;;  %15375 = vmatpush3.bf16.msra.mxu1 %v15973_v43 }
0x4f90   :  { %9530 = vmatprep.subr.bf16.mxu0 %v15976_v44  ;;  %15376 = vmatprep.subr.bf16.mxu1 %v16616_v23 }
0x4f93   :  { %9531 = vmatpush1.bf16.msra.mxu0 %v15974_v40  ;;  %15377 = vmatpush3.bf16.msra.mxu1 %v15977_v55 }
0x4f94   :  { %15387 = vmatprep.subr.mxu1 %v16616_v23  ;;  %15382 = vmatprep.subr.mxu0 %v16616_v23 }
0x5048   :  { %v14605_v21 = vpop.f32.mrb[156].mxu0  ;;  %v14627_v2 = vpop.f32.mrb[144].mxu1 }
0x5049   :  { %v14606_v62 = vpop.f32.mrb[157].mxu0  ;;  %v14628_v27 = vpop.f32.mrb[145].mxu1 }
0x504a   :  { %v14607_v58 = vadd.f32 %v14606_v62, %v14605_v21  ;;  %v14629_v5 = vadd.f32 %v14628_v27, %v14627_v2  ;;  %v14608_v63 = vpop.f32.mrb[158].mxu0  ;;  %v14630_v1 = vpop.f32.mrb[146].mxu1  ;;  %v14147_v2 = vld [vmem:[#allocation19 + $0x1] ss:$0 sm:$0xff] }
0x504b   :  { %v14609_v4 = vpop.f32.mrb[159].mxu0  ;;  %v14631_v15 = vpop.f32.mrb[147].mxu1 }
0x504c   :  { %v9130_v19 = vadd.f32 %v14607_v58, %v14114_v60  ;;  %v14610_v11 = vadd.f32 %v14609_v4, %v14608_v63  ;;  %v14632_v9 = vadd.f32 %v14631_v15, %v14630_v1  ;;  %v14148_v58 = vld [vmem:[#allocation20 + $0x1] ss:$0 sm:$0xff] }
0x504d   :  { %v9371_v15 = vld [vmem:[#allocation7 + $0x6] sm:$0x7] }
0x504e   :  { %v9171_v10 = vadd.f32 %v14629_v5, %v9130_v19  ;;  %v9133_v49 = vadd.f32 %v14610_v11, %v14114_v60  ;;  %v9376_v19 = vrot.slane %v9371_v15, %v16942_v52  ;;  %v9384_v11 = vrot.slane %v9371_v15, %v16945_v53 }
0x5050   :  { %v9174_v14 = vadd.f32 %v14632_v9, %v9133_v49  ;;  %v9177_v6 = vadd.f32 %v9171_v10, %v17762_v51  ;;  %v9380_v9 = vrot.slane %v9371_v15, %v16939_v50 }
0x5052   :  { %9183 = vadd.xlane.f32.xlu0 %v9177_v6  ;;  %v9178_v17 = vadd.f32 %v9174_v14, %v17764_v7 }
0x5056   :  { %9185 = vadd.xlane.f32.xlu0 %v9178_v17 }
0x50df   :  { %v9184_v8 = vpop.xlane.xlu0 %9183 }
0x50e0   :  { %v9187_v41 = vmul.f32 0.0078125, %v9184_v8 }
0x50e2   :  { %v17779_v25 = vsub.f32 %v9177_v6, %v9187_v41 }
0x50e3   :  { %v9186_v51 = vpop.xlane.xlu0 %9185 }
0x50e4   :  { %v9188_v37 = vmul.f32 0.0078125, %v9186_v51  ;;  %v9191_v7 = vmul.f32 %v17779_v25, %v17779_v25 }
0x50e6   :  { %v9190_v26 = vsub.f32 %v9178_v17, %v9188_v37  ;;  %9193 = vadd.xlane.f32.xlu0 %v9191_v7 }
0x50e8   :  { %v9192_v47 = vmul.f32 %v9190_v26, %v9190_v26 }
0x50ea   :  { %9195 = vadd.xlane.f32.xlu0 %v9192_v47 }
0x5173   :  { %v9194_v45 = vpop.xlane.xlu0 %9193 }
0x5174   :  { %v9197_v46 = vmul.f32 0.0078125, %v9194_v45 }
0x5176   :  { %v9199_v42 = vadd.f32 1e-05, %v9197_v46  ;;  %v17849_v46 = vld [vmem:[#allocation8 + $0x88] sm:$0xff]  }
0x5177   :  { %v9196_v16 = vpop.xlane.xlu0 %9195 }
0x5178   :  { %16214 = vrsqrt.f32 %v9199_v42  ;;  %v9198_v12 = vmul.f32 0.0078125, %v9196_v16 }
0x517a   :  { %v9200_v3 = vadd.f32 1e-05, %v9198_v12  ;;  %v17853_v12 = vld [vmem:[#allocation8 + $0x80] sm:$0xff]  }
0x517c   :  { %16216 = vrsqrt.f32 %v9200_v3 }
0x5182   :  { %v16215_v56 = vpop.eup %16214 }
0x5183   :  { %v9203_v21 = vmul.f32 %v16215_v56, %v17779_v25 }
0x5185   :  { %v9211_v27 = vmul.f32 %v14147_v2, %v9203_v21 }
0x5186   :  { %v16217_v60 = vpop.eup %16216 }
0x5187   :  { %v9204_v62 = vmul.f32 %v16217_v60, %v9190_v26  ;;  %v17792_v63 = vadd.f32 %v14148_v58, %v9211_v27 }
0x5189   :  { %v9212_v5 = vmul.f32 %v14147_v2, %v9204_v62 }
0x518b   :  { %v17794_v1 = vadd.f32 %v14148_v58, %v9212_v5 }
0x518d   :  { %v9369_v4 = vpack.c.bf16 %v17794_v1, %v17792_v63 }
0x518f   :  { %9549 = vmatmul.mubr.bf16.vlgmr.msra.gmra.mrb[160].mxu0 %v9369_v4  ;;  %15379 = vmatmul.mubr.bf16.vlgmr.msra.gmra.mrb[148].mxu1 %v9369_v4 }
0x5190   :  { %15384 = vmatprep.mubr.msk.f32.mxu0 %vm16617_vm3, %v16616_v23  ;;  %15389 = vmatprep.mubr.msk.f32.mxu1 %vm16617_vm3, %v16616_v23 }
0x5262   :  { %v9550_v10 = vpop.f32.mrb[160].mxu0  ;;  %v9593_v49 = vpop.f32.mrb[148].mxu1 }
0x5263   :  { %v17805_v14 = vadd.f32 %v9550_v10, %v9376_v19  ;;  %v17807_v6 = vadd.f32 %v9593_v49, %v9384_v11  ;;  %v9552_v17 = vpop.f32.mrb[161].mxu0  ;;  %v15380_v18 = vpop.f32.mrb[149].mxu1 }
0x5264   :  { %v17809_v38 = vadd.f32 %v9552_v17, %v9380_v9  ;;  %v9554_v61 = vpop.f32.mrb[162].mxu0  ;;  %v9596_v22 = vpop.f32.mrb[150].mxu1 }
0x5265   :  { %v17811_v24 = vadd.f32 %v9554_v61, %v9376_v19  ;;  %v17813_v8 = vadd.f32 %v9596_v22, %v9384_v11  ;;  %v9556_v41 = vpop.f32.mrb[163].mxu0  ;;  %v15381_v25 = vpop.f32.mrb[151].mxu1  ;;  %15388 = vmatpush3.msra.mxu1 %v17807_v6  ;;  %9762 = vrot.lane.b32.xlu1 %v17805_v14, %s16618_s4 }
0x5266   :  { %v17818_v51 = vadd.f32 %v9556_v41, %v9380_v9  ;;  %9764 = vrot.lane.b32.xlu0 %v17809_v38, %s16618_s4  ;;  %15383 = vmatpush3.xpose.msk.msra.mxu0 %vm698_vm4, %v17809_v38 }
0x5267   :  { %15392 = vmatprep.subr.mxu0 %v16616_v23  ;;  %15397 = vmatprep.subr.mxu1 %v16616_v23 }
0x5269   :  { %15385 = vmatmul.mubr.msk.f32.vlgmr.msra.gmra.mrb[146].mxu0 %vm698_vm4, %v17805_v14 }
0x526a   :  { %15394 = vmatprep.mubr.msk.f32.mxu0 %vm16617_vm3, %v16616_v23 }
0x52d7   :  { %v9763_v7 = vpop.permute.xlu1 %9762 }
0x52d8   :  { %v9765_v37 = vpop.permute.xlu0 %9764 }
0x52d9   :  { %15393 = vmatpush3.xpose.msk.msra.mxu0 %vm698_vm4, %v9765_v37 }
0x52da   :  { %15402 = vmatprep.subr.bf16.mxu0 %v16616_v23 }
0x52dc   :  { %15395 = vmatmul.mubr.msk.f32.vlgmr.msra.gmra.mrb[164].mxu0 %vm698_vm4, %v9763_v7 }
0x52dd   :  { %15404 = vmatprep.mubr.msk.bf16.mxu0 %vm16617_vm3, %v16616_v23  ;;  %15403 = vmatpush3.bf16.msra.mxu0 %v17849_v46 }
0x52de   :  { %15414 = vmatprep.subr.mxu0 %v16616_v23 }
0x533c   :  { %v9672_v26 = vpop.f32.mrb[146].mxu0 }
0x533d   :  { %v9676_v47 = vmul.f32 0.25, %v9672_v26  ;;  %v15386_v54 = vpop.f32.mrb[147].mxu0 }
0x533f   :  { %v9677_v28 = vsel %vm776_vm5, %v9676_v47, -inf }
0x5340   :  { %9678 = vmax.xlane.f32.xlu1 %v9677_v28 }
0x53af   :  { %v9836_v29 = vpop.f32.mrb[164].mxu0 }
0x53b0   :  { %v9840_v48 = vmul.f32 0.25, %v9836_v29  ;;  %v15396_v30 = vpop.f32.mrb[165].mxu0 }
0x53b2   :  { %v9841_v31 = vsel %vm776_vm5, %v9840_v48, -inf }
0x53b3   :  { %9842 = vmax.xlane.f32.xlu0 %v9841_v31 }
0x53cd   :  { %v9679_v20 = vpop.xlane.xlu1 %9678 }
0x53ce   :  { %v9680_v32 = vsub.f32 %v9676_v47, %v9679_v20 }
0x53d0   :  { %v9681_v35 = vmul.f32 1.442695, %v9680_v32  ;;  %v17888_v32 = vld [vmem:[#allocation8 + $0x90] sm:$0xff]  }
0x53d2   :  { %16218 = vpow2.f32 %v9681_v35 }
0x53dc   :  { %v16219_v33 = vpop.eup %16218 }
0x53dd   :  { %v9683_v36 = vsel %vm776_vm5, %v16219_v33, 0.0 }
0x53de   :  { %9684 = vadd.xlane.f32.xlu0 %v9683_v36 }
0x53f4   :  { %9853 = vrot.lane.b32.xlu0 %v17807_v6, %s16618_s4 }
0x5440   :  { %v9843_v34 = vpop.xlane.xlu0 %9842 }
0x5441   :  { %v9844_v59 = vsub.f32 %v9840_v48, %v9843_v34 }
0x5443   :  { %v9845_v57 = vmul.f32 1.442695, %v9844_v59 }
0x5445   :  { %16220 = vpow2.f32 %v9845_v57 }
0x544f   :  { %v16221_v39 = vpop.eup %16220 }
0x5450   :  { %v9847_v43 = vsel %vm776_vm5, %v16221_v39, 0.0 }
0x5451   :  { %9848 = vadd.xlane.f32.xlu1 %v9847_v43 }
0x5462   :  { %10030 = vrot.lane.b32.xlu1 %v17809_v38, %s16619_s11 }
0x5466   :  { %10028 = vrot.lane.b32.xlu1 %v17805_v14, %s16619_s11 }
0x546b   :  { %v9685_v44 = vpop.xlane.xlu0 %9684 }
0x546c   :  { %16222 = vrcp.f32 %v9685_v44 }
0x546f   :  { %v9854_v45 = vpop.permute.xlu0 %9853 }
0x5476   :  { %v16223_v40 = vpop.eup %16222 }
0x5477   :  { %v9687_v55 = vmul.f32 %v16223_v40, %v16219_v33 }
0x5479   :  { %15390 = vmatmul.mubr.msk.f32.vlgmr.msra.gmra.mrb[152].mxu1 %vm776_vm5, %v9687_v55 }
0x547a   :  { %15398 = vmatpush3.msra.mxu1 %v9854_v45  ;;  %15399 = vmatprep.mubr.msk.f32.mxu1 %vm16617_vm3, %v16616_v23 }
0x547b   :  { %15408 = vmatprep.subr.bf16.mxu1 %v16616_v23 }
0x54de   :  { %v9849_v42 = vpop.xlane.xlu1 %9848 }
0x54df   :  { %16224 = vrcp.f32 %v9849_v42 }
0x54e2   :  { %v10031_v58 = vpop.permute.xlu1 %10030 }
0x54e6   :  { %v10029_v5 = vpop.permute.xlu1 %10028 }
0x54e9   :  { %v16225_v16 = vpop.eup %16224 }
0x54ea   :  { %v9851_v3 = vmul.f32 %v16225_v16, %v16221_v39 }
0x54ec   :  { %15400 = vmatmul.mubr.msk.f32.vlgmr.msra.gmra.mrb[154].mxu1 %vm776_vm5, %v9851_v3 }
0x54ed   :  { %15409 = vmatpush3.bf16.msra.mxu1 %v17853_v12  ;;  %15410 = vmatprep.mubr.msk.bf16.mxu1 %vm16617_vm3, %v16616_v23 }
0x54ee   :  { %15419 = vmatprep.subr.mxu1 %v16616_v23 }
0x554c   :  { %v9757_v56 = vpop.f32.mrb[152].mxu1 }
0x554d   :  { %v9761_v21 = vpack.c.bf16 %v9757_v56, %v9757_v56  ;;  %v15391_v2 = vpop.f32.mrb[153].mxu1 }
0x554f   :  { %15411 = vmatmul.mubr.msk.bf16.vlgmr.msra.gmra.mrb[156].mxu1 %vm698_vm4, %v9761_v21 }
0x5550   :  { %15421 = vmatprep.mubr.msk.f32.mxu1 %vm16617_vm3, %v16616_v23 }
0x55bf   :  { %v9925_v60 = vpop.f32.mrb[154].mxu1 }
0x55c0   :  { %v9929_v62 = vpack.c.bf16 %v9925_v60, %v9925_v60  ;;  %v15401_v27 = vpop.f32.mrb[155].mxu1 }
0x55c2   :  { %15405 = vmatmul.mubr.msk.bf16.vlgmr.msra.gmra.mrb[168].mxu0 %vm698_vm4, %v9929_v62 }
0x55c3   :  { %15415 = vmatpush3.xpose.msk.msra.mxu0 %vm698_vm4, %v10031_v58  ;;  %15416 = vmatprep.mubr.msk.f32.mxu0 %vm16617_vm3, %v16616_v23 }
0x55c4   :  { %15424 = vmatprep.subr.bf16.mxu0 %v16616_v23 }
0x55ca   :  { %15417 = vmatmul.mubr.msk.f32.vlgmr.msra.gmra.mrb[166].mxu0 %vm698_vm4, %v10029_v5 }
0x55cb   :  { %15426 = vmatprep.mubr.msk.bf16.mxu0 %vm16617_vm3, %v16616_v23  ;;  %15425 = vmatpush3.bf16.msra.mxu0 %v17888_v32 }
0x55cc   :  { %15440 = vmatprep.subr.bf16.mxu0 %v16616_v23 }
0x5622   :  { %v10022_v4 = vpop.f32.mrb[156].mxu1 }
0x5623   :  { %v15412_v15 = vpop.f32.mrb[157].mxu1 }
0x5624   :  { %v10025_v19 = vpop.f32.mrb[158].mxu1 }
0x5625   :  { %v15413_v11 = vpop.f32.mrb[159].mxu1 }
0x5695   :  { %v9973_v9 = vpop.f32.mrb[168].mxu0 }
0x5696   :  { %v10023_v10 = vadd.f32 %v10022_v4, %v9973_v9  ;;  %v15406_v49 = vpop.f32.mrb[169].mxu0  ;;  %v17912_v4 = vld [vmem:[#allocation8 + $0x98] sm:$0xff]  }
0x5697   :  { %v9976_v17 = vpop.f32.mrb[170].mxu0 }
0x5698   :  { %v15407_v18 = vpop.f32.mrb[171].mxu0 }
0x569d   :  { %v10102_v61 = vpop.f32.mrb[166].mxu0 }
0x569e   :  { %v10106_v22 = vmul.f32 0.25, %v10102_v61  ;;  %v15418_v41 = vpop.f32.mrb[167].mxu0 }
0x56a0   :  { %v10107_v25 = vsel %vm776_vm5, %v10106_v22, -inf }
0x56a1   :  { %10108 = vmax.xlane.f32.xlu0 %v10107_v25 }
0x56b7   :  { %10118 = vrot.lane.b32.xlu0 %v17807_v6, %s16619_s11 }
0x56bb   :  { %10245 = vrot.lane.b32.xlu0 %v17805_v14, %s16620_s10 }
0x572e   :  { %v10109_v37 = vpop.xlane.xlu0 %10108 }
0x572f   :  { %v10110_v7 = vsub.f32 %v10106_v22, %v10109_v37 }
0x5731   :  { %v10111_v26 = vmul.f32 1.442695, %v10110_v7 }
0x5732   :  { %v10119_v47 = vpop.permute.xlu0 %10118 }
0x5733   :  { %16226 = vpow2.f32 %v10111_v26  ;;  %15420 = vmatpush3.msra.mxu1 %v10119_v47 }
0x5734   :  { %15430 = vmatprep.subr.mxu1 %v16616_v23 }
0x5736   :  { %v10246_v20 = vpop.permute.xlu0 %10245 }
0x573d   :  { %v16227_v54 = vpop.eup %16226 }
0x573e   :  { %v10113_v28 = vsel %vm776_vm5, %v16227_v54, 0.0 }
0x573f   :  { %10114 = vadd.xlane.f32.xlu1 %v10113_v28 }
0x5750   :  { %10247 = vrot.lane.b32.xlu1 %v17809_v38, %s16620_s10 }
0x57cc   :  { %v10115_v29 = vpop.xlane.xlu1 %10114 }
0x57cd   :  { %16228 = vrcp.f32 %v10115_v29 }
0x57d0   :  { %v10248_v31 = vpop.permute.xlu1 %10247 }
0x57d7   :  { %v16229_v48 = vpop.eup %16228 }
0x57d8   :  { %v10117_v30 = vmul.f32 %v16229_v48, %v16227_v54 }
0x57da   :  { %15422 = vmatmul.mubr.msk.f32.vlgmr.msra.gmra.mrb[160].mxu1 %vm776_vm5, %v10117_v30 }
0x57db   :  { %15431 = vmatpush3.xpose.msk.msra.mxu1 %vm698_vm4, %v10248_v31  ;;  %15432 = vmatprep.mubr.msk.f32.mxu1 %vm16617_vm3, %v16616_v23 }
0x57dc   :  { %15435 = vmatprep.subr.mxu1 %v16616_v23 }
0x57de   :  { %15433 = vmatmul.mubr.msk.f32.vlgmr.msra.gmra.mrb[162].mxu1 %vm698_vm4, %v10246_v20 }
0x57df   :  { %15437 = vmatprep.mubr.msk.f32.mxu1 %vm16617_vm3, %v16616_v23 }
0x58ad   :  { %v10190_v35 = vpop.f32.mrb[160].mxu1 }
0x58ae   :  { %v10194_v33 = vpack.c.bf16 %v10190_v35, %v10190_v35  ;;  %v15423_v36 = vpop.f32.mrb[161].mxu1  ;;  %v17936_v35 = vld [vmem:[#allocation8 + $0xa0] sm:$0xff]  }
0x58b0   :  { %15427 = vmatmul.mubr.msk.bf16.vlgmr.msra.gmra.mrb[172].mxu0 %vm698_vm4, %v10194_v33 }
0x58b1   :  { %v10319_v34 = vpop.f32.mrb[162].mxu1  ;;  %15442 = vmatprep.mubr.msk.bf16.mxu0 %vm16617_vm3, %v16616_v23  ;;  %15441 = vmatpush3.bf16.msra.mxu0 %v17912_v4 }
0x58b2   :  { %v10323_v59 = vmul.f32 0.25, %v10319_v34  ;;  %v15434_v57 = vpop.f32.mrb[163].mxu1  ;;  %15456 = vmatprep.subr.bf16.mxu0 %v16616_v23 }
0x58b4   :  { %v10324_v39 = vsel %vm776_vm5, %v10323_v59, -inf }
0x58b5   :  { %10325 = vmax.xlane.f32.xlu1 %v10324_v39 }
0x58c6   :  { %10464 = vrot.lane.b32.xlu1 %v17809_v38, %s16596_s2 }
0x58ca   :  { %10462 = vrot.lane.b32.xlu1 %v17805_v14, %s16596_s2 }
0x5942   :  { %v10326_v43 = vpop.xlane.xlu1 %10325 }
0x5943   :  { %v10327_v44 = vsub.f32 %v10323_v59, %v10326_v43 }
0x5945   :  { %v10328_v40 = vmul.f32 1.442695, %v10327_v44 }
0x5946   :  { %v10465_v27 = vpop.permute.xlu1 %10464 }
0x5947   :  { %16230 = vpow2.f32 %v10328_v40 }
0x594a   :  { %v10463_v5 = vpop.permute.xlu1 %10462 }
0x5951   :  { %v16231_v55 = vpop.eup %16230 }
0x5952   :  { %v10330_v45 = vsel %vm776_vm5, %v16231_v55, 0.0 }
0x5953   :  { %10331 = vadd.xlane.f32.xlu0 %v10330_v45 }
0x5969   :  { %10335 = vrot.lane.b32.xlu0 %v17807_v6, %s16620_s10 }
0x5983   :  { %v10238_v42 = vpop.f32.mrb[172].mxu0 }
0x5984   :  { %v10244_v16 = vadd.f32 %v10238_v42, %v10023_v10  ;;  %v15428_v3 = vpop.f32.mrb[173].mxu0 }
0x5985   :  { %v10241_v56 = vpop.f32.mrb[174].mxu0 }
0x5986   :  { %v15429_v21 = vpop.f32.mrb[175].mxu0 }
0x59e0   :  { %v10332_v2 = vpop.xlane.xlu0 %10331 }
0x59e1   :  { %16232 = vrcp.f32 %v10332_v2 }
0x59e4   :  { %v10336_v60 = vpop.permute.xlu0 %10335 }
0x59e5   :  { %15436 = vmatpush3.msra.mxu1 %v10336_v60 }
0x59e6   :  { %15446 = vmatprep.subr.mxu1 %v16616_v23 }
0x59eb   :  { %v16233_v62 = vpop.eup %16232 }
0x59ec   :  { %v10334_v58 = vmul.f32 %v16233_v62, %v16231_v55 }
0x59ee   :  { %15438 = vmatmul.mubr.msk.f32.vlgmr.msra.gmra.mrb[164].mxu1 %vm776_vm5, %v10334_v58 }
0x59ef   :  { %15447 = vmatpush3.xpose.msk.msra.mxu1 %vm698_vm4, %v10465_v27  ;;  %15448 = vmatprep.mubr.msk.f32.mxu1 %vm16617_vm3, %v16616_v23 }
0x59f0   :  { %15451 = vmatprep.subr.mxu1 %v16616_v23 }
0x59f2   :  { %15449 = vmatmul.mubr.msk.f32.vlgmr.msra.gmra.mrb[166].mxu1 %vm698_vm4, %v10463_v5 }
0x59f3   :  { %15453 = vmatprep.mubr.msk.f32.mxu1 %vm16617_vm3, %v16616_v23 }
0x5ac1   :  { %v10407_v15 = vpop.f32.mrb[164].mxu1 }
0x5ac2   :  { %v10411_v19 = vpack.c.bf16 %v10407_v15, %v10407_v15  ;;  %v15439_v11 = vpop.f32.mrb[165].mxu1 }
0x5ac4   :  { %15443 = vmatmul.mubr.msk.bf16.vlgmr.msra.gmra.mrb[176].mxu0 %vm698_vm4, %v10411_v19  ;;  %v17960_v19 = vld [vmem:[#allocation8 + $0xa8] sm:$0xff]  }
0x5ac5   :  { %v10536_v9 = vpop.f32.mrb[166].mxu1  ;;  %15458 = vmatprep.mubr.msk.bf16.mxu0 %vm16617_vm3, %v16616_v23  ;;  %15457 = vmatpush3.bf16.msra.mxu0 %v17936_v35 }
0x5ac6   :  { %v10540_v10 = vmul.f32 0.25, %v10536_v9  ;;  %v15450_v49 = vpop.f32.mrb[167].mxu1  ;;  %15472 = vmatprep.subr.bf16.mxu0 %v16616_v23 }
0x5ac8   :  { %v10541_v17 = vsel %vm776_vm5, %v10540_v10, -inf }
0x5ac9   :  { %10542 = vmax.xlane.f32.xlu0 %v10541_v17 }
0x5adf   :  { %10552 = vrot.lane.b32.xlu0 %v17807_v6, %s16596_s2 }
0x5ae3   :  { %10679 = vrot.lane.b32.xlu0 %v17805_v14, %s16607_s24 }
0x5b56   :  { %v10543_v18 = vpop.xlane.xlu0 %10542 }
0x5b57   :  { %v10544_v61 = vsub.f32 %v10540_v10, %v10543_v18 }
0x5b59   :  { %v10545_v22 = vmul.f32 1.442695, %v10544_v61 }
0x5b5a   :  { %v10553_v41 = vpop.permute.xlu0 %10552 }
0x5b5b   :  { %16234 = vpow2.f32 %v10545_v22  ;;  %15452 = vmatpush3.msra.mxu1 %v10553_v41 }
0x5b5c   :  { %15462 = vmatprep.subr.mxu1 %v16616_v23 }
0x5b5e   :  { %v10680_v20 = vpop.permute.xlu0 %10679 }
0x5b65   :  { %v16235_v25 = vpop.eup %16234 }
0x5b66   :  { %v10547_v37 = vsel %vm776_vm5, %v16235_v25, 0.0 }
0x5b67   :  { %10548 = vadd.xlane.f32.xlu1 %v10547_v37 }
0x5b78   :  { %10681 = vrot.lane.b32.xlu1 %v17809_v38, %s16607_s24 }
0x5b97   :  { %v10455_v7 = vpop.f32.mrb[176].mxu0 }
0x5b98   :  { %v10461_v26 = vadd.f32 %v10455_v7, %v10244_v16  ;;  %v15444_v47 = vpop.f32.mrb[177].mxu0 }
0x5b99   :  { %v10458_v54 = vpop.f32.mrb[178].mxu0 }
0x5b9a   :  { %v15445_v28 = vpop.f32.mrb[179].mxu0 }
0x5bf4   :  { %v10549_v29 = vpop.xlane.xlu1 %10548 }
0x5bf5   :  { %16236 = vrcp.f32 %v10549_v29 }
0x5bf8   :  { %v10682_v31 = vpop.permute.xlu1 %10681 }
0x5bff   :  { %v16237_v48 = vpop.eup %16236 }
0x5c00   :  { %v10551_v30 = vmul.f32 %v16237_v48, %v16235_v25 }
0x5c02   :  { %15454 = vmatmul.mubr.msk.f32.vlgmr.msra.gmra.mrb[168].mxu1 %vm776_vm5, %v10551_v30 }
0x5c03   :  { %15463 = vmatpush3.xpose.msk.msra.mxu1 %vm698_vm4, %v10682_v31  ;;  %15464 = vmatprep.mubr.msk.f32.mxu1 %vm16617_vm3, %v16616_v23 }
0x5c04   :  { %15467 = vmatprep.subr.mxu1 %v16616_v23 }
0x5c06   :  { %15465 = vmatmul.mubr.msk.f32.vlgmr.msra.gmra.mrb[170].mxu1 %vm698_vm4, %v10680_v20 }
0x5c07   :  { %15469 = vmatprep.mubr.msk.f32.mxu1 %vm16617_vm3, %v16616_v23 }
0x5cd5   :  { %v10624_v33 = vpop.f32.mrb[168].mxu1 }
0x5cd6   :  { %v10628_v36 = vpack.c.bf16 %v10624_v33, %v10624_v33  ;;  %v15455_v34 = vpop.f32.mrb[169].mxu1  ;;  %v17984_v33 = vld [vmem:[#allocation8 + $0xb0] sm:$0xff]  }
0x5cd8   :  { %15459 = vmatmul.mubr.msk.bf16.vlgmr.msra.gmra.mrb[180].mxu0 %vm698_vm4, %v10628_v36 }
0x5cd9   :  { %v10753_v59 = vpop.f32.mrb[170].mxu1  ;;  %15474 = vmatprep.mubr.msk.bf16.mxu0 %vm16617_vm3, %v16616_v23  ;;  %15473 = vmatpush3.bf16.msra.mxu0 %v17960_v19 }
0x5cda   :  { %v10757_v57 = vmul.f32 0.25, %v10753_v59  ;;  %v15466_v39 = vpop.f32.mrb[171].mxu1  ;;  %15488 = vmatprep.subr.bf16.mxu0 %v16616_v23 }
0x5cdc   :  { %v10758_v43 = vsel %vm776_vm5, %v10757_v57, -inf }
0x5cdd   :  { %10759 = vmax.xlane.f32.xlu1 %v10758_v43 }
0x5cee   :  { %10898 = vrot.lane.b32.xlu1 %v17809_v38, %s16621_s22 }
0x5cf2   :  { %10896 = vrot.lane.b32.xlu1 %v17805_v14, %s16621_s22 }
0x5d6a   :  { %v10760_v44 = vpop.xlane.xlu1 %10759 }
0x5d6b   :  { %v10761_v40 = vsub.f32 %v10757_v57, %v10760_v44 }
0x5d6d   :  { %v10762_v55 = vmul.f32 1.442695, %v10761_v40 }
0x5d6e   :  { %v10899_v58 = vpop.permute.xlu1 %10898 }
0x5d6f   :  { %16238 = vpow2.f32 %v10762_v55 }
0x5d72   :  { %v10897_v15 = vpop.permute.xlu1 %10896 }
0x5d79   :  { %v16239_v45 = vpop.eup %16238 }
0x5d7a   :  { %v10764_v42 = vsel %vm776_vm5, %v16239_v45, 0.0 }
0x5d7b   :  { %10765 = vadd.xlane.f32.xlu0 %v10764_v42 }
0x5d91   :  { %10769 = vrot.lane.b32.xlu0 %v17807_v6, %s16607_s24 }
0x5dab   :  { %v10672_v16 = vpop.f32.mrb[180].mxu0 }
0x5dac   :  { %v10678_v3 = vadd.f32 %v10672_v16, %v10461_v26  ;;  %v15460_v56 = vpop.f32.mrb[181].mxu0 }
0x5dad   :  { %v10675_v21 = vpop.f32.mrb[182].mxu0 }
0x5dae   :  { %v15461_v2 = vpop.f32.mrb[183].mxu0 }
0x5e08   :  { %v10766_v60 = vpop.xlane.xlu0 %10765 }
0x5e09   :  { %16240 = vrcp.f32 %v10766_v60 }
0x5e0c   :  { %v10770_v62 = vpop.permute.xlu0 %10769 }
0x5e0d   :  { %15468 = vmatpush3.msra.mxu1 %v10770_v62 }
0x5e0e   :  { %15478 = vmatprep.subr.mxu1 %v16616_v23 }
0x5e13   :  { %v16241_v27 = vpop.eup %16240 }
0x5e14   :  { %v10768_v5 = vmul.f32 %v16241_v27, %v16239_v45 }
0x5e16   :  { %15470 = vmatmul.mubr.msk.f32.vlgmr.msra.gmra.mrb[172].mxu1 %vm776_vm5, %v10768_v5 }
0x5e17   :  { %15479 = vmatpush3.xpose.msk.msra.mxu1 %vm698_vm4, %v10899_v58  ;;  %15480 = vmatprep.mubr.msk.f32.mxu1 %vm16617_vm3, %v16616_v23 }
0x5e18   :  { %15483 = vmatprep.subr.mxu1 %v16616_v23 }
0x5e1a   :  { %15481 = vmatmul.mubr.msk.f32.vlgmr.msra.gmra.mrb[174].mxu1 %vm698_vm4, %v10897_v15 }
0x5e1b   :  { %15485 = vmatprep.mubr.msk.f32.mxu1 %vm16617_vm3, %v16616_v23 }
0x5ee9   :  { %v10841_v11 = vpop.f32.mrb[172].mxu1 }
0x5eea   :  { %v10845_v9 = vpack.c.bf16 %v10841_v11, %v10841_v11  ;;  %v15471_v10 = vpop.f32.mrb[173].mxu1 }
0x5eec   :  { %15475 = vmatmul.mubr.msk.bf16.vlgmr.msra.gmra.mrb[184].mxu0 %vm698_vm4, %v10845_v9 }
0x5eed   :  { %v10970_v49 = vpop.f32.mrb[174].mxu1  ;;  %15490 = vmatprep.mubr.msk.bf16.mxu0 %vm16617_vm3, %v16616_v23  ;;  %15489 = vmatpush3.bf16.msra.mxu0 %v17984_v33 }
0x5eee   :  { %v10974_v17 = vmul.f32 0.25, %v10970_v49  ;;  %v15482_v18 = vpop.f32.mrb[175].mxu1  ;;  %15504 = vmatprep.subr.bf16.mxu0 %v16616_v23 }
0x5ef0   :  { %v10975_v61 = vsel %vm776_vm5, %v10974_v17, -inf }
0x5ef1   :  { %10976 = vmax.xlane.f32.xlu0 %v10975_v61 }
0x5f07   :  { %10986 = vrot.lane.b32.xlu0 %v17807_v6, %s16621_s22 }
0x5f0b   :  { %11113 = vrot.lane.b32.xlu0 %v17805_v14, %s16600_s0 }
0x5f7e   :  { %v10977_v22 = vpop.xlane.xlu0 %10976 }
0x5f7f   :  { %v10978_v41 = vsub.f32 %v10974_v17, %v10977_v22 }
0x5f81   :  { %v10979_v25 = vmul.f32 1.442695, %v10978_v41 }
0x5f82   :  { %v10987_v37 = vpop.permute.xlu0 %10986 }
0x5f83   :  { %16242 = vpow2.f32 %v10979_v25  ;;  %15484 = vmatpush3.msra.mxu1 %v10987_v37 }
0x5f84   :  { %15494 = vmatprep.subr.mxu1 %v16616_v23 }
0x5f8d   :  { %v16243_v7 = vpop.eup %16242 }
0x5f8e   :  { %v10981_v26 = vsel %vm776_vm5, %v16243_v7, 0.0 }
0x5f8f   :  { %10982 = vadd.xlane.f32.xlu1 %v10981_v26 }
0x5fa0   :  { %11115 = vrot.lane.b32.xlu1 %v17809_v38, %s16600_s0  ;;  %v11114_v38 = vpop.permute.xlu0 %11113 }
0x5fbf   :  { %v10889_v47 = vpop.f32.mrb[184].mxu0 }
0x5fc0   :  { %v10895_v54 = vadd.f32 %v10889_v47, %v10678_v3  ;;  %v15476_v28 = vpop.f32.mrb[185].mxu0  ;;  %v17999_v3 = vld [vmem:[#allocation8 + $0xb8] sm:$0xff]  }
0x5fc1   :  { %v10892_v29 = vpop.f32.mrb[186].mxu0 }
0x5fc2   :  { %v15477_v14 = vpop.f32.mrb[187].mxu0 }
0x601c   :  { %v10983_v48 = vpop.xlane.xlu1 %10982 }
0x601d   :  { %16244 = vrcp.f32 %v10983_v48 }
0x6020   :  { %v11116_v20 = vpop.permute.xlu1 %11115 }
0x6027   :  { %v16245_v30 = vpop.eup %16244 }
0x6028   :  { %v10985_v31 = vmul.f32 %v16245_v30, %v16243_v7 }
0x602a   :  { %15486 = vmatmul.mubr.msk.f32.vlgmr.msra.gmra.mrb[176].mxu1 %vm776_vm5, %v10985_v31 }
0x602b   :  { %15495 = vmatpush3.xpose.msk.msra.mxu1 %vm698_vm4, %v11116_v20  ;;  %15496 = vmatprep.mubr.msk.f32.mxu1 %vm16617_vm3, %v16616_v23 }
0x602c   :  { %15499 = vmatprep.subr.mxu1 %v16616_v23 }
0x602e   :  { %15497 = vmatmul.mubr.msk.f32.vlgmr.msra.gmra.mrb[178].mxu1 %vm698_vm4, %v11114_v38 }
0x602f   :  { %15501 = vmatprep.mubr.msk.f32.mxu1 %vm16617_vm3, %v16616_v23 }
0x60fd   :  { %v11058_v36 = vpop.f32.mrb[176].mxu1 }
0x60fe   :  { %v11062_v34 = vpack.c.bf16 %v11058_v36, %v11058_v36  ;;  %v15487_v59 = vpop.f32.mrb[177].mxu1 }
0x6100   :  { %15491 = vmatmul.mubr.msk.bf16.vlgmr.msra.gmra.mrb[188].mxu0 %vm698_vm4, %v11062_v34 }
0x6101   :  { %v11187_v57 = vpop.f32.mrb[178].mxu1  ;;  %15506 = vmatprep.mubr.msk.bf16.mxu0 %vm16617_vm3, %v16616_v23  ;;  %15505 = vmatpush3.bf16.msra.mxu0 %v17999_v3 }
0x6102   :  { %v11191_v39 = vmul.f32 0.25, %v11187_v57  ;;  %v15498_v43 = vpop.f32.mrb[179].mxu1  ;;  %15520 = vmatprep.subr.mxu0 %v16616_v23 }
0x6104   :  { %v11192_v44 = vsel %vm776_vm5, %v11191_v39, -inf }
0x6105   :  { %11193 = vmax.xlane.f32.xlu1 %v11192_v44 }
0x6116   :  { %11494 = vrot.lane.b32.xlu1 %v17818_v51, %s16618_s4 }
0x611a   :  { %11492 = vrot.lane.b32.xlu1 %v17811_v24, %s16618_s4 }
0x6192   :  { %v11194_v40 = vpop.xlane.xlu1 %11193 }
0x6193   :  { %v11195_v55 = vsub.f32 %v11191_v39, %v11194_v40 }
0x6195   :  { %v11196_v45 = vmul.f32 1.442695, %v11195_v55 }
0x6196   :  { %v11495_v10 = vpop.permute.xlu1 %11494 }
0x6197   :  { %16246 = vpow2.f32 %v11196_v45 }
0x619a   :  { %v11493_v22 = vpop.permute.xlu1 %11492 }
0x61a1   :  { %v16247_v42 = vpop.eup %16246 }
0x61a2   :  { %v11198_v16 = vsel %vm776_vm5, %v16247_v42, 0.0 }
0x61a3   :  { %11199 = vadd.xlane.f32.xlu0 %v11198_v16 }
0x61b9   :  { %11203 = vrot.lane.b32.xlu0 %v17807_v6, %s16600_s0 }
0x61d3   :  { %v11106_v56 = vpop.f32.mrb[188].mxu0 }
0x61d4   :  { %v11112_v21 = vadd.f32 %v11106_v56, %v10895_v54  ;;  %v15492_v2 = vpop.f32.mrb[189].mxu0 }
0x61d5   :  { %v11109_v60 = vpop.f32.mrb[190].mxu0 }
0x61d6   :  { %v15493_v62 = vpop.f32.mrb[191].mxu0 }
0x6230   :  { %v11200_v27 = vpop.xlane.xlu0 %11199 }
0x6231   :  { %16248 = vrcp.f32 %v11200_v27 }
0x6234   :  { %v11204_v58 = vpop.permute.xlu0 %11203 }
0x6235   :  { %15500 = vmatpush3.msra.mxu1 %v11204_v58 }
0x6236   :  { %15510 = vmatprep.subr.mxu1 %v16616_v23 }
0x623b   :  { %v16249_v5 = vpop.eup %16248 }
0x623c   :  { %v11202_v15 = vmul.f32 %v16249_v5, %v16247_v42 }
0x623e   :  { %15502 = vmatmul.mubr.msk.f32.vlgmr.msra.gmra.mrb[180].mxu1 %vm776_vm5, %v11202_v15 }
0x623f   :  { %15511 = vmatpush3.xpose.msk.msra.mxu1 %vm698_vm4, %v17818_v51  ;;  %15512 = vmatprep.mubr.msk.f32.mxu1 %vm16617_vm3, %v16616_v23 }
0x6240   :  { %15515 = vmatprep.subr.mxu1 %v16616_v23 }
0x6242   :  { %15513 = vmatmul.mubr.msk.f32.vlgmr.msra.gmra.mrb[182].mxu1 %vm698_vm4, %v17811_v24 }
0x6243   :  { %15516 = vmatpush3.msra.mxu1 %v17813_v8  ;;  %15517 = vmatprep.mubr.msk.f32.mxu1 %vm16617_vm3, %v16616_v23 }
0x6244   :  { %15525 = vmatprep.subr.mxu1 %v16616_v23 }
0x6311   :  { %v11275_v6 = vpop.f32.mrb[180].mxu1 }
0x6312   :  { %v11279_v11 = vpack.c.bf16 %v11275_v6, %v11275_v6  ;;  %v15503_v9 = vpop.f32.mrb[181].mxu1 }
0x6314   :  { %15507 = vmatmul.mubr.msk.bf16.vlgmr.msra.gmra.mrb[192].mxu0 %vm698_vm4, %v11279_v11 }
0x6315   :  { %15521 = vmatpush3.xpose.msk.msra.mxu0 %vm698_vm4, %v11495_v10  ;;  %v11402_v49 = vpop.f32.mrb[182].mxu1  ;;  %15522 = vmatprep.mubr.msk.f32.mxu0 %vm16617_vm3, %v16616_v23 }
0x6316   :  { %v11406_v17 = vmul.f32 0.25, %v11402_v49  ;;  %v15514_v18 = vpop.f32.mrb[183].mxu1  ;;  %15530 = vmatprep.subr.bf16.mxu0 %v16616_v23 }
0x6318   :  { %v11407_v61 = vsel %vm776_vm5, %v11406_v17, -inf }
0x6319   :  { %11408 = vmax.xlane.f32.xlu0 %v11407_v61 }
0x631c   :  { %15523 = vmatmul.mubr.msk.f32.vlgmr.msra.gmra.mrb[196].mxu0 %vm698_vm4, %v11493_v22 }
0x631d   :  { %15531 = vmatpush3.bf16.msra.mxu0 %v17849_v46  ;;  %15532 = vmatprep.mubr.msk.bf16.mxu0 %vm16617_vm3, %v16616_v23 }
0x631e   :  { %15542 = vmatprep.subr.mxu0 %v16616_v23 }
0x63a6   :  { %v11409_v41 = vpop.xlane.xlu0 %11408 }
0x63a7   :  { %v11410_v25 = vsub.f32 %v11406_v17, %v11409_v41 }
0x63a9   :  { %v11411_v37 = vmul.f32 1.442695, %v11410_v25 }
0x63ab   :  { %16250 = vpow2.f32 %v11411_v37 }
0x63b5   :  { %v16251_v7 = vpop.eup %16250 }
0x63b6   :  { %v11413_v26 = vsel %vm776_vm5, %v16251_v7, 0.0 }
0x63b7   :  { %11414 = vadd.xlane.f32.xlu0 %v11413_v26 }
0x63e7   :  { %v11323_v47 = vpop.f32.mrb[192].mxu0 }
0x63e8   :  { %v18028_v54 = vadd.f32 %v11323_v47, %v11112_v21  ;;  %v15508_v28 = vpop.f32.mrb[193].mxu0 }
0x63e9   :  { %v11326_v29 = vpop.f32.mrb[194].mxu0 }
0x63ea   :  { %v15509_v14 = vpop.f32.mrb[195].mxu0 }
0x63ef   :  { %v11566_v46 = vpop.f32.mrb[196].mxu0 }
0x63f0   :  { %v11570_v48 = vmul.f32 0.25, %v11566_v46  ;;  %v15524_v30 = vpop.f32.mrb[197].mxu0 }
0x63f2   :  { %v11571_v31 = vsel %vm776_vm5, %v11570_v48, -inf }
0x63f3   :  { %11572 = vmax.xlane.f32.xlu1 %v11571_v31 }
0x6404   :  { %11583 = vrot.lane.b32.xlu1 %v17813_v8, %s16618_s4  ;;  %s16622_s4 = smov [#allocation22]  }
0x6408   :  { %11746 = vrot.lane.b32.xlu1 %v17811_v24, %s16619_s11 }
0x6444   :  { %v11415_v20 = vpop.xlane.xlu0 %11414 }
0x6445   :  { %16252 = vrcp.f32 %v11415_v20 }
0x644f   :  { %v16253_v38 = vpop.eup %16252 }
0x6450   :  { %v11417_v36 = vmul.f32 %v16253_v38, %v16251_v7 }
0x6452   :  { %15518 = vmatmul.mubr.msk.f32.vlgmr.msra.gmra.mrb[184].mxu1 %vm776_vm5, %v11417_v36 }
0x6453   :  { %15527 = vmatprep.mubr.msk.f32.mxu1 %vm16617_vm3, %v16616_v23 }
0x6480   :  { %v11573_v34 = vpop.xlane.xlu1 %11572 }
0x6481   :  { %v11574_v59 = vsub.f32 %v11570_v48, %v11573_v34 }
0x6483   :  { %v11575_v57 = vmul.f32 1.442695, %v11574_v59 }
0x6484   :  { %v11584_v39 = vpop.permute.xlu1 %11583 }
0x6485   :  { %16254 = vpow2.f32 %v11575_v57  ;;  %15526 = vmatpush3.msra.mxu1 %v11584_v39 }
0x6486   :  { %15536 = vmatprep.subr.bf16.mxu1 %v16616_v23 }
0x6488   :  { %v11747_v15 = vpop.permute.xlu1 %11746 }
0x648f   :  { %v16255_v43 = vpop.eup %16254 }
0x6490   :  { %v11577_v44 = vsel %vm776_vm5, %v16255_v43, 0.0 }
0x6491   :  { %11578 = vadd.xlane.f32.xlu0 %v11577_v44 }
0x64a7   :  { %11748 = vrot.lane.b32.xlu0 %v17818_v51, %s16619_s11 }
0x651e   :  { %v11579_v40 = vpop.xlane.xlu0 %11578 }
0x651f   :  { %16256 = vrcp.f32 %v11579_v40 }
0x6522   :  { %v11749_v62 = vpop.permute.xlu0 %11748 }
0x6525   :  { %v11487_v55 = vpop.f32.mrb[184].mxu1 }
0x6526   :  { %v15519_v45 = vpop.f32.mrb[185].mxu1  ;;  %v11491_v56 = vpack.c.bf16 %v11487_v55, %v11487_v55 }
0x6529   :  { %v16257_v42 = vpop.eup %16256 }
0x652a   :  { %v11581_v16 = vmul.f32 %v16257_v42, %v16255_v43 }
0x652c   :  { %15528 = vmatmul.mubr.msk.f32.vlgmr.msra.gmra.mrb[186].mxu1 %vm776_vm5, %v11581_v16 }
0x652d   :  { %15537 = vmatpush3.bf16.msra.mxu1 %v17853_v12  ;;  %15538 = vmatprep.mubr.msk.bf16.mxu1 %vm16617_vm3, %v16616_v23 }
0x652e   :  { %15547 = vmatprep.subr.mxu1 %v16616_v23 }
0x6530   :  { %15539 = vmatmul.mubr.msk.bf16.vlgmr.msra.gmra.mrb[188].mxu1 %vm698_vm4, %v11491_v56 }
0x6531   :  { %15549 = vmatprep.mubr.msk.f32.mxu1 %vm16617_vm3, %v16616_v23 }
0x65ff   :  { %v11655_v21 = vpop.f32.mrb[186].mxu1 }
0x6600   :  { %v11659_v2 = vpack.c.bf16 %v11655_v21, %v11655_v21  ;;  %v15529_v60 = vpop.f32.mrb[187].mxu1 }
0x6602   :  { %15533 = vmatmul.mubr.msk.bf16.vlgmr.msra.gmra.mrb[200].mxu0 %vm698_vm4, %v11659_v2 }
0x6603   :  { %15543 = vmatpush3.xpose.msk.msra.mxu0 %vm698_vm4, %v11749_v62  ;;  %v11740_v12 = vpop.f32.mrb[188].mxu1  ;;  %15544 = vmatprep.mubr.msk.f32.mxu0 %vm16617_vm3, %v16616_v23 }
0x6604   :  { %v15540_v27 = vpop.f32.mrb[189].mxu1  ;;  %15552 = vmatprep.subr.bf16.mxu0 %v16616_v23 }
0x6605   :  { %v11743_v58 = vpop.f32.mrb[190].mxu1 }
0x6606   :  { %v15541_v5 = vpop.f32.mrb[191].mxu1 }
0x660a   :  { %15545 = vmatmul.mubr.msk.f32.vlgmr.msra.gmra.mrb[198].mxu0 %vm698_vm4, %v11747_v15 }
0x660b   :  { %15553 = vmatpush3.bf16.msra.mxu0 %v17888_v32  ;;  %15554 = vmatprep.mubr.msk.bf16.mxu0 %vm16617_vm3, %v16616_v23 }
0x660c   :  { %15568 = vmatprep.subr.bf16.mxu0 %v16616_v23 }
0x66d5   :  { %v11697_v6 = vpop.f32.mrb[200].mxu0 }
0x66d6   :  { %v11741_v11 = vadd.f32 %v11740_v12, %v11697_v6  ;;  %v15534_v9 = vpop.f32.mrb[201].mxu0 }
0x66d7   :  { %v11700_v10 = vpop.f32.mrb[202].mxu0 }
0x66d8   :  { %v15535_v49 = vpop.f32.mrb[203].mxu0 }
0x66dd   :  { %v11820_v17 = vpop.f32.mrb[198].mxu0 }
0x66de   :  { %v11824_v18 = vmul.f32 0.25, %v11820_v17  ;;  %v15546_v61 = vpop.f32.mrb[199].mxu0 }
0x66e0   :  { %v11825_v22 = vsel %vm776_vm5, %v11824_v18, -inf }
0x66e1   :  { %11826 = vmax.xlane.f32.xlu1 %v11825_v22 }
0x66f2   :  { %11959 = vrot.lane.b32.xlu1 %v17818_v51, %s16620_s10 }
0x66f6   :  { %11957 = vrot.lane.b32.xlu1 %v17811_v24, %s16620_s10 }
0x676e   :  { %v11827_v32 = vpop.xlane.xlu1 %11826 }
0x676f   :  { %v11828_v41 = vsub.f32 %v11824_v18, %v11827_v32 }
0x6771   :  { %v11829_v25 = vmul.f32 1.442695, %v11828_v41 }
0x6772   :  { %v11960_v29 = vpop.permute.xlu1 %11959 }
0x6773   :  { %16258 = vpow2.f32 %v11829_v25 }
0x6776   :  { %v11958_v46 = vpop.permute.xlu1 %11957 }
0x677d   :  { %v16259_v37 = vpop.eup %16258 }
0x677e   :  { %v11831_v7 = vsel %vm776_vm5, %v16259_v37, 0.0 }
0x677f   :  { %11832 = vadd.xlane.f32.xlu0 %v11831_v7 }
0x6795   :  { %11836 = vrot.lane.b32.xlu0 %v17813_v8, %s16619_s11  ;;  %s13794_s11 = sshll.u32 %s16622_s4, 4  ;;  %s13795_s11 = int_to_ptr.vmem [resolvable:$true] %s13794_s11 }
0x6796   :  { %p16559_p13 = scmp.lt.s32.totalorder %s13795_s11, %s13795_s11 }
0x680c   :  { %v11833_v26 = vpop.xlane.xlu0 %11832 }
0x680d   :  { %16260 = vrcp.f32 %v11833_v26 }
0x6810   :  { %v11837_v47 = vpop.permute.xlu0 %11836 }
0x6811   :  { %15548 = vmatpush3.msra.mxu1 %v11837_v47 }
0x6812   :  { %15558 = vmatprep.subr.mxu1 %v16616_v23 }
0x6817   :  { %v16261_v28 = vpop.eup %16260 }
0x6818   :  { %v11835_v14 = vmul.f32 %v16261_v28, %v16259_v37 }
0x681a   :  { %15550 = vmatmul.mubr.msk.f32.vlgmr.msra.gmra.mrb[192].mxu1 %vm776_vm5, %v11835_v14 }
0x681b   :  { %15559 = vmatpush3.xpose.msk.msra.mxu1 %vm698_vm4, %v11960_v29  ;;  %15560 = vmatprep.mubr.msk.f32.mxu1 %vm16617_vm3, %v16616_v23 }
0x681c   :  { %15563 = vmatprep.subr.mxu1 %v16616_v23 }
0x681e   :  { %15561 = vmatmul.mubr.msk.f32.vlgmr.msra.gmra.mrb[194].mxu1 %vm698_vm4, %v11958_v46 }
0x681f   :  { %15565 = vmatprep.mubr.msk.f32.mxu1 %vm16617_vm3, %v16616_v23 }
0x68ed   :  { %v11908_v48 = vpop.f32.mrb[192].mxu1 }
0x68ee   :  { %v11912_v30 = vpack.c.bf16 %v11908_v48, %v11908_v48  ;;  %v15551_v31 = vpop.f32.mrb[193].mxu1 }
0x68f0   :  { %15555 = vmatmul.mubr.msk.bf16.vlgmr.msra.gmra.mrb[204].mxu0 %vm698_vm4, %v11912_v30 }
0x68f1   :  { %v12031_v20 = vpop.f32.mrb[194].mxu1  ;;  %15569 = vmatpush3.bf16.msra.mxu0 %v17912_v4  ;;  %15570 = vmatprep.mubr.msk.bf16.mxu0 %vm16617_vm3, %v16616_v23 }
0x68f2   :  { %v12035_v38 = vmul.f32 0.25, %v12031_v20  ;;  %v15562_v36 = vpop.f32.mrb[195].mxu1  ;;  %15584 = vmatprep.subr.bf16.mxu0 %v16616_v23 }
0x68f4   :  { %v12036_v34 = vsel %vm776_vm5, %v12035_v38, -inf }
0x68f5   :  { %12037 = vmax.xlane.f32.xlu0 %v12036_v34 }
0x690b   :  { %12047 = vrot.lane.b32.xlu0 %v17813_v8, %s16620_s10  ;;  %s16554_s10 = scalar_lea.vmem %s13795_s11, 256 }
0x690c   :  { %p16555_p12 = scmp.ne.s32.totalorder %s13795_s11, %s16554_s10  ;;  %p16560_p0 = scmp.lt.s32.totalorder %s16554_s10, %s16554_s10 }
0x690e   :  { %p16561_p1 = por %p16560_p0, %p16559_p13 }
0x690f   :  { %12168 = vrot.lane.b32.xlu0 %v17811_v24, %s16596_s2 }
0x6910   :  { %p16562_p2 = pnand %p16561_p1, %p16555_p12 }
0x6982   :  { %v12038_v59 = vpop.xlane.xlu0 %12037 }
0x6983   :  { %v12039_v57 = vsub.f32 %v12035_v38, %v12038_v59 }
0x6985   :  { %v12040_v39 = vmul.f32 1.442695, %v12039_v57 }
0x6986   :  { %v12048_v4 = vpop.permute.xlu0 %12047 }
0x6987   :  { %16262 = vpow2.f32 %v12040_v39  ;;  %15564 = vmatpush3.msra.mxu1 %v12048_v4 }
0x6988   :  { %15574 = vmatprep.subr.mxu1 %v16616_v23 }
0x698a   :  { %v12169_v62 = vpop.permute.xlu0 %12168 }
0x6991   :  { %v16263_v43 = vpop.eup %16262 }
0x6992   :  { %v12042_v44 = vsel %vm776_vm5, %v16263_v43, 0.0 }
0x6993   :  { %12043 = vadd.xlane.f32.xlu1 %v12042_v44 }
0x69a4   :  { %12170 = vrot.lane.b32.xlu1 %v17818_v51, %s16596_s2 }
0x69c3   :  { %v11950_v40 = vpop.f32.mrb[204].mxu0 }
0x69c4   :  { %v11956_v55 = vadd.f32 %v11950_v40, %v11741_v11  ;;  %v15556_v45 = vpop.f32.mrb[205].mxu0 }
0x69c5   :  { %v11953_v42 = vpop.f32.mrb[206].mxu0 }
0x69c6   :  { %v15557_v16 = vpop.f32.mrb[207].mxu0 }
0x6a20   :  { %v12044_v56 = vpop.xlane.xlu1 %12043 }
0x6a21   :  { %16264 = vrcp.f32 %v12044_v56 }
0x6a24   :  { %v12171_v60 = vpop.permute.xlu1 %12170 }
0x6a2b   :  { %v16265_v21 = vpop.eup %16264 }
0x6a2c   :  { %v12046_v2 = vmul.f32 %v16265_v21, %v16263_v43 }
0x6a2e   :  { %15566 = vmatmul.mubr.msk.f32.vlgmr.msra.gmra.mrb[196].mxu1 %vm776_vm5, %v12046_v2 }
0x6a2f   :  { %15575 = vmatpush3.xpose.msk.msra.mxu1 %vm698_vm4, %v12171_v60  ;;  %15576 = vmatprep.mubr.msk.f32.mxu1 %vm16617_vm3, %v16616_v23 }
0x6a30   :  { %15579 = vmatprep.subr.mxu1 %v16616_v23 }
0x6a32   :  { %15577 = vmatmul.mubr.msk.f32.vlgmr.msra.gmra.mrb[198].mxu1 %vm698_vm4, %v12169_v62 }
0x6a33   :  { %15581 = vmatprep.mubr.msk.f32.mxu1 %vm16617_vm3, %v16616_v23 }
0x6b01   :  { %v12119_v12 = vpop.f32.mrb[196].mxu1 }
0x6b02   :  { %v12123_v27 = vpack.c.bf16 %v12119_v12, %v12119_v12  ;;  %v15567_v58 = vpop.f32.mrb[197].mxu1 }
0x6b04   :  { %15571 = vmatmul.mubr.msk.bf16.vlgmr.msra.gmra.mrb[208].mxu0 %vm698_vm4, %v12123_v27 }
0x6b05   :  { %v12242_v5 = vpop.f32.mrb[198].mxu1  ;;  %15585 = vmatpush3.bf16.msra.mxu0 %v17936_v35  ;;  %15586 = vmatprep.mubr.msk.bf16.mxu0 %vm16617_vm3, %v16616_v23 }
0x6b06   :  { %v12246_v15 = vmul.f32 0.25, %v12242_v5  ;;  %v15578_v6 = vpop.f32.mrb[199].mxu1  ;;  %15600 = vmatprep.subr.bf16.mxu0 %v16616_v23 }
0x6b08   :  { %v12247_v11 = vsel %vm776_vm5, %v12246_v15, -inf }
0x6b09   :  { %12248 = vmax.xlane.f32.xlu1 %v12247_v11 }
0x6b1a   :  { %12381 = vrot.lane.b32.xlu1 %v17818_v51, %s16607_s24 }
0x6b1e   :  { %12379 = vrot.lane.b32.xlu1 %v17811_v24, %s16607_s24 }
0x6b96   :  { %v12249_v9 = vpop.xlane.xlu1 %12248 }
0x6b97   :  { %v12250_v10 = vsub.f32 %v12246_v15, %v12249_v9 }
0x6b99   :  { %v12251_v49 = vmul.f32 1.442695, %v12250_v10 }
0x6b9a   :  { %v12382_v26 = vpop.permute.xlu1 %12381 }
0x6b9b   :  { %16266 = vpow2.f32 %v12251_v49 }
0x6b9e   :  { %v12380_v28 = vpop.permute.xlu1 %12379 }
0x6ba5   :  { %v16267_v35 = vpop.eup %16266 }
0x6ba6   :  { %v12253_v17 = vsel %vm776_vm5, %v16267_v35, 0.0 }
0x6ba7   :  { %12254 = vadd.xlane.f32.xlu0 %v12253_v17 }
0x6bbd   :  { %12258 = vrot.lane.b32.xlu0 %v17813_v8, %s16596_s2 }
0x6bd7   :  { %v12161_v18 = vpop.f32.mrb[208].mxu0 }
0x6bd8   :  { %v12167_v61 = vadd.f32 %v12161_v18, %v11956_v55  ;;  %v15572_v22 = vpop.f32.mrb[209].mxu0 }
0x6bd9   :  { %v12164_v32 = vpop.f32.mrb[210].mxu0 }
0x6bda   :  { %v15573_v41 = vpop.f32.mrb[211].mxu0 }
0x6c34   :  { %v12255_v25 = vpop.xlane.xlu0 %12254 }
0x6c35   :  { %16268 = vrcp.f32 %v12255_v25 }
0x6c38   :  { %v12259_v37 = vpop.permute.xlu0 %12258 }
0x6c39   :  { %15580 = vmatpush3.msra.mxu1 %v12259_v37 }
0x6c3a   :  { %15590 = vmatprep.subr.mxu1 %v16616_v23 }
0x6c3f   :  { %v16269_v7 = vpop.eup %16268 }
0x6c40   :  { %v12257_v47 = vmul.f32 %v16269_v7, %v16267_v35 }
0x6c42   :  { %15582 = vmatmul.mubr.msk.f32.vlgmr.msra.gmra.mrb[200].mxu1 %vm776_vm5, %v12257_v47 }
0x6c43   :  { %15591 = vmatpush3.xpose.msk.msra.mxu1 %vm698_vm4, %v12382_v26  ;;  %15592 = vmatprep.mubr.msk.f32.mxu1 %vm16617_vm3, %v16616_v23 }
0x6c44   :  { %15595 = vmatprep.subr.mxu1 %v16616_v23 }
0x6c46   :  { %15593 = vmatmul.mubr.msk.f32.vlgmr.msra.gmra.mrb[202].mxu1 %vm698_vm4, %v12380_v28 }
0x6c47   :  { %15597 = vmatprep.mubr.msk.f32.mxu1 %vm16617_vm3, %v16616_v23 }
0x6d15   :  { %v12330_v29 = vpop.f32.mrb[200].mxu1 }
0x6d16   :  { %v12334_v14 = vpack.c.bf16 %v12330_v29, %v12330_v29  ;;  %v15583_v46 = vpop.f32.mrb[201].mxu1 }
0x6d18   :  { %15587 = vmatmul.mubr.msk.bf16.vlgmr.msra.gmra.mrb[212].mxu0 %vm698_vm4, %v12334_v14 }
0x6d19   :  { %v12453_v48 = vpop.f32.mrb[202].mxu1  ;;  %15601 = vmatpush3.bf16.msra.mxu0 %v17960_v19  ;;  %15602 = vmatprep.mubr.msk.bf16.mxu0 %vm16617_vm3, %v16616_v23 }
0x6d1a   :  { %v12457_v30 = vmul.f32 0.25, %v12453_v48  ;;  %v15594_v31 = vpop.f32.mrb[203].mxu1  ;;  %15616 = vmatprep.subr.bf16.mxu0 %v16616_v23 }
0x6d1c   :  { %v12458_v20 = vsel %vm776_vm5, %v12457_v30, -inf }
0x6d1d   :  { %12459 = vmax.xlane.f32.xlu0 %v12458_v20 }
0x6d33   :  { %12469 = vrot.lane.b32.xlu0 %v17813_v8, %s16607_s24 }
0x6d37   :  { %12590 = vrot.lane.b32.xlu0 %v17811_v24, %s16621_s22 }
0x6daa   :  { %v12460_v38 = vpop.xlane.xlu0 %12459 }
0x6dab   :  { %v12461_v36 = vsub.f32 %v12457_v30, %v12460_v38 }
0x6dad   :  { %v12462_v34 = vmul.f32 1.442695, %v12461_v36 }
0x6dae   :  { %v12470_v19 = vpop.permute.xlu0 %12469 }
0x6daf   :  { %16270 = vpow2.f32 %v12462_v34  ;;  %15596 = vmatpush3.msra.mxu1 %v12470_v19 }
0x6db0   :  { %15606 = vmatprep.subr.mxu1 %v16616_v23 }
0x6db2   :  { %v12591_v56 = vpop.permute.xlu0 %12590 }
0x6db9   :  { %v16271_v59 = vpop.eup %16270 }
0x6dba   :  { %v12464_v57 = vsel %vm776_vm5, %v16271_v59, 0.0 }
0x6dbb   :  { %12465 = vadd.xlane.f32.xlu1 %v12464_v57 }
0x6dcc   :  { %12592 = vrot.lane.b32.xlu1 %v17818_v51, %s16621_s22 }
0x6deb   :  { %v12372_v39 = vpop.f32.mrb[212].mxu0 }
0x6dec   :  { %v12378_v4 = vadd.f32 %v12372_v39, %v12167_v61  ;;  %v15588_v43 = vpop.f32.mrb[213].mxu0 }
0x6ded   :  { %v12375_v44 = vpop.f32.mrb[214].mxu0 }
0x6dee   :  { %v15589_v40 = vpop.f32.mrb[215].mxu0 }
0x6e48   :  { %v12466_v55 = vpop.xlane.xlu1 %12465 }
0x6e49   :  { %16272 = vrcp.f32 %v12466_v55 }
0x6e4c   :  { %v12593_v16 = vpop.permute.xlu1 %12592 }
0x6e53   :  { %v16273_v45 = vpop.eup %16272 }
0x6e54   :  { %v12468_v42 = vmul.f32 %v16273_v45, %v16271_v59 }
0x6e56   :  { %15598 = vmatmul.mubr.msk.f32.vlgmr.msra.gmra.mrb[204].mxu1 %vm776_vm5, %v12468_v42 }
0x6e57   :  { %15607 = vmatpush3.xpose.msk.msra.mxu1 %vm698_vm4, %v12593_v16  ;;  %15608 = vmatprep.mubr.msk.f32.mxu1 %vm16617_vm3, %v16616_v23 }
0x6e58   :  { %15611 = vmatprep.subr.mxu1 %v16616_v23 }
0x6e5a   :  { %15609 = vmatmul.mubr.msk.f32.vlgmr.msra.gmra.mrb[206].mxu1 %vm698_vm4, %v12591_v56 }
0x6e5b   :  { %15613 = vmatprep.mubr.msk.f32.mxu1 %vm16617_vm3, %v16616_v23 }
0x6f29   :  { %v12541_v21 = vpop.f32.mrb[204].mxu1 }
0x6f2a   :  { %v12545_v2 = vpack.c.bf16 %v12541_v21, %v12541_v21  ;;  %v15599_v60 = vpop.f32.mrb[205].mxu1 }
0x6f2c   :  { %15603 = vmatmul.mubr.msk.bf16.vlgmr.msra.gmra.mrb[216].mxu0 %vm698_vm4, %v12545_v2 }
0x6f2d   :  { %v12664_v62 = vpop.f32.mrb[206].mxu1  ;;  %15617 = vmatpush3.bf16.msra.mxu0 %v17984_v33  ;;  %15618 = vmatprep.mubr.msk.bf16.mxu0 %vm16617_vm3, %v16616_v23 }
0x6f2e   :  { %v12668_v12 = vmul.f32 0.25, %v12664_v62  ;;  %v15610_v27 = vpop.f32.mrb[207].mxu1  ;;  %15632 = vmatprep.subr.bf16.mxu0 %v16616_v23 }
0x6f2f   :  { %v15988_v27 = vld [vmem:[#allocation13 + $0x204] ss:$16 sps:$4 sm:$0xff]  }
0x6f30   :  { %v12669_v58 = vsel %vm776_vm5, %v12668_v12, -inf }
0x6f31   :  { %12670 = vmax.xlane.f32.xlu1 %v12669_v58  ;;  %v15991_v58 = vld [vmem:[#allocation13 + $0x20c] ss:$16 sps:$4 sm:$0xff]  }
0x6f42   :  { %12803 = vrot.lane.b32.xlu1 %v17818_v51, %s16600_s0 }
0x6f46   :  { %12801 = vrot.lane.b32.xlu1 %v17811_v24, %s16600_s0 }
0x6fbe   :  { %v12671_v5 = vpop.xlane.xlu1 %12670 }
0x6fbf   :  { %v12672_v15 = vsub.f32 %v12668_v12, %v12671_v5  ;;  %v15986_v12 = vld [vmem:[#allocation13 + $0x200] ss:$16 sps:$4 sm:$0xff]   ;;  %v15994_v5 = vld [vmem:[#allocation13 + $0x224] ss:$16 sps:$4 sm:$0xff]  }
0x6fc1   :  { %v12673_v6 = vmul.f32 1.442695, %v12672_v15  ;;  %v15997_v15 = vld [vmem:[#allocation13 + $0x22c] ss:$16 sps:$4 sm:$0xff]  }
0x6fc2   :  { %v12804_v61 = vpop.permute.xlu1 %12803 }
0x6fc3   :  { %16274 = vpow2.f32 %v12673_v6  ;;  %v15992_v6 = vld [vmem:[#allocation13 + $0x220] ss:$16 sps:$4 sm:$0xff]  }
0x6fc6   :  { %v12802_v32 = vpop.permute.xlu1 %12801 }
0x6fcd   :  { %v16275_v33 = vpop.eup %16274 }
0x6fce   :  { %v12675_v11 = vsel %vm776_vm5, %v16275_v33, 0.0 }
0x6fcf   :  { %12676 = vadd.xlane.f32.xlu0 %v12675_v11  ;;  %v16000_v11 = vld [vmem:[#allocation13 + $0x244] ss:$16 sps:$4 sm:$0xff]  }
0x6fe5   :  { %12680 = vrot.lane.b32.xlu0 %v17813_v8, %s16621_s22 }
0x6fff   :  { %v12583_v9 = vpop.f32.mrb[216].mxu0 }
0x7000   :  { %v12589_v10 = vadd.f32 %v12583_v9, %v12378_v4  ;;  %v15604_v49 = vpop.f32.mrb[217].mxu0  ;;  %v15998_v9 = vld [vmem:[#allocation13 + $0x240] ss:$16 sps:$4 sm:$0xff]  }
0x7001   :  { %v12586_v35 = vpop.f32.mrb[218].mxu0 }
0x7002   :  { %v15605_v17 = vpop.f32.mrb[219].mxu0 }
0x705c   :  { %v12677_v51 = vpop.xlane.xlu0 %12676 }
0x705d   :  { %16276 = vrcp.f32 %v12677_v51 }
0x7060   :  { %v12681_v18 = vpop.permute.xlu0 %12680 }
0x7061   :  { %15612 = vmatpush3.msra.mxu1 %v12681_v18  ;;  %v16006_v18 = vld [vmem:[#allocation13 + $0x264] ss:$16 sps:$4 sm:$0xff]  }
0x7062   :  { %15622 = vmatprep.subr.mxu1 %v16616_v23 }
0x7067   :  { %v16277_v24 = vpop.eup %16276 }
0x7068   :  { %v12679_v22 = vmul.f32 %v16277_v24, %v16275_v33  ;;  %v15995_v33 = vld [vmem:[#allocation13 + $0x228] ss:$16 sps:$4 sm:$0xff]   ;;  %v16009_v24 = vld [vmem:[#allocation13 + $0x26c] ss:$16 sps:$4 sm:$0xff]  }
0x706a   :  { %15614 = vmatmul.mubr.msk.f32.vlgmr.msra.gmra.mrb[208].mxu1 %vm776_vm5, %v12679_v22  ;;  %v16007_v22 = vld [vmem:[#allocation13 + $0x268] ss:$16 sps:$4 sm:$0xff]  }
0x706b   :  { %15623 = vmatpush3.xpose.msk.msra.mxu1 %vm698_vm4, %v12804_v61  ;;  %15624 = vmatprep.mubr.msk.f32.mxu1 %vm16617_vm3, %v16616_v23  ;;  %v16004_v61 = vld [vmem:[#allocation13 + $0x260] ss:$16 sps:$4 sm:$0xff]  }
0x706c   :  { %15627 = vmatprep.subr.mxu1 %v16616_v23 }
0x706e   :  { %15625 = vmatmul.mubr.msk.f32.vlgmr.msra.gmra.mrb[210].mxu1 %vm698_vm4, %v12802_v32  ;;  %v16012_v32 = vld [vmem:[#allocation13 + $0x284] ss:$16 sps:$4 sm:$0xff]  }
0x706f   :  { %15629 = vmatprep.mubr.msk.f32.mxu1 %vm16617_vm3, %v16616_v23 }
0x713d   :  { %v12752_v41 = vpop.f32.mrb[208].mxu1 }
0x713e   :  { %v12756_v25 = vpack.c.bf16 %v12752_v41, %v12752_v41  ;;  %v15615_v37 = vpop.f32.mrb[209].mxu1  ;;  %v16015_v41 = vld [vmem:[#allocation13 + $0x28c] ss:$16 sps:$4 sm:$0xff]  }
0x713f   :  { %v16013_v37 = vld [vmem:[#allocation13 + $0x288] ss:$16 sps:$4 sm:$0xff]  }
0x7140   :  { %15619 = vmatmul.mubr.msk.bf16.vlgmr.msra.gmra.mrb[220].mxu0 %vm698_vm4, %v12756_v25  ;;  %v16010_v25 = vld [vmem:[#allocation13 + $0x280] ss:$16 sps:$4 sm:$0xff]  }
0x7141   :  { %v12875_v7 = vpop.f32.mrb[210].mxu1  ;;  %15633 = vmatpush3.bf16.msra.mxu0 %v17999_v3  ;;  %15634 = vmatprep.mubr.msk.bf16.mxu0 %vm16617_vm3, %v16616_v23  ;;  %v14246_v3 = vld [vmem:[%s18257_s5 + $0x2] ss:$0 sm:$0xff] }
0x7142   :  { %v12879_v26 = vmul.f32 0.25, %v12875_v7  ;;  %v15626_v47 = vpop.f32.mrb[211].mxu1  ;;  %v13020_v31 = vadd.f32 %v14246_v3, %v18028_v54  ;;  %13293 = vmatprep.subr.bf16.mxu0 %v15991_v58  ;;  %v16018_v7 = vld [vmem:[#allocation13 + $0x2a4] ss:$16 sps:$4 sm:$0xff]   ;;  %v16043_v58 = vld [vmem:[#allocation16 + $0x2d0] sm:$0xff]  }
0x7143   :  { %v16016_v47 = vld [vmem:[#allocation13 + $0x2a0] ss:$16 sps:$4 sm:$0xff]  }
0x7144   :  { %v12880_v28 = vsel %vm776_vm5, %v12879_v26, -inf  ;;  %v13022_v38 = vadd.f32 %v13020_v31, %v17792_v63  ;;  %v16028_v31 = vld [vmem:[#allocation13 + $0x2e0] ss:$16 sps:$4 sm:$0xff]  }
0x7145   :  { %12881 = vmax.xlane.f32.xlu0 %v12880_v28  ;;  %v16019_v28 = vld [vmem:[#allocation13 + $0x2a8] ss:$16 sps:$4 sm:$0xff]  }
0x715b   :  { %12891 = vrot.lane.b32.xlu0 %v17813_v8, %s16600_s0 }
0x71d2   :  { %v12882_v29 = vpop.xlane.xlu0 %12881 }
0x71d3   :  { %v12883_v14 = vsub.f32 %v12879_v26, %v12882_v29  ;;  %v16021_v26 = vld [vmem:[#allocation13 + $0x2ac] ss:$16 sps:$4 sm:$0xff]   ;;  %v16024_v29 = vld [vmem:[#allocation13 + $0x2c4] ss:$16 sps:$4 sm:$0xff]  }
0x71d5   :  { %v12884_v46 = vmul.f32 1.442695, %v12883_v14  ;;  %v16027_v14 = vld [vmem:[#allocation13 + $0x2cc] ss:$16 sps:$4 sm:$0xff]  }
0x71d6   :  { %v12892_v48 = vpop.permute.xlu0 %12891 }
0x71d7   :  { %16278 = vpow2.f32 %v12884_v46  ;;  %15628 = vmatpush3.msra.mxu1 %v12892_v48  ;;  %v16022_v46 = vld [vmem:[#allocation13 + $0x2c0] ss:$16 sps:$4 sm:$0xff]   ;;  %v16025_v48 = vld [vmem:[#allocation13 + $0x2c8] ss:$16 sps:$4 sm:$0xff]  }
0x71d8   :  { %13250 = vmatprep.subr.bf16.mxu1 %v15988_v27  ;;  %v16041_v27 = vld [vmem:[#allocation16 + $0x288] sm:$0xff]  }
0x71e1   :  { %v16279_v30 = vpop.eup %16278 }
0x71e2   :  { %v12886_v20 = vsel %vm776_vm5, %v16279_v30, 0.0 }
0x71e3   :  { %12887 = vadd.xlane.f32.xlu1 %v12886_v20  ;;  %v16031_v20 = vld [vmem:[#allocation13 + $0x2e8] ss:$16 sps:$4 sm:$0xff]  }
0x71e7   :  { %13028 = vadd.xlane.f32.xlu1 %v13022_v38 }
0x7213   :  { %v12794_v8 = vpop.f32.mrb[220].mxu0 }
0x7214   :  { %v12800_v36 = vadd.f32 %v12794_v8, %v12589_v10  ;;  %v15620_v34 = vpop.f32.mrb[221].mxu0  ;;  %v16001_v10 = vld [vmem:[#allocation13 + $0x248] ss:$16 sps:$4 sm:$0xff]   ;;  %v16035_v8 = vld [vmem:[#allocation16 + $0x2c0] sm:$0xff]  }
0x7215   :  { %v12797_v19 = vpop.f32.mrb[222].mxu0 }
0x7216   :  { %v15621_v59 = vpop.f32.mrb[223].mxu0 }
0x7270   :  { %v12888_v57 = vpop.xlane.xlu1 %12887 }
0x7271   :  { %16280 = vrcp.f32 %v12888_v57 }
0x7274   :  { %v13029_v63 = vpop.xlane.xlu1 %13028 }
0x7275   :  { %v13032_v55 = vmul.f32 0.0078125, %v13029_v63 }
0x7277   :  { %v18182_v2 = vsub.f32 %v13022_v38, %v13032_v55  ;;  %v16034_v38 = vld [vmem:[#allocation16 + $0x240] sm:$0xff]   ;;  %v14248_v55 = vld [vmem:[#allocation11 + $0x2] ss:$0 sm:$0xff] }
0x7279   :  { %v13036_v62 = vmul.f32 %v18182_v2, %v18182_v2 }
0x727b   :  { %v16281_v39 = vpop.eup %16280 }
0x727c   :  { %v12890_v4 = vmul.f32 %v16281_v39, %v16279_v30  ;;  %v16033_v30 = vld [vmem:[#allocation13 + $0x2ec] ss:$16 sps:$4 sm:$0xff]  }
0x727e   :  { %15630 = vmatmul.mubr.msk.f32.vlgmr.msra.gmra.mrb[212].mxu1 %vm776_vm5, %v12890_v4 }
0x727f   :  { %13282 = vmatprep.mubr.bf16.mxu1 %v16615_v0  ;;  %13251 = vmatpush1.bf16.msra.mxu1 %v15986_v12  ;;  %v16039_v12 = vld [vmem:[#allocation16 + $0x2c8] sm:$0xff]  }
0x7280   :  { %13252 = vmatprep.subr.bf16.mxu1 %v15994_v5  ;;  %v16044_v5 = vld [vmem:[#allocation16 + $0x210] sm:$0xff]  }
0x7283   :  { %13253 = vmatpush1.bf16.msra.mxu1 %v15992_v6  ;;  %v16046_v6 = vld [vmem:[#allocation16 + $0x258] sm:$0xff]  }
0x7284   :  { %13254 = vmatprep.subr.bf16.mxu1 %v16000_v11  ;;  %v16048_v11 = vld [vmem:[#allocation16 + $0x218] sm:$0xff]  }
0x7287   :  { %13255 = vmatpush1.bf16.msra.mxu1 %v15998_v9  ;;  %v16050_v9 = vld [vmem:[#allocation16 + $0x260] sm:$0xff]  }
0x7288   :  { %13256 = vmatprep.subr.bf16.mxu1 %v16006_v18  ;;  %v16056_v18 = vld [vmem:[#allocation16 + $0x228] sm:$0xff]  }
0x728b   :  { %13257 = vmatpush1.bf16.msra.mxu1 %v16004_v61  ;;  %v16058_v61 = vld [vmem:[#allocation16 + $0x270] sm:$0xff]  }
0x728c   :  { %13258 = vmatprep.subr.bf16.mxu1 %v16012_v32  ;;  %v16060_v32 = vld [vmem:[#allocation16 + $0x230] sm:$0xff]  }
0x728f   :  { %13259 = vmatpush1.bf16.msra.mxu1 %v16010_v25  ;;  %v16062_v25 = vld [vmem:[#allocation16 + $0x278] sm:$0xff]  }
0x7290   :  { %13260 = vmatprep.subr.bf16.mxu1 %v16018_v7  ;;  %v16064_v7 = vld [vmem:[#allocation16 + $0x238] sm:$0xff]  }
0x7293   :  { %13261 = vmatpush1.bf16.msra.mxu1 %v16016_v47  ;;  %v13068_v47 = vld [vmem:[#allocation14 + $0x8] sm:$0xf] }
0x7294   :  { %13262 = vmatprep.subr.bf16.mxu1 %v16024_v29  ;;  %v13081_v29 = vrot.slane %v13068_v47, %v16945_v53 }
0x7297   :  { %13263 = vmatpush1.bf16.msra.mxu1 %v16022_v46  ;;  %v13085_v46 = vrot.slane %v13068_v47, %v17346_v13 }
0x7351   :  { %v12963_v54 = vpop.f32.mrb[212].mxu1 }
0x7352   :  { %v12967_v43 = vpack.c.bf16 %v12963_v54, %v12963_v54  ;;  %v15631_v44 = vpop.f32.mrb[213].mxu1 }
0x7354   :  { %15635 = vmatmul.mubr.msk.bf16.vlgmr.msra.gmra.mrb[224].mxu0 %vm698_vm4, %v12967_v43  ;;  %v14247_v43 = vld [vmem:[#allocation10 + $0x2] ss:$0 sm:$0xff] }
0x7355   :  { %13325 = vmatprep.mubr.bf16.mxu0 %v16615_v0  ;;  %v15989_v0 = vld [vmem:[#allocation13 + $0x208] ss:$16 sps:$4 sm:$0xff]  }
0x7356   :  { %13294 = vmatpush1.bf16.msra.mxu0 %v15989_v0  ;;  %v16042_v0 = vld [vmem:[#allocation16 + $0x250] sm:$0xff]  }
0x7357   :  { %13295 = vmatprep.subr.bf16.mxu0 %v15997_v15  ;;  %v16045_v15 = vld [vmem:[#allocation16 + $0x290] sm:$0xff]  }
0x735a   :  { %13296 = vmatpush1.bf16.msra.mxu0 %v15995_v33  ;;  %v16047_v33 = vld [vmem:[#allocation16 + $0x2d8] sm:$0xff]  }
0x7427   :  { %v13005_v40 = vpop.f32.mrb[224].mxu0 }
0x7428   :  { %v13011_v45 = vadd.f32 %v13005_v40, %v12800_v36  ;;  %v15636_v42 = vpop.f32.mrb[225].mxu0 }
0x7429   :  { %v13008_v16 = vpop.f32.mrb[226].mxu0 }
0x742a   :  { %v13021_v56 = vadd.f32 %v14246_v3, %v13011_v45  ;;  %v15637_v21 = vpop.f32.mrb[227].mxu0  ;;  %v16030_v3 = vld [vmem:[#allocation13 + $0x2e4] ss:$16 sps:$4 sm:$0xff]  }
0x742b   :  { %13264 = vmatprep.subr.bf16.mxu1 %v16030_v3  ;;  %v16037_v21 = vld [vmem:[#allocation16 + $0x280] sm:$0xff]  }
0x742c   :  { %v13023_v60 = vadd.f32 %v13021_v56, %v17794_v1  ;;  %v16003_v1 = vld [vmem:[#allocation13 + $0x24c] ss:$16 sps:$4 sm:$0xff]   ;;  %13265 = vmatpush1.bf16.msra.mxu1 %v16028_v31 }
0x742d   :  { %13297 = vmatprep.subr.bf16.mxu0 %v16003_v1  ;;  %14738 = vmatprep.subr.bf16.mxu1 %v16034_v38  ;;  %v16036_v56 = vld [vmem:[#allocation16 + $0x200] sm:$0xff]   ;;  %v16049_v1 = vld [vmem:[#allocation16 + $0x298] sm:$0xff]  }
0x742e   :  { %13030 = vadd.xlane.f32.xlu1 %v13023_v60  ;;  %13298 = vmatpush1.bf16.msra.mxu0 %v16001_v10  ;;  %v16051_v10 = vld [vmem:[#allocation16 + $0x2e0] sm:$0xff]  }
0x742f   :  { %13299 = vmatprep.subr.bf16.mxu0 %v16009_v24  ;;  %v16057_v24 = vld [vmem:[#allocation16 + $0x2a8] sm:$0xff]  }
0x7432   :  { %13038 = vadd.xlane.f32.xlu1 %v13036_v62  ;;  %13300 = vmatpush1.bf16.msra.mxu0 %v16007_v22  ;;  %v16038_v62 = vld [vmem:[#allocation16 + $0x248] sm:$0xff]   ;;  %v16059_v22 = vld [vmem:[#allocation16 + $0x2f0] sm:$0xff]  }
0x7433   :  { %13301 = vmatprep.subr.bf16.mxu0 %v16015_v41  ;;  %v16061_v41 = vld [vmem:[#allocation16 + $0x2b0] sm:$0xff]  }
0x7436   :  { %13302 = vmatpush1.bf16.msra.mxu0 %v16013_v37  ;;  %v16063_v37 = vld [vmem:[#allocation16 + $0x2f8] sm:$0xff]  }
0x7437   :  { %13303 = vmatprep.subr.bf16.mxu0 %v16021_v26  ;;  %v16065_v26 = vld [vmem:[#allocation16 + $0x2b8] sm:$0xff]  }
0x743a   :  { %13304 = vmatpush1.bf16.msra.mxu0 %v16019_v28  ;;  %v13073_v28 = vrot.slane %v13068_v47, %v16942_v52 }
0x743b   :  { %13305 = vmatprep.subr.bf16.mxu0 %v16027_v14  ;;  %v13077_v14 = vrot.slane %v13068_v47, %v16939_v50  ;;  %v16069_v47 = vld [vmem:[%s18266_s14 + $0x18] sm:$0xff]  }
0x743e   :  { %13306 = vmatpush1.bf16.msra.mxu0 %v16025_v48 }
0x743f   :  { %13307 = vmatprep.subr.bf16.mxu0 %v16033_v30 }
0x7442   :  { %13308 = vmatpush1.bf16.msra.mxu0 %v16031_v20 }
0x7443   :  { %14760 = vmatprep.subr.bf16.mxu0 %v16035_v8 }
0x74bb   :  { %v13031_v49 = vpop.xlane.xlu1 %13030 }
0x74bc   :  { %v13033_v35 = vmul.f32 0.0078125, %v13031_v49  ;;  %v16052_v49 = vld [vmem:[#allocation16 + $0x220] sm:$0xff]  }
0x74be   :  { %v13035_v17 = vsub.f32 %v13023_v60, %v13033_v35  ;;  %v16053_v35 = vld [vmem:[#allocation16 + $0x2a0] sm:$0xff]  }
0x74bf   :  { %v13039_v36 = vpop.xlane.xlu1 %13038 }
0x74c0   :  { %v13037_v51 = vmul.f32 %v13035_v17, %v13035_v17  ;;  %v13042_v34 = vmul.f32 0.0078125, %v13039_v36 }
0x74c2   :  { %13040 = vadd.xlane.f32.xlu1 %v13037_v51  ;;  %v13044_v19 = vadd.f32 1e-05, %v13042_v34  ;;  %v16055_v51 = vld [vmem:[#allocation16 + $0x2e8] sm:$0xff]  }
0x74c4   :  { %16282 = vrsqrt.f32 %v13044_v19 }
0x74ce   :  { %v16283_v4 = vpop.eup %16282 }
0x74cf   :  { %v13048_v54 = vmul.f32 %v16283_v4, %v18182_v2  ;;  %v16040_v2 = vld [vmem:[#allocation16 + $0x208] sm:$0xff]  }
0x74d1   :  { %v13056_v40 = vmul.f32 %v14247_v43, %v13048_v54 }
0x74d3   :  { %v18188_v42 = vadd.f32 %v14248_v55, %v13056_v40 }
0x754f   :  { %v13041_v59 = vpop.xlane.xlu1 %13040 }
0x7550   :  { %v13043_v57 = vmul.f32 0.0078125, %v13041_v59 }
0x7552   :  { %v13045_v39 = vadd.f32 1e-05, %v13043_v57 }
0x7554   :  { %16284 = vrsqrt.f32 %v13045_v39 }
0x755e   :  { %v16285_v44 = vpop.eup %16284 }
0x755f   :  { %v13049_v63 = vmul.f32 %v16285_v44, %v13035_v17  ;;  %v16054_v17 = vld [vmem:[#allocation16 + $0x268] sm:$0xff]  }
0x7561   :  { %v13057_v45 = vmul.f32 %v14247_v43, %v13049_v63 }
0x7563   :  { %v18190_v16 = vadd.f32 %v14248_v55, %v13057_v45 }
0x7565   :  { %v13066_v60 = vpack.c.bf16 %v18190_v16, %v18188_v42 }
0x7567   :  { %13283 = vmatmul.mubr.bf16.vlgmr.msra.gmra.mrb[216].mxu1 %v13066_v60  ;;  %13326 = vmatmul.mubr.bf16.vlgmr.msra.gmra.mrb[228].mxu0 %v13066_v60 }
0x7568   :  { %14739 = vmatpush3.bf16.msra.mxu1 %v16036_v56  ;;  %14761 = vmatpush3.bf16.msra.mxu0 %v16037_v21 }
0x7569   :  { %14740 = vmatprep.subr.bf16.mxu1 %v16038_v62  ;;  %14762 = vmatprep.subr.bf16.mxu0 %v16039_v12 }
0x756c   :  { %14741 = vmatpush3.bf16.msra.mxu1 %v16040_v2  ;;  %14763 = vmatpush3.bf16.msra.mxu0 %v16041_v27  ;;  %v14281_v2 = vld [vmem:[#allocation17 + $0x2] ss:$0 sm:$0xff] }
0x756d   :  { %14742 = vmatprep.subr.bf16.mxu1 %v16042_v0  ;;  %14764 = vmatprep.subr.bf16.mxu0 %v16043_v58 }
0x7570   :  { %14743 = vmatpush3.bf16.msra.mxu1 %v16044_v5  ;;  %14765 = vmatpush3.bf16.msra.mxu0 %v16045_v15 }
0x7571   :  { %14744 = vmatprep.subr.bf16.mxu1 %v16046_v6  ;;  %14766 = vmatprep.subr.bf16.mxu0 %v16047_v33 }
0x7574   :  { %14745 = vmatpush3.bf16.msra.mxu1 %v16048_v11  ;;  %14767 = vmatpush3.bf16.msra.mxu0 %v16049_v1 }
0x7575   :  { %14746 = vmatprep.subr.bf16.mxu1 %v16050_v9  ;;  %14768 = vmatprep.subr.bf16.mxu0 %v16051_v10 }
0x7578   :  { %14747 = vmatpush3.bf16.msra.mxu1 %v16052_v49  ;;  %14769 = vmatpush3.bf16.msra.mxu0 %v16053_v35 }
0x7579   :  { %14748 = vmatprep.subr.bf16.mxu1 %v16054_v17  ;;  %14770 = vmatprep.subr.bf16.mxu0 %v16055_v51 }
0x757c   :  { %14749 = vmatpush3.bf16.msra.mxu1 %v16056_v18  ;;  %14771 = vmatpush3.bf16.msra.mxu0 %v16057_v24  ;;  %v16066_v24 = vld [vmem:[%s18266_s14] sm:$0xff]  }
0x757d   :  { %14750 = vmatprep.subr.bf16.mxu1 %v16058_v61  ;;  %14772 = vmatprep.subr.bf16.mxu0 %v16059_v22 }
0x7580   :  { %14751 = vmatpush3.bf16.msra.mxu1 %v16060_v32  ;;  %14773 = vmatpush3.bf16.msra.mxu0 %v16061_v41 }
0x7581   :  { %14752 = vmatprep.subr.bf16.mxu1 %v16062_v25  ;;  %14774 = vmatprep.subr.bf16.mxu0 %v16063_v37 }
0x7584   :  { %14753 = vmatpush3.bf16.msra.mxu1 %v16064_v7  ;;  %14775 = vmatpush3.bf16.msra.mxu0 %v16065_v26  ;;  %v16068_v26 = vld [vmem:[%s18266_s14 + $0x10] sm:$0xff]  }
0x7585   :  { %15638 = vmatprep.subr.bf16.mxu1 %v16616_v23 }
0x763a   :  { %v13284_v48 = vpop.f32.mrb[216].mxu1  ;;  %v13327_v3 = vpop.f32.mrb[228].mxu0 }
0x763b   :  { %v13285_v30 = vadd.f32 %v13284_v48, %v13073_v28  ;;  %v13328_v31 = vadd.f32 %v13327_v3, %v13081_v29  ;;  %v13286_v20 = vpop.f32.mrb[217].mxu1  ;;  %v13329_v38 = vpop.f32.mrb[229].mxu0 }
0x763c   :  { %v13287_v8 = vadd.f32 %v13286_v20, %v13077_v14  ;;  %v13330_v36 = vadd.f32 %v13329_v38, %v13085_v46  ;;  %v13288_v34 = vpop.f32.mrb[218].mxu1  ;;  %v13331_v19 = vpop.f32.mrb[230].mxu0 }
0x763d   :  { %v13289_v59 = vadd.f32 %v13288_v34, %v13073_v28  ;;  %v13332_v57 = vadd.f32 %v13331_v19, %v13081_v29  ;;  %v13290_v39 = vpop.f32.mrb[219].mxu1  ;;  %v13333_v52 = vpop.f32.mrb[231].mxu0  ;;  %v13336_v54 = vmax.f32 %v13285_v30, 0.0  ;;  %v13338_v50 = vmax.f32 %v13328_v31, 0.0  ;;  %v16070_v28 = vld [vmem:[%s18266_s14 + $0x20] sm:$0xff]   ;;  %v16071_v29 = vld [vmem:[%s18266_s14 + $0x28] sm:$0xff]  }
0x763e   :  { %v13291_v4 = vadd.f32 %v13290_v39, %v13077_v14  ;;  %v13334_v53 = vadd.f32 %v13333_v52, %v13085_v46  ;;  %v13337_v44 = vmax.f32 %v13287_v8, 0.0  ;;  %v13339_v63 = vmax.f32 %v13330_v36, 0.0  ;;  %v16072_v14 = vld [vmem:[%s18266_s14 + $0x30] sm:$0xff]   ;;  %v16073_v46 = vld [vmem:[%s18266_s14 + $0x38] sm:$0xff]   ;;  %v14314_v34 = vld [vmem:[#allocation19 + $0x2] ss:$0 sm:$0xff] }
0x763f   :  { %v13340_v43 = vmax.f32 %v13289_v59, 0.0  ;;  %v13342_v13 = vmax.f32 %v13332_v57, 0.0  ;;  %v14315_v39 = vld [vmem:[#allocation20 + $0x2] ss:$0 sm:$0xff] }
0x7640   :  { %v13341_v40 = vmax.f32 %v13291_v4, 0.0  ;;  %v13343_v55 = vmax.f32 %v13334_v53, 0.0 }
0x7641   :  { %v13344_v45 = vpack.c.bf16 %v13340_v43, %v13336_v54  ;;  %v13346_v56 = vpack.c.bf16 %v13342_v13, %v13338_v50  ;;  %v14316_v54 = vld [vmem:[%s18267_s15] ss:$0 sm:$0xff] }
0x7642   :  { %v13345_v21 = vpack.c.bf16 %v13341_v40, %v13337_v44  ;;  %v13347_v60 = vpack.c.bf16 %v13343_v55, %v13339_v63 }
0x7644   :  { %13580 = vmatprep.mubr.bf16.mxu1 %v13345_v21  ;;  %13621 = vmatprep.mubr.bf16.mxu0 %v13347_v60 }
0x7645   :  { %13581 = vmatmul.mubr.bf16.vlgmr.msra.gmra.mrb[220].mxu1 %v13344_v45  ;;  %13622 = vmatmul.mubr.bf16.vlgmr.msra.gmra.mrb[232].mxu0 %v13346_v56 }
0x7646   :  { %15654 = vmatprep.mubr.msk.bf16.mxu1 %vm16617_vm3, %v16616_v23  ;;  %15639 = vmatpush3.bf16.msra.mxu1 %v16066_v24 }
0x7647   :  { %15640 = vmatprep.subr.bf16.mxu1 %v16616_v23 }
0x7718   :  { %v14754_v62 = vpop.f32.mrb[220].mxu1  ;;  %v14776_v12 = vpop.f32.mrb[232].mxu0 }
0x7719   :  { %v14755_v27 = vpop.f32.mrb[221].mxu1  ;;  %v14777_v0 = vpop.f32.mrb[233].mxu0 }
0x771a   :  { %v14756_v58 = vadd.f32 %v14755_v27, %v14754_v62  ;;  %v14778_v5 = vadd.f32 %v14777_v0, %v14776_v12  ;;  %v14757_v15 = vpop.f32.mrb[222].mxu1  ;;  %v14779_v6 = vpop.f32.mrb[234].mxu0 }
0x771b   :  { %v14758_v33 = vpop.f32.mrb[223].mxu1  ;;  %v14780_v11 = vpop.f32.mrb[235].mxu0 }
0x771c   :  { %v13583_v1 = vadd.f32 %v14756_v58, %v14281_v2  ;;  %v14759_v9 = vadd.f32 %v14758_v33, %v14757_v15  ;;  %v14781_v10 = vadd.f32 %v14780_v11, %v14779_v6 }
0x771e   :  { %v13624_v49 = vadd.f32 %v14778_v5, %v13583_v1  ;;  %v13586_v35 = vadd.f32 %v14759_v9, %v14281_v2 }
0x7720   :  { %v13627_v17 = vadd.f32 %v14781_v10, %v13586_v35  ;;  %v13630_v51 = vadd.f32 %v13624_v49, %v18188_v42 }
0x7722   :  { %13636 = vadd.xlane.f32.xlu0 %v13630_v51  ;;  %v13631_v18 = vadd.f32 %v13627_v17, %v18190_v16  ;;  %v16067_v16 = vld [vmem:[%s18266_s14 + $0x8] sm:$0xff]  }
0x7723   :  { %15641 = vmatpush3.bf16.msra.mxu1 %v16067_v16 }
0x7724   :  { %13638 = vadd.xlane.f32.xlu1 %v13631_v18  ;;  %15642 = vmatprep.subr.bf16.mxu1 %v16616_v23 }
0x7727   :  { %15643 = vmatpush3.bf16.msra.mxu1 %v16068_v26 }
0x7728   :  { %15644 = vmatprep.subr.bf16.mxu1 %v16616_v23 }
0x772b   :  { %15645 = vmatpush3.bf16.msra.mxu1 %v16069_v47 }
0x772c   :  { %15646 = vmatprep.subr.bf16.mxu1 %v16616_v23 }
0x772f   :  { %15647 = vmatpush3.bf16.msra.mxu1 %v16070_v28 }
0x7730   :  { %15648 = vmatprep.subr.bf16.mxu1 %v16616_v23 }
0x7733   :  { %15649 = vmatpush3.bf16.msra.mxu1 %v16071_v29 }
0x7734   :  { %15650 = vmatprep.subr.bf16.mxu1 %v16616_v23 }
0x7737   :  { %15651 = vmatpush3.bf16.msra.mxu1 %v16072_v14 }
0x7738   :  { %15652 = vmatprep.subr.bf16.mxu1 %v16616_v23 }
0x773b   :  { %15653 = vmatpush3.bf16.msra.mxu1 %v16073_v46 }
0x77af   :  { %v13637_v61 = vpop.xlane.xlu0 %13636 }
0x77b0   :  { %v13640_v22 = vmul.f32 0.0078125, %v13637_v61 }
0x77b1   :  { %v13639_v32 = vpop.xlane.xlu1 %13638 }
0x77b2   :  { %v13642_v41 = vsub.f32 %v13630_v51, %v13640_v22  ;;  %v13641_v25 = vmul.f32 0.0078125, %v13639_v32 }
0x77b4   :  { %v13644_v37 = vmul.f32 %v13642_v41, %v13642_v41  ;;  %v13643_v7 = vsub.f32 %v13631_v18, %v13641_v25 }
0x77b6   :  { %13646 = vadd.xlane.f32.xlu1 %v13644_v37  ;;  %v13645_v42 = vmul.f32 %v13643_v7, %v13643_v7 }
0x77ba   :  { %13648 = vadd.xlane.f32.xlu1 %v13645_v42 }
0x7843   :  { %v13647_v48 = vpop.xlane.xlu1 %13646 }
0x7844   :  { %v13650_v3 = vmul.f32 0.0078125, %v13647_v48 }
0x7846   :  { %v13652_v30 = vadd.f32 1e-05, %v13650_v3 }
0x7847   :  { %v13649_v31 = vpop.xlane.xlu1 %13648 }
0x7848   :  { %16286 = vrsqrt.f32 %v13652_v30  ;;  %v13651_v20 = vmul.f32 0.0078125, %v13649_v31 }
0x784a   :  { %v13653_v38 = vadd.f32 1e-05, %v13651_v20 }
0x784c   :  { %16288 = vrsqrt.f32 %v13653_v38 }
0x7852   :  { %v16287_v8 = vpop.eup %16286 }
0x7853   :  { %v13656_v36 = vmul.f32 %v16287_v8, %v13642_v41 }
0x7855   :  { %v13664_v57 = vmul.f32 %v14314_v34, %v13656_v36 }
0x7856   :  { %v16289_v19 = vpop.eup %16288 }
0x7857   :  { %v13657_v59 = vmul.f32 %v16289_v19, %v13643_v7  ;;  %v13672_v4 = vadd.f32 %v14315_v39, %v13664_v57 }
0x7859   :  { %v13665_v52 = vmul.f32 %v14314_v34, %v13657_v59 }
0x785b   :  { %v13673_v53 = vadd.f32 %v14315_v39, %v13665_v52 }
0x785d   :  { %v13674_v23 = vpack.c.bf16 %v13673_v53, %v13672_v4 }
0x785f   :  { %15655 = vmatmul.mubr.bf16.vlgmr.msra.gmra.mrb[224].mxu1 %v13674_v23 }
0x7932   :  { %v13780_v50 = vpop.f32.mrb[224].mxu1 }
0x7933   :  { %v13781_v43 = vadd.f32 %v14316_v54, %v13780_v50  ;;  %v15656_v13 = vpop.f32.mrb[225].mxu1 }
0x7934   :  { %v13783_v44 = vpop.f32.mrb[226].mxu1 }
0x7935   :  { %13787 = vst [vmem:[#allocation22] sm:$0xff] %v13781_v43  ;;  %v13784_v63 = vadd.f32 %v14316_v54, %v13783_v44  ;;  %v15657_v40 = vpop.f32.mrb[227].mxu1 }
0x7937   :  { %13788 = vst [vmem:[#allocation22 + $0x8] sm:$0xff] %v13784_v63 }
0x7938   :  { %16565 = shalt.err (!%p16562_p2)
}
0x7939   :  { %s16566_s3 = scalar_lea.hbm %s18268_s16, 256 }
0x793a   :  { %p16567_p3 = scmp.ne.s32.totalorder %s18268_s16, %s16566_s3  ;;  %p16570_p4 = scmp.lt.u32.totalorder %s16566_s3, %s18268_s16 }
0x793c   :  { %p16572_p5 = pnand %p16570_p4, %p16567_p3 }
0x793e   :  { %16575 = shalt.err (!%p16572_p5)
}
0x793f   :  { %s18273_s24 = smov 128  }
0x7940   :  { %13800 = dma.vmem_to_hbm [thread:$0]  %s13795_s11, 256, %s18268_s16, [#allocation4], %s18273_s24, %s18273_s24, %s16605_s18  }
0x7941   :  { %16590 = dma.done.wait [#allocation4], 256  }
0x7942   :  { %16591 = vsyncadd [#allocation4], 4294967040 }
0x7943   :  { %13804 = vsyncpa [#allocation3], 1 }
0x7944   :  { %13805 = vsyncpa [#allocation6], 1 }
0x7945   :  { %13806 = vsyncpa [#allocation9], 1 }
0x7946   :  { %13807 = vsyncpa [#allocation12], 1 }
0x7947   :  { %13808 = vsyncpa [#allocation15], 1 }
0x7948   :  { %13809 = vsyncpa [#allocation18], 1 }
0x7949   :  { %13810 = vsyncpa [#allocation21], 1 }
0x794a   :  { %13811 = vsyncpa [#allocation4], 1 }

</bundles_post_ra>
